<compile_context>
chip_gen: v6e
topology: v6e:2x2x1
jax: 0.10.0
libtpu: 0.0.40
codegen_flags: <defaults>
</compile_context>

<pallas_src>
import jax
import jax.numpy as jnp
from jax import lax
from jax.experimental import pallas as pl
from jax.experimental.pallas import tpu as pltpu

NEG_SLOPE = 0.2                        # nn.LeakyReLU(negative_slope=0.2)
VMEM_LIMIT_BYTES = 48 * 1024 * 1024    # safe on v5e/v6e (128 MiB) and v7x (64 MiB/TC)
TARGET_M = 1024                        # aim for >= 1024 output pixels (MXU M) per step
MAX_SLAB_BYTES = 6 * 1024 * 1024       # cap on the per-step input slab (x2 buffers)


# ----------------------------- Pallas kernels ------------------------------ #

def _taps_bias_leaky(slab_ref, w_ref, b_ref, m1):
    """4-tap (2x2 over space-to-depth) conv + bias + LeakyReLU for one row block.

    slab_ref: (1, 1, (R+2)*(wout+1), K) bf16 -- flattened overlapping s2d slab.
    w_ref:    (4, K, Cout) bf16 tap weights (tap index = 2*dh + dw).
    b_ref:    (1, Cout) f32.
    Returns (m1, Cout) f32 with m1 = R*(wout+1); the w'==wout column is garbage
    (wrap-around) and is cropped by the wrapper.
    """
    w1 = (slab_ref.shape[2] - m1) // 2          # == wout + 1 (static)
    slab = slab_ref[0, 0]                       # ((R+2)*(wout+1), K) bf16
    acc = None
    for dh in range(2):
        for dw in range(2):
            off = dh * w1 + dw                  # static flat shift of this tap
            x_tap = slab[off:off + m1, :]       # static sublane-offset slice
            part = jnp.dot(x_tap, w_ref[2 * dh + dw],
                           preferred_element_type=jnp.float32)
            acc = part if acc is None else acc + part
    acc = acc + b_ref[...]
    return jnp.where(acc >= 0, acc, NEG_SLOPE * acc)


def _conv_kernel(slab_ref, w_ref, b_ref, o_ref):
    """Layers 1-3: fused 4x4/s2 reflect-pad conv + bias + LeakyReLU, bf16 out."""
    m1 = o_ref.shape[2]
    y = _taps_bias_leaky(slab_ref, w_ref, b_ref, m1)
    o_ref[0, 0] = y.astype(o_ref.dtype)


def _conv_head_kernel(slab_ref, w_ref, b_ref, wh_ref, bh_ref, out_ref, logits_ref):
    """Layer 4 with the 1x1 conv_out + sigmoid head fused into the epilogue."""
    m1 = out_ref.shape[2]
    y = _taps_bias_leaky(slab_ref, w_ref, b_ref, m1)              # (m1, 512) f32
    # conv_out (Cout=1): VPU multiply + cross-lane sum instead of a degenerate
    # (m1,512)x(512,1) MXU matmul.  bf16 rounding of operands mirrors torch/bf16
    # reference numerics.
    yb = y.astype(jnp.bfloat16).astype(jnp.float32)
    wh = wh_ref[...].astype(jnp.float32)                          # (1, 512)
    logits = jnp.sum(yb * wh, axis=-1, keepdims=True) + bh_ref[...]   # (m1, 1) f32
    logits_ref[0, 0] = logits
    # TODO(synk): head stores are lane-width 1 (masked vst); output is tiny so it
    # is negligible, but a lane-major (1, m1) layout would make them unmasked.
    out_ref[0, 0] = jax.nn.sigmoid(logits)


# ------------------------------ Conv plumbing ------------------------------ #

def _pick_rows(hout, wout, k_lane, batch):
    """Pick R (divisor of hout): grow the per-step row block until the matmul
    M = R*(wout+1) reaches TARGET_M, the slab would exceed MAX_SLAB_BYTES, or
    (once M >= 256) growing further would leave fewer than 4 parallel steps."""
    best = 1
    for r in range(2, hout + 1):
        if hout % r:
            continue
        m_best = best * (wout + 1)
        if m_best >= TARGET_M:
            break
        if (r + 2) * (wout + 1) * k_lane * 2 > MAX_SLAB_BYTES:
            break
        if m_best >= 256 and batch * (hout // r) < 4:
            break      # keep both v7x TensorCores busy
        best = r
    return best


def _space_to_depth_slabs(x, rows):
    """Reflect-pad by 1, fold each 2x2 padded-pixel block into channels, and emit
    one flattened overlapping slab of (rows+2) s2d rows per row block.

    The 4x4/stride-2 conv on the padded image becomes a 2x2/stride-1 conv on the
    s2d view; inside the kernel each tap is a constant flat row shift of the slab.
    Duplication vs the plain s2d layout is only (rows+2)/rows.
    """
    n, h, w, c = x.shape
    assert h % 2 == 0 and w % 2 == 0, "spatial dims must be even"
    hout, wout = h // 2, w // 2
    xp = jnp.pad(x, ((0, 0), (1, 1), (1, 1), (0, 0)), mode="reflect")
    s2d = xp.reshape(n, hout + 1, 2, wout + 1, 2, c)
    s2d = s2d.transpose(0, 1, 3, 2, 4, 5).reshape(n, hout + 1, wout + 1, 4 * c)
    s2d = jnp.pad(s2d, ((0, 0), (0, 1), (0, 0), (0, 0)))        # zero guard row
    n_blocks = hout // rows
    slabs = jnp.stack(
        [s2d[:, i * rows:i * rows + rows + 2] for i in range(n_blocks)], axis=1)
    slabs = slabs.reshape(n, n_blocks, (rows + 2) * (wout + 1), 4 * c)
    return slabs, hout, wout


def _conv_layer(x, w_taps, bias, head=None):
    """Fused conv(4x4, s2, reflect pad 1) + LeakyReLU [+ 1x1 head + sigmoid].

    x:      (N, H, W, Cin) bf16
    w_taps: (4, 4*Cin, Cout) bf16
    bias:   (1, Cout) f32
    head:   optional ((1, Cout) bf16, (1, 1) f32) for the fused conv_out.
    """
    # TODO(synk): the slab build is one XLA relayout copy per layer (fused under
    # jit); storing the next layer's slab layout directly from the kernel
    # epilogue would remove it entirely.
    n, cin = x.shape[0], x.shape[-1]
    k = 4 * cin
    cout = w_taps.shape[-1]
    hout, wout = x.shape[1] // 2, x.shape[2] // 2
    rows = _pick_rows(hout, wout, k, n)
    slabs, hout, wout = _space_to_depth_slabs(x, rows)
    n_blocks = hout // rows
    m1 = rows * (wout + 1)
    s_len = (rows + 2) * (wout + 1)

    slab_spec = pl.BlockSpec((1, 1, s_len, k), lambda i, j: (i, j, 0, 0))
    w_spec = pl.BlockSpec((4, k, cout), lambda i, j: (0, 0, 0))
    b_spec = pl.BlockSpec((1, cout), lambda i, j: (0, 0))
    cparams = pltpu.CompilerParams(
        dimension_semantics=("parallel", "parallel"),
        vmem_limit_bytes=VMEM_LIMIT_BYTES)

    if head is None:
        out = pl.pallas_call(
            _conv_kernel,
            out_shape=jax.ShapeDtypeStruct((n, n_blocks, m1, cout), jnp.bfloat16),
            grid=(n, n_blocks),
            in_specs=[slab_spec, w_spec, b_spec],
            out_specs=pl.BlockSpec((1, 1, m1, cout), lambda i, j: (i, j, 0, 0)),
            compiler_params=cparams,
        )(slabs, w_taps, bias)
        # Crop the garbage w'==wout column; fuses with the next layer's slab build.
        out = out.reshape(n, n_blocks, rows, wout + 1, cout)
        out = out.reshape(n, hout, wout + 1, cout)[:, :, :wout, :]
        return out

    w_head, b_head = head
    wh_spec = pl.BlockSpec((1, cout), lambda i, j: (0, 0))
    bh_spec = pl.BlockSpec((1, 1), lambda i, j: (0, 0))
    o_spec = pl.BlockSpec((1, 1, m1, 1), lambda i, j: (i, j, 0, 0))
    out, logits = pl.pallas_call(
        _conv_head_kernel,
        out_shape=(jax.ShapeDtypeStruct((n, n_blocks, m1, 1), jnp.float32),
                   jax.ShapeDtypeStruct((n, n_blocks, m1, 1), jnp.float32)),
        grid=(n, n_blocks),
        in_specs=[slab_spec, w_spec, b_spec, wh_spec, bh_spec],
        out_specs=(o_spec, o_spec),
        compiler_params=cparams,
    )(slabs, w_taps, bias, w_head, b_head)

    def _crop(t):
        t = t.reshape(n, n_blocks, rows, wout + 1)
        t = t.reshape(n, hout, wout + 1)[:, :, :wout]
        return t.reshape(n * hout * wout, 1)

    return _crop(out), _crop(logits)


# ------------------------------ Parameters --------------------------------- #

def spectral_normalize(w, n_iter=30):
    # TODO(synk): PyTorch's spectral_norm keeps a persistent `u` vector updated by
    # one power iteration per forward; here sigma is computed by running power
    # iteration to convergence on the same (Cout, -1) reshaped matrix.
    cout = w.shape[0]
    wm = w.reshape(cout, -1).astype(jnp.float32)
    v = jnp.ones((wm.shape[1],), jnp.float32)
    v = v / jnp.linalg.norm(v)
    for _ in range(n_iter):
        u = wm @ v
        u = u / (jnp.linalg.norm(u) + 1e-12)
        v = wm.T @ u
        v = v / (jnp.linalg.norm(v) + 1e-12)
    sigma = u @ (wm @ v)
    return w / sigma


def init_params(key):
    """Deterministic synthetic parameters in PyTorch layout (OIHW)."""
    specs = [(6, 64), (64, 128), (128, 256), (256, 512)]
    keys = jax.random.split(key, 10)
    params = {}
    for i, (cin, cout) in enumerate(specs):
        fan_in = cin * 4 * 4
        bound = 1.0 / (fan_in ** 0.5)
        w = jax.random.uniform(keys[2 * i], (cout, cin, 4, 4), jnp.float32, -bound, bound)
        b = jax.random.uniform(keys[2 * i + 1], (cout,), jnp.float32, -bound, bound)
        params[f"conv{i + 1}"] = (spectral_normalize(w), b)
    bound = 1.0 / (512 ** 0.5)
    w = jax.random.uniform(keys[8], (1, 512, 1, 1), jnp.float32, -bound, bound)
    b = jax.random.uniform(keys[9], (1,), jnp.float32, -bound, bound)
    params["conv_out"] = (w, b)
    return params


def prepare_kernel_params(params):
    """Convert OIHW weights to space-to-depth tap layout, cast to bf16.

    Hoisted out of the forward pass: run once per checkpoint, not per call.
    """
    prepped = {}
    for i in range(4):
        w, b = params[f"conv{i + 1}"]
        cout, cin = w.shape[0], w.shape[1]
        wt = jnp.transpose(w, (2, 3, 1, 0))            # (kh, kw, cin, cout)
        wt = wt.reshape(2, 2, 2, 2, cin, cout)         # (dh, ph, dw, pw, cin, cout)
        wt = wt.transpose(0, 2, 1, 3, 4, 5)            # (dh, dw, ph, pw, cin, cout)
        w_taps = wt.reshape(4, 4 * cin, cout).astype(jnp.bfloat16)
        prepped[f"conv{i + 1}"] = (w_taps, b.reshape(1, cout).astype(jnp.float32))
        # TODO(synk): conv1's K = 4*Cin = 24 underfills the MXU contraction; packing
        # the full 4x4 window (K = 96) for conv1 only would fill it better.
    w_out, b_out = params["conv_out"]                  # (1, 512, 1, 1), (1,)
    prepped["head"] = (w_out.reshape(1, -1).astype(jnp.bfloat16),     # (1, 512)
                       b_out.reshape(1, 1).astype(jnp.float32))
    return prepped


# ------------------------------ Model wrapper ------------------------------ #

@jax.jit
def discriminator_hf_forward(x_nchw, kparams):
    """Forward pass. x_nchw: (N, 6, H, W) float32, H and W divisible by 16.
    kparams: output of prepare_kernel_params.  Returns (out, out_logits)."""
    assert x_nchw.shape[2] % 16 == 0 and x_nchw.shape[3] % 16 == 0
    x = jnp.transpose(x_nchw, (0, 2, 3, 1)).astype(jnp.bfloat16)   # NCHW -> NHWC
    for i in range(3):
        w_taps, b = kparams[f"conv{i + 1}"]
        x = _conv_layer(x, w_taps, b)
    w_taps, b = kparams["conv4"]
    return _conv_layer(x, w_taps, b, head=kparams["head"])


# ------------------------------ Reference (JAX) ----------------------------- #

def reference_forward(x_nchw, params):
    """Pure-JAX reference mirroring the kernels' bf16-operand / f32-accumulate math."""
    x = x_nchw.astype(jnp.bfloat16)
    for i in range(4):
        w, b = params[f"conv{i + 1}"]
        xp = jnp.pad(x, ((0, 0), (0, 0), (1, 1), (1, 1)), mode="reflect")
        y = lax.conv_general_dilated(
            xp, w.astype(jnp.bfloat16), window_strides=(2, 2), padding="VALID",
            dimension_numbers=("NCHW", "OIHW", "NCHW"),
            preferred_element_type=jnp.float32)
        y = y + b.reshape(1, -1, 1, 1)
        y = jnp.where(y >= 0, y, NEG_SLOPE * y)
        x = y.astype(jnp.bfloat16)
    w, b = params["conv_out"]
    y = lax.conv_general_dilated(
        x, w.astype(jnp.bfloat16), window_strides=(1, 1), padding="VALID",
        dimension_numbers=("NCHW", "OIHW", "NCHW"),
        preferred_element_type=jnp.float32) + b.reshape(1, -1, 1, 1)
    logits = y.reshape(-1, 1)
    return jax.nn.sigmoid(logits), logits


if __name__ == "__main__":
    key = jax.random.PRNGKey(0)
    pkey, xkey = jax.random.split(key)
    params = init_params(pkey)
    kparams = prepare_kernel_params(params)        # done once, outside the forward
    x = jax.random.normal(xkey, (2, 6, 16, 16), jnp.float32)  # NCHW, Cin=6 fixed

    out, logits = discriminator_hf_forward(x, kparams)
    out = jax.block_until_ready(out)
    logits = jax.block_until_ready(logits)

    ref_out, ref_logits = reference_forward(x, params)
    assert out.shape == (2 * 1 * 1, 1) and logits.shape == (2 * 1 * 1, 1)
    assert jnp.allclose(logits, ref_logits, rtol=1e-3, atol=1e-3)
    assert jnp.allclose(out, ref_out, rtol=1e-3, atol=1e-3)

    print("KERNEL_OK")
</pallas_src>

<mosaic_0001>
module attributes {stable_mosaic.version = 11 : i64} {
  func.func @_conv_kernel(%arg0: i32, %arg1: i32, %arg2: memref<1x1x90x24xbf16, #tpu.memory_space<vmem>>, %arg3: memref<4x24x64xbf16, #tpu.memory_space<vmem>>, %arg4: memref<1x64xf32, #tpu.memory_space<vmem>>, %arg5: memref<1x1x72x64xbf16, #tpu.memory_space<vmem>>) attributes {dimension_semantics = [#tpu.dimension_semantics<parallel>, #tpu.dimension_semantics<parallel>], iteration_bounds = array<i64: 2, 1>, scalar_prefetch = 0 : i64, scratch_operands = 0 : i64, tpu.core_type = #tpu.core_type<tc>, window_params = [{transform_indices = @transform_0, window_bounds = array<i64: 1, 1, 90, 24>}, {pipeline_mode = #tpu.pipeline_mode<synchronous>, transform_indices = @transform_1, window_bounds = array<i64: 4, 24, 64>}, {pipeline_mode = #tpu.pipeline_mode<synchronous>, transform_indices = @transform_2, window_bounds = array<i64: 1, 64>}, {transform_indices = @transform_3, window_bounds = array<i64: 1, 1, 72, 64>}]} {
    %c0 = arith.constant 0 : index
    %c0_0 = arith.constant 0 : index
    %c0_1 = arith.constant 0 : index
    %c0_2 = arith.constant 0 : index
    %0 = vector.load %arg2[%c0, %c0_0, %c0_1, %c0_2] : memref<1x1x90x24xbf16, #tpu.memory_space<vmem>>, vector<1x1x90x24xbf16>
    %1 = vector.shape_cast %0 : vector<1x1x90x24xbf16> to vector<90x24xbf16>
    %2 = vector.extract_strided_slice %1 {offsets = [0, 0], sizes = [72, 24], strides = [1, 1]} : vector<90x24xbf16> to vector<72x24xbf16>
    %c0_3 = arith.constant 0 : index
    %c0_4 = arith.constant 0 : index
    %c0_5 = arith.constant 0 : index
    %3 = vector.load %arg3[%c0_3, %c0_4, %c0_5] : memref<4x24x64xbf16, #tpu.memory_space<vmem>>, vector<1x24x64xbf16>
    %4 = vector.shape_cast %3 : vector<1x24x64xbf16> to vector<24x64xbf16>
    %cst = arith.constant dense<0.000000e+00> : vector<72x64xf32>
    %5 = tpu.matmul %2, %4, %cst {dimension_numbers = #tpu.dot_dimension_numbers<[1], [0], [0], [1], [0, 0, 1, 1], [], []>} : vector<72x24xbf16>, vector<24x64xbf16>, vector<72x64xf32> -> vector<72x64xf32>
    %6 = vector.extract_strided_slice %1 {offsets = [1, 0], sizes = [72, 24], strides = [1, 1]} : vector<90x24xbf16> to vector<72x24xbf16>
    %c1 = arith.constant 1 : index
    %c0_6 = arith.constant 0 : index
    %c0_7 = arith.constant 0 : index
    %7 = vector.load %arg3[%c1, %c0_6, %c0_7] : memref<4x24x64xbf16, #tpu.memory_space<vmem>>, vector<1x24x64xbf16>
    %8 = vector.shape_cast %7 : vector<1x24x64xbf16> to vector<24x64xbf16>
    %cst_8 = arith.constant dense<0.000000e+00> : vector<72x64xf32>
    %9 = tpu.matmul %6, %8, %cst_8 {dimension_numbers = #tpu.dot_dimension_numbers<[1], [0], [0], [1], [0, 0, 1, 1], [], []>} : vector<72x24xbf16>, vector<24x64xbf16>, vector<72x64xf32> -> vector<72x64xf32>
    %10 = arith.addf %5, %9 : vector<72x64xf32>
    %11 = vector.extract_strided_slice %1 {offsets = [9, 0], sizes = [72, 24], strides = [1, 1]} : vector<90x24xbf16> to vector<72x24xbf16>
    %c2 = arith.constant 2 : index
    %c0_9 = arith.constant 0 : index
    %c0_10 = arith.constant 0 : index
    %12 = vector.load %arg3[%c2, %c0_9, %c0_10] : memref<4x24x64xbf16, #tpu.memory_space<vmem>>, vector<1x24x64xbf16>
    %13 = vector.shape_cast %12 : vector<1x24x64xbf16> to vector<24x64xbf16>
    %cst_11 = arith.constant dense<0.000000e+00> : vector<72x64xf32>
    %14 = tpu.matmul %11, %13, %cst_11 {dimension_numbers = #tpu.dot_dimension_numbers<[1], [0], [0], [1], [0, 0, 1, 1], [], []>} : vector<72x24xbf16>, vector<24x64xbf16>, vector<72x64xf32> -> vector<72x64xf32>
    %15 = arith.addf %10, %14 : vector<72x64xf32>
    %16 = vector.extract_strided_slice %1 {offsets = [10, 0], sizes = [72, 24], strides = [1, 1]} : vector<90x24xbf16> to vector<72x24xbf16>
    %c3 = arith.constant 3 : index
    %c0_12 = arith.constant 0 : index
    %c0_13 = arith.constant 0 : index
    %17 = vector.load %arg3[%c3, %c0_12, %c0_13] : memref<4x24x64xbf16, #tpu.memory_space<vmem>>, vector<1x24x64xbf16>
    %18 = vector.shape_cast %17 : vector<1x24x64xbf16> to vector<24x64xbf16>
    %cst_14 = arith.constant dense<0.000000e+00> : vector<72x64xf32>
    %19 = tpu.matmul %16, %18, %cst_14 {dimension_numbers = #tpu.dot_dimension_numbers<[1], [0], [0], [1], [0, 0, 1, 1], [], []>} : vector<72x24xbf16>, vector<24x64xbf16>, vector<72x64xf32> -> vector<72x64xf32>
    %20 = arith.addf %15, %19 : vector<72x64xf32>
    %c0_15 = arith.constant 0 : index
    %c0_16 = arith.constant 0 : index
    %21 = vector.load %arg4[%c0_15, %c0_16] : memref<1x64xf32, #tpu.memory_space<vmem>>, vector<1x64xf32>
    %22 = vector.broadcast %21 : vector<1x64xf32> to vector<72x64xf32>
    %23 = arith.addf %20, %22 : vector<72x64xf32>
    %cst_17 = arith.constant 0.000000e+00 : f32
    %24 = vector.broadcast %cst_17 : f32 to vector<72x64xf32>
    %25 = arith.cmpf oge, %23, %24 : vector<72x64xf32>
    %cst_18 = arith.constant 2.000000e-01 : f32
    %26 = vector.broadcast %cst_18 : f32 to vector<72x64xf32>
    %27 = arith.mulf %26, %23 : vector<72x64xf32>
    %28 = arith.select %25, %23, %27 : vector<72x64xi1>, vector<72x64xf32>
    %29 = arith.truncf %28 : vector<72x64xf32> to vector<72x64xbf16>
    %c0_19 = arith.constant 0 : index
    %c0_20 = arith.constant 0 : index
    %c0_21 = arith.constant 0 : index
    %c0_22 = arith.constant 0 : index
    %30 = vector.load %arg5[%c0_19, %c0_20, %c0_21, %c0_22] : memref<1x1x72x64xbf16, #tpu.memory_space<vmem>>, vector<1x1x72x64xbf16>
    %31 = vector.shape_cast %30 : vector<1x1x72x64xbf16> to vector<72x64xbf16>
    %32 = vector.shape_cast %29 : vector<72x64xbf16> to vector<1x1x72x64xbf16>
    tpu.vector_store %arg5[%c0_19, %c0_20, %c0_21, %c0_22], %32 {strides = array<i32>} : memref<1x1x72x64xbf16, #tpu.memory_space<vmem>>, vector<1x1x72x64xbf16>,
    return
  }
  func.func @transform_0(%arg0: i32, %arg1: i32) -> (i32, i32, i32, i32) {
    %c0_i32 = arith.constant 0 : i32
    %c0_i32_0 = arith.constant 0 : i32
    %c0_i32_1 = arith.constant 0 : i32
    return %arg0, %arg1, %c0_i32, %c0_i32_0 : i32, i32, i32, i32
  }
  func.func @transform_1(%arg0: i32, %arg1: i32) -> (i32, i32, i32) {
    %c0_i32 = arith.constant 0 : i32
    %c0_i32_0 = arith.constant 0 : i32
    %c0_i32_1 = arith.constant 0 : i32
    %c0_i32_2 = arith.constant 0 : i32
    return %c0_i32, %c0_i32_0, %c0_i32_1 : i32, i32, i32
  }
  func.func @transform_2(%arg0: i32, %arg1: i32) -> (i32, i32) {
    %c0_i32 = arith.constant 0 : i32
    %c0_i32_0 = arith.constant 0 : i32
    %c0_i32_1 = arith.constant 0 : i32
    return %c0_i32, %c0_i32_0 : i32, i32
  }
  func.func @transform_3(%arg0: i32, %arg1: i32) -> (i32, i32, i32, i32) {
    %c0_i32 = arith.constant 0 : i32
    %c0_i32_0 = arith.constant 0 : i32
    %c0_i32_1 = arith.constant 0 : i32
    return %arg0, %arg1, %c0_i32, %c0_i32_0 : i32, i32, i32, i32
  }
}

module attributes {stable_mosaic.version = 11 : i64} {
  func.func @_conv_kernel(%arg0: i32, %arg1: i32, %arg2: memref<1x1x30x256xbf16, #tpu.memory_space<vmem>>, %arg3: memref<4x256x128xbf16, #tpu.memory_space<vmem>>, %arg4: memref<1x128xf32, #tpu.memory_space<vmem>>, %arg5: memref<1x1x20x128xbf16, #tpu.memory_space<vmem>>) attributes {dimension_semantics = [#tpu.dimension_semantics<parallel>, #tpu.dimension_semantics<parallel>], iteration_bounds = array<i64: 2, 1>, scalar_prefetch = 0 : i64, scratch_operands = 0 : i64, tpu.core_type = #tpu.core_type<tc>, window_params = [{transform_indices = @transform_0, window_bounds = array<i64: 1, 1, 30, 256>}, {pipeline_mode = #tpu.pipeline_mode<synchronous>, transform_indices = @transform_1, window_bounds = array<i64: 4, 256, 128>}, {pipeline_mode = #tpu.pipeline_mode<synchronous>, transform_indices = @transform_2, window_bounds = array<i64: 1, 128>}, {transform_indices = @transform_3, window_bounds = array<i64: 1, 1, 20, 128>}]} {
    %c0 = arith.constant 0 : index
    %c0_0 = arith.constant 0 : index
    %c0_1 = arith.constant 0 : index
    %c0_2 = arith.constant 0 : index
    %0 = vector.load %arg2[%c0, %c0_0, %c0_1, %c0_2] : memref<1x1x30x256xbf16, #tpu.memory_space<vmem>>, vector<1x1x30x256xbf16>
    %1 = vector.shape_cast %0 : vector<1x1x30x256xbf16> to vector<30x256xbf16>
    %2 = vector.extract_strided_slice %1 {offsets = [0, 0], sizes = [20, 256], strides = [1, 1]} : vector<30x256xbf16> to vector<20x256xbf16>
    %c0_3 = arith.constant 0 : index
    %c0_4 = arith.constant 0 : index
    %c0_5 = arith.constant 0 : index
    %3 = vector.load %arg3[%c0_3, %c0_4, %c0_5] : memref<4x256x128xbf16, #tpu.memory_space<vmem>>, vector<1x256x128xbf16>
    %4 = vector.shape_cast %3 : vector<1x256x128xbf16> to vector<256x128xbf16>
    %cst = arith.constant dense<0.000000e+00> : vector<20x128xf32>
    %5 = tpu.matmul %2, %4, %cst {dimension_numbers = #tpu.dot_dimension_numbers<[1], [0], [0], [1], [0, 0, 1, 1], [], []>} : vector<20x256xbf16>, vector<256x128xbf16>, vector<20x128xf32> -> vector<20x128xf32>
    %6 = vector.extract_strided_slice %1 {offsets = [1, 0], sizes = [20, 256], strides = [1, 1]} : vector<30x256xbf16> to vector<20x256xbf16>
    %c1 = arith.constant 1 : index
    %c0_6 = arith.constant 0 : index
    %c0_7 = arith.constant 0 : index
    %7 = vector.load %arg3[%c1, %c0_6, %c0_7] : memref<4x256x128xbf16, #tpu.memory_space<vmem>>, vector<1x256x128xbf16>
    %8 = vector.shape_cast %7 : vector<1x256x128xbf16> to vector<256x128xbf16>
    %cst_8 = arith.constant dense<0.000000e+00> : vector<20x128xf32>
    %9 = tpu.matmul %6, %8, %cst_8 {dimension_numbers = #tpu.dot_dimension_numbers<[1], [0], [0], [1], [0, 0, 1, 1], [], []>} : vector<20x256xbf16>, vector<256x128xbf16>, vector<20x128xf32> -> vector<20x128xf32>
    %10 = arith.addf %5, %9 : vector<20x128xf32>
    %11 = vector.extract_strided_slice %1 {offsets = [5, 0], sizes = [20, 256], strides = [1, 1]} : vector<30x256xbf16> to vector<20x256xbf16>
    %c2 = arith.constant 2 : index
    %c0_9 = arith.constant 0 : index
    %c0_10 = arith.constant 0 : index
    %12 = vector.load %arg3[%c2, %c0_9, %c0_10] : memref<4x256x128xbf16, #tpu.memory_space<vmem>>, vector<1x256x128xbf16>
    %13 = vector.shape_cast %12 : vector<1x256x128xbf16> to vector<256x128xbf16>
    %cst_11 = arith.constant dense<0.000000e+00> : vector<20x128xf32>
    %14 = tpu.matmul %11, %13, %cst_11 {dimension_numbers = #tpu.dot_dimension_numbers<[1], [0], [0], [1], [0, 0, 1, 1], [], []>} : vector<20x256xbf16>, vector<256x128xbf16>, vector<20x128xf32> -> vector<20x128xf32>
    %15 = arith.addf %10, %14 : vector<20x128xf32>
    %16 = vector.extract_strided_slice %1 {offsets = [6, 0], sizes = [20, 256], strides = [1, 1]} : vector<30x256xbf16> to vector<20x256xbf16>
    %c3 = arith.constant 3 : index
    %c0_12 = arith.constant 0 : index
    %c0_13 = arith.constant 0 : index
    %17 = vector.load %arg3[%c3, %c0_12, %c0_13] : memref<4x256x128xbf16, #tpu.memory_space<vmem>>, vector<1x256x128xbf16>
    %18 = vector.shape_cast %17 : vector<1x256x128xbf16> to vector<256x128xbf16>
    %cst_14 = arith.constant dense<0.000000e+00> : vector<20x128xf32>
    %19 = tpu.matmul %16, %18, %cst_14 {dimension_numbers = #tpu.dot_dimension_numbers<[1], [0], [0], [1], [0, 0, 1, 1], [], []>} : vector<20x256xbf16>, vector<256x128xbf16>, vector<20x128xf32> -> vector<20x128xf32>
    %20 = arith.addf %15, %19 : vector<20x128xf32>
    %c0_15 = arith.constant 0 : index
    %c0_16 = arith.constant 0 : index
    %21 = vector.load %arg4[%c0_15, %c0_16] : memref<1x128xf32, #tpu.memory_space<vmem>>, vector<1x128xf32>
    %22 = vector.broadcast %21 : vector<1x128xf32> to vector<20x128xf32>
    %23 = arith.addf %20, %22 : vector<20x128xf32>
    %cst_17 = arith.constant 0.000000e+00 : f32
    %24 = vector.broadcast %cst_17 : f32 to vector<20x128xf32>
    %25 = arith.cmpf oge, %23, %24 : vector<20x128xf32>
    %cst_18 = arith.constant 2.000000e-01 : f32
    %26 = vector.broadcast %cst_18 : f32 to vector<20x128xf32>
    %27 = arith.mulf %26, %23 : vector<20x128xf32>
    %28 = arith.select %25, %23, %27 : vector<20x128xi1>, vector<20x128xf32>
    %29 = arith.truncf %28 : vector<20x128xf32> to vector<20x128xbf16>
    %c0_19 = arith.constant 0 : index
    %c0_20 = arith.constant 0 : index
    %c0_21 = arith.constant 0 : index
    %c0_22 = arith.constant 0 : index
    %30 = vector.load %arg5[%c0_19, %c0_20, %c0_21, %c0_22] : memref<1x1x20x128xbf16, #tpu.memory_space<vmem>>, vector<1x1x20x128xbf16>
    %31 = vector.shape_cast %30 : vector<1x1x20x128xbf16> to vector<20x128xbf16>
    %32 = vector.shape_cast %29 : vector<20x128xbf16> to vector<1x1x20x128xbf16>
    tpu.vector_store %arg5[%c0_19, %c0_20, %c0_21, %c0_22], %32 {strides = array<i32>} : memref<1x1x20x128xbf16, #tpu.memory_space<vmem>>, vector<1x1x20x128xbf16>,
    return
  }
  func.func @transform_0(%arg0: i32, %arg1: i32) -> (i32, i32, i32, i32) {
    %c0_i32 = arith.constant 0 : i32
    %c0_i32_0 = arith.constant 0 : i32
    %c0_i32_1 = arith.constant 0 : i32
    return %arg0, %arg1, %c0_i32, %c0_i32_0 : i32, i32, i32, i32
  }
  func.func @transform_1(%arg0: i32, %arg1: i32) -> (i32, i32, i32) {
    %c0_i32 = arith.constant 0 : i32
    %c0_i32_0 = arith.constant 0 : i32
    %c0_i32_1 = arith.constant 0 : i32
    %c0_i32_2 = arith.constant 0 : i32
    return %c0_i32, %c0_i32_0, %c0_i32_1 : i32, i32, i32
  }
  func.func @transform_2(%arg0: i32, %arg1: i32) -> (i32, i32) {
    %c0_i32 = arith.constant 0 : i32
    %c0_i32_0 = arith.constant 0 : i32
    %c0_i32_1 = arith.constant 0 : i32
    return %c0_i32, %c0_i32_0 : i32, i32
  }
  func.func @transform_3(%arg0: i32, %arg1: i32) -> (i32, i32, i32, i32) {
    %c0_i32 = arith.constant 0 : i32
    %c0_i32_0 = arith.constant 0 : i32
    %c0_i32_1 = arith.constant 0 : i32
    return %arg0, %arg1, %c0_i32, %c0_i32_0 : i32, i32, i32, i32
  }
}

module attributes {stable_mosaic.version = 11 : i64} {
  func.func @_conv_kernel(%arg0: i32, %arg1: i32, %arg2: memref<1x1x12x512xbf16, #tpu.memory_space<vmem>>, %arg3: memref<4x512x256xbf16, #tpu.memory_space<vmem>>, %arg4: memref<1x256xf32, #tpu.memory_space<vmem>>, %arg5: memref<1x1x6x256xbf16, #tpu.memory_space<vmem>>) attributes {dimension_semantics = [#tpu.dimension_semantics<parallel>, #tpu.dimension_semantics<parallel>], iteration_bounds = array<i64: 2, 1>, scalar_prefetch = 0 : i64, scratch_operands = 0 : i64, tpu.core_type = #tpu.core_type<tc>, window_params = [{transform_indices = @transform_0, window_bounds = array<i64: 1, 1, 12, 512>}, {pipeline_mode = #tpu.pipeline_mode<synchronous>, transform_indices = @transform_1, window_bounds = array<i64: 4, 512, 256>}, {pipeline_mode = #tpu.pipeline_mode<synchronous>, transform_indices = @transform_2, window_bounds = array<i64: 1, 256>}, {transform_indices = @transform_3, window_bounds = array<i64: 1, 1, 6, 256>}]} {
    %c0 = arith.constant 0 : index
    %c0_0 = arith.constant 0 : index
    %c0_1 = arith.constant 0 : index
    %c0_2 = arith.constant 0 : index
    %0 = vector.load %arg2[%c0, %c0_0, %c0_1, %c0_2] : memref<1x1x12x512xbf16, #tpu.memory_space<vmem>>, vector<1x1x12x512xbf16>
    %1 = vector.shape_cast %0 : vector<1x1x12x512xbf16> to vector<12x512xbf16>
    %2 = vector.extract_strided_slice %1 {offsets = [0, 0], sizes = [6, 512], strides = [1, 1]} : vector<12x512xbf16> to vector<6x512xbf16>
    %c0_3 = arith.constant 0 : index
    %c0_4 = arith.constant 0 : index
    %c0_5 = arith.constant 0 : index
    %3 = vector.load %arg3[%c0_3, %c0_4, %c0_5] : memref<4x512x256xbf16, #tpu.memory_space<vmem>>, vector<1x512x256xbf16>
    %4 = vector.shape_cast %3 : vector<1x512x256xbf16> to vector<512x256xbf16>
    %cst = arith.constant dense<0.000000e+00> : vector<6x256xf32>
    %5 = tpu.matmul %2, %4, %cst {dimension_numbers = #tpu.dot_dimension_numbers<[1], [0], [0], [1], [0, 0, 1, 1], [], []>} : vector<6x512xbf16>, vector<512x256xbf16>, vector<6x256xf32> -> vector<6x256xf32>
    %6 = vector.extract_strided_slice %1 {offsets = [1, 0], sizes = [6, 512], strides = [1, 1]} : vector<12x512xbf16> to vector<6x512xbf16>
    %c1 = arith.constant 1 : index
    %c0_6 = arith.constant 0 : index
    %c0_7 = arith.constant 0 : index
    %7 = vector.load %arg3[%c1, %c0_6, %c0_7] : memref<4x512x256xbf16, #tpu.memory_space<vmem>>, vector<1x512x256xbf16>
    %8 = vector.shape_cast %7 : vector<1x512x256xbf16> to vector<512x256xbf16>
    %cst_8 = arith.constant dense<0.000000e+00> : vector<6x256xf32>
    %9 = tpu.matmul %6, %8, %cst_8 {dimension_numbers = #tpu.dot_dimension_numbers<[1], [0], [0], [1], [0, 0, 1, 1], [], []>} : vector<6x512xbf16>, vector<512x256xbf16>, vector<6x256xf32> -> vector<6x256xf32>
    %10 = arith.addf %5, %9 : vector<6x256xf32>
    %11 = vector.extract_strided_slice %1 {offsets = [3, 0], sizes = [6, 512], strides = [1, 1]} : vector<12x512xbf16> to vector<6x512xbf16>
    %c2 = arith.constant 2 : index
    %c0_9 = arith.constant 0 : index
    %c0_10 = arith.constant 0 : index
    %12 = vector.load %arg3[%c2, %c0_9, %c0_10] : memref<4x512x256xbf16, #tpu.memory_space<vmem>>, vector<1x512x256xbf16>
    %13 = vector.shape_cast %12 : vector<1x512x256xbf16> to vector<512x256xbf16>
    %cst_11 = arith.constant dense<0.000000e+00> : vector<6x256xf32>
    %14 = tpu.matmul %11, %13, %cst_11 {dimension_numbers = #tpu.dot_dimension_numbers<[1], [0], [0], [1], [0, 0, 1, 1], [], []>} : vector<6x512xbf16>, vector<512x256xbf16>, vector<6x256xf32> -> vector<6x256xf32>
    %15 = arith.addf %10, %14 : vector<6x256xf32>
    %16 = vector.extract_strided_slice %1 {offsets = [4, 0], sizes = [6, 512], strides = [1, 1]} : vector<12x512xbf16> to vector<6x512xbf16>
    %c3 = arith.constant 3 : index
    %c0_12 = arith.constant 0 : index
    %c0_13 = arith.constant 0 : index
    %17 = vector.load %arg3[%c3, %c0_12, %c0_13] : memref<4x512x256xbf16, #tpu.memory_space<vmem>>, vector<1x512x256xbf16>
    %18 = vector.shape_cast %17 : vector<1x512x256xbf16> to vector<512x256xbf16>
    %cst_14 = arith.constant dense<0.000000e+00> : vector<6x256xf32>
    %19 = tpu.matmul %16, %18, %cst_14 {dimension_numbers = #tpu.dot_dimension_numbers<[1], [0], [0], [1], [0, 0, 1, 1], [], []>} : vector<6x512xbf16>, vector<512x256xbf16>, vector<6x256xf32> -> vector<6x256xf32>
    %20 = arith.addf %15, %19 : vector<6x256xf32>
    %c0_15 = arith.constant 0 : index
    %c0_16 = arith.constant 0 : index
    %21 = vector.load %arg4[%c0_15, %c0_16] : memref<1x256xf32, #tpu.memory_space<vmem>>, vector<1x256xf32>
    %22 = vector.broadcast %21 : vector<1x256xf32> to vector<6x256xf32>
    %23 = arith.addf %20, %22 : vector<6x256xf32>
    %cst_17 = arith.constant 0.000000e+00 : f32
    %24 = vector.broadcast %cst_17 : f32 to vector<6x256xf32>
    %25 = arith.cmpf oge, %23, %24 : vector<6x256xf32>
    %cst_18 = arith.constant 2.000000e-01 : f32
    %26 = vector.broadcast %cst_18 : f32 to vector<6x256xf32>
    %27 = arith.mulf %26, %23 : vector<6x256xf32>
    %28 = arith.select %25, %23, %27 : vector<6x256xi1>, vector<6x256xf32>
    %29 = arith.truncf %28 : vector<6x256xf32> to vector<6x256xbf16>
    %c0_19 = arith.constant 0 : index
    %c0_20 = arith.constant 0 : index
    %c0_21 = arith.constant 0 : index
    %c0_22 = arith.constant 0 : index
    %30 = vector.load %arg5[%c0_19, %c0_20, %c0_21, %c0_22] : memref<1x1x6x256xbf16, #tpu.memory_space<vmem>>, vector<1x1x6x256xbf16>
    %31 = vector.shape_cast %30 : vector<1x1x6x256xbf16> to vector<6x256xbf16>
    %32 = vector.shape_cast %29 : vector<6x256xbf16> to vector<1x1x6x256xbf16>
    tpu.vector_store %arg5[%c0_19, %c0_20, %c0_21, %c0_22], %32 {strides = array<i32>} : memref<1x1x6x256xbf16, #tpu.memory_space<vmem>>, vector<1x1x6x256xbf16>,
    return
  }
  func.func @transform_0(%arg0: i32, %arg1: i32) -> (i32, i32, i32, i32) {
    %c0_i32 = arith.constant 0 : i32
    %c0_i32_0 = arith.constant 0 : i32
    %c0_i32_1 = arith.constant 0 : i32
    return %arg0, %arg1, %c0_i32, %c0_i32_0 : i32, i32, i32, i32
  }
  func.func @transform_1(%arg0: i32, %arg1: i32) -> (i32, i32, i32) {
    %c0_i32 = arith.constant 0 : i32
    %c0_i32_0 = arith.constant 0 : i32
    %c0_i32_1 = arith.constant 0 : i32
    %c0_i32_2 = arith.constant 0 : i32
    return %c0_i32, %c0_i32_0, %c0_i32_1 : i32, i32, i32
  }
  func.func @transform_2(%arg0: i32, %arg1: i32) -> (i32, i32) {
    %c0_i32 = arith.constant 0 : i32
    %c0_i32_0 = arith.constant 0 : i32
    %c0_i32_1 = arith.constant 0 : i32
    return %c0_i32, %c0_i32_0 : i32, i32
  }
  func.func @transform_3(%arg0: i32, %arg1: i32) -> (i32, i32, i32, i32) {
    %c0_i32 = arith.constant 0 : i32
    %c0_i32_0 = arith.constant 0 : i32
    %c0_i32_1 = arith.constant 0 : i32
    return %arg0, %arg1, %c0_i32, %c0_i32_0 : i32, i32, i32, i32
  }
}

module attributes {stable_mosaic.version = 11 : i64} {
  func.func @_conv_head_kernel(%arg0: i32, %arg1: i32, %arg2: memref<1x1x6x1024xbf16, #tpu.memory_space<vmem>>, %arg3: memref<4x1024x512xbf16, #tpu.memory_space<vmem>>, %arg4: memref<1x512xf32, #tpu.memory_space<vmem>>, %arg5: memref<1x512xbf16, #tpu.memory_space<vmem>>, %arg6: memref<1x1xf32, #tpu.memory_space<vmem>>, %arg7: memref<1x1x2x1xf32, #tpu.memory_space<vmem>>, %arg8: memref<1x1x2x1xf32, #tpu.memory_space<vmem>>) attributes {dimension_semantics = [#tpu.dimension_semantics<parallel>, #tpu.dimension_semantics<parallel>], iteration_bounds = array<i64: 2, 1>, scalar_prefetch = 0 : i64, scratch_operands = 0 : i64, tpu.core_type = #tpu.core_type<tc>, window_params = [{transform_indices = @transform_0, window_bounds = array<i64: 1, 1, 6, 1024>}, {pipeline_mode = #tpu.pipeline_mode<synchronous>, transform_indices = @transform_1, window_bounds = array<i64: 4, 1024, 512>}, {pipeline_mode = #tpu.pipeline_mode<synchronous>, transform_indices = @transform_2, window_bounds = array<i64: 1, 512>}, {pipeline_mode = #tpu.pipeline_mode<synchronous>, transform_indices = @transform_3, window_bounds = array<i64: 1, 512>}, {pipeline_mode = #tpu.pipeline_mode<synchronous>, transform_indices = @transform_4, window_bounds = array<i64: 1, 1>}, {transform_indices = @transform_5, window_bounds = array<i64: 1, 1, 2, 1>}, {transform_indices = @transform_6, window_bounds = array<i64: 1, 1, 2, 1>}]} {
    %c0 = arith.constant 0 : index
    %c0_0 = arith.constant 0 : index
    %c0_1 = arith.constant 0 : index
    %c0_2 = arith.constant 0 : index
    %0 = vector.load %arg2[%c0, %c0_0, %c0_1, %c0_2] : memref<1x1x6x1024xbf16, #tpu.memory_space<vmem>>, vector<1x1x6x1024xbf16>
    %1 = vector.shape_cast %0 : vector<1x1x6x1024xbf16> to vector<6x1024xbf16>
    %2 = vector.extract_strided_slice %1 {offsets = [0, 0], sizes = [2, 1024], strides = [1, 1]} : vector<6x1024xbf16> to vector<2x1024xbf16>
    %c0_3 = arith.constant 0 : index
    %c0_4 = arith.constant 0 : index
    %c0_5 = arith.constant 0 : index
    %3 = vector.load %arg3[%c0_3, %c0_4, %c0_5] : memref<4x1024x512xbf16, #tpu.memory_space<vmem>>, vector<1x1024x512xbf16>
    %4 = vector.shape_cast %3 : vector<1x1024x512xbf16> to vector<1024x512xbf16>
    %cst = arith.constant dense<0.000000e+00> : vector<2x512xf32>
    %5 = tpu.matmul %2, %4, %cst {dimension_numbers = #tpu.dot_dimension_numbers<[1], [0], [0], [1], [0, 0, 1, 1], [], []>} : vector<2x1024xbf16>, vector<1024x512xbf16>, vector<2x512xf32> -> vector<2x512xf32>
    %6 = vector.extract_strided_slice %1 {offsets = [1, 0], sizes = [2, 1024], strides = [1, 1]} : vector<6x1024xbf16> to vector<2x1024xbf16>
    %c1 = arith.constant 1 : index
    %c0_6 = arith.constant 0 : index
    %c0_7 = arith.constant 0 : index
    %7 = vector.load %arg3[%c1, %c0_6, %c0_7] : memref<4x1024x512xbf16, #tpu.memory_space<vmem>>, vector<1x1024x512xbf16>
    %8 = vector.shape_cast %7 : vector<1x1024x512xbf16> to vector<1024x512xbf16>
    %cst_8 = arith.constant dense<0.000000e+00> : vector<2x512xf32>
    %9 = tpu.matmul %6, %8, %cst_8 {dimension_numbers = #tpu.dot_dimension_numbers<[1], [0], [0], [1], [0, 0, 1, 1], [], []>} : vector<2x1024xbf16>, vector<1024x512xbf16>, vector<2x512xf32> -> vector<2x512xf32>
    %10 = arith.addf %5, %9 : vector<2x512xf32>
    %11 = vector.extract_strided_slice %1 {offsets = [2, 0], sizes = [2, 1024], strides = [1, 1]} : vector<6x1024xbf16> to vector<2x1024xbf16>
    %c2 = arith.constant 2 : index
    %c0_9 = arith.constant 0 : index
    %c0_10 = arith.constant 0 : index
    %12 = vector.load %arg3[%c2, %c0_9, %c0_10] : memref<4x1024x512xbf16, #tpu.memory_space<vmem>>, vector<1x1024x512xbf16>
    %13 = vector.shape_cast %12 : vector<1x1024x512xbf16> to vector<1024x512xbf16>
    %cst_11 = arith.constant dense<0.000000e+00> : vector<2x512xf32>
    %14 = tpu.matmul %11, %13, %cst_11 {dimension_numbers = #tpu.dot_dimension_numbers<[1], [0], [0], [1], [0, 0, 1, 1], [], []>} : vector<2x1024xbf16>, vector<1024x512xbf16>, vector<2x512xf32> -> vector<2x512xf32>
    %15 = arith.addf %10, %14 : vector<2x512xf32>
    %16 = vector.extract_strided_slice %1 {offsets = [3, 0], sizes = [2, 1024], strides = [1, 1]} : vector<6x1024xbf16> to vector<2x1024xbf16>
    %c3 = arith.constant 3 : index
    %c0_12 = arith.constant 0 : index
    %c0_13 = arith.constant 0 : index
    %17 = vector.load %arg3[%c3, %c0_12, %c0_13] : memref<4x1024x512xbf16, #tpu.memory_space<vmem>>, vector<1x1024x512xbf16>
    %18 = vector.shape_cast %17 : vector<1x1024x512xbf16> to vector<1024x512xbf16>
    %cst_14 = arith.constant dense<0.000000e+00> : vector<2x512xf32>
    %19 = tpu.matmul %16, %18, %cst_14 {dimension_numbers = #tpu.dot_dimension_numbers<[1], [0], [0], [1], [0, 0, 1, 1], [], []>} : vector<2x1024xbf16>, vector<1024x512xbf16>, vector<2x512xf32> -> vector<2x512xf32>
    %20 = arith.addf %15, %19 : vector<2x512xf32>
    %c0_15 = arith.constant 0 : index
    %c0_16 = arith.constant 0 : index
    %21 = vector.load %arg4[%c0_15, %c0_16] : memref<1x512xf32, #tpu.memory_space<vmem>>, vector<1x512xf32>
    %22 = vector.broadcast %21 : vector<1x512xf32> to vector<2x512xf32>
    %23 = arith.addf %20, %22 : vector<2x512xf32>
    %cst_17 = arith.constant 0.000000e+00 : f32
    %24 = vector.broadcast %cst_17 : f32 to vector<2x512xf32>
    %25 = arith.cmpf oge, %23, %24 : vector<2x512xf32>
    %cst_18 = arith.constant 2.000000e-01 : f32
    %26 = vector.broadcast %cst_18 : f32 to vector<2x512xf32>
    %27 = arith.mulf %26, %23 : vector<2x512xf32>
    %28 = arith.select %25, %23, %27 : vector<2x512xi1>, vector<2x512xf32>
    %29 = arith.truncf %28 : vector<2x512xf32> to vector<2x512xbf16>
    %30 = arith.extf %29 : vector<2x512xbf16> to vector<2x512xf32>
    %c0_19 = arith.constant 0 : index
    %c0_20 = arith.constant 0 : index
    %31 = vector.load %arg5[%c0_19, %c0_20] : memref<1x512xbf16, #tpu.memory_space<vmem>>, vector<1x512xbf16>
    %32 = arith.extf %31 : vector<1x512xbf16> to vector<1x512xf32>
    %33 = vector.broadcast %32 : vector<1x512xf32> to vector<2x512xf32>
    %34 = arith.mulf %30, %33 : vector<2x512xf32>
    %cst_21 = arith.constant dense<0.000000e+00> : vector<2xf32>
    %35 = vector.multi_reduction <add>, %34, %cst_21 [1] : vector<2x512xf32> to vector<2xf32>
    %36 = vector.shape_cast %35 : vector<2xf32> to vector<2x1xf32>
    %c0_22 = arith.constant 0 : index
    %c0_23 = arith.constant 0 : index
    %37 = vector.load %arg6[%c0_22, %c0_23] : memref<1x1xf32, #tpu.memory_space<vmem>>, vector<1x1xf32>
    %38 = vector.broadcast %37 : vector<1x1xf32> to vector<2x1xf32>
    %39 = arith.addf %36, %38 : vector<2x1xf32>
    %c0_24 = arith.constant 0 : index
    %c0_25 = arith.constant 0 : index
    %c0_26 = arith.constant 0 : index
    %c0_27 = arith.constant 0 : index
    %40 = vector.load %arg8[%c0_24, %c0_25, %c0_26, %c0_27] : memref<1x1x2x1xf32, #tpu.memory_space<vmem>>, vector<1x1x2x1xf32>
    %41 = vector.shape_cast %40 : vector<1x1x2x1xf32> to vector<2x1xf32>
    %42 = vector.shape_cast %39 : vector<2x1xf32> to vector<1x1x2x1xf32>
    tpu.vector_store %arg8[%c0_24, %c0_25, %c0_26, %c0_27], %42 {strides = array<i32>} : memref<1x1x2x1xf32, #tpu.memory_space<vmem>>, vector<1x1x2x1xf32>,
    %43 = arith.negf %39 : vector<2x1xf32>
    %44 = math.exp %43 : vector<2x1xf32>
    %cst_28 = arith.constant 1.000000e+00 : f32
    %45 = vector.broadcast %cst_28 : f32 to vector<2x1xf32>
    %46 = arith.addf %45, %44 : vector<2x1xf32>
    %47 = arith.divf %45, %46 : vector<2x1xf32>
    %c0_29 = arith.constant 0 : index
    %c0_30 = arith.constant 0 : index
    %c0_31 = arith.constant 0 : index
    %c0_32 = arith.constant 0 : index
    %48 = vector.load %arg7[%c0_29, %c0_30, %c0_31, %c0_32] : memref<1x1x2x1xf32, #tpu.memory_space<vmem>>, vector<1x1x2x1xf32>
    %49 = vector.shape_cast %48 : vector<1x1x2x1xf32> to vector<2x1xf32>
    %50 = vector.shape_cast %47 : vector<2x1xf32> to vector<1x1x2x1xf32>
    tpu.vector_store %arg7[%c0_29, %c0_30, %c0_31, %c0_32], %50 {strides = array<i32>} : memref<1x1x2x1xf32, #tpu.memory_space<vmem>>, vector<1x1x2x1xf32>,
    return
  }
  func.func @transform_0(%arg0: i32, %arg1: i32) -> (i32, i32, i32, i32) {
    %c0_i32 = arith.constant 0 : i32
    %c0_i32_0 = arith.constant 0 : i32
    %c0_i32_1 = arith.constant 0 : i32
    return %arg0, %arg1, %c0_i32, %c0_i32_0 : i32, i32, i32, i32
  }
  func.func @transform_1(%arg0: i32, %arg1: i32) -> (i32, i32, i32) {
    %c0_i32 = arith.constant 0 : i32
    %c0_i32_0 = arith.constant 0 : i32
    %c0_i32_1 = arith.constant 0 : i32
    %c0_i32_2 = arith.constant 0 : i32
    return %c0_i32, %c0_i32_0, %c0_i32_1 : i32, i32, i32
  }
  func.func @transform_2(%arg0: i32, %arg1: i32) -> (i32, i32) {
    %c0_i32 = arith.constant 0 : i32
    %c0_i32_0 = arith.constant 0 : i32
    %c0_i32_1 = arith.constant 0 : i32
    return %c0_i32, %c0_i32_0 : i32, i32
  }
  func.func @transform_3(%arg0: i32, %arg1: i32) -> (i32, i32) {
    %c0_i32 = arith.constant 0 : i32
    %c0_i32_0 = arith.constant 0 : i32
    %c0_i32_1 = arith.constant 0 : i32
    return %c0_i32, %c0_i32_0 : i32, i32
  }
  func.func @transform_4(%arg0: i32, %arg1: i32) -> (i32, i32) {
    %c0_i32 = arith.constant 0 : i32
    %c0_i32_0 = arith.constant 0 : i32
    %c0_i32_1 = arith.constant 0 : i32
    return %c0_i32, %c0_i32_0 : i32, i32
  }
  func.func @transform_5(%arg0: i32, %arg1: i32) -> (i32, i32, i32, i32) {
    %c0_i32 = arith.constant 0 : i32
    %c0_i32_0 = arith.constant 0 : i32
    %c0_i32_1 = arith.constant 0 : i32
    return %arg0, %arg1, %c0_i32, %c0_i32_0 : i32, i32, i32, i32
  }
  func.func @transform_6(%arg0: i32, %arg1: i32) -> (i32, i32, i32, i32) {
    %c0_i32 = arith.constant 0 : i32
    %c0_i32_0 = arith.constant 0 : i32
    %c0_i32_1 = arith.constant 0 : i32
    return %arg0, %arg1, %c0_i32, %c0_i32_0 : i32, i32, i32, i32
  }
}

</mosaic_0001>

<bundles_post_ra>
// kernel: discriminator_hf_forward.4
= control target key start
LH: loop header
LB: loop body
LE: loop exit
PB: predicated region body
PF: predicated region fallthrough
CT: control target
= control target key end

     0   :  { %8 = vsyncpa [#allocation3], 0  ;;  %s1665_s0 = inlined_call_operand.vmem [shape: bf16[2,1,90,24], index: 0, kind: input, shape index: {}]   ;;  %s1666_s1 = inlined_call_operand.hbm [shape: bf16[4,24,64], index: 1, kind: input, shape index: {}]   ;;  %s1667_s2 = inlined_call_operand.hbm [shape: f32[1,64], index: 2, kind: input, shape index: {}]   ;;  %s1668_s3 = inlined_call_operand.vmem [shape: bf16[2,1,72,64], index: 3, kind: output, shape index: {}]  }
   0x1   :  { %9 = vsyncpa [#allocation5], 0  ;;  %s1376_s12 = smov 0   ;;  %s1378_s13 = smov 0  }
   0x2   :  { %s1380_s14 = smov 0  }
   0x3 LB: > { %s1001_s15 = sadd.s32 4294967295, %s1348_s14   ;;  %s27_s16 = sadd.s32 1, %s1344_s13  ;;  %s1348_s14 = sphi %s1380_s14, %s15_s14   ;;  %s1344_s13 = sphi %s1378_s13, %s1673_s13   ;;  %s1340_s12 = sphi %s1376_s12, %s1672_s12  }
   0x4   : > { %p29_p0 = scmp.ge.s32.totalorder %s27_s16, 2  ;;  %p1003_p1 = scmp.ge.s32.totalorder %s1348_s14, 1 }
   0x5   : > { %p130_p2 = scmp.lt.s32.totalorder %s1348_s14, 3  ;;  %p1401_p4 = scmp.eq.s32.totalorder %s1001_s15, 0 }
   0x6   : > { %s1675_s16 = smov (%p29_p0, %s27_s16), 0  ;;  %s1350_s19 = smov [#allocation2]  }
   0x7   : > { %p1397_p3 = pnand %p1003_p1, %p130_p2  ;;  %s142_s20 = sshll.u32 %s1350_s19, 4  ;;  %s143_s20 = int_to_ptr.vmem [resolvable:$true] %s142_s20 }
   0x8   : > { %s1351_s22 = smov [#allocation4]   ;;  %s1277_s24 = scalar_lea.vmem %s143_s20, 768 }
   0x9   : > { %p1206_p5 = pneg %p1397_p3  ;;  %s156_s23 = sshll.u32 %s1351_s22, 4  ;;  %s157_s23 = int_to_ptr.vmem [resolvable:$true] %s156_s23 }
   0xa   : > { %p1278_p8 = scmp.ne.s32.totalorder %s143_s20, %s1277_s24  ;;  %p1285_p11 = scmp.lt.s32.totalorder %s143_s20, %s143_s20 }
   0xb   : > { %p1409_p6 = pnand %p1401_p4, %p1206_p5  ;;  %p1286_p12 = scmp.lt.s32.totalorder %s1277_s24, %s1277_s24 }
   0xd   : > { %p1268_p7 = pneg %p1409_p6  ;;  %p1287_p13 = por %p1286_p12, %p1285_p11 }
   0xf   : > { %p1280_p9 = pnand %p1278_p8, %p1268_p7 }
  0x11   : > { %p1281_p10 = pneg %p1280_p9 }
  0x13   : > { %p1288_p0 = pnand %p1287_p13, %p1281_p10 }
  0x15   : > { %1291 = shalt.err (!%p1288_p0)
}
  0x16   : > { %s1352_s25 = smov 64   ;;  %s1353_s26 = smov 4  }
  0x17   : > { %1209 = dma.hbm_to_vmem [thread:$0]  (!%p1409_p6), %s1666_s1, 768, %s143_s20, [#allocation3], %s1352_s25, %s1352_s25, %s1353_s26  }
  0x18   : > { %s1303_s29 = scalar_lea.vmem %s157_s23, 16  ;;  %s1310_s30 = scalar_lea.vmem %s157_s23, 32 }
  0x19   : > { %p1304_p1 = scmp.ne.s32.totalorder %s157_s23, %s1303_s29  ;;  %p1311_p8 = scmp.lt.s32.totalorder %s157_s23, %s157_s23 }
  0x1a   : > { %p1312_p9 = scmp.lt.s32.totalorder %s1310_s30, %s1303_s29 }
  0x1b   : > { %p1306_p2 = pnand %p1304_p1, %p1268_p7 }
  0x1c   : > { %p1313_p10 = por %p1312_p9, %p1311_p8 }
  0x1d   : > { %p1307_p5 = pneg %p1306_p2 }
  0x1f   : > { %p1314_p11 = pnand %p1313_p10, %p1307_p5 }
  0x21   : > { %1317 = shalt.err (!%p1314_p11)
}
  0x22   : > { %1212 = dma.hbm_to_vmem [thread:$0]  (!%p1409_p6), %s1667_s2, 16, %s157_s23, [#allocation5]  }
  0x23   : > { %181 = sbr.rel (%p1397_p3) target bundleno = 336 (0x150), region = 32 }
  0x28   : > { %1331 = dma.done.wait (%p1401_p4), [#allocation3], 768  }
  0x29   : > { %1333 = vsyncadd (%p1401_p4), [#allocation3], 4294966528 }
  0x2a   : > { %1335 = dma.done.wait (%p1401_p4), [#allocation5], 16  }
  0x2b   : > { %1337 = vsyncadd (%p1401_p4), [#allocation5], 4294967280  ;;  %p217_p7 = scmp.lt.s32.totalorder %s1340_s12, 1  ;;  %v1354_v0 = vmov 0.0   ;;  %vm1355_vm0 = vmmov 0   ;;  %vm344_vm1 = vcmask 1043456  }
  0x2c   : > { %1100 = vmatprep.subr.bf16.mxu0 %v1354_v0  ;;  %1124 = vmatprep.subr.bf16.mxu1 %v1354_v0  ;;  %v1247_v1 = vld [vmem:[#allocation2 + $0x14] ss:$0 sps:$4 sm:$0xff]   ;;  %v1248_v2 = vld [vmem:[#allocation2 + $0x8] ss:$0 sps:$4 sm:$0xff]   ;;  %v1249_v4 = vld [vmem:[#allocation2 + $0xc] sm:$0xff]   ;;  %vm328_vm2 = vcmask 195584  }
  0x2d   : > { %1104 = vmatprep.mubr.msk.bf16.mxu0 %vm1355_vm0, %v1354_v0  ;;  %1128 = vmatprep.mubr.msk.bf16.mxu1 %vm1355_vm0, %v1354_v0  ;;  %s1677_s12 = smov (!%p217_p7, %s1340_s12), 1  ;;  %v346_v3 = vsel %vm344_vm1, %v1247_v1, 0  ;;  %v442_v5 = vsel %vm344_vm1, %v1248_v2, 0  ;;  %v1250_v6 = vld [vmem:[#allocation2] sm:$0xff]   ;;  %v1255_v13 = vld [vmem:[#allocation2 + $0x2c] ss:$0 sps:$4 sm:$0xff]  }
  0x2e   : > { %s1196_s6 = smul.u32 48, %s1677_s12  ;;  %1101 = vmatpush3.bf16.msra.mxu0 %v346_v3  ;;  %1125 = vmatpush3.bf16.msra.mxu1 %v442_v5  ;;  %v1254_v19 = vld [vmem:[#allocation2 + $0x20] ss:$0 sps:$4 sm:$0xff]   ;;  %vm279_vm3 = vsmask.f32 7424  ;;  %v713_v23 = vsel %vm344_vm1, %v1255_v13, 0 }
  0x2f   : > { %1102 = vmatprep.subr.bf16.mxu0 %v1354_v0  ;;  %1126 = vmatprep.subr.bf16.mxu1 %v1354_v0  ;;  %v591_v27 = vsel %vm344_vm1, %v1254_v19, 0  ;;  %v1260_v31 = vld [vmem:[#allocation2 + $0x24] sm:$0xff]   ;;  %v1259_v36 = vld [vmem:[#allocation2 + $0x18] sm:$0xff]   ;;  %vm678_vm4 = vcmask 1046528   ;;  %s1197_s10 = smul.u32 36, %s1677_s12  ;;  %vm876_vm6 = vcmask 519168  }
  0x30   : > { %s1455_s9 = scalar_lea.vmem %s1665_s0, %s1196_s6 }
  0x31   : > { %v236_v7 = vld [vmem:[%s1455_s9] sm:$0xf]  ;;  %v1461_v8 = vld [vmem:[%s1455_s9 + $0x4] sm:$0xf]  ;;  %v1465_v9 = vld [vmem:[%s1455_s9 + $0x8] sm:$0xf]  ;;  %s1618_s17 = scalar_lea.vmem %s1668_s3, %s1197_s10 }
  0x32   : > { %v1468_v10 = vld [vmem:[%s1455_s9 + $0xc] sm:$0xf]  ;;  %v1012_v11 = vcombine.low %v236_v7, %v1461_v8  ;;  %v1475_v16 = vld [vmem:[%s1455_s9 + $0x10] sm:$0xf]  ;;  %v1478_v17 = vld [vmem:[%s1455_s9 + $0x14] sm:$0xf]  ;;  %1103 = vmatpush3.bf16.msra.mxu0 %v1249_v4  ;;  %1127 = vmatpush3.bf16.msra.mxu1 %v1250_v6  ;;  %v1032_v59 = vcombine.low %v1461_v8, %v1465_v9 }
  0x33   : > { %v1013_v12 = vcombine.low %v1465_v9, %v1468_v10  ;;  %v1014_v20 = vcombine.low %v1475_v16, %v1478_v17  ;;  %1148 = vmatprep.subr.bf16.mxu0 %v1354_v0  ;;  %1172 = vmatprep.subr.bf16.mxu1 %v1354_v0  ;;  %v1488_v28 = vld [vmem:[%s1455_s9 + $0x18] sm:$0xf]  ;;  %v243_v29 = vld [vmem:[%s1455_s9 + $0x1c] sm:$0xf]  ;;  %v246_v32 = vld [vmem:[%s1455_s9 + $0x28] sm:$0xf]  ;;  %v1033_v62 = vcombine.low %v1468_v10, %v1475_v16 }
  0x34   : > { %v281_v14 = vshrl.u32 %v1012_v11, 16  ;;  %v283_v15 = vshll.u32 %v1012_v11, 16  ;;  %v1015_v35 = vcombine.low %v1488_v28, %v243_v29  ;;  %v245_v37 = vld [vmem:[%s1455_s9 + $0x24] sm:$0xf]  ;;  %v244_v38 = vld [vmem:[%s1455_s9 + $0x20] sm:$0xf]  ;;  %v1034_v10 = vcombine.low %v1478_v17, %v1488_v28 }
  0x35   : > { %v288_v18 = vshll.u32 %v1013_v12, 16  ;;  %v292_v25 = vshrl.u32 %v1013_v12, 16  ;;  %v296_v26 = vshll.u32 %v1014_v20, 16  ;;  %1129 = vmatmul.mubr.msk.bf16.vlgmr.msra.gmra.mxu1 %vm328_vm2, %v1012_v11  ;;  %v1503_v39 = vcombine.low %v245_v37, %v246_v32 }
  0x36   : > { %v285_v21 = vrot.slane %v283_v15, 1  ;;  %1173 = vmatpush3.bf16.msra.mxu1 %v713_v23  ;;  %1132 = vmatprep.mubr.msk.bf16.mxu1 %vm1355_vm0, %v1354_v0  ;;  %v1505_v40 = vcombine.low %v243_v29, %v244_v38  ;;  %v300_v42 = vshrl.u32 %v1014_v20, 16  ;;  %v304_v43 = vshll.u32 %v1015_v35, 16 }
  0x37   : > { %v290_v22 = vrot.slane %v288_v18, 1  ;;  %1174 = vmatprep.subr.bf16.mxu1 %v1354_v0  ;;  %v298_v34 = vrot.slane %v296_v26, 1  ;;  %v559_v46 = vshll.u32 %v1503_v39, 16  ;;  %v1016_v50 = vcombine.low %v244_v38, %v245_v37 }
  0x38   : > { %v286_v24 = vor.u32 %v285_v21, %v281_v14  ;;  %v551_v44 = vshll.u32 %v1505_v40, 16  ;;  %v555_v45 = vshrl.u32 %v1505_v40, 16  ;;  %v306_v49 = vrot.slane %v304_v43, 1 }
  0x39   : > { %v294_v33 = vor.u32 %v292_v25, %v290_v22  ;;  %v302_v48 = vor.u32 %v300_v42, %v298_v34  ;;  %v1519_v51 = vrot.slane %v559_v46, 1  ;;  %v308_v55 = vshrl.u32 %v1015_v35, 16 }
  0x3a   : > { %v291_v30 = vsel %vm279_vm3, %v286_v24, %v290_v22  ;;  %1175 = vmatpush3.bf16.msra.mxu1 %v1260_v31  ;;  %v1515_v47 = vrot.slane %v551_v44, 1  ;;  %v312_v56 = vshll.u32 %v1016_v50, 16  ;;  %v316_v61 = vshrl.u32 %v1016_v50, 16 }
  0x3b   : > { %1105 = vmatmul.mubr.msk.bf16.vlgmr.msra.gmra.mxu0 %vm328_vm2, %v291_v30  ;;  %v299_v41 = vsel %vm279_vm3, %v294_v33, %v298_v34  ;;  %v307_v54 = vsel %vm279_vm3, %v302_v48, %v306_v49  ;;  %v310_v57 = vor.u32 %v308_v55, %v306_v49  ;;  %v530_v63 = vshll.u32 %v1032_v59, 16 }
  0x3c   : > { %1149 = vmatpush3.bf16.msra.mxu0 %v591_v27  ;;  %1108 = vmatprep.mubr.msk.bf16.mxu0 %vm1355_vm0, %v1354_v0  ;;  %v557_v52 = vor.u32 %v555_v45, %v1515_v47  ;;  %v314_v58 = vrot.slane %v312_v56, 1  ;;  %v1024_v1 = vcombine.low %v244_v38, %v244_v38  ;;  %v528_v3 = vshrl.u32 %v1032_v59, 16 }
  0x3d   : > { %1150 = vmatprep.subr.bf16.mxu0 %v1354_v0  ;;  %1133 = vmatmul.mubr.msk.bf16.gmra.mxu1 %vm328_vm2, %v1013_v12  ;;  %v532_v4 = vrot.slane %v530_v63, 1  ;;  %v535_v5 = vshll.u32 %v1033_v62, 16  ;;  %v679_v6 = vrot.slane %v1032_v59, 1  ;;  %v680_v7 = vrot.slane %v1033_v62, 1 }
  0x3e   : > { %1136 = vmatprep.mubr.msk.bf16.mxu1 %vm1355_vm0, %v1354_v0  ;;  %v1524_v53 = vsel %vm279_vm3, %v557_v52, %v1519_v51  ;;  %v315_v60 = vsel %vm279_vm3, %v310_v57, %v314_v58  ;;  %v318_v2 = vor.u32 %v316_v61, %v314_v58  ;;  %v539_v13 = vshrl.u32 %v1033_v62, 16 }
  0x3f   : > { %v533_v8 = vor.u32 %v532_v4, %v528_v3  ;;  %v537_v9 = vrot.slane %v535_v5, 1  ;;  %v681_v11 = vsel %vm678_vm4, %v679_v6, %v680_v7  ;;  %v543_v14 = vshll.u32 %v1034_v10, 16 }
  0x40   : > { %1151 = vmatpush3.bf16.msra.mxu0 %v1259_v36  ;;  %v682_v15 = vrot.slane %v1034_v10, 1  ;;  %v684_v21 = vrot.slane %v1505_v40, 1  ;;  %v686_v25 = vrot.slane %v1503_v39, 1  ;;  %v563_v27 = vshrl.u32 %v1503_v39, 16 }
  0x41   : > { %v538_v12 = vsel %vm279_vm3, %v533_v8, %v537_v9  ;;  %v541_v16 = vor.u32 %v539_v13, %v537_v9  ;;  %v545_v18 = vrot.slane %v543_v14, 1 }
  0x42   : > { %v683_v17 = vsel %vm678_vm4, %v680_v7, %v682_v15  ;;  %v685_v23 = vsel %vm678_vm4, %v682_v15, %v684_v21  ;;  %v687_v26 = vsel %vm678_vm4, %v684_v21, %v686_v25  ;;  %v565_v28 = vor.u32 %v563_v27, %v1519_v51 }
  0x43   : > { %1109 = vmatmul.mubr.msk.bf16.gmra.mxu0 %vm328_vm2, %v299_v41  ;;  %v546_v19 = vsel %vm279_vm3, %v541_v16, %v545_v18 }
  0x44   : > { %1112 = vmatprep.mubr.msk.bf16.mxu0 %vm1355_vm0, %v1354_v0 }
  0x45   : > { %1137 = vmatmul.mubr.msk.bf16.gmra.mxu1 %vm328_vm2, %v1014_v20  ;;  %v547_v20 = vshrl.u32 %v1034_v10, 16  ;;  %v1611_v10 = vld [vmem:[#allocation4] ss:$0 sm:$0xff] }
  0x46   : > { %1140 = vmatprep.mubr.msk.bf16.mxu1 %vm1355_vm0, %v1354_v0 }
  0x47   : > { %v549_v22 = vor.u32 %v547_v20, %v545_v18 }
  0x49   : > { %v554_v24 = vsel %vm279_vm3, %v549_v22, %v1515_v47 }
  0x4b   : > { %1113 = vmatmul.mubr.msk.bf16.gmra.mxu0 %vm328_vm2, %v307_v54 }
  0x4c   : > { %1116 = vmatprep.mubr.msk.bf16.mxu0 %vm1355_vm0, %v1354_v0 }
  0x4d   : > { %1141 = vmatmul.mubr.msk.bf16.gmra.mxu1 %vm328_vm2, %v1015_v35 }
  0x4e   : > { %1144 = vmatprep.mubr.msk.bf16.mxu1 %vm1355_vm0, %v1354_v0 }
  0x53   : > { %1117 = vmatmul.mubr.msk.bf16.gmra.mxu0 %vm328_vm2, %v315_v60 }
  0x54   : > { %1120 = vmatprep.mubr.msk.bf16.mxu0 %vm1355_vm0, %v1354_v0 }
  0x55   : > { %1145 = vmatmul.mubr.msk.bf16.gmra.mxu1 %vm328_vm2, %v1024_v1 }
  0x56   : > { %1176 = vmatprep.mubr.msk.bf16.mxu1 %vm1355_vm0, %v1354_v0 }
  0x5b   : > { %1121 = vmatmul.mubr.msk.bf16.gmra.mxu0 %vm328_vm2, %v318_v2 }
  0x5c   : > { %1152 = vmatprep.mubr.msk.bf16.mxu0 %vm1355_vm0, %v1354_v0 }
  0x5d   : > { %1177 = vmatmul.mubr.msk.bf16.vlgmr.msra.gmra.mxu1 %vm328_vm2, %v681_v11 }
  0x5e   : > { %1180 = vmatprep.mubr.msk.bf16.mxu1 %vm1355_vm0, %v1354_v0 }
  0x63   : > { %1153 = vmatmul.mubr.msk.bf16.vlgmr.msra.gmra.mxu0 %vm328_vm2, %v538_v12 }
  0x64   : > { %1156 = vmatprep.mubr.msk.bf16.mxu0 %vm1355_vm0, %v1354_v0 }
  0x65   : > { %1181 = vmatmul.mubr.msk.bf16.gmra.mxu1 %vm328_vm2, %v683_v17 }
  0x66   : > { %1184 = vmatprep.mubr.msk.bf16.mxu1 %vm1355_vm0, %v1354_v0 }
  0x6b   : > { %1157 = vmatmul.mubr.msk.bf16.gmra.mxu0 %vm328_vm2, %v546_v19 }
  0x6c   : > { %1160 = vmatprep.mubr.msk.bf16.mxu0 %vm1355_vm0, %v1354_v0 }
  0x6d   : > { %1185 = vmatmul.mubr.msk.bf16.gmra.mxu1 %vm328_vm2, %v685_v23 }
  0x6e   : > { %1188 = vmatprep.mubr.msk.bf16.mxu1 %vm1355_vm0, %v1354_v0 }
  0x73   : > { %1161 = vmatmul.mubr.msk.bf16.gmra.mxu0 %vm328_vm2, %v554_v24 }
  0x74   : > { %1164 = vmatprep.mubr.msk.bf16.mxu0 %vm1355_vm0, %v1354_v0 }
  0x75   : > { %1189 = vmatmul.mubr.msk.bf16.gmra.mxu1 %vm328_vm2, %v687_v26 }
  0x76   : > { %1192 = vmatprep.mubr.msk.bf16.mxu1 %vm1355_vm0, %v1354_v0 }
  0x7b   : > { %1165 = vmatmul.mubr.msk.bf16.gmra.mxu0 %vm328_vm2, %v1524_v53 }
  0x7c   : > { %1168 = vmatprep.mubr.msk.bf16.mxu0 %vm1355_vm0, %v1354_v0 }
  0x7d   : > { %1193 = vmatmul.mubr.msk.bf16.gmra.mxu1 %vm328_vm2, %v686_v25 }
  0x83   : > { %1169 = vmatmul.mubr.msk.bf16.gmra.mxu0 %vm328_vm2, %v565_v28 }
  0xf5   : > { %v478_v29 = vpop.f32.mrf.mxu1 }
  0xf7   : > { %v1130_v31 = vpop.f32.mrf.mxu1 }
  0xf9   : > { %v481_v33 = vpop.f32.mrf.mxu1 }
  0xfb   : > { %v382_v30 = vpop.f32.mrf.mxu0  ;;  %v1131_v35 = vpop.f32.mrf.mxu1 }
  0xfc   : > { %v479_v6 = vadd.f32 %v478_v29, %v382_v30 }
  0xfd   : > { %v1106_v32 = vpop.f32.mrf.mxu0  ;;  %v486_v37 = vpop.f32.mrf.mxu1 }
  0xff   : > { %v385_v34 = vpop.f32.mrf.mxu0  ;;  %v1134_v39 = vpop.f32.mrf.mxu1 }
 0x100   : > { %v482_v13 = vadd.f32 %v481_v33, %v385_v34 }
 0x101   : > { %v1107_v36 = vpop.f32.mrf.mxu0  ;;  %v489_v41 = vpop.f32.mrf.mxu1 }
 0x103   : > { %v390_v38 = vpop.f32.mrf.mxu0  ;;  %v1135_v42 = vpop.f32.mrf.mxu1 }
 0x104   : > { %v487_v21 = vadd.f32 %v486_v37, %v390_v38 }
 0x105   : > { %v1110_v40 = vpop.f32.mrf.mxu0  ;;  %v1591_v44 = vpop.f32.mrf.mxu1 }
 0x107   : > { %v393_v0 = vpop.f32.mrf.mxu0  ;;  %v1138_v46 = vpop.f32.mrf.mxu1 }
 0x108   : > { %v490_v32 = vadd.f32 %v489_v41, %v393_v0 }
 0x109   : > { %v1111_v43 = vpop.f32.mrf.mxu0  ;;  %v1595_v48 = vpop.f32.mrf.mxu1 }
 0x10b   : > { %v1593_v45 = vpop.f32.mrf.mxu0  ;;  %v1139_v50 = vpop.f32.mrf.mxu1 }
 0x10c   : > { %v495_v46 = vadd.f32 %v1591_v44, %v1593_v45 }
 0x10d   : > { %v1114_v47 = vpop.f32.mrf.mxu0  ;;  %v1599_v52 = vpop.f32.mrf.mxu1 }
 0x10f   : > { %v1597_v49 = vpop.f32.mrf.mxu0  ;;  %v1142_v54 = vpop.f32.mrf.mxu1 }
 0x111   : > { %v1115_v51 = vpop.f32.mrf.mxu0  ;;  %v1603_v56 = vpop.f32.mrf.mxu1 }
 0x113   : > { %v1601_v53 = vpop.f32.mrf.mxu0  ;;  %v1143_v58 = vpop.f32.mrf.mxu1 }
 0x115   : > { %v1118_v55 = vpop.f32.mrf.mxu0  ;;  %v1607_v60 = vpop.f32.mrf.mxu1 }
 0x117   : > { %v1605_v57 = vpop.f32.mrf.mxu0  ;;  %v1146_v62 = vpop.f32.mrf.mxu1 }
 0x119   : > { %v1119_v59 = vpop.f32.mrf.mxu0  ;;  %v513_v1 = vpop.f32.mrf.mxu1 }
 0x11b   : > { %v1609_v61 = vpop.f32.mrf.mxu0  ;;  %v1147_v3 = vpop.f32.mrf.mxu1 }
 0x11d   : > { %v1122_v63 = vpop.f32.mrf.mxu0  ;;  %v749_v5 = vpop.f32.mrf.mxu1 }
 0x11e   : > { %v498_v63 = vadd.f32 %v1595_v48, %v1597_v49 }
 0x11f   : > { %v417_v2 = vpop.f32.mrf.mxu0  ;;  %v1178_v8 = vpop.f32.mrf.mxu1 }
 0x121   : > { %v1123_v4 = vpop.f32.mrf.mxu0  ;;  %v752_v12 = vpop.f32.mrf.mxu1 }
 0x123   : > { %v627_v7 = vpop.f32.mrf.mxu0  ;;  %v1179_v16 = vpop.f32.mrf.mxu1 }
 0x124   : > { %v665_v9 = vadd.f32 %v627_v7, %v479_v6 }
 0x125   : > { %v1154_v11 = vpop.f32.mrf.mxu0  ;;  %v757_v20 = vpop.f32.mrf.mxu1 }
 0x126   : > { %v787_v14 = vadd.f32 %v749_v5, %v665_v9  ;;  %v503_v9 = vadd.f32 %v1599_v52, %v1601_v53 }
 0x127   : > { %v630_v15 = vpop.f32.mrf.mxu0  ;;  %v1182_v25 = vpop.f32.mrf.mxu1 }
 0x128   : > { %v803_v18 = vadd.f32 %v1611_v10, %v787_v14  ;;  %v666_v17 = vadd.f32 %v630_v15, %v482_v13 }
 0x129   : > { %v1155_v19 = vpop.f32.mrf.mxu0  ;;  %v760_v31 = vpop.f32.mrf.mxu1 }
 0x12a   : > { %vm812_vm5 = vcmp.ge.f32.partialorder %v803_v18, 0.0  ;;  %v821_v22 = vmul.f32 0.2, %v803_v18  ;;  %v788_v23 = vadd.f32 %v752_v12, %v666_v17  ;;  %v506_v19 = vadd.f32 %v1603_v56, %v1605_v57 }
 0x12b   : > { %v635_v24 = vpop.f32.mrf.mxu0  ;;  %v1183_v36 = vpop.f32.mrf.mxu1 }
 0x12c   : > { %v830_v26 = vsel %vm812_vm5, %v803_v18, %v821_v22  ;;  %v804_v27 = vadd.f32 %v1611_v10, %v788_v23  ;;  %v667_v28 = vadd.f32 %v635_v24, %v487_v21 }
 0x12d   : > { %v1063_v29 = vpack.c.bf16 %v830_v26, %v830_v26  ;;  %v1158_v30 = vpop.f32.mrf.mxu0  ;;  %v765_v43 = vpop.f32.mrf.mxu1 }
 0x12e   : > { %vm813_vm7 = vcmp.ge.f32.partialorder %v804_v27, 0.0  ;;  %v822_v33 = vmul.f32 0.2, %v804_v27  ;;  %v789_v34 = vadd.f32 %v757_v20, %v667_v28  ;;  %v511_v28 = vadd.f32 %v1607_v60, %v1609_v61 }
 0x12f   : > { %877 = vst.msk [vmem:[%s1618_s17] sm:$0xf] %vm876_vm6, %v1063_v29  ;;  %v638_v35 = vpop.f32.mrf.mxu0  ;;  %v1186_v50 = vpop.f32.mrf.mxu1 }
 0x130   : > { %v831_v37 = vsel %vm813_vm7, %v804_v27, %v822_v33  ;;  %v805_v38 = vadd.f32 %v1611_v10, %v789_v34  ;;  %v668_v39 = vadd.f32 %v638_v35, %v490_v32 }
 0x131   : > { %v1064_v40 = vpack.c.bf16 %v831_v37, %v831_v37  ;;  %v1159_v42 = vpop.f32.mrf.mxu0  ;;  %v768_v62 = vpop.f32.mrf.mxu1 }
 0x132   : > { %vm814_vm8 = vcmp.ge.f32.partialorder %v805_v38, 0.0  ;;  %v823_v41 = vmul.f32 0.2, %v805_v38  ;;  %v790_v0 = vadd.f32 %v760_v31, %v668_v39 }
 0x133   : > { %878 = vst.msk [vmem:[%s1618_s17 + $0x4] sm:$0xf] %vm876_vm6, %v1064_v40  ;;  %v643_v47 = vpop.f32.mrf.mxu0  ;;  %v1187_v2 = vpop.f32.mrf.mxu1 }
 0x134   : > { %v832_v51 = vsel %vm814_vm8, %v805_v38, %v823_v41  ;;  %v806_v54 = vadd.f32 %v1611_v10, %v790_v0  ;;  %v669_v55 = vadd.f32 %v643_v47, %v495_v46 }
 0x135   : > { %v1065_v58 = vpack.c.bf16 %v832_v51, %v832_v51  ;;  %v1162_v59 = vpop.f32.mrf.mxu0  ;;  %v773_v8 = vpop.f32.mrf.mxu1 }
 0x136   : > { %vm815_vm9 = vcmp.ge.f32.partialorder %v806_v54, 0.0  ;;  %v824_v44 = vmul.f32 0.2, %v806_v54  ;;  %v791_v45 = vadd.f32 %v765_v43, %v669_v55 }
 0x137   : > { %879 = vst.msk [vmem:[%s1618_s17 + $0x8] sm:$0xf] %vm876_vm6, %v1065_v58  ;;  %v646_v1 = vpop.f32.mrf.mxu0  ;;  %v1190_v12 = vpop.f32.mrf.mxu1 }
 0x138   : > { %v833_v3 = vsel %vm815_vm9, %v806_v54, %v824_v44  ;;  %v807_v4 = vadd.f32 %v1611_v10, %v791_v45  ;;  %v670_v5 = vadd.f32 %v646_v1, %v498_v63 }
 0x139   : > { %v1066_v6 = vpack.c.bf16 %v833_v3, %v833_v3  ;;  %v1163_v7 = vpop.f32.mrf.mxu0  ;;  %v776_v17 = vpop.f32.mrf.mxu1 }
 0x13a   : > { %vm816_vm10 = vcmp.ge.f32.partialorder %v807_v4, 0.0  ;;  %v825_v48 = vmul.f32 0.2, %v807_v4  ;;  %v792_v49 = vadd.f32 %v768_v62, %v670_v5 }
 0x13b   : > { %880 = vst.msk [vmem:[%s1618_s17 + $0xc] sm:$0xf] %vm876_vm6, %v1066_v6  ;;  %v651_v11 = vpop.f32.mrf.mxu0  ;;  %v1191_v21 = vpop.f32.mrf.mxu1 }
 0x13c   : > { %v834_v13 = vsel %vm816_vm10, %v807_v4, %v825_v48  ;;  %v808_v14 = vadd.f32 %v1611_v10, %v792_v49  ;;  %v671_v15 = vadd.f32 %v651_v11, %v503_v9 }
 0x13d   : > { %v1067_v16 = vpack.c.bf16 %v834_v13, %v834_v13  ;;  %v1166_v18 = vpop.f32.mrf.mxu0  ;;  %v781_v27 = vpop.f32.mrf.mxu1 }
 0x13e   : > { %vm817_vm11 = vcmp.ge.f32.partialorder %v808_v14, 0.0  ;;  %v826_v52 = vmul.f32 0.2, %v808_v14  ;;  %v793_v53 = vadd.f32 %v773_v8, %v671_v15 }
 0x13f   : > { %881 = vst.msk [vmem:[%s1618_s17 + $0x10] sm:$0xf] %vm876_vm6, %v1067_v16  ;;  %v654_v20 = vpop.f32.mrf.mxu0  ;;  %v1194_v30 = vpop.f32.mrf.mxu1 }
 0x140   : > { %v835_v22 = vsel %vm817_vm11, %v808_v14, %v826_v52  ;;  %v809_v23 = vadd.f32 %v1611_v10, %v793_v53  ;;  %v672_v24 = vadd.f32 %v654_v20, %v506_v19 }
 0x141   : > { %v1068_v25 = vpack.c.bf16 %v835_v22, %v835_v22  ;;  %v1167_v26 = vpop.f32.mrf.mxu0  ;;  %v784_v36 = vpop.f32.mrf.mxu1 }
 0x142   : > { %vm818_vm12 = vcmp.ge.f32.partialorder %v809_v23, 0.0  ;;  %v827_v56 = vmul.f32 0.2, %v809_v23  ;;  %v794_v57 = vadd.f32 %v776_v17, %v672_v24 }
 0x143   : > { %882 = vst.msk [vmem:[%s1618_s17 + $0x14] sm:$0xf] %vm876_vm6, %v1068_v25  ;;  %v659_v29 = vpop.f32.mrf.mxu0  ;;  %v1195_v38 = vpop.f32.mrf.mxu1 }
 0x144   : > { %v836_v31 = vsel %vm818_vm12, %v809_v23, %v827_v56  ;;  %v810_v32 = vadd.f32 %v1611_v10, %v794_v57  ;;  %v673_v33 = vadd.f32 %v659_v29, %v511_v28 }
 0x145   : > { %v1069_v34 = vpack.c.bf16 %v836_v31, %v836_v31  ;;  %v1170_v35 = vpop.f32.mrf.mxu0 }
 0x146   : > { %vm819_vm13 = vcmp.ge.f32.partialorder %v810_v32, 0.0  ;;  %v828_v37 = vmul.f32 0.2, %v810_v32  ;;  %v795_v60 = vadd.f32 %v781_v27, %v673_v33 }
 0x147   : > { %883 = vst.msk [vmem:[%s1618_s17 + $0x18] sm:$0xf] %vm876_vm6, %v1069_v34  ;;  %v662_v61 = vpop.f32.mrf.mxu0 }
 0x148   : > { %v837_v39 = vsel %vm819_vm13, %v810_v32, %v828_v37  ;;  %v811_v40 = vadd.f32 %v1611_v10, %v795_v60 }
 0x149   : > { %v1070_v42 = vpack.c.bf16 %v837_v39, %v837_v39  ;;  %v1171_v43 = vpop.f32.mrf.mxu0 }
 0x14a   : > { %vm820_vm14 = vcmp.ge.f32.partialorder %v811_v40, 0.0  ;;  %v829_v46 = vmul.f32 0.2, %v811_v40 }
 0x14b   : > { %884 = vst.msk [vmem:[%s1618_s17 + $0x1c] sm:$0xf] %vm876_vm6, %v1070_v42 }
 0x14c   : > { %v838_v41 = vsel %vm820_vm14, %v811_v40, %v829_v46 }
 0x14d   : > { %v1071_v0 = vpack.c.bf16 %v838_v41, %v838_v41 }
 0x14f   : > { %885 = vst.msk [vmem:[%s1618_s17 + $0x20] sm:$0xf] %vm876_vm6, %v1071_v0 }
 0x150 PF: > { %s15_s14 = sadd.s32 1, %s1348_s14   ;;  %s1672_s12 = smov %s1344_s13 }
 0x151   : > { %p12_p3 = scmp.ge.s32.totalorder %s15_s14, 4   ;;  %s1673_s13 = smov %s1675_s16 }
 0x153   :  { %14 = sbr.rel (!%p12_p3) target bundleno = 3 (0x3), region = 74 }
 0x158   :  { %915 = vsyncpa [#allocation3], 1 }
 0x159   :  { %917 = vsyncpa [#allocation3 + $0x1], 1 }
 0x15a   :  { %918 = vsyncpa [#allocation5], 1 }

// kernel: discriminator_hf_forward.5
= control target key start
LH: loop header
LB: loop body
LE: loop exit
PB: predicated region body
PF: predicated region fallthrough
CT: control target
= control target key end

     0   :  { %8 = vsyncpa [#allocation3], 0  ;;  %s1768_s0 = inlined_call_operand.vmem [shape: bf16[2,1,30,256], index: 0, kind: input, shape index: {}]   ;;  %s1769_s1 = inlined_call_operand.hbm [shape: bf16[4,256,128], index: 1, kind: input, shape index: {}]   ;;  %s1770_s2 = inlined_call_operand.hbm [shape: f32[1,128], index: 2, kind: input, shape index: {}]   ;;  %s1771_s3 = inlined_call_operand.vmem [shape: bf16[2,1,20,128], index: 3, kind: output, shape index: {}]  }
   0x1   :  { %9 = vsyncpa [#allocation5], 0  ;;  %s1636_s12 = smov 0   ;;  %s1638_s13 = smov 0  }
   0x2   :  { %s1640_s14 = smov 0  }
   0x3 LB: > { %s1200_s15 = sadd.s32 4294967295, %s1610_s14   ;;  %s27_s16 = sadd.s32 1, %s1606_s13  ;;  %s1610_s14 = sphi %s1640_s14, %s15_s14   ;;  %s1606_s13 = sphi %s1638_s13, %s1776_s13   ;;  %s1602_s12 = sphi %s1636_s12, %s1775_s12  }
   0x4   : > { %p29_p0 = scmp.ge.s32.totalorder %s27_s16, 2  ;;  %p1202_p1 = scmp.ge.s32.totalorder %s1610_s14, 1 }
   0x5   : > { %p130_p2 = scmp.lt.s32.totalorder %s1610_s14, 3  ;;  %p1661_p4 = scmp.eq.s32.totalorder %s1200_s15, 0 }
   0x6   : > { %s1778_s16 = smov (%p29_p0, %s27_s16), 0  ;;  %s1612_s19 = smov [#allocation2]  }
   0x7   : > { %p1657_p3 = pnand %p1202_p1, %p130_p2  ;;  %s142_s20 = sshll.u32 %s1612_s19, 4  ;;  %s143_s20 = int_to_ptr.vmem [resolvable:$true] %s142_s20 }
   0x8   : > { %s1613_s22 = smov [#allocation4]   ;;  %s1539_s24 = scalar_lea.vmem %s143_s20, 8192 }
   0x9   : > { %p1418_p5 = pneg %p1657_p3  ;;  %s156_s23 = sshll.u32 %s1613_s22, 4  ;;  %s157_s23 = int_to_ptr.vmem [resolvable:$true] %s156_s23 }
   0xa   : > { %p1540_p8 = scmp.ne.s32.totalorder %s143_s20, %s1539_s24  ;;  %p1547_p11 = scmp.lt.s32.totalorder %s143_s20, %s143_s20 }
   0xb   : > { %p1669_p6 = pnand %p1661_p4, %p1418_p5  ;;  %p1548_p12 = scmp.lt.s32.totalorder %s1539_s24, %s1539_s24 }
   0xd   : > { %p1530_p7 = pneg %p1669_p6  ;;  %p1549_p13 = por %p1548_p12, %p1547_p11 }
   0xf   : > { %p1542_p9 = pnand %p1540_p8, %p1530_p7 }
  0x11   : > { %p1543_p10 = pneg %p1542_p9 }
  0x13   : > { %p1550_p0 = pnand %p1549_p13, %p1543_p10 }
  0x15   : > { %1553 = shalt.err (!%p1550_p0)
}
  0x16   : > { %s1614_s25 = smov 64   ;;  %s1615_s26 = smov 4  }
  0x17   : > { %1421 = dma.hbm_to_vmem [thread:$0]  (!%p1669_p6), %s1769_s1, 8192, %s143_s20, [#allocation3], %s1614_s25, %s1614_s25, %s1615_s26  }
  0x18   : > { %s1565_s29 = scalar_lea.vmem %s157_s23, 16  ;;  %s1572_s30 = scalar_lea.vmem %s157_s23, 32 }
  0x19   : > { %p1566_p1 = scmp.ne.s32.totalorder %s157_s23, %s1565_s29  ;;  %p1573_p8 = scmp.lt.s32.totalorder %s157_s23, %s157_s23 }
  0x1a   : > { %p1574_p9 = scmp.lt.s32.totalorder %s1572_s30, %s1565_s29 }
  0x1b   : > { %p1568_p2 = pnand %p1566_p1, %p1530_p7 }
  0x1c   : > { %p1575_p10 = por %p1574_p9, %p1573_p8 }
  0x1d   : > { %p1569_p5 = pneg %p1568_p2 }
  0x1f   : > { %p1576_p11 = pnand %p1575_p10, %p1569_p5 }
  0x21   : > { %1579 = shalt.err (!%p1576_p11)
}
  0x22   : > { %1424 = dma.hbm_to_vmem [thread:$0]  (!%p1669_p6), %s1770_s2, 16, %s157_s23, [#allocation5]  }
  0x23   : > { %181 = sbr.rel (%p1657_p3) target bundleno = 326 (0x146), region = 32 }
  0x28   : > { %1593 = dma.done.wait (%p1661_p4), [#allocation3], 8192  }
  0x29   : > { %1595 = vsyncadd (%p1661_p4), [#allocation3], 4294959104 }
  0x2a   : > { %1597 = dma.done.wait (%p1661_p4), [#allocation5], 16  }
  0x2b   : > { %1599 = vsyncadd (%p1661_p4), [#allocation5], 4294967280  ;;  %v1457_v0 = vld [vmem:[#allocation2 + $0xf8] sm:$0xff]   ;;  %v1461_v4 = vld [vmem:[#allocation2 + $0xf0] sm:$0xff]   ;;  %p217_p3 = scmp.lt.s32.totalorder %s1602_s12, 1  ;;  %vm892_vm1 = vcmask 1044480  }
  0x2c   : > { %v1458_v1 = vld [vmem:[#allocation2 + $0x78] sm:$0xff]   ;;  %1297 = vmatprep.subr.bf16.mxu0 %v1457_v0  ;;  %v1462_v5 = vld [vmem:[#allocation2 + $0x70] sm:$0xff]   ;;  %v1465_v8 = vld [vmem:[#allocation2 + $0xe8] sm:$0xff]   ;;  %vm318_vm0 = vsmask.f32 7424 }
  0x2d   : > { %v1459_v2 = vld [vmem:[#allocation2 + $0xb8] sm:$0xff]   ;;  %1325 = vmatprep.subr.bf16.mxu1 %v1458_v1  ;;  %v1463_v6 = vld [vmem:[#allocation2 + $0xb0] sm:$0xff]   ;;  %v1466_v9 = vld [vmem:[#allocation2 + $0x68] sm:$0xff]   ;;  %s1780_s12 = smov (!%p217_p3, %s1602_s12), 1  ;;  %vm683_vm2 = vsmask.f32 5376 }
  0x2e   : > { %v1460_v3 = vld [vmem:[#allocation2 + $0x38] sm:$0xff]   ;;  %1298 = vmatpush3.bf16.msra.mxu0 %v1459_v2  ;;  %v1464_v7 = vld [vmem:[#allocation2 + $0x30] sm:$0xff]   ;;  %v1467_v10 = vld [vmem:[#allocation2 + $0xa8] sm:$0xff]   ;;  %s1288_s6 = sshll.u32 %s1780_s12, 5  ;;  %s1409_s10 = smul.u32 12, %s1780_s12 }
  0x2f   : > { %1326 = vmatpush3.bf16.msra.mxu1 %v1460_v3  ;;  %1299 = vmatprep.subr.bf16.mxu0 %v1461_v4  ;;  %v1468_v11 = vld [vmem:[#allocation2 + $0x28] sm:$0xff]   ;;  %v1469_v12 = vld [vmem:[#allocation2 + $0xe0] sm:$0xff]   ;;  %v1473_v16 = vld [vmem:[#allocation2 + $0xd8] sm:$0xff]   ;;  %s1709_s9 = scalar_lea.vmem %s1768_s0, %s1288_s6 }
  0x30   : > { %1327 = vmatprep.subr.bf16.mxu1 %v1462_v5  ;;  %v1470_v13 = vld [vmem:[#allocation2 + $0x60] sm:$0xff]   ;;  %v1474_v17 = vld [vmem:[#allocation2 + $0x58] sm:$0xff]   ;;  %v1477_v20 = vld [vmem:[#allocation2 + $0xd0] sm:$0xff]   ;;  %s234_s17 = scalar_lea.vmem %s1771_s3, %s1409_s10 }
  0x31   : > { %v1471_v14 = vld [vmem:[#allocation2 + $0xa0] sm:$0xff]   ;;  %v1475_v18 = vld [vmem:[#allocation2 + $0x98] sm:$0xff]   ;;  %v1478_v21 = vld [vmem:[#allocation2 + $0x50] sm:$0xff]  }
  0x32   : > { %1300 = vmatpush3.bf16.msra.mxu0 %v1463_v6  ;;  %v1472_v15 = vld [vmem:[#allocation2 + $0x20] sm:$0xff]   ;;  %v1476_v19 = vld [vmem:[#allocation2 + $0x18] sm:$0xff]   ;;  %v1479_v22 = vld [vmem:[#allocation2 + $0x90] sm:$0xff]  }
  0x33   : > { %1328 = vmatpush3.bf16.msra.mxu1 %v1464_v7  ;;  %1301 = vmatprep.subr.bf16.mxu0 %v1465_v8  ;;  %v1480_v23 = vld [vmem:[#allocation2 + $0x10] sm:$0xff]   ;;  %v1481_v24 = vld [vmem:[#allocation2 + $0xc8] sm:$0xff]   ;;  %v1485_v28 = vld [vmem:[#allocation2 + $0xc0] sm:$0xff]  }
  0x34   : > { %1329 = vmatprep.subr.bf16.mxu1 %v1466_v9  ;;  %v1482_v25 = vld [vmem:[#allocation2 + $0x48] sm:$0xff]   ;;  %v1486_v29 = vld [vmem:[#allocation2 + $0x40] sm:$0xff]   ;;  %v1712_v32 = vld [vmem:[%s1709_s9 + $0x10] sm:$0xff] }
  0x35   : > { %v1483_v26 = vld [vmem:[#allocation2 + $0x88] sm:$0xff]   ;;  %v1487_v30 = vld [vmem:[#allocation2 + $0x80] sm:$0xff]   ;;  %v1215_v34 = vcombine.high %v1712_v32, %v1712_v32  ;;  %v1214_v36 = vcombine.low %v1712_v32, %v1712_v32  ;;  %v1494_v37 = vld [vmem:[#allocation2 + $0x178] sm:$0xff]  }
  0x36   : > { %1302 = vmatpush3.bf16.msra.mxu0 %v1467_v10  ;;  %v1484_v27 = vld [vmem:[#allocation2 + $0x8] sm:$0xff]   ;;  %v1488_v31 = vld [vmem:[#allocation2] sm:$0xff]   ;;  %v1495_v44 = vld [vmem:[#allocation2 + $0x1f8] sm:$0xff]  }
  0x37   : > { %1330 = vmatpush3.bf16.msra.mxu1 %v1468_v11  ;;  %1303 = vmatprep.subr.bf16.mxu0 %v1469_v12  ;;  %v1715_v33 = vld [vmem:[%s1709_s9 + $0x4] ss:$8 sps:$4 sm:$0xff]   ;;  %v1720_v35 = vld [vmem:[%s1709_s9] ss:$8 sps:$4 sm:$0xff]   ;;  %v339_v40 = vshll.u32 %v1215_v34, 16  ;;  %v327_v43 = vshll.u32 %v1214_v36, 16 }
  0x38   : > { %1331 = vmatprep.subr.bf16.mxu1 %v1470_v13  ;;  %v332_v38 = vshrl.u32 %v1715_v33, 16  ;;  %v334_v39 = vshll.u32 %v1715_v33, 16  ;;  %629 = vmatprep.mubr.bf16.mxu1 %v1715_v33  ;;  %v320_v41 = vshrl.u32 %v1720_v35, 16  ;;  %v322_v42 = vshll.u32 %v1720_v35, 16  ;;  %v1497_v47 = vld [vmem:[#allocation2 + $0x1b8] sm:$0xff]   ;;  %v1499_v54 = vld [vmem:[#allocation2 + $0x1f0] sm:$0xff]  }
  0x39   : > { %v341_v46 = vrot.slane %v339_v40, 1  ;;  %v329_v49 = vrot.slane %v327_v43, 1  ;;  %v1496_v51 = vld [vmem:[#allocation2 + $0x138] sm:$0xff]   ;;  %v346_v52 = vshrl.u32 %v1215_v34, 16  ;;  %v1498_v56 = vld [vmem:[#allocation2 + $0x170] sm:$0xff]   ;;  %v343_v61 = vshrl.u32 %v1214_v36, 16 }
  0x3a   : > { %1304 = vmatpush3.bf16.msra.mxu0 %v1471_v14  ;;  %v336_v45 = vrot.slane %v334_v39, 1  ;;  %v324_v48 = vrot.slane %v322_v42, 1  ;;  %v1501_v59 = vld [vmem:[#allocation2 + $0x1b0] sm:$0xff]   ;;  %v1503_v62 = vld [vmem:[#allocation2 + $0x1e8] sm:$0xff]   ;;  %v1507_v3 = vld [vmem:[#allocation2 + $0x1e0] sm:$0xff]  }
  0x3b   : > { %1332 = vmatpush3.bf16.msra.mxu1 %v1472_v15  ;;  %1305 = vmatprep.subr.bf16.mxu0 %v1473_v16  ;;  %v348_v57 = vor.u32 %v346_v52, %v341_v46  ;;  %v1500_v60 = vld [vmem:[#allocation2 + $0x130] sm:$0xff]   ;;  %v1502_v63 = vld [vmem:[#allocation2 + $0x168] sm:$0xff]   ;;  %v345_v2 = vor.u32 %v343_v61, %v329_v49  ;;  %v1506_v4 = vld [vmem:[#allocation2 + $0x160] sm:$0xff]  }
  0x3c   : > { %1333 = vmatprep.subr.bf16.mxu1 %v1474_v17  ;;  %v337_v50 = vor.u32 %v336_v45, %v332_v38  ;;  %v325_v53 = vor.u32 %v324_v48, %v320_v41  ;;  %v1505_v0 = vld [vmem:[#allocation2 + $0x1a8] sm:$0xff]   ;;  %v1509_v5 = vld [vmem:[#allocation2 + $0x1a0] sm:$0xff]   ;;  %v1511_v7 = vld [vmem:[#allocation2 + $0x1d8] sm:$0xff]  }
  0x3d   : > { %v1504_v1 = vld [vmem:[#allocation2 + $0x128] sm:$0xff]   ;;  %v1508_v6 = vld [vmem:[#allocation2 + $0x120] sm:$0xff]   ;;  %v1510_v8 = vld [vmem:[#allocation2 + $0x158] sm:$0xff]  }
  0x3e   : > { %1306 = vmatpush3.bf16.msra.mxu0 %v1475_v18  ;;  %v342_v55 = vsel %vm318_vm0, %v337_v50, %v341_v46  ;;  %v330_v58 = vsel %vm318_vm0, %v325_v53, %v329_v49  ;;  %v1513_v9 = vld [vmem:[#allocation2 + $0x198] sm:$0xff]   ;;  %v1515_v11 = vld [vmem:[#allocation2 + $0x1d0] sm:$0xff]   ;;  %v1519_v15 = vld [vmem:[#allocation2 + $0x1c8] sm:$0xff]  }
  0x3f   : > { %1334 = vmatpush3.bf16.msra.mxu1 %v1476_v19  ;;  %1307 = vmatprep.subr.bf16.mxu0 %v1477_v20  ;;  %v1512_v10 = vld [vmem:[#allocation2 + $0x118] sm:$0xff]   ;;  %v1514_v12 = vld [vmem:[#allocation2 + $0x150] sm:$0xff]   ;;  %v1518_v16 = vld [vmem:[#allocation2 + $0x148] sm:$0xff]  }
  0x40   : > { %1335 = vmatprep.subr.bf16.mxu1 %v1478_v21  ;;  %481 = vmatprep.mubr.bf16.mxu0 %v342_v55  ;;  %v1517_v13 = vld [vmem:[#allocation2 + $0x190] sm:$0xff]   ;;  %v1521_v17 = vld [vmem:[#allocation2 + $0x188] sm:$0xff]   ;;  %v1523_v19 = vld [vmem:[#allocation2 + $0x1c0] sm:$0xff]  }
  0x41   : > { %v1516_v14 = vld [vmem:[#allocation2 + $0x110] sm:$0xff]   ;;  %v1520_v18 = vld [vmem:[#allocation2 + $0x108] sm:$0xff]   ;;  %v1522_v20 = vld [vmem:[#allocation2 + $0x140] sm:$0xff]  }
  0x42   : > { %1308 = vmatpush3.bf16.msra.mxu0 %v1479_v22  ;;  %v1525_v21 = vld [vmem:[#allocation2 + $0x180] sm:$0xff]   ;;  %v239_v22 = vld [vmem:[%s1709_s9 + $0x18] sm:$0x77] }
  0x43   : > { %1336 = vmatpush3.bf16.msra.mxu1 %v1480_v23  ;;  %1309 = vmatprep.subr.bf16.mxu0 %v1481_v24  ;;  %v696_v23 = vrot.slane %v332_v38, 2  ;;  %v697_v24 = vrot.slane %v334_v39, 3 }
  0x44   : > { %1337 = vmatprep.subr.bf16.mxu1 %v1482_v25  ;;  %v1524_v25 = vld [vmem:[#allocation2 + $0x100] sm:$0xff]  }
  0x45   : > { %v698_v39 = vor.u32 %v697_v24, %v696_v23 }
  0x46   : > { %1310 = vmatpush3.bf16.msra.mxu0 %v1483_v26  ;;  %v1248_v26 = vcombine.low %v1712_v32, %v239_v22 }
  0x47   : > { %1338 = vmatpush3.bf16.msra.mxu1 %v1484_v27  ;;  %1311 = vmatprep.subr.bf16.mxu0 %v1485_v28  ;;  %v1249_v27 = vcombine.high %v1712_v32, %v239_v22  ;;  %v896_v28 = vrot.slane %v1715_v33, 3 }
  0x48   : > { %1339 = vmatprep.subr.bf16.mxu1 %v1486_v29  ;;  %v684_v29 = vrot.slane %v320_v41, 2  ;;  %v688_v38 = vshrl.u32 %v1248_v26, 16  ;;  %v691_v40 = vshll.u32 %v1248_v26, 16  ;;  %v894_v43 = vrot.slane %v1248_v26, 3 }
  0x4a   : > { %1312 = vmatpush3.bf16.msra.mxu0 %v1487_v30  ;;  %v685_v30 = vrot.slane %v322_v42, 3  ;;  %v690_v41 = vrot.slane %v688_v38, 2  ;;  %v693_v46 = vrot.slane %v691_v40, 3 }
  0x4b   : > { %1340 = vmatpush3.bf16.msra.mxu1 %v1488_v31  ;;  %1353 = vmatprep.subr.bf16.mxu0 %v1494_v37  ;;  %v893_v31 = vrot.slane %v1720_v35, 3  ;;  %v897_v37 = vrot.slane %v1249_v27, 3 }
  0x4c   : > { %1381 = vmatprep.subr.bf16.mxu1 %v1495_v44  ;;  %v686_v45 = vor.u32 %v685_v30, %v684_v29 }
  0x4d   : > { %482 = vmatmul.mubr.bf16.vlgmr.msra.gmra.mxu0 %v330_v58  ;;  %v898_v44 = vsel %vm892_vm1, %v896_v28, %v897_v37  ;;  %v895_v42 = vsel %vm892_vm1, %v893_v31, %v894_v43 }
  0x4e   : > { %630 = vmatmul.mubr.bf16.vlgmr.msra.gmra.mxu1 %v1720_v35  ;;  %1354 = vmatpush3.bf16.msra.mxu0 %v1496_v51 }
  0x4f   : > { %637 = vmatprep.mubr.bf16.mxu1 %v1215_v34  ;;  %1382 = vmatpush3.bf16.msra.mxu1 %v1497_v47  ;;  %v700_v34 = vshrl.u32 %v1249_v27, 16  ;;  %v694_v47 = vor.u32 %v693_v46, %v690_v41 }
  0x50   : > { %1383 = vmatprep.subr.bf16.mxu1 %v1499_v54  ;;  %1355 = vmatprep.subr.bf16.mxu0 %v1498_v56 }
  0x51   : > { %489 = vmatprep.mubr.bf16.mxu0 %v348_v57  ;;  %v702_v32 = vrot.slane %v700_v34, 2  ;;  %v695_v49 = vsel %vm683_vm2, %v686_v45, %v694_v47 }
  0x52   : > { %1356 = vmatpush3.bf16.msra.mxu0 %v1500_v60 }
  0x53   : > { %1384 = vmatpush3.bf16.msra.mxu1 %v1501_v59  ;;  %1357 = vmatprep.subr.bf16.mxu0 %v1502_v63 }
  0x54   : > { %1385 = vmatprep.subr.bf16.mxu1 %v1503_v62 }
  0x55   : > { %490 = vmatmul.mubr.bf16.gmra.mxu0 %v345_v2 }
  0x56   : > { %638 = vmatmul.mubr.bf16.gmra.mxu1 %v1214_v36  ;;  %1358 = vmatpush3.bf16.msra.mxu0 %v1504_v1  ;;  %v703_v36 = vshll.u32 %v1249_v27, 16 }
  0x57   : > { %1386 = vmatpush3.bf16.msra.mxu1 %v1505_v0  ;;  %1359 = vmatprep.subr.bf16.mxu0 %v1506_v4 }
  0x58   : > { %1387 = vmatprep.subr.bf16.mxu1 %v1507_v3  ;;  %v705_v33 = vrot.slane %v703_v36, 3  ;;  %1031 = vmatprep.mubr.bf16.mxu1 %v898_v44 }
  0x5a   : > { %1360 = vmatpush3.bf16.msra.mxu0 %v1508_v6  ;;  %v706_v35 = vor.u32 %v705_v33, %v702_v32 }
  0x5b   : > { %1388 = vmatpush3.bf16.msra.mxu1 %v1509_v5  ;;  %1361 = vmatprep.subr.bf16.mxu0 %v1510_v8 }
  0x5c   : > { %1389 = vmatprep.subr.bf16.mxu1 %v1511_v7  ;;  %v707_v48 = vsel %vm683_vm2, %v698_v39, %v706_v35 }
  0x5d   : > { %840 = vmatprep.mubr.bf16.mxu0 %v707_v48 }
  0x5e   : > { %1362 = vmatpush3.bf16.msra.mxu0 %v1512_v10 }
  0x5f   : > { %1390 = vmatpush3.bf16.msra.mxu1 %v1513_v9  ;;  %1363 = vmatprep.subr.bf16.mxu0 %v1514_v12 }
  0x60   : > { %1391 = vmatprep.subr.bf16.mxu1 %v1515_v11 }
  0x62   : > { %1364 = vmatpush3.bf16.msra.mxu0 %v1516_v14 }
  0x63   : > { %1392 = vmatpush3.bf16.msra.mxu1 %v1517_v13  ;;  %1365 = vmatprep.subr.bf16.mxu0 %v1518_v16 }
  0x64   : > { %1393 = vmatprep.subr.bf16.mxu1 %v1519_v15 }
  0x66   : > { %1366 = vmatpush3.bf16.msra.mxu0 %v1520_v18 }
  0x67   : > { %1394 = vmatpush3.bf16.msra.mxu1 %v1521_v17  ;;  %1367 = vmatprep.subr.bf16.mxu0 %v1522_v20 }
  0x68   : > { %1395 = vmatprep.subr.bf16.mxu1 %v1523_v19  ;;  %v1282_v19 = vld [vmem:[#allocation4] ss:$0 sm:$0xff] }
  0x6a   : > { %1368 = vmatpush3.bf16.msra.mxu0 %v1524_v25 }
  0x6b   : > { %1396 = vmatpush3.bf16.msra.mxu1 %v1525_v21 }
  0x6d   : > { %841 = vmatmul.mubr.bf16.vlgmr.msra.gmra.mxu0 %v695_v49 }
  0x6e   : > { %1032 = vmatmul.mubr.bf16.vlgmr.msra.gmra.mxu1 %v895_v42  ;;  %848 = vmatprep.mubr.bf16.mxu0 %v706_v35 }
  0x6f   : > { %1039 = vmatprep.mubr.bf16.mxu1 %v897_v37 }
  0x75   : > { %849 = vmatmul.mubr.bf16.gmra.mxu0 %v694_v47 }
  0x76   : > { %1040 = vmatmul.mubr.bf16.gmra.mxu1 %v894_v43 }
 0x10d   : > { %v1313_v53 = vpop.f32.mrf.mxu0 }
 0x10e   : > { %v1341_v50 = vpop.f32.mrf.mxu1 }
 0x10f   : > { %v1314_v55 = vpop.f32.mrf.mxu0 }
 0x110   : > { %v1342_v51 = vpop.f32.mrf.mxu1  ;;  %v1315_v4 = vadd.f32 %v1314_v55, %v1313_v53 }
 0x111   : > { %v1316_v57 = vpop.f32.mrf.mxu0  ;;  %v1343_v5 = vadd.f32 %v1342_v51, %v1341_v50 }
 0x112   : > { %v1344_v52 = vpop.f32.mrf.mxu1 }
 0x113   : > { %v1317_v59 = vpop.f32.mrf.mxu0  ;;  %v632_v10 = vadd.f32 %v1343_v5, %v1315_v4 }
 0x114   : > { %v1345_v54 = vpop.f32.mrf.mxu1  ;;  %v1318_v11 = vadd.f32 %v1317_v59, %v1316_v57 }
 0x115   : > { %v1319_v61 = vpop.f32.mrf.mxu0  ;;  %v1346_v12 = vadd.f32 %v1345_v54, %v1344_v52 }
 0x116   : > { %v1347_v56 = vpop.f32.mrf.mxu1 }
 0x117   : > { %v1320_v63 = vpop.f32.mrf.mxu0  ;;  %v635_v22 = vadd.f32 %v1346_v12, %v1318_v11 }
 0x118   : > { %v1348_v58 = vpop.f32.mrf.mxu1  ;;  %v1321_v23 = vadd.f32 %v1320_v63, %v1319_v61 }
 0x119   : > { %v1322_v0 = vpop.f32.mrf.mxu0  ;;  %v1349_v18 = vadd.f32 %v1348_v58, %v1347_v56 }
 0x11a   : > { %v1350_v60 = vpop.f32.mrf.mxu1 }
 0x11b   : > { %v1323_v1 = vpop.f32.mrf.mxu0  ;;  %v640_v36 = vadd.f32 %v1349_v18, %v1321_v23 }
 0x11c   : > { %v1351_v62 = vpop.f32.mrf.mxu1 }
 0x12d   : > { %v1369_v6 = vpop.f32.mrf.mxu0 }
 0x12e   : > { %v1397_v2 = vpop.f32.mrf.mxu1 }
 0x12f   : > { %v1370_v8 = vpop.f32.mrf.mxu0 }
 0x130   : > { %v1398_v3 = vpop.f32.mrf.mxu1  ;;  %v1371_v13 = vadd.f32 %v1370_v8, %v1369_v6 }
 0x131   : > { %v1372_v14 = vpop.f32.mrf.mxu0  ;;  %v1399_v17 = vadd.f32 %v1398_v3, %v1397_v2 }
 0x132   : > { %v1400_v7 = vpop.f32.mrf.mxu1  ;;  %v856_v16 = vadd.f32 %v1371_v13, %v632_v10 }
 0x133   : > { %v1373_v20 = vpop.f32.mrf.mxu0 }
 0x134   : > { %v1401_v9 = vpop.f32.mrf.mxu1  ;;  %v1047_v24 = vadd.f32 %v1399_v17, %v856_v16  ;;  %v1374_v25 = vadd.f32 %v1373_v20, %v1372_v14 }
 0x135   : > { %v1375_v26 = vpop.f32.mrf.mxu0  ;;  %v1402_v30 = vadd.f32 %v1401_v9, %v1400_v7 }
 0x136   : > { %v1403_v15 = vpop.f32.mrf.mxu1  ;;  %v1057_v28 = vadd.f32 %v1282_v19, %v1047_v24  ;;  %v857_v29 = vadd.f32 %v1374_v25, %v635_v22 }
 0x137   : > { %v1376_v31 = vpop.f32.mrf.mxu0 }
 0x138   : > { %v1404_v21 = vpop.f32.mrf.mxu1  ;;  %v1048_v37 = vadd.f32 %v1402_v30, %v857_v29  ;;  %v1377_v38 = vadd.f32 %v1376_v31, %v1375_v26  ;;  %v1063_v40 = vmul.f32 0.2, %v1057_v28  ;;  %vm1060_vm3 = vcmp.ge.f32.partialorder %v1057_v28, 0.0 }
 0x139   : > { %v1378_v39 = vpop.f32.mrf.mxu0  ;;  %v1405_v33 = vadd.f32 %v1404_v21, %v1403_v15 }
 0x13a   : > { %v1406_v27 = vpop.f32.mrf.mxu1  ;;  %v1058_v43 = vadd.f32 %v1282_v19, %v1048_v37  ;;  %v858_v32 = vadd.f32 %v1377_v38, %v640_v36  ;;  %v1066_v46 = vsel %vm1060_vm3, %v1057_v28, %v1063_v40 }
 0x13b   : > { %v1379_v44 = vpop.f32.mrf.mxu0 }
 0x13c   : > { %v1407_v34 = vpop.f32.mrf.mxu1  ;;  %vm1061_vm4 = vcmp.ge.f32.partialorder %v1058_v43, 0.0  ;;  %v1064_v41 = vmul.f32 0.2, %v1058_v43  ;;  %v1049_v45 = vadd.f32 %v1405_v33, %v858_v32 }
 0x13e   : > { %v1067_v42 = vsel %vm1061_vm4, %v1058_v43, %v1064_v41  ;;  %v1059_v35 = vadd.f32 %v1282_v19, %v1049_v45 }
 0x13f   : > { %v1295_v47 = vpack.c.bf16 %v1067_v42, %v1066_v46 }
 0x140   : > { %vm1062_vm5 = vcmp.ge.f32.partialorder %v1059_v35, 0.0  ;;  %v1065_v48 = vmul.f32 0.2, %v1059_v35 }
 0x141   : > { %1296 = vst [vmem:[%s234_s17] sm:$0xff] %v1295_v47  }
 0x142   : > { %v1068_v49 = vsel %vm1062_vm5, %v1059_v35, %v1065_v48 }
 0x143   : > { %v1291_v50 = vpack.c.bf16 %v1068_v49, %v1068_v49 }
 0x145   : > { %1084 = vst [vmem:[%s234_s17 + $0x8] sm:$0x3] %v1291_v50 }
 0x146 PF: > { %s15_s14 = sadd.s32 1, %s1610_s14   ;;  %s1775_s12 = smov %s1606_s13 }
 0x147   : > { %p12_p4 = scmp.ge.s32.totalorder %s15_s14, 4   ;;  %s1776_s13 = smov %s1778_s16 }
 0x149   :  { %14 = sbr.rel (!%p12_p4) target bundleno = 3 (0x3), region = 74 }
 0x14e   :  { %1114 = vsyncpa [#allocation3], 1 }
 0x14f   :  { %1116 = vsyncpa [#allocation3 + $0x1], 1 }
 0x150   :  { %1117 = vsyncpa [#allocation5], 1 }

// kernel: discriminator_hf_forward.6
= control target key start
LH: loop header
LB: loop body
LE: loop exit
PB: predicated region body
PF: predicated region fallthrough
CT: control target
= control target key end

     0   :  { %8 = vsyncpa [#allocation3], 0  ;;  %s3340_s0 = inlined_call_operand.vmem [shape: bf16[2,1,12,512], index: 0, kind: input, shape index: {}]   ;;  %s3341_s1 = inlined_call_operand.hbm [shape: bf16[4,512,256], index: 1, kind: input, shape index: {}]   ;;  %s3342_s2 = inlined_call_operand.hbm [shape: f32[1,256], index: 2, kind: input, shape index: {}]   ;;  %s3343_s3 = inlined_call_operand.vmem [shape: bf16[2,1,6,256], index: 3, kind: output, shape index: {}]  }
   0x1   :  { %9 = vsyncpa [#allocation5], 0  ;;  %s3184_s12 = smov 0   ;;  %s3186_s13 = smov 0  }
   0x2   :  { %s3188_s14 = smov 0  }
   0x3 LB: > { %s2354_s15 = sadd.s32 4294967295, %s3158_s14   ;;  %s27_s16 = sadd.s32 1, %s3154_s13  ;;  %s3158_s14 = sphi %s3188_s14, %s15_s14   ;;  %s3154_s13 = sphi %s3186_s13, %s3348_s13   ;;  %s3150_s12 = sphi %s3184_s12, %s3347_s12  }
   0x4   : > { %p29_p0 = scmp.ge.s32.totalorder %s27_s16, 2  ;;  %p2356_p1 = scmp.ge.s32.totalorder %s3158_s14, 1 }
   0x5   : > { %p130_p2 = scmp.lt.s32.totalorder %s3158_s14, 3  ;;  %p3209_p4 = scmp.eq.s32.totalorder %s2354_s15, 0 }
   0x6   : > { %s3350_s16 = smov (%p29_p0, %s27_s16), 0  ;;  %s3160_s19 = smov [#allocation2]  }
   0x7   : > { %p3205_p3 = pnand %p2356_p1, %p130_p2  ;;  %s142_s20 = sshll.u32 %s3160_s19, 4  ;;  %s143_s20 = int_to_ptr.vmem [resolvable:$true] %s142_s20 }
   0x8   : > { %s3161_s22 = smov [#allocation4]   ;;  %s3087_s24 = scalar_lea.vmem %s143_s20, 32768 }
   0x9   : > { %p2645_p5 = pneg %p3205_p3  ;;  %s156_s23 = sshll.u32 %s3161_s22, 4  ;;  %s157_s23 = int_to_ptr.vmem [resolvable:$true] %s156_s23 }
   0xa   : > { %p3088_p8 = scmp.ne.s32.totalorder %s143_s20, %s3087_s24  ;;  %p3095_p11 = scmp.lt.s32.totalorder %s143_s20, %s143_s20 }
   0xb   : > { %p3217_p6 = pnand %p3209_p4, %p2645_p5  ;;  %p3096_p12 = scmp.lt.s32.totalorder %s3087_s24, %s3087_s24 }
   0xd   : > { %p3078_p7 = pneg %p3217_p6  ;;  %p3097_p13 = por %p3096_p12, %p3095_p11 }
   0xf   : > { %p3090_p9 = pnand %p3088_p8, %p3078_p7 }
  0x11   : > { %p3091_p10 = pneg %p3090_p9 }
  0x13   : > { %p3098_p0 = pnand %p3097_p13, %p3091_p10 }
  0x15   : > { %3101 = shalt.err (!%p3098_p0)
}
  0x16   : > { %s3162_s25 = smov 128   ;;  %s3163_s26 = smov 8  }
  0x17   : > { %2648 = dma.hbm_to_vmem [thread:$0]  (!%p3217_p6), %s3341_s1, 32768, %s143_s20, [#allocation3], %s3162_s25, %s3162_s25, %s3163_s26  }
  0x18   : > { %s3113_s29 = scalar_lea.vmem %s157_s23, 32  ;;  %p3121_p8 = scmp.lt.s32.totalorder %s157_s23, %s157_s23 }
  0x19   : > { %p3114_p1 = scmp.ne.s32.totalorder %s157_s23, %s3113_s29  ;;  %p3122_p9 = scmp.lt.s32.totalorder %s3113_s29, %s3113_s29 }
  0x1b   : > { %p3116_p2 = pnand %p3114_p1, %p3078_p7  ;;  %p3123_p11 = por %p3122_p9, %p3121_p8 }
  0x1d   : > { %p3117_p5 = pneg %p3116_p2 }
  0x1f   : > { %p3124_p10 = pnand %p3123_p11, %p3117_p5 }
  0x21   : > { %3127 = shalt.err (!%p3124_p10)
}
  0x22   : > { %2651 = dma.hbm_to_vmem [thread:$0]  (!%p3217_p6), %s3342_s2, 32, %s157_s23, [#allocation5]  }
  0x23   : > { %181 = sbr.rel (%p3205_p3) target bundleno = 508 (0x1fc), region = 32 }
  0x28   : > { %3141 = dma.done.wait (%p3209_p4), [#allocation3], 32768  }
  0x29   : > { %3143 = vsyncadd (%p3209_p4), [#allocation3], 4294934528 }
  0x2a   : > { %3145 = dma.done.wait (%p3209_p4), [#allocation5], 32  }
  0x2b   : > { %3147 = vsyncadd (%p3209_p4), [#allocation5], 4294967264  ;;  %v2684_v0 = vld [vmem:[#allocation2 + $0x274] ss:$8 sps:$4 sm:$0xff]   ;;  %v2688_v2 = vld [vmem:[#allocation2 + $0x270] ss:$8 sps:$4 sm:$0xff]  }
  0x2c   : > { %v2686_v1 = vld [vmem:[#allocation2 + $0x374] ss:$8 sps:$4 sm:$0xff]   ;;  %730 = vmatprep.subr.bf16.mxu0 %v2684_v0  ;;  %v2689_v3 = vld [vmem:[#allocation2 + $0x370] ss:$8 sps:$4 sm:$0xff]   ;;  %v2690_v4 = vld [vmem:[#allocation2 + $0x264] ss:$8 sps:$4 sm:$0xff]  }
  0x2d   : > { %771 = vmatprep.subr.bf16.mxu1 %v2686_v1  ;;  %731 = vmatpush1.bf16.msra.mxu0 %v2688_v2  ;;  %v2692_v5 = vld [vmem:[#allocation2 + $0x364] ss:$8 sps:$4 sm:$0xff]   ;;  %v2694_v6 = vld [vmem:[#allocation2 + $0x260] ss:$8 sps:$4 sm:$0xff]   ;;  %v2696_v8 = vld [vmem:[#allocation2 + $0x254] ss:$8 sps:$4 sm:$0xff]  }
  0x2e   : > { %772 = vmatpush1.bf16.msra.mxu1 %v2689_v3  ;;  %732 = vmatprep.subr.bf16.mxu0 %v2690_v4  ;;  %v2695_v7 = vld [vmem:[#allocation2 + $0x360] ss:$8 sps:$4 sm:$0xff]   ;;  %v2698_v9 = vld [vmem:[#allocation2 + $0x354] ss:$8 sps:$4 sm:$0xff]   ;;  %v2700_v10 = vld [vmem:[#allocation2 + $0x250] ss:$8 sps:$4 sm:$0xff]  }
  0x2f   : > { %773 = vmatprep.subr.bf16.mxu1 %v2692_v5  ;;  %v2701_v11 = vld [vmem:[#allocation2 + $0x350] ss:$8 sps:$4 sm:$0xff]   ;;  %v2702_v12 = vld [vmem:[#allocation2 + $0x244] ss:$8 sps:$4 sm:$0xff]   ;;  %v2706_v14 = vld [vmem:[#allocation2 + $0x240] ss:$8 sps:$4 sm:$0xff]  }
  0x30   : > { %v2704_v13 = vld [vmem:[#allocation2 + $0x344] ss:$8 sps:$4 sm:$0xff]   ;;  %v2707_v15 = vld [vmem:[#allocation2 + $0x340] ss:$8 sps:$4 sm:$0xff]   ;;  %v2708_v16 = vld [vmem:[#allocation2 + $0x234] ss:$8 sps:$4 sm:$0xff]  }
  0x31   : > { %733 = vmatpush1.bf16.msra.mxu0 %v2694_v6  ;;  %v2710_v17 = vld [vmem:[#allocation2 + $0x334] ss:$8 sps:$4 sm:$0xff]   ;;  %v2712_v18 = vld [vmem:[#allocation2 + $0x230] ss:$8 sps:$4 sm:$0xff]   ;;  %v2714_v20 = vld [vmem:[#allocation2 + $0x224] ss:$8 sps:$4 sm:$0xff]  }
  0x32   : > { %774 = vmatpush1.bf16.msra.mxu1 %v2695_v7  ;;  %734 = vmatprep.subr.bf16.mxu0 %v2696_v8  ;;  %v2713_v19 = vld [vmem:[#allocation2 + $0x330] ss:$8 sps:$4 sm:$0xff]   ;;  %v2716_v21 = vld [vmem:[#allocation2 + $0x324] ss:$8 sps:$4 sm:$0xff]   ;;  %v2718_v22 = vld [vmem:[#allocation2 + $0x220] ss:$8 sps:$4 sm:$0xff]  }
  0x33   : > { %775 = vmatprep.subr.bf16.mxu1 %v2698_v9  ;;  %v2719_v23 = vld [vmem:[#allocation2 + $0x320] ss:$8 sps:$4 sm:$0xff]   ;;  %v2720_v24 = vld [vmem:[#allocation2 + $0x214] ss:$8 sps:$4 sm:$0xff]   ;;  %v2724_v26 = vld [vmem:[#allocation2 + $0x210] ss:$8 sps:$4 sm:$0xff]  }
  0x34   : > { %v2722_v25 = vld [vmem:[#allocation2 + $0x314] ss:$8 sps:$4 sm:$0xff]   ;;  %v2725_v27 = vld [vmem:[#allocation2 + $0x310] ss:$8 sps:$4 sm:$0xff]   ;;  %v2726_v28 = vld [vmem:[#allocation2 + $0x204] ss:$8 sps:$4 sm:$0xff]  }
  0x35   : > { %735 = vmatpush1.bf16.msra.mxu0 %v2700_v10  ;;  %v2728_v29 = vld [vmem:[#allocation2 + $0x304] ss:$8 sps:$4 sm:$0xff]   ;;  %v2730_v30 = vld [vmem:[#allocation2 + $0x200] ss:$8 sps:$4 sm:$0xff]   ;;  %v2732_v32 = vld [vmem:[#allocation2 + $0x2f4] ss:$8 sps:$4 sm:$0xff]  }
  0x36   : > { %776 = vmatpush1.bf16.msra.mxu1 %v2701_v11  ;;  %736 = vmatprep.subr.bf16.mxu0 %v2702_v12  ;;  %v2731_v31 = vld [vmem:[#allocation2 + $0x300] ss:$8 sps:$4 sm:$0xff]   ;;  %p217_p3 = scmp.lt.s32.totalorder %s3150_s12, 1  ;;  %v2734_v33 = vld [vmem:[#allocation2 + $0x3f4] ss:$8 sps:$4 sm:$0xff]  }
  0x37   : > { %777 = vmatprep.subr.bf16.mxu1 %v2704_v13  ;;  %v2736_v34 = vld [vmem:[#allocation2 + $0x2f0] ss:$8 sps:$4 sm:$0xff]   ;;  %v2738_v36 = vld [vmem:[#allocation2 + $0x2e4] ss:$8 sps:$4 sm:$0xff]   ;;  %v2742_v38 = vld [vmem:[#allocation2 + $0x2e0] ss:$8 sps:$4 sm:$0xff]  }
  0x38   : > { %v2737_v35 = vld [vmem:[#allocation2 + $0x3f0] ss:$8 sps:$4 sm:$0xff]   ;;  %s3352_s12 = smov (!%p217_p3, %s3150_s12), 1  ;;  %v2740_v37 = vld [vmem:[#allocation2 + $0x3e4] ss:$8 sps:$4 sm:$0xff]  }
  0x39   : > { %737 = vmatpush1.bf16.msra.mxu0 %v2706_v14  ;;  %v2743_v39 = vld [vmem:[#allocation2 + $0x3e0] ss:$8 sps:$4 sm:$0xff]   ;;  %v2744_v40 = vld [vmem:[#allocation2 + $0x2d4] ss:$8 sps:$4 sm:$0xff]   ;;  %s2634_s5 = sshll.u32 %s3352_s12, 5  ;;  %s2635_s9 = sshll.u32 %s3352_s12, 3 }
  0x3a   : > { %778 = vmatpush1.bf16.msra.mxu1 %v2707_v15  ;;  %738 = vmatprep.subr.bf16.mxu0 %v2708_v16  ;;  %v2746_v41 = vld [vmem:[#allocation2 + $0x3d4] ss:$8 sps:$4 sm:$0xff]   ;;  %v2748_v42 = vld [vmem:[#allocation2 + $0x2d0] ss:$8 sps:$4 sm:$0xff]   ;;  %s3257_s8 = scalar_lea.vmem %s3340_s0, %s2634_s5  ;;  %v2750_v44 = vld [vmem:[#allocation2 + $0x2c4] ss:$8 sps:$4 sm:$0xff]   ;;  %s234_s15 = scalar_lea.vmem %s3343_s3, %s2635_s9 }
  0x3b   : > { %779 = vmatprep.subr.bf16.mxu1 %v2710_v17  ;;  %v2749_v43 = vld [vmem:[#allocation2 + $0x3d0] ss:$8 sps:$4 sm:$0xff]   ;;  %v2752_v45 = vld [vmem:[#allocation2 + $0x3c4] ss:$8 sps:$4 sm:$0xff]   ;;  %v2754_v46 = vld [vmem:[#allocation2 + $0x2c0] ss:$8 sps:$4 sm:$0xff]  }
  0x3c   : > { %v3260_v47 = vld [vmem:[%s3257_s8] sm:$0xff]  ;;  %v3267_v49 = vld [vmem:[%s3257_s8 + $0x8] sm:$0xff]  ;;  %v2756_v51 = vld [vmem:[#allocation2 + $0x2b4] ss:$8 sps:$4 sm:$0xff]  }
  0x3d   : > { %739 = vmatpush1.bf16.msra.mxu0 %v2712_v18  ;;  %v3264_v48 = vcombine.high %v3260_v47, %v3260_v47  ;;  %v2755_v50 = vld [vmem:[#allocation2 + $0x3c0] ss:$8 sps:$4 sm:$0xff]   ;;  %v3271_v52 = vcombine.high %v3267_v49, %v3267_v49  ;;  %v2758_v53 = vld [vmem:[#allocation2 + $0x3b4] ss:$8 sps:$4 sm:$0xff]   ;;  %v2760_v59 = vld [vmem:[#allocation2 + $0x2b0] ss:$8 sps:$4 sm:$0xff]   ;;  %v3279_v2 = vcombine.low %v3260_v47, %v3260_v47  ;;  %v3283_v3 = vcombine.low %v3267_v49, %v3267_v49 }
  0x3e   : > { %780 = vmatpush1.bf16.msra.mxu1 %v2713_v19  ;;  %740 = vmatprep.subr.bf16.mxu0 %v2714_v20  ;;  %v2761_v60 = vld [vmem:[#allocation2 + $0x3b0] ss:$8 sps:$4 sm:$0xff]   ;;  %v2762_v62 = vld [vmem:[#allocation2 + $0x2a4] ss:$8 sps:$4 sm:$0xff]   ;;  %v2766_v4 = vld [vmem:[#allocation2 + $0x2a0] ss:$8 sps:$4 sm:$0xff]  }
  0x3f   : > { %781 = vmatprep.subr.bf16.mxu1 %v2716_v21  ;;  %v386_v54 = vshrl.u32 %v3264_v48, 16  ;;  %v388_v55 = vshll.u32 %v3264_v48, 16  ;;  %v400_v56 = vshrl.u32 %v3271_v52, 16  ;;  %v402_v57 = vshll.u32 %v3271_v52, 16  ;;  %v2764_v63 = vld [vmem:[#allocation2 + $0x3a4] ss:$8 sps:$4 sm:$0xff]  }
  0x40   : > { %v2767_v5 = vld [vmem:[#allocation2 + $0x3a0] ss:$8 sps:$4 sm:$0xff]   ;;  %v2768_v6 = vld [vmem:[#allocation2 + $0x294] ss:$8 sps:$4 sm:$0xff]   ;;  %v381_v8 = vshll.u32 %v3279_v2, 16  ;;  %v395_v9 = vshll.u32 %v3283_v3, 16 }
  0x41   : > { %741 = vmatpush1.bf16.msra.mxu0 %v2718_v22  ;;  %v390_v58 = vrot.slane %v388_v55, 1  ;;  %v404_v61 = vrot.slane %v402_v57, 1  ;;  %v2770_v7 = vld [vmem:[#allocation2 + $0x394] ss:$8 sps:$4 sm:$0xff]   ;;  %v2772_v10 = vld [vmem:[#allocation2 + $0x290] ss:$8 sps:$4 sm:$0xff]  }
  0x42   : > { %782 = vmatpush1.bf16.msra.mxu1 %v2719_v23  ;;  %742 = vmatprep.subr.bf16.mxu0 %v2720_v24  ;;  %v2773_v11 = vld [vmem:[#allocation2 + $0x390] ss:$8 sps:$4 sm:$0xff]   ;;  %v2774_v12 = vld [vmem:[#allocation2 + $0x284] ss:$8 sps:$4 sm:$0xff]   ;;  %v379_v14 = vshrl.u32 %v3279_v2, 16  ;;  %v383_v15 = vrot.slane %v381_v8, 1 }
  0x43   : > { %783 = vmatprep.subr.bf16.mxu1 %v2722_v25  ;;  %v391_v0 = vor.u32 %v390_v58, %v386_v54  ;;  %v405_v1 = vor.u32 %v404_v61, %v400_v56  ;;  %v2776_v13 = vld [vmem:[#allocation2 + $0x384] ss:$8 sps:$4 sm:$0xff]   ;;  %v393_v16 = vshrl.u32 %v3283_v3, 16  ;;  %v397_v17 = vrot.slane %v395_v9, 1  ;;  %v2778_v18 = vld [vmem:[#allocation2 + $0x280] ss:$8 sps:$4 sm:$0xff]  }
  0x44   : > { %v2779_v19 = vld [vmem:[#allocation2 + $0x380] ss:$8 sps:$4 sm:$0xff]   ;;  %v2786_v20 = vld [vmem:[#allocation2 + $0x74] ss:$8 sps:$4 sm:$0xff]   ;;  %v384_v22 = vor.u32 %v383_v15, %v379_v14  ;;  %v2784_v24 = vld [vmem:[#allocation2 + $0x70] ss:$8 sps:$4 sm:$0xff]  }
  0x45   : > { %743 = vmatpush1.bf16.msra.mxu0 %v2724_v26  ;;  %762 = vmatprep.mubr.bf16.mxu0 %v391_v0  ;;  %v2789_v21 = vld [vmem:[#allocation2 + $0x174] ss:$8 sps:$4 sm:$0xff]   ;;  %v398_v23 = vor.u32 %v397_v17, %v393_v16  ;;  %v2787_v25 = vld [vmem:[#allocation2 + $0x170] ss:$8 sps:$4 sm:$0xff]   ;;  %v2792_v26 = vld [vmem:[#allocation2 + $0x64] ss:$8 sps:$4 sm:$0xff]  }
  0x46   : > { %784 = vmatpush1.bf16.msra.mxu1 %v2725_v27  ;;  %744 = vmatprep.subr.bf16.mxu0 %v2726_v28  ;;  %v2795_v27 = vld [vmem:[#allocation2 + $0x164] ss:$8 sps:$4 sm:$0xff]   ;;  %v2790_v28 = vld [vmem:[#allocation2 + $0x60] ss:$8 sps:$4 sm:$0xff]   ;;  %v2834_v56 = vld [vmem:[#allocation2 + $0xf4] ss:$8 sps:$4 sm:$0xff]  }
  0x47   : > { %785 = vmatprep.subr.bf16.mxu1 %v2728_v29  ;;  %803 = vmatprep.mubr.bf16.mxu1 %v405_v1  ;;  %v2793_v29 = vld [vmem:[#allocation2 + $0x160] ss:$8 sps:$4 sm:$0xff]   ;;  %v2837_v57 = vld [vmem:[#allocation2 + $0x1f4] ss:$8 sps:$4 sm:$0xff]   ;;  %v2832_v58 = vld [vmem:[#allocation2 + $0xf0] ss:$8 sps:$4 sm:$0xff]  }
  0x48   : > { %v2826_v54 = vld [vmem:[#allocation2] ss:$8 sps:$4 sm:$0xff]   ;;  %v2843_v61 = vld [vmem:[#allocation2 + $0x1e4] ss:$8 sps:$4 sm:$0xff]   ;;  %v2846_v0 = vld [vmem:[#allocation2 + $0xd4] ss:$8 sps:$4 sm:$0xff]  }
  0x49   : > { %745 = vmatpush1.bf16.msra.mxu0 %v2730_v30  ;;  %v2798_v30 = vld [vmem:[#allocation2 + $0x54] ss:$8 sps:$4 sm:$0xff]   ;;  %v2829_v55 = vld [vmem:[#allocation2 + $0x100] ss:$8 sps:$4 sm:$0xff]   ;;  %v2864_v14 = vld [vmem:[#allocation2 + $0xa4] ss:$8 sps:$4 sm:$0xff]  }
  0x4a   : > { %786 = vmatpush1.bf16.msra.mxu1 %v2731_v31  ;;  %746 = vmatprep.subr.bf16.mxu0 %v2732_v32  ;;  %v2801_v31 = vld [vmem:[#allocation2 + $0x154] ss:$8 sps:$4 sm:$0xff]   ;;  %v2796_v32 = vld [vmem:[#allocation2 + $0x50] ss:$8 sps:$4 sm:$0xff]   ;;  %v2850_v8 = vld [vmem:[#allocation2 + $0xc0] ss:$8 sps:$4 sm:$0xff]  }
  0x4b   : > { %787 = vmatprep.subr.bf16.mxu1 %v2734_v33  ;;  %v2799_v33 = vld [vmem:[#allocation2 + $0x150] ss:$8 sps:$4 sm:$0xff]   ;;  %v2849_v1 = vld [vmem:[#allocation2 + $0x1d4] ss:$8 sps:$4 sm:$0xff]   ;;  %v2853_v9 = vld [vmem:[#allocation2 + $0x1c0] ss:$8 sps:$4 sm:$0xff]  }
  0x4c   : > { %v2867_v15 = vld [vmem:[#allocation2 + $0x1a4] ss:$8 sps:$4 sm:$0xff]   ;;  %v2862_v16 = vld [vmem:[#allocation2 + $0xa0] ss:$8 sps:$4 sm:$0xff]  }
  0x4d   : > { %747 = vmatpush2.bf16.msra.mxu0 %v2736_v34  ;;  %v2804_v34 = vld [vmem:[#allocation2 + $0x44] ss:$8 sps:$4 sm:$0xff]   ;;  %v2865_v17 = vld [vmem:[#allocation2 + $0x1a0] ss:$8 sps:$4 sm:$0xff]  }
  0x4e   : > { %788 = vmatpush2.bf16.msra.mxu1 %v2737_v35  ;;  %748 = vmatprep.subr.bf16.mxu0 %v2738_v36  ;;  %v2807_v35 = vld [vmem:[#allocation2 + $0x144] ss:$8 sps:$4 sm:$0xff]   ;;  %v2802_v36 = vld [vmem:[#allocation2 + $0x40] ss:$8 sps:$4 sm:$0xff]  }
  0x4f   : > { %789 = vmatprep.subr.bf16.mxu1 %v2740_v37  ;;  %v2805_v37 = vld [vmem:[#allocation2 + $0x140] ss:$8 sps:$4 sm:$0xff]  }
  0x51   : > { %749 = vmatpush2.bf16.msra.mxu0 %v2742_v38  ;;  %v2810_v38 = vld [vmem:[#allocation2 + $0x34] ss:$8 sps:$4 sm:$0xff]  }
  0x52   : > { %790 = vmatpush2.bf16.msra.mxu1 %v2743_v39  ;;  %750 = vmatprep.subr.bf16.mxu0 %v2744_v40  ;;  %v2813_v39 = vld [vmem:[#allocation2 + $0x134] ss:$8 sps:$4 sm:$0xff]   ;;  %v2808_v40 = vld [vmem:[#allocation2 + $0x30] ss:$8 sps:$4 sm:$0xff]  }
  0x53   : > { %791 = vmatprep.subr.bf16.mxu1 %v2746_v41  ;;  %v2811_v41 = vld [vmem:[#allocation2 + $0x130] ss:$8 sps:$4 sm:$0xff]  }
  0x55   : > { %751 = vmatpush2.bf16.msra.mxu0 %v2748_v42  ;;  %v2816_v42 = vld [vmem:[#allocation2 + $0x24] ss:$8 sps:$4 sm:$0xff]  }
  0x56   : > { %792 = vmatpush2.bf16.msra.mxu1 %v2749_v43  ;;  %752 = vmatprep.subr.bf16.mxu0 %v2750_v44  ;;  %v2819_v43 = vld [vmem:[#allocation2 + $0x124] ss:$8 sps:$4 sm:$0xff]   ;;  %v2814_v44 = vld [vmem:[#allocation2 + $0x20] ss:$8 sps:$4 sm:$0xff]  }
  0x57   : > { %793 = vmatprep.subr.bf16.mxu1 %v2752_v45  ;;  %v2817_v45 = vld [vmem:[#allocation2 + $0x120] ss:$8 sps:$4 sm:$0xff]  }
  0x59   : > { %753 = vmatpush2.bf16.msra.mxu0 %v2754_v46  ;;  %v2822_v46 = vld [vmem:[#allocation2 + $0x14] ss:$8 sps:$4 sm:$0xff]  }
  0x5a   : > { %794 = vmatpush2.bf16.msra.mxu1 %v2755_v50  ;;  %754 = vmatprep.subr.bf16.mxu0 %v2756_v51  ;;  %v2820_v50 = vld [vmem:[#allocation2 + $0x10] ss:$8 sps:$4 sm:$0xff]  }
  0x5b   : > { %795 = vmatprep.subr.bf16.mxu1 %v2758_v53  ;;  %v2823_v51 = vld [vmem:[#allocation2 + $0x110] ss:$8 sps:$4 sm:$0xff]   ;;  %v2831_v53 = vld [vmem:[#allocation2 + $0x104] ss:$8 sps:$4 sm:$0xff]  }
  0x5d   : > { %755 = vmatpush2.bf16.msra.mxu0 %v2760_v59  ;;  %v2835_v59 = vld [vmem:[#allocation2 + $0x1f0] ss:$8 sps:$4 sm:$0xff]  }
  0x5e   : > { %796 = vmatpush2.bf16.msra.mxu1 %v2761_v60  ;;  %756 = vmatprep.subr.bf16.mxu0 %v2762_v62  ;;  %v2840_v60 = vld [vmem:[#allocation2 + $0xe4] ss:$8 sps:$4 sm:$0xff]   ;;  %v2838_v62 = vld [vmem:[#allocation2 + $0xe0] ss:$8 sps:$4 sm:$0xff]  }
  0x5f   : > { %797 = vmatprep.subr.bf16.mxu1 %v2764_v63  ;;  %v2841_v63 = vld [vmem:[#allocation2 + $0x1e0] ss:$8 sps:$4 sm:$0xff]  }
  0x61   : > { %757 = vmatpush2.bf16.msra.mxu0 %v2766_v4  ;;  %v2844_v4 = vld [vmem:[#allocation2 + $0xd0] ss:$8 sps:$4 sm:$0xff]  }
  0x62   : > { %798 = vmatpush2.bf16.msra.mxu1 %v2767_v5  ;;  %758 = vmatprep.subr.bf16.mxu0 %v2768_v6  ;;  %v2847_v5 = vld [vmem:[#allocation2 + $0x1d0] ss:$8 sps:$4 sm:$0xff]   ;;  %v2852_v6 = vld [vmem:[#allocation2 + $0xc4] ss:$8 sps:$4 sm:$0xff]  }
  0x63   : > { %799 = vmatprep.subr.bf16.mxu1 %v2770_v7  ;;  %v2855_v7 = vld [vmem:[#allocation2 + $0x1c4] ss:$8 sps:$4 sm:$0xff]  }
  0x65   : > { %759 = vmatpush2.bf16.msra.mxu0 %v2772_v10  ;;  %v2858_v10 = vld [vmem:[#allocation2 + $0xb4] ss:$8 sps:$4 sm:$0xff]  }
  0x66   : > { %800 = vmatpush2.bf16.msra.mxu1 %v2773_v11  ;;  %760 = vmatprep.subr.bf16.mxu0 %v2774_v12  ;;  %v2861_v11 = vld [vmem:[#allocation2 + $0x1b4] ss:$8 sps:$4 sm:$0xff]   ;;  %v2856_v12 = vld [vmem:[#allocation2 + $0xb0] ss:$8 sps:$4 sm:$0xff]  }
  0x67   : > { %801 = vmatprep.subr.bf16.mxu1 %v2776_v13  ;;  %v2859_v13 = vld [vmem:[#allocation2 + $0x1b0] ss:$8 sps:$4 sm:$0xff]  }
  0x69   : > { %761 = vmatpush2.bf16.msra.mxu0 %v2778_v18  ;;  %v2870_v18 = vld [vmem:[#allocation2 + $0x94] ss:$8 sps:$4 sm:$0xff]  }
  0x6a   : > { %802 = vmatpush2.bf16.msra.mxu1 %v2779_v19  ;;  %1136 = vmatprep.subr.bf16.mxu0 %v2786_v20  ;;  %v2873_v19 = vld [vmem:[#allocation2 + $0x194] ss:$8 sps:$4 sm:$0xff]   ;;  %v2868_v20 = vld [vmem:[#allocation2 + $0x90] ss:$8 sps:$4 sm:$0xff]  }
  0x6b   : > { %1177 = vmatprep.subr.bf16.mxu1 %v2789_v21  ;;  %v2871_v21 = vld [vmem:[#allocation2 + $0x190] ss:$8 sps:$4 sm:$0xff]  }
  0x6c   : > { %763 = vmatmul.mubr.bf16.vlgmr.msra.gmra.mxu0 %v384_v22  ;;  %v2876_v22 = vld [vmem:[#allocation2 + $0x84] ss:$8 sps:$4 sm:$0xff]  }
  0x6d   : > { %804 = vmatmul.mubr.bf16.vlgmr.msra.gmra.mxu1 %v398_v23  ;;  %1137 = vmatpush1.bf16.msra.mxu0 %v2784_v24  ;;  %v2879_v23 = vld [vmem:[#allocation2 + $0x184] ss:$8 sps:$4 sm:$0xff]   ;;  %v2874_v24 = vld [vmem:[#allocation2 + $0x80] ss:$8 sps:$4 sm:$0xff]  }
  0x6e   : > { %1178 = vmatpush1.bf16.msra.mxu1 %v2787_v25  ;;  %1138 = vmatprep.subr.bf16.mxu0 %v2792_v26  ;;  %v2877_v25 = vld [vmem:[#allocation2 + $0x180] ss:$8 sps:$4 sm:$0xff]   ;;  %v2882_v26 = vld [vmem:[#allocation2 + $0x474] ss:$8 sps:$4 sm:$0xff]  }
  0x6f   : > { %1179 = vmatprep.subr.bf16.mxu1 %v2795_v27  ;;  %1168 = vmatprep.mubr.bf16.mxu0 %v3264_v48  ;;  %v2825_v48 = vld [vmem:[#allocation2 + $0x114] ss:$8 sps:$4 sm:$0xff]  }
  0x70   : > { %1209 = vmatprep.mubr.bf16.mxu1 %v3271_v52  ;;  %v2828_v52 = vld [vmem:[#allocation2 + $0x4] ss:$8 sps:$4 sm:$0xff]   ;;  %v2885_v27 = vld [vmem:[#allocation2 + $0x574] ss:$8 sps:$4 sm:$0xff]  }
  0x71   : > { %1139 = vmatpush1.bf16.msra.mxu0 %v2790_v28  ;;  %v2880_v28 = vld [vmem:[#allocation2 + $0x470] ss:$8 sps:$4 sm:$0xff]  }
  0x72   : > { %1180 = vmatpush1.bf16.msra.mxu1 %v2793_v29  ;;  %1140 = vmatprep.subr.bf16.mxu0 %v2798_v30  ;;  %v2883_v29 = vld [vmem:[#allocation2 + $0x570] ss:$8 sps:$4 sm:$0xff]   ;;  %v2888_v30 = vld [vmem:[#allocation2 + $0x464] ss:$8 sps:$4 sm:$0xff]  }
  0x73   : > { %1181 = vmatprep.subr.bf16.mxu1 %v2801_v31  ;;  %v2891_v31 = vld [vmem:[#allocation2 + $0x564] ss:$8 sps:$4 sm:$0xff]  }
  0x75   : > { %1141 = vmatpush1.bf16.msra.mxu0 %v2796_v32  ;;  %v3292_v32 = vld [vmem:[%s3257_s8 + $0x10] sm:$0x33] }
  0x76   : > { %1182 = vmatpush1.bf16.msra.mxu1 %v2799_v33  ;;  %1142 = vmatprep.subr.bf16.mxu0 %v2804_v34  ;;  %v3295_v33 = vld [vmem:[%s3257_s8 + $0x18] sm:$0x33]  ;;  %v2886_v34 = vld [vmem:[#allocation2 + $0x460] ss:$8 sps:$4 sm:$0xff]  }
  0x77   : > { %1183 = vmatprep.subr.bf16.mxu1 %v2807_v35  ;;  %v3301_v35 = vcombine.high %v3260_v47, %v3292_v32 }
  0x79   : > { %1143 = vmatpush1.bf16.msra.mxu0 %v2802_v36  ;;  %v2889_v36 = vld [vmem:[#allocation2 + $0x560] ss:$8 sps:$4 sm:$0xff]  }
  0x7a   : > { %1184 = vmatpush1.bf16.msra.mxu1 %v2805_v37  ;;  %1144 = vmatprep.subr.bf16.mxu0 %v2810_v38  ;;  %v3305_v37 = vcombine.high %v3267_v49, %v3295_v33  ;;  %v2894_v38 = vld [vmem:[#allocation2 + $0x454] ss:$8 sps:$4 sm:$0xff]  }
  0x7b   : > { %1185 = vmatprep.subr.bf16.mxu1 %v2813_v39  ;;  %v2897_v39 = vld [vmem:[#allocation2 + $0x554] ss:$8 sps:$4 sm:$0xff]  }
  0x7d   : > { %1145 = vmatpush1.bf16.msra.mxu0 %v2808_v40  ;;  %v1318_v40 = vshrl.u32 %v3305_v37, 16 }
  0x7e   : > { %1186 = vmatpush1.bf16.msra.mxu1 %v2811_v41  ;;  %1146 = vmatprep.subr.bf16.mxu0 %v2816_v42  ;;  %v1321_v41 = vshll.u32 %v3305_v37, 16  ;;  %v2892_v42 = vld [vmem:[#allocation2 + $0x450] ss:$8 sps:$4 sm:$0xff]  }
  0x7f   : > { %1187 = vmatprep.subr.bf16.mxu1 %v2819_v43 }
  0x81   : > { %1147 = vmatpush1.bf16.msra.mxu0 %v2814_v44 }
  0x82   : > { %1188 = vmatpush1.bf16.msra.mxu1 %v2817_v45  ;;  %1148 = vmatprep.subr.bf16.mxu0 %v2822_v46  ;;  %v2895_v45 = vld [vmem:[#allocation2 + $0x550] ss:$8 sps:$4 sm:$0xff]   ;;  %v2900_v46 = vld [vmem:[#allocation2 + $0x444] ss:$8 sps:$4 sm:$0xff]  }
  0x83   : > { %1189 = vmatprep.subr.bf16.mxu1 %v2825_v48  ;;  %v1320_v48 = vrot.slane %v1318_v40, 1 }
  0x85   : > { %1149 = vmatpush1.bf16.msra.mxu0 %v2820_v50  ;;  %v1323_v50 = vrot.slane %v1321_v41, 2 }
  0x86   : > { %1190 = vmatpush1.bf16.msra.mxu1 %v2823_v51  ;;  %1150 = vmatprep.subr.bf16.mxu0 %v2828_v52  ;;  %v2903_v51 = vld [vmem:[#allocation2 + $0x544] ss:$8 sps:$4 sm:$0xff]  }
  0x87   : > { %1191 = vmatprep.subr.bf16.mxu1 %v2831_v53  ;;  %v1324_v53 = vor.u32 %v1323_v50, %v1320_v48  ;;  %v2970_v50 = vld [vmem:[#allocation2 + $0x480] ss:$8 sps:$4 sm:$0xff]  }
  0x89   : > { %1151 = vmatpush1.bf16.msra.mxu0 %v2826_v54  ;;  %v2898_v54 = vld [vmem:[#allocation2 + $0x440] ss:$8 sps:$4 sm:$0xff]  }
  0x8a   : > { %1192 = vmatpush1.bf16.msra.mxu1 %v2829_v55  ;;  %1152 = vmatprep.subr.bf16.mxu0 %v2834_v56  ;;  %v2901_v55 = vld [vmem:[#allocation2 + $0x540] ss:$8 sps:$4 sm:$0xff]   ;;  %v2906_v56 = vld [vmem:[#allocation2 + $0x434] ss:$8 sps:$4 sm:$0xff]  }
  0x8b   : > { %1193 = vmatprep.subr.bf16.mxu1 %v2837_v57  ;;  %v2909_v57 = vld [vmem:[#allocation2 + $0x534] ss:$8 sps:$4 sm:$0xff]  }
  0x8d   : > { %1153 = vmatpush2.bf16.msra.mxu0 %v2832_v58  ;;  %v2904_v58 = vld [vmem:[#allocation2 + $0x430] ss:$8 sps:$4 sm:$0xff]  }
  0x8e   : > { %1194 = vmatpush2.bf16.msra.mxu1 %v2835_v59  ;;  %1154 = vmatprep.subr.bf16.mxu0 %v2840_v60  ;;  %v2907_v59 = vld [vmem:[#allocation2 + $0x530] ss:$8 sps:$4 sm:$0xff]   ;;  %v2912_v60 = vld [vmem:[#allocation2 + $0x424] ss:$8 sps:$4 sm:$0xff]  }
  0x8f   : > { %1195 = vmatprep.subr.bf16.mxu1 %v2843_v61  ;;  %v2915_v61 = vld [vmem:[#allocation2 + $0x524] ss:$8 sps:$4 sm:$0xff]  }
  0x91   : > { %1155 = vmatpush2.bf16.msra.mxu0 %v2838_v62  ;;  %v2910_v62 = vld [vmem:[#allocation2 + $0x420] ss:$8 sps:$4 sm:$0xff]  }
  0x92   : > { %1196 = vmatpush2.bf16.msra.mxu1 %v2841_v63  ;;  %1156 = vmatprep.subr.bf16.mxu0 %v2846_v0  ;;  %v2913_v63 = vld [vmem:[#allocation2 + $0x520] ss:$8 sps:$4 sm:$0xff]   ;;  %v2918_v0 = vld [vmem:[#allocation2 + $0x414] ss:$8 sps:$4 sm:$0xff]  }
  0x93   : > { %1197 = vmatprep.subr.bf16.mxu1 %v2849_v1  ;;  %v2921_v1 = vld [vmem:[#allocation2 + $0x514] ss:$8 sps:$4 sm:$0xff]  }
  0x95   : > { %1157 = vmatpush2.bf16.msra.mxu0 %v2844_v4  ;;  %v2916_v4 = vld [vmem:[#allocation2 + $0x410] ss:$8 sps:$4 sm:$0xff]  }
  0x96   : > { %1198 = vmatpush2.bf16.msra.mxu1 %v2847_v5  ;;  %1158 = vmatprep.subr.bf16.mxu0 %v2852_v6  ;;  %v2919_v5 = vld [vmem:[#allocation2 + $0x510] ss:$8 sps:$4 sm:$0xff]   ;;  %v2924_v6 = vld [vmem:[#allocation2 + $0x404] ss:$8 sps:$4 sm:$0xff]  }
  0x97   : > { %1199 = vmatprep.subr.bf16.mxu1 %v2855_v7  ;;  %v2927_v7 = vld [vmem:[#allocation2 + $0x504] ss:$8 sps:$4 sm:$0xff]  }
  0x99   : > { %1159 = vmatpush2.bf16.msra.mxu0 %v2850_v8  ;;  %v2922_v8 = vld [vmem:[#allocation2 + $0x400] ss:$8 sps:$4 sm:$0xff]  }
  0x9a   : > { %1200 = vmatpush2.bf16.msra.mxu1 %v2853_v9  ;;  %1160 = vmatprep.subr.bf16.mxu0 %v2858_v10  ;;  %v2925_v9 = vld [vmem:[#allocation2 + $0x500] ss:$8 sps:$4 sm:$0xff]   ;;  %v2930_v10 = vld [vmem:[#allocation2 + $0x4f4] ss:$8 sps:$4 sm:$0xff]  }
  0x9b   : > { %1201 = vmatprep.subr.bf16.mxu1 %v2861_v11  ;;  %v2933_v11 = vld [vmem:[#allocation2 + $0x5f4] ss:$8 sps:$4 sm:$0xff]  }
  0x9d   : > { %1161 = vmatpush2.bf16.msra.mxu0 %v2856_v12  ;;  %v2928_v12 = vld [vmem:[#allocation2 + $0x4f0] ss:$8 sps:$4 sm:$0xff]  }
  0x9e   : > { %1202 = vmatpush2.bf16.msra.mxu1 %v2859_v13  ;;  %1162 = vmatprep.subr.bf16.mxu0 %v2864_v14  ;;  %v2931_v13 = vld [vmem:[#allocation2 + $0x5f0] ss:$8 sps:$4 sm:$0xff]   ;;  %v2936_v14 = vld [vmem:[#allocation2 + $0x4e4] ss:$8 sps:$4 sm:$0xff]  }
  0x9f   : > { %1203 = vmatprep.subr.bf16.mxu1 %v2867_v15  ;;  %v2939_v15 = vld [vmem:[#allocation2 + $0x5e4] ss:$8 sps:$4 sm:$0xff]  }
  0xa1   : > { %1163 = vmatpush2.bf16.msra.mxu0 %v2862_v16  ;;  %v2934_v16 = vld [vmem:[#allocation2 + $0x4e0] ss:$8 sps:$4 sm:$0xff]  }
  0xa2   : > { %1204 = vmatpush2.bf16.msra.mxu1 %v2865_v17  ;;  %1164 = vmatprep.subr.bf16.mxu0 %v2870_v18  ;;  %v2937_v17 = vld [vmem:[#allocation2 + $0x5e0] ss:$8 sps:$4 sm:$0xff]   ;;  %v2942_v18 = vld [vmem:[#allocation2 + $0x4d4] ss:$8 sps:$4 sm:$0xff]  }
  0xa3   : > { %1205 = vmatprep.subr.bf16.mxu1 %v2873_v19  ;;  %v2945_v19 = vld [vmem:[#allocation2 + $0x5d4] ss:$8 sps:$4 sm:$0xff]  }
  0xa5   : > { %1165 = vmatpush2.bf16.msra.mxu0 %v2868_v20  ;;  %v2940_v20 = vld [vmem:[#allocation2 + $0x4d0] ss:$8 sps:$4 sm:$0xff]  }
  0xa6   : > { %1206 = vmatpush2.bf16.msra.mxu1 %v2871_v21  ;;  %1166 = vmatprep.subr.bf16.mxu0 %v2876_v22  ;;  %v2943_v21 = vld [vmem:[#allocation2 + $0x5d0] ss:$8 sps:$4 sm:$0xff]   ;;  %v2948_v22 = vld [vmem:[#allocation2 + $0x4c4] ss:$8 sps:$4 sm:$0xff]  }
  0xa7   : > { %1207 = vmatprep.subr.bf16.mxu1 %v2879_v23  ;;  %v2951_v23 = vld [vmem:[#allocation2 + $0x5c4] ss:$8 sps:$4 sm:$0xff]  }
  0xa9   : > { %1167 = vmatpush2.bf16.msra.mxu0 %v2874_v24  ;;  %v2946_v24 = vld [vmem:[#allocation2 + $0x4c0] ss:$8 sps:$4 sm:$0xff]  }
  0xaa   : > { %1208 = vmatpush2.bf16.msra.mxu1 %v2877_v25  ;;  %1649 = vmatprep.subr.bf16.mxu0 %v2882_v26  ;;  %v2949_v25 = vld [vmem:[#allocation2 + $0x5c0] ss:$8 sps:$4 sm:$0xff]   ;;  %v2954_v26 = vld [vmem:[#allocation2 + $0x4b4] ss:$8 sps:$4 sm:$0xff]  }
  0xab   : > { %1690 = vmatprep.subr.bf16.mxu1 %v2885_v27  ;;  %v2957_v27 = vld [vmem:[#allocation2 + $0x5b4] ss:$8 sps:$4 sm:$0xff]  }
  0xac   : > { %1169 = vmatmul.mubr.bf16.vlgmr.msra.gmra.mxu0 %v3279_v2  ;;  %v1302_v2 = vshrl.u32 %v3301_v35, 16 }
  0xad   : > { %1210 = vmatmul.mubr.bf16.vlgmr.msra.gmra.mxu1 %v3283_v3  ;;  %1650 = vmatpush1.bf16.msra.mxu0 %v2880_v28  ;;  %v1305_v3 = vshll.u32 %v3301_v35, 16  ;;  %v2952_v28 = vld [vmem:[#allocation2 + $0x4b0] ss:$8 sps:$4 sm:$0xff]  }
  0xae   : > { %1691 = vmatpush1.bf16.msra.mxu1 %v2883_v29  ;;  %1651 = vmatprep.subr.bf16.mxu0 %v2888_v30  ;;  %v1304_v43 = vrot.slane %v1302_v2, 1  ;;  %v2955_v29 = vld [vmem:[#allocation2 + $0x5b0] ss:$8 sps:$4 sm:$0xff]   ;;  %v2960_v30 = vld [vmem:[#allocation2 + $0x4a4] ss:$8 sps:$4 sm:$0xff]  }
  0xaf   : > { %1692 = vmatprep.subr.bf16.mxu1 %v2891_v31  ;;  %v1307_v44 = vrot.slane %v1305_v3, 2  ;;  %1722 = vmatprep.mubr.bf16.mxu1 %v1324_v53  ;;  %v2963_v31 = vld [vmem:[#allocation2 + $0x5a4] ss:$8 sps:$4 sm:$0xff]   ;;  %v2966_v2 = vld [vmem:[#allocation2 + $0x494] ss:$8 sps:$4 sm:$0xff]  }
  0xb0   : > { %v2969_v3 = vld [vmem:[#allocation2 + $0x594] ss:$8 sps:$4 sm:$0xff]  }
  0xb1   : > { %1652 = vmatpush1.bf16.msra.mxu0 %v2886_v34  ;;  %v1308_v52 = vor.u32 %v1307_v44, %v1304_v43  ;;  %v3313_v34 = vcombine.low %v3260_v47, %v3292_v32  ;;  %v2967_v32 = vld [vmem:[#allocation2 + $0x590] ss:$8 sps:$4 sm:$0xff]   ;;  %v2975_v43 = vld [vmem:[#allocation2 + $0x584] ss:$8 sps:$4 sm:$0xff]   ;;  %v2985_v53 = vld [vmem:[#allocation2 + $0x774] ss:$8 sps:$4 sm:$0xff]  }
  0xb2   : > { %1693 = vmatpush1.bf16.msra.mxu1 %v2889_v36  ;;  %1653 = vmatprep.subr.bf16.mxu0 %v2894_v38  ;;  %v3317_v36 = vcombine.low %v3267_v49, %v3295_v33  ;;  %v2958_v38 = vld [vmem:[#allocation2 + $0x4a0] ss:$8 sps:$4 sm:$0xff]   ;;  %v2964_v49 = vld [vmem:[#allocation2 + $0x490] ss:$8 sps:$4 sm:$0xff]   ;;  %v2972_v33 = vld [vmem:[#allocation2 + $0x484] ss:$8 sps:$4 sm:$0xff]  }
  0xb3   : > { %1694 = vmatprep.subr.bf16.mxu1 %v2897_v39  ;;  %1681 = vmatprep.mubr.bf16.mxu0 %v1308_v52  ;;  %v2961_v39 = vld [vmem:[#allocation2 + $0x5a0] ss:$8 sps:$4 sm:$0xff]   ;;  %v1294_v40 = vshrl.u32 %v3313_v34, 16  ;;  %v1297_v41 = vshll.u32 %v3313_v34, 16  ;;  %v2982_v52 = vld [vmem:[#allocation2 + $0x674] ss:$8 sps:$4 sm:$0xff]  }
  0xb4   : > { %v1313_v47 = vshll.u32 %v3317_v36, 16 }
  0xb5   : > { %1654 = vmatpush1.bf16.msra.mxu0 %v2892_v42  ;;  %v1310_v42 = vshrl.u32 %v3317_v36, 16  ;;  %v1296_v44 = vrot.slane %v1294_v40, 1  ;;  %v3048_v40 = vld [vmem:[#allocation2 + $0x6c4] ss:$8 sps:$4 sm:$0xff]  }
  0xb6   : > { %1695 = vmatpush1.bf16.msra.mxu1 %v2895_v45  ;;  %1655 = vmatprep.subr.bf16.mxu0 %v2900_v46  ;;  %v1299_v45 = vrot.slane %v1297_v41, 2  ;;  %v1315_v48 = vrot.slane %v1313_v47, 2  ;;  %v3051_v41 = vld [vmem:[#allocation2 + $0x7c4] ss:$8 sps:$4 sm:$0xff]   ;;  %v3049_v47 = vld [vmem:[#allocation2 + $0x7c0] ss:$8 sps:$4 sm:$0xff]  }
  0xb7   : > { %1696 = vmatprep.subr.bf16.mxu1 %v2903_v51  ;;  %v1312_v46 = vrot.slane %v1310_v42, 1  ;;  %v2973_v51 = vld [vmem:[#allocation2 + $0x580] ss:$8 sps:$4 sm:$0xff]  }
  0xb8   : > { %v3046_v42 = vld [vmem:[#allocation2 + $0x6c0] ss:$8 sps:$4 sm:$0xff]  }
  0xb9   : > { %1656 = vmatpush1.bf16.msra.mxu0 %v2898_v54  ;;  %v1300_v54 = vor.u32 %v1299_v45, %v1296_v44  ;;  %v3060_v44 = vld [vmem:[#allocation2 + $0x6a4] ss:$8 sps:$4 sm:$0xff]  }
  0xba   : > { %1697 = vmatpush1.bf16.msra.mxu1 %v2901_v55  ;;  %1657 = vmatprep.subr.bf16.mxu0 %v2906_v56  ;;  %v1316_v55 = vor.u32 %v1315_v48, %v1312_v46  ;;  %v2980_v56 = vld [vmem:[#allocation2 + $0x670] ss:$8 sps:$4 sm:$0xff]   ;;  %v3063_v45 = vld [vmem:[#allocation2 + $0x7a4] ss:$8 sps:$4 sm:$0xff]   ;;  %v3058_v46 = vld [vmem:[#allocation2 + $0x6a0] ss:$8 sps:$4 sm:$0xff]  }
  0xbb   : > { %1698 = vmatprep.subr.bf16.mxu1 %v2909_v57  ;;  %v2983_v57 = vld [vmem:[#allocation2 + $0x770] ss:$8 sps:$4 sm:$0xff]   ;;  %v3061_v48 = vld [vmem:[#allocation2 + $0x7a0] ss:$8 sps:$4 sm:$0xff]  }
  0xbd   : > { %1658 = vmatpush1.bf16.msra.mxu0 %v2904_v58  ;;  %v2988_v58 = vld [vmem:[#allocation2 + $0x664] ss:$8 sps:$4 sm:$0xff]  }
  0xbe   : > { %1699 = vmatpush1.bf16.msra.mxu1 %v2907_v59  ;;  %1659 = vmatprep.subr.bf16.mxu0 %v2912_v60  ;;  %v2991_v59 = vld [vmem:[#allocation2 + $0x764] ss:$8 sps:$4 sm:$0xff]   ;;  %v1799_v60 = vrot.slane %v3301_v35, 2 }
  0xbf   : > { %1700 = vmatprep.subr.bf16.mxu1 %v2915_v61  ;;  %v1801_v61 = vrot.slane %v3305_v37, 2  ;;  %v3000_v35 = vld [vmem:[#allocation2 + $0x644] ss:$8 sps:$4 sm:$0xff]  }
  0xc0   : > { %v3003_v37 = vld [vmem:[#allocation2 + $0x744] ss:$8 sps:$4 sm:$0xff]  }
  0xc1   : > { %1660 = vmatpush1.bf16.msra.mxu0 %v2910_v62  ;;  %v2986_v62 = vld [vmem:[#allocation2 + $0x660] ss:$8 sps:$4 sm:$0xff]  }
  0xc2   : > { %1701 = vmatpush1.bf16.msra.mxu1 %v2913_v63  ;;  %1661 = vmatprep.subr.bf16.mxu0 %v2918_v0  ;;  %v2989_v63 = vld [vmem:[#allocation2 + $0x760] ss:$8 sps:$4 sm:$0xff]   ;;  %v2994_v0 = vld [vmem:[#allocation2 + $0x654] ss:$8 sps:$4 sm:$0xff]  }
  0xc3   : > { %1702 = vmatprep.subr.bf16.mxu1 %v2921_v1  ;;  %v2997_v1 = vld [vmem:[#allocation2 + $0x754] ss:$8 sps:$4 sm:$0xff]  }
  0xc5   : > { %1662 = vmatpush1.bf16.msra.mxu0 %v2916_v4  ;;  %v2992_v4 = vld [vmem:[#allocation2 + $0x650] ss:$8 sps:$4 sm:$0xff]  }
  0xc6   : > { %1703 = vmatpush1.bf16.msra.mxu1 %v2919_v5  ;;  %1663 = vmatprep.subr.bf16.mxu0 %v2924_v6  ;;  %v2995_v5 = vld [vmem:[#allocation2 + $0x750] ss:$8 sps:$4 sm:$0xff]   ;;  %v2998_v6 = vld [vmem:[#allocation2 + $0x640] ss:$8 sps:$4 sm:$0xff]  }
  0xc7   : > { %1704 = vmatprep.subr.bf16.mxu1 %v2927_v7  ;;  %v3001_v7 = vld [vmem:[#allocation2 + $0x740] ss:$8 sps:$4 sm:$0xff]  }
  0xc9   : > { %1664 = vmatpush1.bf16.msra.mxu0 %v2922_v8  ;;  %v3006_v8 = vld [vmem:[#allocation2 + $0x634] ss:$8 sps:$4 sm:$0xff]  }
  0xca   : > { %1705 = vmatpush1.bf16.msra.mxu1 %v2925_v9  ;;  %1665 = vmatprep.subr.bf16.mxu0 %v2930_v10  ;;  %v3009_v9 = vld [vmem:[#allocation2 + $0x734] ss:$8 sps:$4 sm:$0xff]   ;;  %v3004_v10 = vld [vmem:[#allocation2 + $0x630] ss:$8 sps:$4 sm:$0xff]  }
  0xcb   : > { %1706 = vmatprep.subr.bf16.mxu1 %v2933_v11  ;;  %v3007_v11 = vld [vmem:[#allocation2 + $0x730] ss:$8 sps:$4 sm:$0xff]  }
  0xcd   : > { %1666 = vmatpush2.bf16.msra.mxu0 %v2928_v12  ;;  %v3012_v12 = vld [vmem:[#allocation2 + $0x624] ss:$8 sps:$4 sm:$0xff]  }
  0xce   : > { %1707 = vmatpush2.bf16.msra.mxu1 %v2931_v13  ;;  %1667 = vmatprep.subr.bf16.mxu0 %v2936_v14  ;;  %v3015_v13 = vld [vmem:[#allocation2 + $0x724] ss:$8 sps:$4 sm:$0xff]   ;;  %v3010_v14 = vld [vmem:[#allocation2 + $0x620] ss:$8 sps:$4 sm:$0xff]  }
  0xcf   : > { %1708 = vmatprep.subr.bf16.mxu1 %v2939_v15  ;;  %v3013_v15 = vld [vmem:[#allocation2 + $0x720] ss:$8 sps:$4 sm:$0xff]  }
  0xd1   : > { %1668 = vmatpush2.bf16.msra.mxu0 %v2934_v16  ;;  %v3018_v16 = vld [vmem:[#allocation2 + $0x614] ss:$8 sps:$4 sm:$0xff]  }
  0xd2   : > { %1709 = vmatpush2.bf16.msra.mxu1 %v2937_v17  ;;  %1669 = vmatprep.subr.bf16.mxu0 %v2942_v18  ;;  %v3021_v17 = vld [vmem:[#allocation2 + $0x714] ss:$8 sps:$4 sm:$0xff]   ;;  %v3016_v18 = vld [vmem:[#allocation2 + $0x610] ss:$8 sps:$4 sm:$0xff]  }
  0xd3   : > { %1710 = vmatprep.subr.bf16.mxu1 %v2945_v19  ;;  %v3019_v19 = vld [vmem:[#allocation2 + $0x710] ss:$8 sps:$4 sm:$0xff]  }
  0xd5   : > { %1670 = vmatpush2.bf16.msra.mxu0 %v2940_v20  ;;  %v3024_v20 = vld [vmem:[#allocation2 + $0x604] ss:$8 sps:$4 sm:$0xff]  }
  0xd6   : > { %1711 = vmatpush2.bf16.msra.mxu1 %v2943_v21  ;;  %1671 = vmatprep.subr.bf16.mxu0 %v2948_v22  ;;  %v3027_v21 = vld [vmem:[#allocation2 + $0x704] ss:$8 sps:$4 sm:$0xff]   ;;  %v3022_v22 = vld [vmem:[#allocation2 + $0x600] ss:$8 sps:$4 sm:$0xff]  }
  0xd7   : > { %1712 = vmatprep.subr.bf16.mxu1 %v2951_v23  ;;  %v3025_v23 = vld [vmem:[#allocation2 + $0x700] ss:$8 sps:$4 sm:$0xff]  }
  0xd9   : > { %1672 = vmatpush2.bf16.msra.mxu0 %v2946_v24  ;;  %v3030_v24 = vld [vmem:[#allocation2 + $0x6f4] ss:$8 sps:$4 sm:$0xff]  }
  0xda   : > { %1713 = vmatpush2.bf16.msra.mxu1 %v2949_v25  ;;  %1673 = vmatprep.subr.bf16.mxu0 %v2954_v26  ;;  %v3033_v25 = vld [vmem:[#allocation2 + $0x7f4] ss:$8 sps:$4 sm:$0xff]   ;;  %v3028_v26 = vld [vmem:[#allocation2 + $0x6f0] ss:$8 sps:$4 sm:$0xff]  }
  0xdb   : > { %1714 = vmatprep.subr.bf16.mxu1 %v2957_v27  ;;  %v3031_v27 = vld [vmem:[#allocation2 + $0x7f0] ss:$8 sps:$4 sm:$0xff]  }
  0xdd   : > { %1674 = vmatpush2.bf16.msra.mxu0 %v2952_v28  ;;  %v3036_v28 = vld [vmem:[#allocation2 + $0x6e4] ss:$8 sps:$4 sm:$0xff]  }
  0xde   : > { %1715 = vmatpush2.bf16.msra.mxu1 %v2955_v29  ;;  %1675 = vmatprep.subr.bf16.mxu0 %v2960_v30  ;;  %v3039_v29 = vld [vmem:[#allocation2 + $0x7e4] ss:$8 sps:$4 sm:$0xff]   ;;  %v3034_v30 = vld [vmem:[#allocation2 + $0x6e0] ss:$8 sps:$4 sm:$0xff]  }
  0xdf   : > { %1716 = vmatprep.subr.bf16.mxu1 %v2963_v31  ;;  %v3037_v31 = vld [vmem:[#allocation2 + $0x7e0] ss:$8 sps:$4 sm:$0xff]  }
  0xe1   : > { %1676 = vmatpush2.bf16.msra.mxu0 %v2958_v38  ;;  %v3042_v38 = vld [vmem:[#allocation2 + $0x6d4] ss:$8 sps:$4 sm:$0xff]  }
  0xe2   : > { %1717 = vmatpush2.bf16.msra.mxu1 %v2961_v39  ;;  %1677 = vmatprep.subr.bf16.mxu0 %v2966_v2  ;;  %v3045_v39 = vld [vmem:[#allocation2 + $0x7d4] ss:$8 sps:$4 sm:$0xff]   ;;  %v3040_v2 = vld [vmem:[#allocation2 + $0x6d0] ss:$8 sps:$4 sm:$0xff]  }
  0xe3   : > { %1718 = vmatprep.subr.bf16.mxu1 %v2969_v3  ;;  %v3043_v3 = vld [vmem:[#allocation2 + $0x7d0] ss:$8 sps:$4 sm:$0xff]  }
  0xe5   : > { %1678 = vmatpush2.bf16.msra.mxu0 %v2964_v49  ;;  %v3054_v49 = vld [vmem:[#allocation2 + $0x6b4] ss:$8 sps:$4 sm:$0xff]  }
  0xe6   : > { %1719 = vmatpush2.bf16.msra.mxu1 %v2967_v32  ;;  %1679 = vmatprep.subr.bf16.mxu0 %v2972_v33  ;;  %v3057_v32 = vld [vmem:[#allocation2 + $0x7b4] ss:$8 sps:$4 sm:$0xff]   ;;  %v3052_v33 = vld [vmem:[#allocation2 + $0x6b0] ss:$8 sps:$4 sm:$0xff]  }
  0xe7   : > { %1720 = vmatprep.subr.bf16.mxu1 %v2975_v43  ;;  %v3055_v43 = vld [vmem:[#allocation2 + $0x7b0] ss:$8 sps:$4 sm:$0xff]  }
  0xe9   : > { %1680 = vmatpush2.bf16.msra.mxu0 %v2970_v50  ;;  %v3066_v50 = vld [vmem:[#allocation2 + $0x694] ss:$8 sps:$4 sm:$0xff]  }
  0xea   : > { %1721 = vmatpush2.bf16.msra.mxu1 %v2973_v51  ;;  %2126 = vmatprep.subr.bf16.mxu0 %v2982_v52  ;;  %v3069_v51 = vld [vmem:[#allocation2 + $0x794] ss:$8 sps:$4 sm:$0xff]   ;;  %v3064_v52 = vld [vmem:[#allocation2 + $0x690] ss:$8 sps:$4 sm:$0xff]  }
  0xeb   : > { %2167 = vmatprep.subr.bf16.mxu1 %v2985_v53  ;;  %v3067_v53 = vld [vmem:[#allocation2 + $0x790] ss:$8 sps:$4 sm:$0xff]  }
  0xec   : > { %1682 = vmatmul.mubr.bf16.vlgmr.msra.gmra.mxu0 %v1300_v54  ;;  %v3072_v54 = vld [vmem:[#allocation2 + $0x684] ss:$8 sps:$4 sm:$0xff]  }
  0xed   : > { %1723 = vmatmul.mubr.bf16.vlgmr.msra.gmra.mxu1 %v1316_v55  ;;  %2127 = vmatpush1.bf16.msra.mxu0 %v2980_v56  ;;  %v3075_v55 = vld [vmem:[#allocation2 + $0x784] ss:$8 sps:$4 sm:$0xff]   ;;  %v3070_v56 = vld [vmem:[#allocation2 + $0x680] ss:$8 sps:$4 sm:$0xff]  }
  0xee   : > { %2168 = vmatpush1.bf16.msra.mxu1 %v2983_v57  ;;  %2128 = vmatprep.subr.bf16.mxu0 %v2988_v58  ;;  %v3073_v57 = vld [vmem:[#allocation2 + $0x780] ss:$8 sps:$4 sm:$0xff]   ;;  %v1798_v58 = vrot.slane %v3313_v34, 2 }
  0xef   : > { %2169 = vmatprep.subr.bf16.mxu1 %v2991_v59  ;;  %2158 = vmatprep.mubr.bf16.mxu0 %v1799_v60  ;;  %v1800_v59 = vrot.slane %v3317_v36, 2 }
  0xf0   : > { %2199 = vmatprep.mubr.bf16.mxu1 %v1801_v61 }
  0xf1   : > { %2129 = vmatpush1.bf16.msra.mxu0 %v2986_v62 }
  0xf2   : > { %2170 = vmatpush1.bf16.msra.mxu1 %v2989_v63  ;;  %2130 = vmatprep.subr.bf16.mxu0 %v2994_v0 }
  0xf3   : > { %2171 = vmatprep.subr.bf16.mxu1 %v2997_v1 }
  0xf5   : > { %2131 = vmatpush1.bf16.msra.mxu0 %v2992_v4 }
  0xf6   : > { %2172 = vmatpush1.bf16.msra.mxu1 %v2995_v5  ;;  %2132 = vmatprep.subr.bf16.mxu0 %v3000_v35 }
  0xf7   : > { %2173 = vmatprep.subr.bf16.mxu1 %v3003_v37 }
  0xf9   : > { %2133 = vmatpush1.bf16.msra.mxu0 %v2998_v6 }
  0xfa   : > { %2174 = vmatpush1.bf16.msra.mxu1 %v3001_v7  ;;  %2134 = vmatprep.subr.bf16.mxu0 %v3006_v8 }
  0xfb   : > { %2175 = vmatprep.subr.bf16.mxu1 %v3009_v9 }
  0xfd   : > { %2135 = vmatpush1.bf16.msra.mxu0 %v3004_v10 }
  0xfe   : > { %2176 = vmatpush1.bf16.msra.mxu1 %v3007_v11  ;;  %2136 = vmatprep.subr.bf16.mxu0 %v3012_v12 }
  0xff   : > { %2177 = vmatprep.subr.bf16.mxu1 %v3015_v13 }
 0x101   : > { %2137 = vmatpush1.bf16.msra.mxu0 %v3010_v14 }
 0x102   : > { %2178 = vmatpush1.bf16.msra.mxu1 %v3013_v15  ;;  %2138 = vmatprep.subr.bf16.mxu0 %v3018_v16 }
 0x103   : > { %2179 = vmatprep.subr.bf16.mxu1 %v3021_v17 }
 0x105   : > { %2139 = vmatpush1.bf16.msra.mxu0 %v3016_v18 }
 0x106   : > { %2180 = vmatpush1.bf16.msra.mxu1 %v3019_v19  ;;  %2140 = vmatprep.subr.bf16.mxu0 %v3024_v20 }
 0x107   : > { %2181 = vmatprep.subr.bf16.mxu1 %v3027_v21 }
 0x109   : > { %2141 = vmatpush1.bf16.msra.mxu0 %v3022_v22 }
 0x10a   : > { %2182 = vmatpush1.bf16.msra.mxu1 %v3025_v23  ;;  %2142 = vmatprep.subr.bf16.mxu0 %v3030_v24 }
 0x10b   : > { %2183 = vmatprep.subr.bf16.mxu1 %v3033_v25 }
 0x10d   : > { %2143 = vmatpush2.bf16.msra.mxu0 %v3028_v26  ;;  %v2212_v26 = vlaneseq }
 0x10e   : > { %2184 = vmatpush2.bf16.msra.mxu1 %v3031_v27  ;;  %2144 = vmatprep.subr.bf16.mxu0 %v3036_v28 }
 0x10f   : > { %2185 = vmatprep.subr.bf16.mxu1 %v3039_v29  ;;  %v2213_v27 = vshrl.u32 %v2212_v26, 7  ;;  %v2210_v29 = vld [vmem:[#allocation4] sm:$0x3] }
 0x111   : > { %2145 = vmatpush2.bf16.msra.mxu0 %v3034_v30  ;;  %v2214_v28 = vsub.s32 0, %v2213_v27 }
 0x112   : > { %2186 = vmatpush2.bf16.msra.mxu1 %v3037_v31  ;;  %2146 = vmatprep.subr.bf16.mxu0 %v3042_v38  ;;  %v2218_v31 = vsub.s32 1, %v2213_v27 }
 0x113   : > { %2187 = vmatprep.subr.bf16.mxu1 %v3045_v39 }
 0x115   : > { %2147 = vmatpush2.bf16.msra.mxu0 %v3040_v2 }
 0x116   : > { %2188 = vmatpush2.bf16.msra.mxu1 %v3043_v3  ;;  %2148 = vmatprep.subr.bf16.mxu0 %v3048_v40  ;;  %v2215_v3 = vrot.slane %v2210_v29, %v2214_v28 }
 0x117   : > { %2189 = vmatprep.subr.bf16.mxu1 %v3051_v41 }
 0x119   : > { %2149 = vmatpush2.bf16.msra.mxu0 %v3046_v42 }
 0x11a   : > { %2190 = vmatpush2.bf16.msra.mxu1 %v3049_v47  ;;  %2150 = vmatprep.subr.bf16.mxu0 %v3054_v49 }
 0x11b   : > { %2191 = vmatprep.subr.bf16.mxu1 %v3057_v32  ;;  %v2219_v32 = vrot.slane %v2210_v29, %v2218_v31 }
 0x11d   : > { %2151 = vmatpush2.bf16.msra.mxu0 %v3052_v33 }
 0x11e   : > { %2192 = vmatpush2.bf16.msra.mxu1 %v3055_v43  ;;  %2152 = vmatprep.subr.bf16.mxu0 %v3060_v44 }
 0x11f   : > { %2193 = vmatprep.subr.bf16.mxu1 %v3063_v45 }
 0x121   : > { %2153 = vmatpush2.bf16.msra.mxu0 %v3058_v46 }
 0x122   : > { %2194 = vmatpush2.bf16.msra.mxu1 %v3061_v48  ;;  %2154 = vmatprep.subr.bf16.mxu0 %v3066_v50 }
 0x123   : > { %2195 = vmatprep.subr.bf16.mxu1 %v3069_v51 }
 0x125   : > { %2155 = vmatpush2.bf16.msra.mxu0 %v3064_v52 }
 0x126   : > { %2196 = vmatpush2.bf16.msra.mxu1 %v3067_v53  ;;  %2156 = vmatprep.subr.bf16.mxu0 %v3072_v54 }
 0x127   : > { %2197 = vmatprep.subr.bf16.mxu1 %v3075_v55 }
 0x129   : > { %2157 = vmatpush2.bf16.msra.mxu0 %v3070_v56 }
 0x12a   : > { %2198 = vmatpush2.bf16.msra.mxu1 %v3073_v57 }
 0x12c   : > { %v764_v60 = vpop.f32.mrf.mxu0  ;;  %2159 = vmatmul.mubr.bf16.vlgmr.msra.gmra.mxu0 %v1798_v58 }
 0x12d   : > { %v805_v61 = vpop.f32.mrf.mxu1  ;;  %2200 = vmatmul.mubr.bf16.vlgmr.msra.gmra.mxu1 %v1800_v59 }
 0x12e   : > { %v806_v62 = vadd.f32 %v805_v61, %v764_v60  ;;  %v766_v63 = vpop.f32.mrf.mxu0 }
 0x12f   : > { %v807_v0 = vpop.f32.mrf.mxu1 }
 0x130   : > { %v808_v1 = vadd.f32 %v807_v0, %v766_v63  ;;  %v768_v4 = vpop.f32.mrf.mxu0 }
 0x131   : > { %v809_v5 = vpop.f32.mrf.mxu1 }
 0x132   : > { %v769_v35 = vpop.f32.mrf.mxu0 }
 0x133   : > { %v810_v37 = vpop.f32.mrf.mxu1 }
 0x16c   : > { %v1170_v6 = vpop.f32.mrf.mxu0 }
 0x16d   : > { %v1211_v7 = vpop.f32.mrf.mxu1  ;;  %v1171_v8 = vadd.f32 %v1170_v6, %v806_v62 }
 0x16e   : > { %v1172_v34 = vpop.f32.mrf.mxu0 }
 0x16f   : > { %v1213_v9 = vpop.f32.mrf.mxu1  ;;  %v1212_v36 = vadd.f32 %v1211_v7, %v1171_v8  ;;  %v1173_v10 = vadd.f32 %v1172_v34, %v808_v1 }
 0x170   : > { %v1174_v11 = vpop.f32.mrf.mxu0 }
 0x171   : > { %v1215_v12 = vpop.f32.mrf.mxu1  ;;  %v1214_v13 = vadd.f32 %v1213_v9, %v1173_v10 }
 0x172   : > { %v1175_v14 = vpop.f32.mrf.mxu0 }
 0x173   : > { %v1216_v15 = vpop.f32.mrf.mxu1 }
 0x1ac   : > { %v1683_v16 = vpop.f32.mrf.mxu0 }
 0x1ad   : > { %v1724_v17 = vpop.f32.mrf.mxu1 }
 0x1ae   : > { %v1725_v18 = vadd.f32 %v1724_v17, %v1683_v16  ;;  %v1685_v19 = vpop.f32.mrf.mxu0 }
 0x1af   : > { %v1726_v20 = vpop.f32.mrf.mxu1 }
 0x1b0   : > { %v1731_v21 = vadd.f32 %v1725_v18, %v1212_v36  ;;  %v1687_v22 = vpop.f32.mrf.mxu0  ;;  %v1727_v30 = vadd.f32 %v1726_v20, %v1685_v19 }
 0x1b1   : > { %v1728_v23 = vpop.f32.mrf.mxu1 }
 0x1b2   : > { %v1688_v24 = vpop.f32.mrf.mxu0  ;;  %v1732_v42 = vadd.f32 %v1727_v30, %v1214_v13 }
 0x1b3   : > { %v1729_v25 = vpop.f32.mrf.mxu1 }
 0x1ec   : > { %v2160_v38 = vpop.f32.mrf.mxu0 }
 0x1ed   : > { %v2201_v39 = vpop.f32.mrf.mxu1 }
 0x1ee   : > { %v2202_v2 = vadd.f32 %v2201_v39, %v2160_v38  ;;  %v2162_v40 = vpop.f32.mrf.mxu0 }
 0x1ef   : > { %v2203_v41 = vpop.f32.mrf.mxu1 }
 0x1f0   : > { %v2208_v47 = vadd.f32 %v2202_v2, %v1731_v21  ;;  %v2204_v49 = vadd.f32 %v2203_v41, %v2162_v40  ;;  %v2164_v33 = vpop.f32.mrf.mxu0 }
 0x1f1   : > { %v2205_v43 = vpop.f32.mrf.mxu1 }
 0x1f2   : > { %v2222_v44 = vadd.f32 %v2215_v3, %v2208_v47  ;;  %v2209_v45 = vadd.f32 %v2204_v49, %v1732_v42  ;;  %v2165_v46 = vpop.f32.mrf.mxu0 }
 0x1f3   : > { %v2206_v48 = vpop.f32.mrf.mxu1 }
 0x1f4   : > { %v2226_v50 = vmul.f32 0.2, %v2222_v44  ;;  %v2223_v51 = vadd.f32 %v2219_v32, %v2209_v45  ;;  %vm2224_vm0 = vcmp.ge.f32.partialorder %v2222_v44, 0.0 }
 0x1f6   : > { %vm2225_vm1 = vcmp.ge.f32.partialorder %v2223_v51, 0.0  ;;  %v2227_v52 = vmul.f32 0.2, %v2223_v51  ;;  %v2228_v53 = vsel %vm2224_vm0, %v2222_v44, %v2226_v50 }
 0x1f8   : > { %v2229_v54 = vsel %vm2225_vm1, %v2223_v51, %v2227_v52 }
 0x1f9   : > { %v2636_v55 = vpack.c.bf16 %v2229_v54, %v2228_v53 }
 0x1fb   : > { %2238 = vst [vmem:[%s234_s15] sm:$0x77] %v2636_v55 }
 0x1fc PF: > { %s15_s14 = sadd.s32 1, %s3158_s14   ;;  %s3347_s12 = smov %s3154_s13 }
 0x1fd   : > { %p12_p4 = scmp.ge.s32.totalorder %s15_s14, 4   ;;  %s3348_s13 = smov %s3350_s16 }
 0x1ff   :  { %14 = sbr.rel (!%p12_p4) target bundleno = 3 (0x3), region = 74 }
 0x204   :  { %2268 = vsyncpa [#allocation3], 1 }
 0x205   :  { %2270 = vsyncpa [#allocation3 + $0x1], 1 }
 0x206   :  { %2271 = vsyncpa [#allocation5], 1 }

// kernel: discriminator_hf_forward.7
= control target key start
LH: loop header
LB: loop body
LE: loop exit
PB: predicated region body
PF: predicated region fallthrough
CT: control target
= control target key end

     0   :  { %s11601_s23 = smov 0   ;;  %s11603_s24 = smov 0   ;;  %s15061_s0 = inlined_call_operand.vmem [shape: bf16[2,1,6,1024], index: 0, kind: input, shape index: {}]   ;;  %s15062_s1 = inlined_call_operand.vmem [shape: bf16[4,1024,512], index: 1, kind: input, shape index: {}]   ;;  %s15063_s2 = inlined_call_operand.vmem [shape: f32[1,512], index: 2, kind: input, shape index: {}]   ;;  %s15064_s3 = inlined_call_operand.vmem [shape: bf16[1,512], index: 3, kind: input, shape index: {}]   ;;  %s15065_s4 = inlined_call_operand.<no memory space> [shape: f32[1,1], index: 4, kind: input, shape index: {}]   ;;  %s15066_s5 = inlined_call_operand.vmem [shape: f32[2,1,2,1], index: 5, kind: output, shape index: {0}]   ;;  %s15067_s6 = inlined_call_operand.vmem [shape: f32[2,1,2,1], index: 6, kind: output, shape index: {1}]  }
   0x1   :  { %v12_v0 = vstv %s15065_s4  ;;  %s11605_s25 = smov 0  }
   0x2   :  { %13 = vst [vmem:[#allocation2] sm:$0x1] %v12_v0 }
   0x3 LB: > { %s31_s4 = sadd.s32 1, %s11557_s24  ;;  %p8157_p0 = scmp.ge.s32.totalorder %s11561_s25, 1  ;;  %s11561_s25 = sphi %s11605_s25, %s19_s25   ;;  %s11557_s24 = sphi %s11603_s24, %s15069_s24   ;;  %s11553_s23 = sphi %s11601_s23, %s15068_s23  }
   0x4   : > { %p33_p1 = scmp.ge.s32.totalorder %s31_s4, 2  ;;  %p239_p2 = scmp.lt.s32.totalorder %s11561_s25, 3 }
   0x6   : > { %s15071_s4 = smov (%p33_p1, %s31_s4), 0  ;;  %p240_p3 = pnand %p8157_p0, %p239_p2 }
   0x7   : > { %p282_p4 = scmp.lt.s32.totalorder (!%p240_p3), %s11553_s23, 1 }
   0x8   : > { %243 = sbr.rel (%p240_p3) target bundleno = 1426 (0x592), region = 40 }
   0xd   : > { %v9991_v1 = vld [vmem:[%s15062_s1 + $0x8e4] ss:$16 sps:$4 sm:$0xff]   ;;  %v9995_v3 = vld [vmem:[%s15062_s1 + $0x8e0] ss:$16 sps:$4 sm:$0xff]   ;;  %s15073_s23 = smov (!%p282_p4, %s11553_s23), 1  ;;  %vm8005_vm2 = vcmask 1041408  }
   0xe   : > { %v9993_v2 = vld [vmem:[%s15062_s1 + $0xae4] ss:$16 sps:$4 sm:$0xff]   ;;  %2186 = vmatprep.subr.bf16.mxu0 %v9991_v1  ;;  %v9996_v4 = vld [vmem:[%s15062_s1 + $0xae0] ss:$16 sps:$4 sm:$0xff]   ;;  %s9966_s21 = sshll.u32 %s15073_s23, 5  ;;  %s8160_s28 = sshll.u32 %s15073_s23, 1 }
   0xf   : > { %2227 = vmatprep.subr.bf16.mxu1 %v9993_v2  ;;  %v9997_v5 = vld [vmem:[%s15062_s1 + $0x8c4] ss:$16 sps:$4 sm:$0xff]   ;;  %2187 = vmatpush1.bf16.msra.mxu0 %v9995_v3  ;;  %v10001_v7 = vld [vmem:[%s15062_s1 + $0x8c0] ss:$16 sps:$4 sm:$0xff]   ;;  %s11761_s9 = scalar_lea.vmem %s15061_s0, %s9966_s21  ;;  %s304_s7 = scalar_lea.vmem %s15067_s6, %s8160_s28  ;;  %vm8023_vm5 = vcmask 1024  }
  0x10   : > { %2228 = vmatpush1.bf16.msra.mxu1 %v9996_v4  ;;  %v9999_v6 = vld [vmem:[%s15062_s1 + $0xac4] ss:$16 sps:$4 sm:$0xff]   ;;  %2188 = vmatprep.subr.bf16.mxu0 %v9997_v5  ;;  %v10002_v8 = vld [vmem:[%s15062_s1 + $0xac0] ss:$16 sps:$4 sm:$0xff]   ;;  %v306_v50 = vld [vmem:[%s11761_s9 + $0x8] sm:$0x77]  ;;  %s297_s10 = scalar_lea.vmem %s15066_s5, %s8160_s28 }
  0x11   : > { %2229 = vmatprep.subr.bf16.mxu1 %v9999_v6  ;;  %v10003_v9 = vld [vmem:[%s15062_s1 + $0x8a4] ss:$16 sps:$4 sm:$0xff]   ;;  %v10007_v11 = vld [vmem:[%s15062_s1 + $0x8a0] ss:$16 sps:$4 sm:$0xff]   ;;  %v11782_v53 = vcombine.high %v306_v50, %v306_v50  ;;  %v11824_v6 = vcombine.low %v306_v50, %v306_v50 }
  0x12   : > { %v10005_v10 = vld [vmem:[%s15062_s1 + $0xaa4] ss:$16 sps:$4 sm:$0xff]   ;;  %v10008_v12 = vld [vmem:[%s15062_s1 + $0xaa0] ss:$16 sps:$4 sm:$0xff]  }
  0x13   : > { %2189 = vmatpush1.bf16.msra.mxu0 %v10001_v7  ;;  %v10009_v13 = vld [vmem:[%s15062_s1 + $0x884] ss:$16 sps:$4 sm:$0xff]   ;;  %v10013_v15 = vld [vmem:[%s15062_s1 + $0x880] ss:$16 sps:$4 sm:$0xff]   ;;  %v864_v57 = vshrl.u32 %v11782_v53, 16  ;;  %v866_v58 = vshll.u32 %v11782_v53, 16 }
  0x14   : > { %2230 = vmatpush1.bf16.msra.mxu1 %v10002_v8  ;;  %2190 = vmatprep.subr.bf16.mxu0 %v10003_v9  ;;  %v10011_v14 = vld [vmem:[%s15062_s1 + $0xa84] ss:$16 sps:$4 sm:$0xff]   ;;  %v10014_v16 = vld [vmem:[%s15062_s1 + $0xa80] ss:$16 sps:$4 sm:$0xff]  }
  0x15   : > { %2231 = vmatprep.subr.bf16.mxu1 %v10005_v10  ;;  %v10015_v17 = vld [vmem:[%s15062_s1 + $0x864] ss:$16 sps:$4 sm:$0xff]   ;;  %v10019_v19 = vld [vmem:[%s15062_s1 + $0x860] ss:$16 sps:$4 sm:$0xff]   ;;  %v868_v62 = vrot.slane %v866_v58, 1 }
  0x16   : > { %v10017_v18 = vld [vmem:[%s15062_s1 + $0xa64] ss:$16 sps:$4 sm:$0xff]   ;;  %v10020_v20 = vld [vmem:[%s15062_s1 + $0xa60] ss:$16 sps:$4 sm:$0xff]  }
  0x17   : > { %2191 = vmatpush1.bf16.msra.mxu0 %v10007_v11  ;;  %v10021_v21 = vld [vmem:[%s15062_s1 + $0x844] ss:$16 sps:$4 sm:$0xff]   ;;  %v10025_v23 = vld [vmem:[%s15062_s1 + $0x840] ss:$16 sps:$4 sm:$0xff]   ;;  %v11813_v2 = vor.u32 %v868_v62, %v864_v57 }
  0x18   : > { %2232 = vmatpush1.bf16.msra.mxu1 %v10008_v12  ;;  %2192 = vmatprep.subr.bf16.mxu0 %v10009_v13  ;;  %v10023_v22 = vld [vmem:[%s15062_s1 + $0xa44] ss:$16 sps:$4 sm:$0xff]   ;;  %v10026_v24 = vld [vmem:[%s15062_s1 + $0xa40] ss:$16 sps:$4 sm:$0xff]   ;;  %v859_v12 = vshll.u32 %v11824_v6, 16 }
  0x19   : > { %2233 = vmatprep.subr.bf16.mxu1 %v10011_v14  ;;  %v10027_v25 = vld [vmem:[%s15062_s1 + $0x824] ss:$16 sps:$4 sm:$0xff]   ;;  %v10031_v27 = vld [vmem:[%s15062_s1 + $0x820] ss:$16 sps:$4 sm:$0xff]   ;;  %2259 = vmatprep.mubr.bf16.mxu1 %v11813_v2 }
  0x1a   : > { %v10029_v26 = vld [vmem:[%s15062_s1 + $0xa24] ss:$16 sps:$4 sm:$0xff]   ;;  %v10032_v28 = vld [vmem:[%s15062_s1 + $0xa20] ss:$16 sps:$4 sm:$0xff]  }
  0x1b   : > { %2193 = vmatpush1.bf16.msra.mxu0 %v10013_v15  ;;  %v10033_v29 = vld [vmem:[%s15062_s1 + $0x804] ss:$16 sps:$4 sm:$0xff]   ;;  %v10037_v31 = vld [vmem:[%s15062_s1 + $0x800] ss:$16 sps:$4 sm:$0xff]  }
  0x1c   : > { %2234 = vmatpush1.bf16.msra.mxu1 %v10014_v16  ;;  %2194 = vmatprep.subr.bf16.mxu0 %v10015_v17  ;;  %v10035_v30 = vld [vmem:[%s15062_s1 + $0xa04] ss:$16 sps:$4 sm:$0xff]   ;;  %v10038_v32 = vld [vmem:[%s15062_s1 + $0xa00] ss:$16 sps:$4 sm:$0xff]  }
  0x1d   : > { %2235 = vmatprep.subr.bf16.mxu1 %v10017_v18  ;;  %v10039_v33 = vld [vmem:[%s15062_s1 + $0x9e4] ss:$16 sps:$4 sm:$0xff]   ;;  %v10043_v35 = vld [vmem:[%s15062_s1 + $0x9e0] ss:$16 sps:$4 sm:$0xff]  }
  0x1e   : > { %v10041_v34 = vld [vmem:[%s15062_s1 + $0xbe4] ss:$16 sps:$4 sm:$0xff]   ;;  %v10044_v36 = vld [vmem:[%s15062_s1 + $0xbe0] ss:$16 sps:$4 sm:$0xff]  }
  0x1f   : > { %2195 = vmatpush1.bf16.msra.mxu0 %v10019_v19  ;;  %v10045_v37 = vld [vmem:[%s15062_s1 + $0x9c4] ss:$16 sps:$4 sm:$0xff]   ;;  %v10049_v39 = vld [vmem:[%s15062_s1 + $0x9c0] ss:$16 sps:$4 sm:$0xff]   ;;  %v857_v19 = vshrl.u32 %v11824_v6, 16 }
  0x20   : > { %2236 = vmatpush1.bf16.msra.mxu1 %v10020_v20  ;;  %2196 = vmatprep.subr.bf16.mxu0 %v10021_v21  ;;  %v10047_v38 = vld [vmem:[%s15062_s1 + $0xbc4] ss:$16 sps:$4 sm:$0xff]   ;;  %v10050_v40 = vld [vmem:[%s15062_s1 + $0xbc0] ss:$16 sps:$4 sm:$0xff]   ;;  %v861_v20 = vrot.slane %v859_v12, 1 }
  0x21   : > { %2237 = vmatprep.subr.bf16.mxu1 %v10023_v22  ;;  %v10051_v41 = vld [vmem:[%s15062_s1 + $0x9a4] ss:$16 sps:$4 sm:$0xff]   ;;  %v10055_v43 = vld [vmem:[%s15062_s1 + $0x9a0] ss:$16 sps:$4 sm:$0xff]  }
  0x22   : > { %v10053_v42 = vld [vmem:[%s15062_s1 + $0xba4] ss:$16 sps:$4 sm:$0xff]   ;;  %v10056_v44 = vld [vmem:[%s15062_s1 + $0xba0] ss:$16 sps:$4 sm:$0xff]  }
  0x23   : > { %2197 = vmatpush1.bf16.msra.mxu0 %v10025_v23  ;;  %v10057_v45 = vld [vmem:[%s15062_s1 + $0x984] ss:$16 sps:$4 sm:$0xff]   ;;  %v10061_v47 = vld [vmem:[%s15062_s1 + $0x980] ss:$16 sps:$4 sm:$0xff]  }
  0x24   : > { %2238 = vmatpush1.bf16.msra.mxu1 %v10026_v24  ;;  %2198 = vmatprep.subr.bf16.mxu0 %v10027_v25  ;;  %v10059_v46 = vld [vmem:[%s15062_s1 + $0xb84] ss:$16 sps:$4 sm:$0xff]   ;;  %v10062_v51 = vld [vmem:[%s15062_s1 + $0xb80] ss:$16 sps:$4 sm:$0xff]   ;;  %v11871_v24 = vor.u32 %v861_v20, %v857_v19 }
  0x25   : > { %2239 = vmatprep.subr.bf16.mxu1 %v10029_v26  ;;  %v305_v48 = vld [vmem:[%s11761_s9] sm:$0x77] }
  0x26   : > { %v11773_v49 = vcombine.high %v305_v48, %v305_v48  ;;  %v10063_v52 = vld [vmem:[%s15062_s1 + $0x964] ss:$16 sps:$4 sm:$0xff]   ;;  %v10067_v59 = vld [vmem:[%s15062_s1 + $0x960] ss:$16 sps:$4 sm:$0xff]   ;;  %v11821_v5 = vcombine.low %v305_v48, %v305_v48 }
  0x27   : > { %2199 = vmatpush1.bf16.msra.mxu0 %v10031_v27  ;;  %v10065_v54 = vld [vmem:[%s15062_s1 + $0xb64] ss:$16 sps:$4 sm:$0xff]   ;;  %v10068_v61 = vld [vmem:[%s15062_s1 + $0xb60] ss:$16 sps:$4 sm:$0xff]  }
  0x28   : > { %2240 = vmatpush1.bf16.msra.mxu1 %v10032_v28  ;;  %2200 = vmatprep.subr.bf16.mxu0 %v10033_v29  ;;  %v850_v55 = vshrl.u32 %v11773_v49, 16  ;;  %v852_v56 = vshll.u32 %v11773_v49, 16  ;;  %v10069_v63 = vld [vmem:[%s15062_s1 + $0x944] ss:$16 sps:$4 sm:$0xff]   ;;  %v10073_v3 = vld [vmem:[%s15062_s1 + $0x940] ss:$16 sps:$4 sm:$0xff]  }
  0x29   : > { %2241 = vmatprep.subr.bf16.mxu1 %v10035_v30  ;;  %v10071_v0 = vld [vmem:[%s15062_s1 + $0xb44] ss:$16 sps:$4 sm:$0xff]   ;;  %v10074_v4 = vld [vmem:[%s15062_s1 + $0xb40] ss:$16 sps:$4 sm:$0xff]   ;;  %v845_v11 = vshll.u32 %v11821_v5, 16  ;;  %v843_v17 = vshrl.u32 %v11821_v5, 16 }
  0x2a   : > { %v854_v60 = vrot.slane %v852_v56, 1  ;;  %v10075_v7 = vld [vmem:[%s15062_s1 + $0x924] ss:$16 sps:$4 sm:$0xff]   ;;  %v10079_v9 = vld [vmem:[%s15062_s1 + $0x920] ss:$16 sps:$4 sm:$0xff]  }
  0x2b   : > { %2201 = vmatpush1.bf16.msra.mxu0 %v10037_v31  ;;  %v10077_v8 = vld [vmem:[%s15062_s1 + $0xb24] ss:$16 sps:$4 sm:$0xff]   ;;  %v10080_v10 = vld [vmem:[%s15062_s1 + $0xb20] ss:$16 sps:$4 sm:$0xff]   ;;  %v847_v18 = vrot.slane %v845_v11, 1 }
  0x2c   : > { %2242 = vmatpush1.bf16.msra.mxu1 %v10038_v32  ;;  %2202 = vmatprep.subr.bf16.mxu0 %v10039_v33  ;;  %v11809_v1 = vor.u32 %v854_v60, %v850_v55  ;;  %v10081_v13 = vld [vmem:[%s15062_s1 + $0x904] ss:$16 sps:$4 sm:$0xff]   ;;  %v10085_v15 = vld [vmem:[%s15062_s1 + $0x900] ss:$16 sps:$4 sm:$0xff]  }
  0x2d   : > { %2243 = vmatprep.subr.bf16.mxu1 %v10041_v34  ;;  %v10083_v14 = vld [vmem:[%s15062_s1 + $0xb04] ss:$16 sps:$4 sm:$0xff]   ;;  %v10086_v16 = vld [vmem:[%s15062_s1 + $0xb00] ss:$16 sps:$4 sm:$0xff]   ;;  %v11867_v23 = vor.u32 %v847_v18, %v843_v17 }
  0x2e   : > { %2218 = vmatprep.mubr.bf16.mxu0 %v11809_v1  ;;  %v10093_v21 = vld [vmem:[%s15062_s1 + $0xce4] ss:$16 sps:$4 sm:$0xff]   ;;  %v10091_v25 = vld [vmem:[%s15062_s1 + $0xce0] ss:$16 sps:$4 sm:$0xff]  }
  0x2f   : > { %2203 = vmatpush2.bf16.msra.mxu0 %v10043_v35  ;;  %v10096_v22 = vld [vmem:[%s15062_s1 + $0xee4] ss:$16 sps:$4 sm:$0xff]   ;;  %v10094_v26 = vld [vmem:[%s15062_s1 + $0xee0] ss:$16 sps:$4 sm:$0xff]  }
  0x30   : > { %2244 = vmatpush2.bf16.msra.mxu1 %v10044_v36  ;;  %2204 = vmatprep.subr.bf16.mxu0 %v10045_v37  ;;  %v10099_v27 = vld [vmem:[%s15062_s1 + $0xcc4] ss:$16 sps:$4 sm:$0xff]   ;;  %v10097_v29 = vld [vmem:[%s15062_s1 + $0xcc0] ss:$16 sps:$4 sm:$0xff]  }
  0x31   : > { %2245 = vmatprep.subr.bf16.mxu1 %v10047_v38  ;;  %v10102_v28 = vld [vmem:[%s15062_s1 + $0xec4] ss:$16 sps:$4 sm:$0xff]   ;;  %v10100_v30 = vld [vmem:[%s15062_s1 + $0xec0] ss:$16 sps:$4 sm:$0xff]  }
  0x32   : > { %v10105_v31 = vld [vmem:[%s15062_s1 + $0xca4] ss:$16 sps:$4 sm:$0xff]   ;;  %v10103_v33 = vld [vmem:[%s15062_s1 + $0xca0] ss:$16 sps:$4 sm:$0xff]  }
  0x33   : > { %2205 = vmatpush2.bf16.msra.mxu0 %v10049_v39  ;;  %v10108_v32 = vld [vmem:[%s15062_s1 + $0xea4] ss:$16 sps:$4 sm:$0xff]   ;;  %v10106_v34 = vld [vmem:[%s15062_s1 + $0xea0] ss:$16 sps:$4 sm:$0xff]  }
  0x34   : > { %2246 = vmatpush2.bf16.msra.mxu1 %v10050_v40  ;;  %2206 = vmatprep.subr.bf16.mxu0 %v10051_v41  ;;  %v10111_v35 = vld [vmem:[%s15062_s1 + $0xc84] ss:$16 sps:$4 sm:$0xff]   ;;  %v10109_v37 = vld [vmem:[%s15062_s1 + $0xc80] ss:$16 sps:$4 sm:$0xff]  }
  0x35   : > { %2247 = vmatprep.subr.bf16.mxu1 %v10053_v42  ;;  %v10114_v36 = vld [vmem:[%s15062_s1 + $0xe84] ss:$16 sps:$4 sm:$0xff]   ;;  %v10112_v38 = vld [vmem:[%s15062_s1 + $0xe80] ss:$16 sps:$4 sm:$0xff]  }
  0x36   : > { %v10117_v39 = vld [vmem:[%s15062_s1 + $0xc64] ss:$16 sps:$4 sm:$0xff]   ;;  %v10115_v41 = vld [vmem:[%s15062_s1 + $0xc60] ss:$16 sps:$4 sm:$0xff]  }
  0x37   : > { %2207 = vmatpush2.bf16.msra.mxu0 %v10055_v43  ;;  %v10120_v40 = vld [vmem:[%s15062_s1 + $0xe64] ss:$16 sps:$4 sm:$0xff]   ;;  %v10118_v42 = vld [vmem:[%s15062_s1 + $0xe60] ss:$16 sps:$4 sm:$0xff]  }
  0x38   : > { %2248 = vmatpush2.bf16.msra.mxu1 %v10056_v44  ;;  %2208 = vmatprep.subr.bf16.mxu0 %v10057_v45  ;;  %v10123_v43 = vld [vmem:[%s15062_s1 + $0xc44] ss:$16 sps:$4 sm:$0xff]   ;;  %v10121_v45 = vld [vmem:[%s15062_s1 + $0xc40] ss:$16 sps:$4 sm:$0xff]  }
  0x39   : > { %2249 = vmatprep.subr.bf16.mxu1 %v10059_v46  ;;  %v10126_v44 = vld [vmem:[%s15062_s1 + $0xe44] ss:$16 sps:$4 sm:$0xff]   ;;  %v10124_v46 = vld [vmem:[%s15062_s1 + $0xe40] ss:$16 sps:$4 sm:$0xff]  }
  0x3a   : > { %v10132_v48 = vld [vmem:[%s15062_s1 + $0xe24] ss:$16 sps:$4 sm:$0xff]   ;;  %v10127_v50 = vld [vmem:[%s15062_s1 + $0xc20] ss:$16 sps:$4 sm:$0xff]  }
  0x3b   : > { %2209 = vmatpush2.bf16.msra.mxu0 %v10061_v47  ;;  %v10129_v47 = vld [vmem:[%s15062_s1 + $0xc24] ss:$16 sps:$4 sm:$0xff]   ;;  %v10142_v18 = vld [vmem:[%s15062_s1 + $0xfe0] ss:$16 sps:$4 sm:$0xff]  }
  0x3c   : > { %2250 = vmatpush2.bf16.msra.mxu1 %v10062_v51  ;;  %2210 = vmatprep.subr.bf16.mxu0 %v10063_v52  ;;  %v10130_v51 = vld [vmem:[%s15062_s1 + $0xe20] ss:$16 sps:$4 sm:$0xff]   ;;  %v10138_v60 = vld [vmem:[%s15062_s1 + $0xe04] ss:$16 sps:$4 sm:$0xff]  }
  0x3d   : > { %2251 = vmatprep.subr.bf16.mxu1 %v10065_v54  ;;  %v11954_v52 = vld [vmem:[%s11761_s9 + $0x10] sm:$0x77]  ;;  %v11957_v54 = vld [vmem:[%s11761_s9 + $0x18] sm:$0x77] }
  0x3e   : > { %v11971_v62 = vcombine.high %v11957_v54, %v11957_v54 }
  0x3f   : > { %2211 = vmatpush2.bf16.msra.mxu0 %v10067_v59  ;;  %v10135_v59 = vld [vmem:[%s15062_s1 + $0xc04] ss:$16 sps:$4 sm:$0xff]  }
  0x40   : > { %2252 = vmatpush2.bf16.msra.mxu1 %v10068_v61  ;;  %2212 = vmatprep.subr.bf16.mxu0 %v10069_v63  ;;  %v11967_v61 = vcombine.high %v11954_v52, %v11954_v52  ;;  %v10133_v63 = vld [vmem:[%s15062_s1 + $0xc00] ss:$16 sps:$4 sm:$0xff]  }
  0x41   : > { %2253 = vmatprep.subr.bf16.mxu1 %v10071_v0 }
  0x42   : > { %v878_v0 = vshrl.u32 %v11967_v61, 16 }
  0x43   : > { %2213 = vmatpush2.bf16.msra.mxu0 %v10073_v3  ;;  %v880_v3 = vshll.u32 %v11967_v61, 16 }
  0x44   : > { %2254 = vmatpush2.bf16.msra.mxu1 %v10074_v4  ;;  %2214 = vmatprep.subr.bf16.mxu0 %v10075_v7  ;;  %v10136_v4 = vld [vmem:[%s15062_s1 + $0xe00] ss:$16 sps:$4 sm:$0xff]   ;;  %v892_v7 = vshrl.u32 %v11971_v62, 16 }
  0x45   : > { %2255 = vmatprep.subr.bf16.mxu1 %v10077_v8  ;;  %v894_v8 = vshll.u32 %v11971_v62, 16 }
  0x47   : > { %2215 = vmatpush2.bf16.msra.mxu0 %v10079_v9  ;;  %v10141_v9 = vld [vmem:[%s15062_s1 + $0xde4] ss:$16 sps:$4 sm:$0xff]  }
  0x48   : > { %2256 = vmatpush2.bf16.msra.mxu1 %v10080_v10  ;;  %2216 = vmatprep.subr.bf16.mxu0 %v10081_v13  ;;  %v10144_v10 = vld [vmem:[%s15062_s1 + $0xfe4] ss:$16 sps:$4 sm:$0xff]   ;;  %v882_v13 = vrot.slane %v880_v3, 1 }
  0x49   : > { %2257 = vmatprep.subr.bf16.mxu1 %v10083_v14  ;;  %v896_v14 = vrot.slane %v894_v8, 1 }
  0x4b   : > { %2217 = vmatpush2.bf16.msra.mxu0 %v10085_v15  ;;  %v11995_v15 = vor.u32 %v882_v13, %v878_v0  ;;  %v12005_v20 = vor.u32 %v896_v14, %v892_v7  ;;  %v10193_v13 = vld [vmem:[%s15062_s1 + $0x8ec] ss:$16 sps:$4 sm:$0xff]  }
  0x4c   : > { %2258 = vmatpush2.bf16.msra.mxu1 %v10086_v16  ;;  %2268 = vmatprep.subr.bf16.mxu0 %v10093_v21  ;;  %v10139_v16 = vld [vmem:[%s15062_s1 + $0xde0] ss:$16 sps:$4 sm:$0xff]   ;;  %v10147_v21 = vld [vmem:[%s15062_s1 + $0xdc4] ss:$16 sps:$4 sm:$0xff]   ;;  %v10196_v14 = vld [vmem:[%s15062_s1 + $0xaec] ss:$16 sps:$4 sm:$0xff]  }
  0x4d   : > { %2309 = vmatprep.subr.bf16.mxu1 %v10096_v22  ;;  %v10150_v22 = vld [vmem:[%s15062_s1 + $0xfc4] ss:$16 sps:$4 sm:$0xff]  }
  0x4e   : > { %2219 = vmatmul.mubr.bf16.vlgmr.msra.gmra.mxu0 %v11867_v23 }
  0x4f   : > { %2260 = vmatmul.mubr.bf16.vlgmr.msra.gmra.mxu1 %v11871_v24  ;;  %2269 = vmatpush1.bf16.msra.mxu0 %v10091_v25  ;;  %v10145_v25 = vld [vmem:[%s15062_s1 + $0xdc0] ss:$16 sps:$4 sm:$0xff]  }
  0x50   : > { %2310 = vmatpush1.bf16.msra.mxu1 %v10094_v26  ;;  %2270 = vmatprep.subr.bf16.mxu0 %v10099_v27  ;;  %v10148_v26 = vld [vmem:[%s15062_s1 + $0xfc0] ss:$16 sps:$4 sm:$0xff]   ;;  %v10153_v27 = vld [vmem:[%s15062_s1 + $0xda4] ss:$16 sps:$4 sm:$0xff]  }
  0x51   : > { %2311 = vmatprep.subr.bf16.mxu1 %v10102_v28  ;;  %2300 = vmatprep.mubr.bf16.mxu0 %v11995_v15  ;;  %v10156_v28 = vld [vmem:[%s15062_s1 + $0xfa4] ss:$16 sps:$4 sm:$0xff]  }
  0x52   : > { %2341 = vmatprep.mubr.bf16.mxu1 %v12005_v20 }
  0x53   : > { %2271 = vmatpush1.bf16.msra.mxu0 %v10097_v29  ;;  %v10151_v29 = vld [vmem:[%s15062_s1 + $0xda0] ss:$16 sps:$4 sm:$0xff]  }
  0x54   : > { %2312 = vmatpush1.bf16.msra.mxu1 %v10100_v30  ;;  %2272 = vmatprep.subr.bf16.mxu0 %v10105_v31  ;;  %v10154_v30 = vld [vmem:[%s15062_s1 + $0xfa0] ss:$16 sps:$4 sm:$0xff]   ;;  %v10159_v31 = vld [vmem:[%s15062_s1 + $0xd84] ss:$16 sps:$4 sm:$0xff]  }
  0x55   : > { %2313 = vmatprep.subr.bf16.mxu1 %v10108_v32  ;;  %v10162_v32 = vld [vmem:[%s15062_s1 + $0xf84] ss:$16 sps:$4 sm:$0xff]  }
  0x57   : > { %2273 = vmatpush1.bf16.msra.mxu0 %v10103_v33  ;;  %v10157_v33 = vld [vmem:[%s15062_s1 + $0xd80] ss:$16 sps:$4 sm:$0xff]  }
  0x58   : > { %2314 = vmatpush1.bf16.msra.mxu1 %v10106_v34  ;;  %2274 = vmatprep.subr.bf16.mxu0 %v10111_v35  ;;  %v10160_v34 = vld [vmem:[%s15062_s1 + $0xf80] ss:$16 sps:$4 sm:$0xff]   ;;  %v10165_v35 = vld [vmem:[%s15062_s1 + $0xd64] ss:$16 sps:$4 sm:$0xff]  }
  0x59   : > { %2315 = vmatprep.subr.bf16.mxu1 %v10114_v36  ;;  %v10168_v36 = vld [vmem:[%s15062_s1 + $0xf64] ss:$16 sps:$4 sm:$0xff]  }
  0x5b   : > { %2275 = vmatpush1.bf16.msra.mxu0 %v10109_v37  ;;  %v10163_v37 = vld [vmem:[%s15062_s1 + $0xd60] ss:$16 sps:$4 sm:$0xff]  }
  0x5c   : > { %2316 = vmatpush1.bf16.msra.mxu1 %v10112_v38  ;;  %2276 = vmatprep.subr.bf16.mxu0 %v10117_v39  ;;  %v10166_v38 = vld [vmem:[%s15062_s1 + $0xf60] ss:$16 sps:$4 sm:$0xff]   ;;  %v10171_v39 = vld [vmem:[%s15062_s1 + $0xd44] ss:$16 sps:$4 sm:$0xff]  }
  0x5d   : > { %2317 = vmatprep.subr.bf16.mxu1 %v10120_v40  ;;  %v10174_v40 = vld [vmem:[%s15062_s1 + $0xf44] ss:$16 sps:$4 sm:$0xff]  }
  0x5f   : > { %2277 = vmatpush1.bf16.msra.mxu0 %v10115_v41  ;;  %v12065_v41 = vcombine.low %v11954_v52, %v11954_v52  ;;  %v10183_v52 = vld [vmem:[%s15062_s1 + $0xd04] ss:$16 sps:$4 sm:$0xff]  }
  0x60   : > { %2318 = vmatpush1.bf16.msra.mxu1 %v10118_v42  ;;  %2278 = vmatprep.subr.bf16.mxu0 %v10123_v43  ;;  %v12069_v42 = vcombine.low %v11957_v54, %v11957_v54  ;;  %v10169_v43 = vld [vmem:[%s15062_s1 + $0xd40] ss:$16 sps:$4 sm:$0xff]   ;;  %v10186_v54 = vld [vmem:[%s15062_s1 + $0xf04] ss:$16 sps:$4 sm:$0xff]  }
  0x61   : > { %2319 = vmatprep.subr.bf16.mxu1 %v10126_v44  ;;  %v10172_v44 = vld [vmem:[%s15062_s1 + $0xf40] ss:$16 sps:$4 sm:$0xff]  }
  0x63   : > { %2279 = vmatpush1.bf16.msra.mxu0 %v10121_v45  ;;  %v10177_v45 = vld [vmem:[%s15062_s1 + $0xd24] ss:$16 sps:$4 sm:$0xff]  }
  0x64   : > { %2320 = vmatpush1.bf16.msra.mxu1 %v10124_v46  ;;  %2280 = vmatprep.subr.bf16.mxu0 %v10129_v47  ;;  %v10180_v46 = vld [vmem:[%s15062_s1 + $0xf24] ss:$16 sps:$4 sm:$0xff]   ;;  %v873_v47 = vshll.u32 %v12065_v41, 16 }
  0x65   : > { %2321 = vmatprep.subr.bf16.mxu1 %v10132_v48  ;;  %v887_v48 = vshll.u32 %v12069_v42, 16 }
  0x67   : > { %2281 = vmatpush1.bf16.msra.mxu0 %v10127_v50  ;;  %v10175_v50 = vld [vmem:[%s15062_s1 + $0xd20] ss:$16 sps:$4 sm:$0xff]  }
  0x68   : > { %2322 = vmatpush1.bf16.msra.mxu1 %v10130_v51  ;;  %2282 = vmatprep.subr.bf16.mxu0 %v10135_v59  ;;  %v10178_v51 = vld [vmem:[%s15062_s1 + $0xf20] ss:$16 sps:$4 sm:$0xff]   ;;  %v871_v59 = vshrl.u32 %v12065_v41, 16 }
  0x69   : > { %2323 = vmatprep.subr.bf16.mxu1 %v10138_v60  ;;  %v875_v60 = vrot.slane %v873_v47, 1 }
  0x6b   : > { %2283 = vmatpush1.bf16.msra.mxu0 %v10133_v63  ;;  %v885_v63 = vshrl.u32 %v12069_v42, 16 }
  0x6c   : > { %2324 = vmatpush1.bf16.msra.mxu1 %v10136_v4  ;;  %2284 = vmatprep.subr.bf16.mxu0 %v10141_v9  ;;  %v889_v4 = vrot.slane %v887_v48, 1  ;;  %v10181_v9 = vld [vmem:[%s15062_s1 + $0xd00] ss:$16 sps:$4 sm:$0xff]  }
  0x6d   : > { %2325 = vmatprep.subr.bf16.mxu1 %v10144_v10  ;;  %v10184_v10 = vld [vmem:[%s15062_s1 + $0xf00] ss:$16 sps:$4 sm:$0xff]  }
  0x6f   : > { %2285 = vmatpush2.bf16.msra.mxu0 %v10139_v16  ;;  %v12117_v16 = vor.u32 %v875_v60, %v871_v59  ;;  %v10233_v60 = vld [vmem:[%s15062_s1 + $0x808] ss:$16 sps:$4 sm:$0xff]  }
  0x70   : > { %2326 = vmatpush2.bf16.msra.mxu1 %v10142_v18  ;;  %2286 = vmatprep.subr.bf16.mxu0 %v10147_v21  ;;  %v12121_v18 = vor.u32 %v889_v4, %v885_v63  ;;  %v10191_v21 = vld [vmem:[%s15062_s1 + $0x8e8] ss:$16 sps:$4 sm:$0xff]  }
  0x71   : > { %2327 = vmatprep.subr.bf16.mxu1 %v10150_v22  ;;  %v10194_v22 = vld [vmem:[%s15062_s1 + $0xae8] ss:$16 sps:$4 sm:$0xff]  }
  0x72   : > { %v10236_v4 = vld [vmem:[%s15062_s1 + $0xa08] ss:$16 sps:$4 sm:$0xff]  }
  0x73   : > { %2287 = vmatpush2.bf16.msra.mxu0 %v10145_v25  ;;  %v10199_v25 = vld [vmem:[%s15062_s1 + $0x8cc] ss:$16 sps:$4 sm:$0xff]  }
  0x74   : > { %2328 = vmatpush2.bf16.msra.mxu1 %v10148_v26  ;;  %2288 = vmatprep.subr.bf16.mxu0 %v10153_v27  ;;  %v10202_v26 = vld [vmem:[%s15062_s1 + $0xacc] ss:$16 sps:$4 sm:$0xff]   ;;  %v10197_v27 = vld [vmem:[%s15062_s1 + $0x8c8] ss:$16 sps:$4 sm:$0xff]  }
  0x75   : > { %2329 = vmatprep.subr.bf16.mxu1 %v10156_v28  ;;  %v10200_v28 = vld [vmem:[%s15062_s1 + $0xac8] ss:$16 sps:$4 sm:$0xff]  }
  0x77   : > { %2289 = vmatpush2.bf16.msra.mxu0 %v10151_v29  ;;  %v10205_v29 = vld [vmem:[%s15062_s1 + $0x8ac] ss:$16 sps:$4 sm:$0xff]  }
  0x78   : > { %2330 = vmatpush2.bf16.msra.mxu1 %v10154_v30  ;;  %2290 = vmatprep.subr.bf16.mxu0 %v10159_v31  ;;  %v10208_v30 = vld [vmem:[%s15062_s1 + $0xaac] ss:$16 sps:$4 sm:$0xff]   ;;  %v10203_v31 = vld [vmem:[%s15062_s1 + $0x8a8] ss:$16 sps:$4 sm:$0xff]  }
  0x79   : > { %2331 = vmatprep.subr.bf16.mxu1 %v10162_v32  ;;  %v10206_v32 = vld [vmem:[%s15062_s1 + $0xaa8] ss:$16 sps:$4 sm:$0xff]  }
  0x7b   : > { %2291 = vmatpush2.bf16.msra.mxu0 %v10157_v33  ;;  %v10211_v33 = vld [vmem:[%s15062_s1 + $0x88c] ss:$16 sps:$4 sm:$0xff]  }
  0x7c   : > { %2332 = vmatpush2.bf16.msra.mxu1 %v10160_v34  ;;  %2292 = vmatprep.subr.bf16.mxu0 %v10165_v35  ;;  %v10212_v34 = vld [vmem:[%s15062_s1 + $0xa88] ss:$16 sps:$4 sm:$0xff]   ;;  %v10217_v35 = vld [vmem:[%s15062_s1 + $0x86c] ss:$16 sps:$4 sm:$0xff]  }
  0x7d   : > { %2333 = vmatprep.subr.bf16.mxu1 %v10168_v36  ;;  %v10220_v36 = vld [vmem:[%s15062_s1 + $0xa6c] ss:$16 sps:$4 sm:$0xff]  }
  0x7f   : > { %2293 = vmatpush2.bf16.msra.mxu0 %v10163_v37  ;;  %v10215_v37 = vld [vmem:[%s15062_s1 + $0x868] ss:$16 sps:$4 sm:$0xff]  }
  0x80   : > { %2334 = vmatpush2.bf16.msra.mxu1 %v10166_v38  ;;  %2294 = vmatprep.subr.bf16.mxu0 %v10171_v39  ;;  %v10218_v38 = vld [vmem:[%s15062_s1 + $0xa68] ss:$16 sps:$4 sm:$0xff]   ;;  %v10223_v39 = vld [vmem:[%s15062_s1 + $0x84c] ss:$16 sps:$4 sm:$0xff]  }
  0x81   : > { %2335 = vmatprep.subr.bf16.mxu1 %v10174_v40  ;;  %v10226_v40 = vld [vmem:[%s15062_s1 + $0xa4c] ss:$16 sps:$4 sm:$0xff]  }
  0x83   : > { %2295 = vmatpush2.bf16.msra.mxu0 %v10169_v43  ;;  %v10221_v43 = vld [vmem:[%s15062_s1 + $0x848] ss:$16 sps:$4 sm:$0xff]  }
  0x84   : > { %2336 = vmatpush2.bf16.msra.mxu1 %v10172_v44  ;;  %2296 = vmatprep.subr.bf16.mxu0 %v10177_v45  ;;  %v10224_v44 = vld [vmem:[%s15062_s1 + $0xa48] ss:$16 sps:$4 sm:$0xff]   ;;  %v10229_v45 = vld [vmem:[%s15062_s1 + $0x82c] ss:$16 sps:$4 sm:$0xff]  }
  0x85   : > { %2337 = vmatprep.subr.bf16.mxu1 %v10180_v46  ;;  %v10232_v46 = vld [vmem:[%s15062_s1 + $0xa2c] ss:$16 sps:$4 sm:$0xff]  }
  0x87   : > { %2297 = vmatpush2.bf16.msra.mxu0 %v10175_v50  ;;  %v10227_v50 = vld [vmem:[%s15062_s1 + $0x828] ss:$16 sps:$4 sm:$0xff]  }
  0x88   : > { %2338 = vmatpush2.bf16.msra.mxu1 %v10178_v51  ;;  %2298 = vmatprep.subr.bf16.mxu0 %v10183_v52  ;;  %v10230_v51 = vld [vmem:[%s15062_s1 + $0xa28] ss:$16 sps:$4 sm:$0xff]   ;;  %v10235_v52 = vld [vmem:[%s15062_s1 + $0x80c] ss:$16 sps:$4 sm:$0xff]  }
  0x89   : > { %2339 = vmatprep.subr.bf16.mxu1 %v10186_v54  ;;  %v10238_v54 = vld [vmem:[%s15062_s1 + $0xa0c] ss:$16 sps:$4 sm:$0xff]  }
  0x8b   : > { %2299 = vmatpush2.bf16.msra.mxu0 %v10181_v9  ;;  %v10241_v9 = vld [vmem:[%s15062_s1 + $0x9ec] ss:$16 sps:$4 sm:$0xff]  }
  0x8c   : > { %2340 = vmatpush2.bf16.msra.mxu1 %v10184_v10  ;;  %2350 = vmatprep.subr.bf16.mxu0 %v10193_v13  ;;  %v10244_v10 = vld [vmem:[%s15062_s1 + $0xbec] ss:$16 sps:$4 sm:$0xff]   ;;  %v10239_v13 = vld [vmem:[%s15062_s1 + $0x9e8] ss:$16 sps:$4 sm:$0xff]  }
  0x8d   : > { %2391 = vmatprep.subr.bf16.mxu1 %v10196_v14  ;;  %v10242_v14 = vld [vmem:[%s15062_s1 + $0xbe8] ss:$16 sps:$4 sm:$0xff]  }
  0x8e   : > { %2301 = vmatmul.mubr.bf16.vlgmr.msra.gmra.mxu0 %v12117_v16 }
  0x8f   : > { %2342 = vmatmul.mubr.bf16.vlgmr.msra.gmra.mxu1 %v12121_v18  ;;  %2351 = vmatpush1.bf16.msra.mxu0 %v10191_v21  ;;  %v10247_v21 = vld [vmem:[%s15062_s1 + $0x9cc] ss:$16 sps:$4 sm:$0xff]  }
  0x90   : > { %2392 = vmatpush1.bf16.msra.mxu1 %v10194_v22  ;;  %2352 = vmatprep.subr.bf16.mxu0 %v10199_v25  ;;  %v10250_v22 = vld [vmem:[%s15062_s1 + $0xbcc] ss:$16 sps:$4 sm:$0xff]   ;;  %v10245_v25 = vld [vmem:[%s15062_s1 + $0x9c8] ss:$16 sps:$4 sm:$0xff]  }
  0x91   : > { %2393 = vmatprep.subr.bf16.mxu1 %v10202_v26  ;;  %2382 = vmatprep.mubr.bf16.mxu0 %v11809_v1  ;;  %v10214_v1 = vld [vmem:[%s15062_s1 + $0xa8c] ss:$16 sps:$4 sm:$0xff]   ;;  %v10248_v26 = vld [vmem:[%s15062_s1 + $0xbc8] ss:$16 sps:$4 sm:$0xff]  }
  0x92   : > { %2423 = vmatprep.mubr.bf16.mxu1 %v11813_v2  ;;  %v10209_v2 = vld [vmem:[%s15062_s1 + $0x888] ss:$16 sps:$4 sm:$0xff]  }
  0x93   : > { %2353 = vmatpush1.bf16.msra.mxu0 %v10197_v27  ;;  %v10253_v27 = vld [vmem:[%s15062_s1 + $0x9ac] ss:$16 sps:$4 sm:$0xff]  }
  0x94   : > { %2394 = vmatpush1.bf16.msra.mxu1 %v10200_v28  ;;  %2354 = vmatprep.subr.bf16.mxu0 %v10205_v29  ;;  %v10256_v28 = vld [vmem:[%s15062_s1 + $0xbac] ss:$16 sps:$4 sm:$0xff]   ;;  %v10251_v29 = vld [vmem:[%s15062_s1 + $0x9a8] ss:$16 sps:$4 sm:$0xff]  }
  0x95   : > { %2395 = vmatprep.subr.bf16.mxu1 %v10208_v30  ;;  %v10254_v30 = vld [vmem:[%s15062_s1 + $0xba8] ss:$16 sps:$4 sm:$0xff]  }
  0x97   : > { %2355 = vmatpush1.bf16.msra.mxu0 %v10203_v31  ;;  %v10259_v31 = vld [vmem:[%s15062_s1 + $0x98c] ss:$16 sps:$4 sm:$0xff]  }
  0x98   : > { %2396 = vmatpush1.bf16.msra.mxu1 %v10206_v32  ;;  %2356 = vmatprep.subr.bf16.mxu0 %v10211_v33  ;;  %v10262_v32 = vld [vmem:[%s15062_s1 + $0xb8c] ss:$16 sps:$4 sm:$0xff]   ;;  %v10257_v33 = vld [vmem:[%s15062_s1 + $0x988] ss:$16 sps:$4 sm:$0xff]  }
  0x99   : > { %2397 = vmatprep.subr.bf16.mxu1 %v10214_v1  ;;  %v10260_v1 = vld [vmem:[%s15062_s1 + $0xb88] ss:$16 sps:$4 sm:$0xff]  }
  0x9b   : > { %2357 = vmatpush1.bf16.msra.mxu0 %v10209_v2  ;;  %v10265_v2 = vld [vmem:[%s15062_s1 + $0x96c] ss:$16 sps:$4 sm:$0xff]  }
  0x9c   : > { %2398 = vmatpush1.bf16.msra.mxu1 %v10212_v34  ;;  %2358 = vmatprep.subr.bf16.mxu0 %v10217_v35  ;;  %v10268_v34 = vld [vmem:[%s15062_s1 + $0xb6c] ss:$16 sps:$4 sm:$0xff]   ;;  %v10263_v35 = vld [vmem:[%s15062_s1 + $0x968] ss:$16 sps:$4 sm:$0xff]  }
  0x9d   : > { %2399 = vmatprep.subr.bf16.mxu1 %v10220_v36  ;;  %v10266_v36 = vld [vmem:[%s15062_s1 + $0xb68] ss:$16 sps:$4 sm:$0xff]  }
  0x9f   : > { %2359 = vmatpush1.bf16.msra.mxu0 %v10215_v37  ;;  %v10271_v37 = vld [vmem:[%s15062_s1 + $0x94c] ss:$16 sps:$4 sm:$0xff]  }
  0xa0   : > { %2400 = vmatpush1.bf16.msra.mxu1 %v10218_v38  ;;  %2360 = vmatprep.subr.bf16.mxu0 %v10223_v39  ;;  %v10274_v38 = vld [vmem:[%s15062_s1 + $0xb4c] ss:$16 sps:$4 sm:$0xff]   ;;  %v10269_v39 = vld [vmem:[%s15062_s1 + $0x948] ss:$16 sps:$4 sm:$0xff]  }
  0xa1   : > { %2401 = vmatprep.subr.bf16.mxu1 %v10226_v40  ;;  %v10272_v40 = vld [vmem:[%s15062_s1 + $0xb48] ss:$16 sps:$4 sm:$0xff]  }
  0xa3   : > { %2361 = vmatpush1.bf16.msra.mxu0 %v10221_v43  ;;  %v10277_v43 = vld [vmem:[%s15062_s1 + $0x92c] ss:$16 sps:$4 sm:$0xff]  }
  0xa4   : > { %2402 = vmatpush1.bf16.msra.mxu1 %v10224_v44  ;;  %2362 = vmatprep.subr.bf16.mxu0 %v10229_v45  ;;  %v10280_v44 = vld [vmem:[%s15062_s1 + $0xb2c] ss:$16 sps:$4 sm:$0xff]   ;;  %v10275_v45 = vld [vmem:[%s15062_s1 + $0x928] ss:$16 sps:$4 sm:$0xff]  }
  0xa5   : > { %2403 = vmatprep.subr.bf16.mxu1 %v10232_v46  ;;  %v10278_v46 = vld [vmem:[%s15062_s1 + $0xb28] ss:$16 sps:$4 sm:$0xff]  }
  0xa7   : > { %2363 = vmatpush1.bf16.msra.mxu0 %v10227_v50  ;;  %v10283_v50 = vld [vmem:[%s15062_s1 + $0x90c] ss:$16 sps:$4 sm:$0xff]  }
  0xa8   : > { %2404 = vmatpush1.bf16.msra.mxu1 %v10230_v51  ;;  %2364 = vmatprep.subr.bf16.mxu0 %v10235_v52  ;;  %v10286_v51 = vld [vmem:[%s15062_s1 + $0xb0c] ss:$16 sps:$4 sm:$0xff]   ;;  %v10281_v52 = vld [vmem:[%s15062_s1 + $0x908] ss:$16 sps:$4 sm:$0xff]  }
  0xa9   : > { %2405 = vmatprep.subr.bf16.mxu1 %v10238_v54  ;;  %v10284_v54 = vld [vmem:[%s15062_s1 + $0xb08] ss:$16 sps:$4 sm:$0xff]  }
  0xab   : > { %2365 = vmatpush1.bf16.msra.mxu0 %v10233_v60  ;;  %v10289_v60 = vld [vmem:[%s15062_s1 + $0xcec] ss:$16 sps:$4 sm:$0xff]  }
  0xac   : > { %2406 = vmatpush1.bf16.msra.mxu1 %v10236_v4  ;;  %2366 = vmatprep.subr.bf16.mxu0 %v10241_v9  ;;  %v10292_v4 = vld [vmem:[%s15062_s1 + $0xeec] ss:$16 sps:$4 sm:$0xff]   ;;  %v10287_v9 = vld [vmem:[%s15062_s1 + $0xce8] ss:$16 sps:$4 sm:$0xff]  }
  0xad   : > { %2407 = vmatprep.subr.bf16.mxu1 %v10244_v10  ;;  %v10290_v10 = vld [vmem:[%s15062_s1 + $0xee8] ss:$16 sps:$4 sm:$0xff]  }
  0xaf   : > { %2367 = vmatpush2.bf16.msra.mxu0 %v10239_v13  ;;  %v10295_v13 = vld [vmem:[%s15062_s1 + $0xccc] ss:$16 sps:$4 sm:$0xff]  }
  0xb0   : > { %2408 = vmatpush2.bf16.msra.mxu1 %v10242_v14  ;;  %2368 = vmatprep.subr.bf16.mxu0 %v10247_v21  ;;  %v10298_v14 = vld [vmem:[%s15062_s1 + $0xecc] ss:$16 sps:$4 sm:$0xff]   ;;  %v10293_v21 = vld [vmem:[%s15062_s1 + $0xcc8] ss:$16 sps:$4 sm:$0xff]  }
  0xb1   : > { %2409 = vmatprep.subr.bf16.mxu1 %v10250_v22  ;;  %v10296_v22 = vld [vmem:[%s15062_s1 + $0xec8] ss:$16 sps:$4 sm:$0xff]  }
  0xb3   : > { %2369 = vmatpush2.bf16.msra.mxu0 %v10245_v25  ;;  %v10301_v25 = vld [vmem:[%s15062_s1 + $0xcac] ss:$16 sps:$4 sm:$0xff]  }
  0xb4   : > { %2410 = vmatpush2.bf16.msra.mxu1 %v10248_v26  ;;  %2370 = vmatprep.subr.bf16.mxu0 %v10253_v27  ;;  %v10302_v26 = vld [vmem:[%s15062_s1 + $0xea8] ss:$16 sps:$4 sm:$0xff]   ;;  %v10307_v27 = vld [vmem:[%s15062_s1 + $0xc8c] ss:$16 sps:$4 sm:$0xff]  }
  0xb5   : > { %2411 = vmatprep.subr.bf16.mxu1 %v10256_v28  ;;  %v10308_v28 = vld [vmem:[%s15062_s1 + $0xe88] ss:$16 sps:$4 sm:$0xff]  }
  0xb7   : > { %2371 = vmatpush2.bf16.msra.mxu0 %v10251_v29  ;;  %v10313_v29 = vld [vmem:[%s15062_s1 + $0xc6c] ss:$16 sps:$4 sm:$0xff]  }
  0xb8   : > { %2412 = vmatpush2.bf16.msra.mxu1 %v10254_v30  ;;  %2372 = vmatprep.subr.bf16.mxu0 %v10259_v31  ;;  %v10316_v30 = vld [vmem:[%s15062_s1 + $0xe6c] ss:$16 sps:$4 sm:$0xff]   ;;  %v10311_v31 = vld [vmem:[%s15062_s1 + $0xc68] ss:$16 sps:$4 sm:$0xff]  }
  0xb9   : > { %2413 = vmatprep.subr.bf16.mxu1 %v10262_v32  ;;  %v10314_v32 = vld [vmem:[%s15062_s1 + $0xe68] ss:$16 sps:$4 sm:$0xff]  }
  0xbb   : > { %2373 = vmatpush2.bf16.msra.mxu0 %v10257_v33  ;;  %v10319_v33 = vld [vmem:[%s15062_s1 + $0xc4c] ss:$16 sps:$4 sm:$0xff]  }
  0xbc   : > { %2414 = vmatpush2.bf16.msra.mxu1 %v10260_v1  ;;  %2374 = vmatprep.subr.bf16.mxu0 %v10265_v2  ;;  %v10322_v1 = vld [vmem:[%s15062_s1 + $0xe4c] ss:$16 sps:$4 sm:$0xff]   ;;  %v10317_v2 = vld [vmem:[%s15062_s1 + $0xc48] ss:$16 sps:$4 sm:$0xff]  }
  0xbd   : > { %2415 = vmatprep.subr.bf16.mxu1 %v10268_v34  ;;  %v10320_v34 = vld [vmem:[%s15062_s1 + $0xe48] ss:$16 sps:$4 sm:$0xff]  }
  0xbf   : > { %2375 = vmatpush2.bf16.msra.mxu0 %v10263_v35  ;;  %v10325_v35 = vld [vmem:[%s15062_s1 + $0xc2c] ss:$16 sps:$4 sm:$0xff]  }
  0xc0   : > { %2416 = vmatpush2.bf16.msra.mxu1 %v10266_v36  ;;  %2376 = vmatprep.subr.bf16.mxu0 %v10271_v37  ;;  %v10328_v36 = vld [vmem:[%s15062_s1 + $0xe2c] ss:$16 sps:$4 sm:$0xff]   ;;  %v10323_v37 = vld [vmem:[%s15062_s1 + $0xc28] ss:$16 sps:$4 sm:$0xff]  }
  0xc1   : > { %2417 = vmatprep.subr.bf16.mxu1 %v10274_v38  ;;  %v10326_v38 = vld [vmem:[%s15062_s1 + $0xe28] ss:$16 sps:$4 sm:$0xff]  }
  0xc3   : > { %2377 = vmatpush2.bf16.msra.mxu0 %v10269_v39  ;;  %v10331_v39 = vld [vmem:[%s15062_s1 + $0xc0c] ss:$16 sps:$4 sm:$0xff]  }
  0xc4   : > { %2418 = vmatpush2.bf16.msra.mxu1 %v10272_v40  ;;  %2378 = vmatprep.subr.bf16.mxu0 %v10277_v43  ;;  %v10334_v40 = vld [vmem:[%s15062_s1 + $0xe0c] ss:$16 sps:$4 sm:$0xff]   ;;  %v10329_v43 = vld [vmem:[%s15062_s1 + $0xc08] ss:$16 sps:$4 sm:$0xff]  }
  0xc5   : > { %2419 = vmatprep.subr.bf16.mxu1 %v10280_v44  ;;  %v10332_v44 = vld [vmem:[%s15062_s1 + $0xe08] ss:$16 sps:$4 sm:$0xff]  }
  0xc7   : > { %2379 = vmatpush2.bf16.msra.mxu0 %v10275_v45  ;;  %v10337_v45 = vld [vmem:[%s15062_s1 + $0xdec] ss:$16 sps:$4 sm:$0xff]  }
  0xc8   : > { %2420 = vmatpush2.bf16.msra.mxu1 %v10278_v46  ;;  %2380 = vmatprep.subr.bf16.mxu0 %v10283_v50  ;;  %v10340_v46 = vld [vmem:[%s15062_s1 + $0xfec] ss:$16 sps:$4 sm:$0xff]   ;;  %v10335_v50 = vld [vmem:[%s15062_s1 + $0xde8] ss:$16 sps:$4 sm:$0xff]  }
  0xc9   : > { %2421 = vmatprep.subr.bf16.mxu1 %v10286_v51  ;;  %v10338_v51 = vld [vmem:[%s15062_s1 + $0xfe8] ss:$16 sps:$4 sm:$0xff]  }
  0xcb   : > { %2381 = vmatpush2.bf16.msra.mxu0 %v10281_v52  ;;  %v10343_v52 = vld [vmem:[%s15062_s1 + $0xdcc] ss:$16 sps:$4 sm:$0xff]  }
  0xcc   : > { %2422 = vmatpush2.bf16.msra.mxu1 %v10284_v54  ;;  %2432 = vmatprep.subr.bf16.mxu0 %v10289_v60  ;;  %v10346_v54 = vld [vmem:[%s15062_s1 + $0xfcc] ss:$16 sps:$4 sm:$0xff]   ;;  %v10341_v60 = vld [vmem:[%s15062_s1 + $0xdc8] ss:$16 sps:$4 sm:$0xff]  }
  0xcd   : > { %2473 = vmatprep.subr.bf16.mxu1 %v10292_v4  ;;  %v10344_v4 = vld [vmem:[%s15062_s1 + $0xfc8] ss:$16 sps:$4 sm:$0xff]  }
  0xce   : > { %2383 = vmatmul.mubr.bf16.vlgmr.msra.gmra.mxu0 %v11867_v23  ;;  %v10304_v23 = vld [vmem:[%s15062_s1 + $0xeac] ss:$16 sps:$4 sm:$0xff]  }
  0xcf   : > { %2424 = vmatmul.mubr.bf16.vlgmr.msra.gmra.mxu1 %v11871_v24  ;;  %2433 = vmatpush1.bf16.msra.mxu0 %v10287_v9  ;;  %v10299_v24 = vld [vmem:[%s15062_s1 + $0xca8] ss:$16 sps:$4 sm:$0xff]   ;;  %v10349_v9 = vld [vmem:[%s15062_s1 + $0xdac] ss:$16 sps:$4 sm:$0xff]  }
  0xd0   : > { %2474 = vmatpush1.bf16.msra.mxu1 %v10290_v10  ;;  %2434 = vmatprep.subr.bf16.mxu0 %v10295_v13  ;;  %v10352_v10 = vld [vmem:[%s15062_s1 + $0xfac] ss:$16 sps:$4 sm:$0xff]   ;;  %v10347_v13 = vld [vmem:[%s15062_s1 + $0xda8] ss:$16 sps:$4 sm:$0xff]  }
  0xd1   : > { %2475 = vmatprep.subr.bf16.mxu1 %v10298_v14  ;;  %2464 = vmatprep.mubr.bf16.mxu0 %v11995_v15  ;;  %v10310_v15 = vld [vmem:[%s15062_s1 + $0xe8c] ss:$16 sps:$4 sm:$0xff]   ;;  %v10350_v14 = vld [vmem:[%s15062_s1 + $0xfa8] ss:$16 sps:$4 sm:$0xff]  }
  0xd2   : > { %2505 = vmatprep.mubr.bf16.mxu1 %v12005_v20  ;;  %v10305_v20 = vld [vmem:[%s15062_s1 + $0xc88] ss:$16 sps:$4 sm:$0xff]  }
  0xd3   : > { %2435 = vmatpush1.bf16.msra.mxu0 %v10293_v21  ;;  %v10355_v21 = vld [vmem:[%s15062_s1 + $0xd8c] ss:$16 sps:$4 sm:$0xff]  }
  0xd4   : > { %2476 = vmatpush1.bf16.msra.mxu1 %v10296_v22  ;;  %2436 = vmatprep.subr.bf16.mxu0 %v10301_v25  ;;  %v10358_v22 = vld [vmem:[%s15062_s1 + $0xf8c] ss:$16 sps:$4 sm:$0xff]   ;;  %v10353_v25 = vld [vmem:[%s15062_s1 + $0xd88] ss:$16 sps:$4 sm:$0xff]  }
  0xd5   : > { %2477 = vmatprep.subr.bf16.mxu1 %v10304_v23  ;;  %v10356_v23 = vld [vmem:[%s15062_s1 + $0xf88] ss:$16 sps:$4 sm:$0xff]  }
  0xd7   : > { %2437 = vmatpush1.bf16.msra.mxu0 %v10299_v24  ;;  %v10361_v24 = vld [vmem:[%s15062_s1 + $0xd6c] ss:$16 sps:$4 sm:$0xff]  }
  0xd8   : > { %2478 = vmatpush1.bf16.msra.mxu1 %v10302_v26  ;;  %2438 = vmatprep.subr.bf16.mxu0 %v10307_v27  ;;  %v10364_v26 = vld [vmem:[%s15062_s1 + $0xf6c] ss:$16 sps:$4 sm:$0xff]   ;;  %v10359_v27 = vld [vmem:[%s15062_s1 + $0xd68] ss:$16 sps:$4 sm:$0xff]  }
  0xd9   : > { %2479 = vmatprep.subr.bf16.mxu1 %v10310_v15  ;;  %v10362_v15 = vld [vmem:[%s15062_s1 + $0xf68] ss:$16 sps:$4 sm:$0xff]  }
  0xdb   : > { %2439 = vmatpush1.bf16.msra.mxu0 %v10305_v20  ;;  %v10367_v20 = vld [vmem:[%s15062_s1 + $0xd4c] ss:$16 sps:$4 sm:$0xff]  }
  0xdc   : > { %2480 = vmatpush1.bf16.msra.mxu1 %v10308_v28  ;;  %2440 = vmatprep.subr.bf16.mxu0 %v10313_v29  ;;  %v10370_v28 = vld [vmem:[%s15062_s1 + $0xf4c] ss:$16 sps:$4 sm:$0xff]   ;;  %v10365_v29 = vld [vmem:[%s15062_s1 + $0xd48] ss:$16 sps:$4 sm:$0xff]  }
  0xdd   : > { %2481 = vmatprep.subr.bf16.mxu1 %v10316_v30  ;;  %v10368_v30 = vld [vmem:[%s15062_s1 + $0xf48] ss:$16 sps:$4 sm:$0xff]  }
  0xdf   : > { %2441 = vmatpush1.bf16.msra.mxu0 %v10311_v31  ;;  %v10373_v31 = vld [vmem:[%s15062_s1 + $0xd2c] ss:$16 sps:$4 sm:$0xff]  }
  0xe0   : > { %2482 = vmatpush1.bf16.msra.mxu1 %v10314_v32  ;;  %2442 = vmatprep.subr.bf16.mxu0 %v10319_v33  ;;  %v10376_v32 = vld [vmem:[%s15062_s1 + $0xf2c] ss:$16 sps:$4 sm:$0xff]   ;;  %v10371_v33 = vld [vmem:[%s15062_s1 + $0xd28] ss:$16 sps:$4 sm:$0xff]  }
  0xe1   : > { %2483 = vmatprep.subr.bf16.mxu1 %v10322_v1  ;;  %v10374_v1 = vld [vmem:[%s15062_s1 + $0xf28] ss:$16 sps:$4 sm:$0xff]  }
  0xe3   : > { %2443 = vmatpush1.bf16.msra.mxu0 %v10317_v2  ;;  %v10379_v2 = vld [vmem:[%s15062_s1 + $0xd0c] ss:$16 sps:$4 sm:$0xff]  }
  0xe4   : > { %2484 = vmatpush1.bf16.msra.mxu1 %v10320_v34  ;;  %2444 = vmatprep.subr.bf16.mxu0 %v10325_v35  ;;  %v10382_v34 = vld [vmem:[%s15062_s1 + $0xf0c] ss:$16 sps:$4 sm:$0xff]   ;;  %v10377_v35 = vld [vmem:[%s15062_s1 + $0xd08] ss:$16 sps:$4 sm:$0xff]  }
  0xe5   : > { %2485 = vmatprep.subr.bf16.mxu1 %v10328_v36  ;;  %v10380_v36 = vld [vmem:[%s15062_s1 + $0xf08] ss:$16 sps:$4 sm:$0xff]  }
  0xe7   : > { %2445 = vmatpush1.bf16.msra.mxu0 %v10323_v37  ;;  %v10385_v37 = vld [vmem:[%s15062_s1 + $0xe4] ss:$16 sps:$4 sm:$0xff]  }
  0xe8   : > { %2486 = vmatpush1.bf16.msra.mxu1 %v10326_v38  ;;  %2446 = vmatprep.subr.bf16.mxu0 %v10331_v39  ;;  %v10388_v38 = vld [vmem:[%s15062_s1 + $0x2e4] ss:$16 sps:$4 sm:$0xff]   ;;  %v10383_v39 = vld [vmem:[%s15062_s1 + $0xe0] ss:$16 sps:$4 sm:$0xff]  }
  0xe9   : > { %2487 = vmatprep.subr.bf16.mxu1 %v10334_v40  ;;  %v10386_v40 = vld [vmem:[%s15062_s1 + $0x2e0] ss:$16 sps:$4 sm:$0xff]  }
  0xeb   : > { %2447 = vmatpush1.bf16.msra.mxu0 %v10329_v43  ;;  %v10391_v43 = vld [vmem:[%s15062_s1 + $0xc4] ss:$16 sps:$4 sm:$0xff]  }
  0xec   : > { %2488 = vmatpush1.bf16.msra.mxu1 %v10332_v44  ;;  %2448 = vmatprep.subr.bf16.mxu0 %v10337_v45  ;;  %v10394_v44 = vld [vmem:[%s15062_s1 + $0x2c4] ss:$16 sps:$4 sm:$0xff]  }
  0xed   : > { %2489 = vmatprep.subr.bf16.mxu1 %v10340_v46 }
  0xef   : > { %2449 = vmatpush2.bf16.msra.mxu0 %v10335_v50 }
  0xf0   : > { %2490 = vmatpush2.bf16.msra.mxu1 %v10338_v51  ;;  %2450 = vmatprep.subr.bf16.mxu0 %v10343_v52  ;;  %v10389_v51 = vld [vmem:[%s15062_s1 + $0xc0] ss:$16 sps:$4 sm:$0xff]  }
  0xf1   : > { %2491 = vmatprep.subr.bf16.mxu1 %v10346_v54  ;;  %v10392_v52 = vld [vmem:[%s15062_s1 + $0x2c0] ss:$16 sps:$4 sm:$0xff]  }
  0xf3   : > { %2451 = vmatpush2.bf16.msra.mxu0 %v10341_v60 }
  0xf4   : > { %2492 = vmatpush2.bf16.msra.mxu1 %v10344_v4  ;;  %2452 = vmatprep.subr.bf16.mxu0 %v10349_v9 }
  0xf5   : > { %2493 = vmatprep.subr.bf16.mxu1 %v10352_v10 }
  0xf7   : > { %2453 = vmatpush2.bf16.msra.mxu0 %v10347_v13  ;;  %v10395_v13 = vld [vmem:[%s15062_s1 + $0xa0] ss:$16 sps:$4 sm:$0xff]  }
  0xf8   : > { %2494 = vmatpush2.bf16.msra.mxu1 %v10350_v14  ;;  %2454 = vmatprep.subr.bf16.mxu0 %v10355_v21  ;;  %v10398_v14 = vld [vmem:[%s15062_s1 + $0x2a0] ss:$16 sps:$4 sm:$0xff]  }
  0xf9   : > { %2495 = vmatprep.subr.bf16.mxu1 %v10358_v22 }
  0xfb   : > { %2455 = vmatpush2.bf16.msra.mxu0 %v10353_v25  ;;  %v10403_v25 = vld [vmem:[%s15062_s1 + $0x84] ss:$16 sps:$4 sm:$0xff]  }
  0xfc   : > { %2496 = vmatpush2.bf16.msra.mxu1 %v10356_v23  ;;  %2456 = vmatprep.subr.bf16.mxu0 %v10361_v24  ;;  %v10406_v23 = vld [vmem:[%s15062_s1 + $0x284] ss:$16 sps:$4 sm:$0xff]   ;;  %v10401_v24 = vld [vmem:[%s15062_s1 + $0x80] ss:$16 sps:$4 sm:$0xff]  }
  0xfd   : > { %2497 = vmatprep.subr.bf16.mxu1 %v10364_v26  ;;  %v10404_v26 = vld [vmem:[%s15062_s1 + $0x280] ss:$16 sps:$4 sm:$0xff]  }
  0xff   : > { %2457 = vmatpush2.bf16.msra.mxu0 %v10359_v27  ;;  %v10409_v27 = vld [vmem:[%s15062_s1 + $0x64] ss:$16 sps:$4 sm:$0xff]  }
 0x100   : > { %2498 = vmatpush2.bf16.msra.mxu1 %v10362_v15  ;;  %2458 = vmatprep.subr.bf16.mxu0 %v10367_v20  ;;  %v10412_v15 = vld [vmem:[%s15062_s1 + $0x264] ss:$16 sps:$4 sm:$0xff]   ;;  %v10407_v20 = vld [vmem:[%s15062_s1 + $0x60] ss:$16 sps:$4 sm:$0xff]  }
 0x101   : > { %2499 = vmatprep.subr.bf16.mxu1 %v10370_v28  ;;  %v10410_v28 = vld [vmem:[%s15062_s1 + $0x260] ss:$16 sps:$4 sm:$0xff]  }
 0x103   : > { %2459 = vmatpush2.bf16.msra.mxu0 %v10365_v29  ;;  %v10415_v29 = vld [vmem:[%s15062_s1 + $0x44] ss:$16 sps:$4 sm:$0xff]  }
 0x104   : > { %2500 = vmatpush2.bf16.msra.mxu1 %v10368_v30  ;;  %2460 = vmatprep.subr.bf16.mxu0 %v10373_v31  ;;  %v10418_v30 = vld [vmem:[%s15062_s1 + $0x244] ss:$16 sps:$4 sm:$0xff]   ;;  %v10413_v31 = vld [vmem:[%s15062_s1 + $0x40] ss:$16 sps:$4 sm:$0xff]  }
 0x105   : > { %2501 = vmatprep.subr.bf16.mxu1 %v10376_v32  ;;  %v10416_v32 = vld [vmem:[%s15062_s1 + $0x240] ss:$16 sps:$4 sm:$0xff]  }
 0x107   : > { %2461 = vmatpush2.bf16.msra.mxu0 %v10371_v33  ;;  %v10421_v33 = vld [vmem:[%s15062_s1 + $0x24] ss:$16 sps:$4 sm:$0xff]  }
 0x108   : > { %2502 = vmatpush2.bf16.msra.mxu1 %v10374_v1  ;;  %2462 = vmatprep.subr.bf16.mxu0 %v10379_v2  ;;  %v10424_v1 = vld [vmem:[%s15062_s1 + $0x224] ss:$16 sps:$4 sm:$0xff]   ;;  %v10419_v2 = vld [vmem:[%s15062_s1 + $0x20] ss:$16 sps:$4 sm:$0xff]  }
 0x109   : > { %2503 = vmatprep.subr.bf16.mxu1 %v10382_v34  ;;  %v10422_v34 = vld [vmem:[%s15062_s1 + $0x220] ss:$16 sps:$4 sm:$0xff]  }
 0x10b   : > { %2463 = vmatpush2.bf16.msra.mxu0 %v10377_v35  ;;  %v10427_v35 = vld [vmem:[%s15062_s1 + $0x4] ss:$16 sps:$4 sm:$0xff]  }
 0x10c   : > { %2504 = vmatpush2.bf16.msra.mxu1 %v10380_v36  ;;  %3802 = vmatprep.subr.bf16.mxu0 %v10385_v37  ;;  %v10430_v36 = vld [vmem:[%s15062_s1 + $0x204] ss:$16 sps:$4 sm:$0xff]   ;;  %v10425_v37 = vld [vmem:[%s15062_s1] ss:$16 sps:$4 sm:$0xff]  }
 0x10d   : > { %3843 = vmatprep.subr.bf16.mxu1 %v10388_v38  ;;  %v10428_v38 = vld [vmem:[%s15062_s1 + $0x200] ss:$16 sps:$4 sm:$0xff]  }
 0x10e   : > { %v2220_v45 = vpop.f32.mrf.mxu0  ;;  %2465 = vmatmul.mubr.bf16.vlgmr.msra.gmra.mxu0 %v12117_v16  ;;  %v10397_v16 = vld [vmem:[%s15062_s1 + $0xa4] ss:$16 sps:$4 sm:$0xff]  }
 0x10f   : > { %v2261_v46 = vpop.f32.mrf.mxu1  ;;  %2506 = vmatmul.mubr.bf16.vlgmr.msra.gmra.mxu1 %v12121_v18  ;;  %3803 = vmatpush1.bf16.msra.mxu0 %v10383_v39  ;;  %v10400_v18 = vld [vmem:[%s15062_s1 + $0x2a4] ss:$16 sps:$4 sm:$0xff]  }
 0x110   : > { %v12529_v50 = vadd.f32 %v2261_v46, %v2220_v45  ;;  %3844 = vmatpush1.bf16.msra.mxu1 %v10386_v40  ;;  %v2222_v54 = vpop.f32.mrf.mxu0  ;;  %3804 = vmatprep.subr.bf16.mxu0 %v10391_v43  ;;  %v10433_v39 = vld [vmem:[%s15062_s1 + $0x1e4] ss:$16 sps:$4 sm:$0xff]   ;;  %v10431_v43 = vld [vmem:[%s15062_s1 + $0x1e0] ss:$16 sps:$4 sm:$0xff]  }
 0x111   : > { %v2263_v60 = vpop.f32.mrf.mxu1  ;;  %3845 = vmatprep.subr.bf16.mxu1 %v10394_v44  ;;  %3834 = vmatprep.mubr.bf16.mxu0 %v11773_v49  ;;  %v10436_v40 = vld [vmem:[%s15062_s1 + $0x3e4] ss:$16 sps:$4 sm:$0xff]   ;;  %v10434_v44 = vld [vmem:[%s15062_s1 + $0x3e0] ss:$16 sps:$4 sm:$0xff]  }
 0x112   : > { %v12543_v4 = vadd.f32 %v2263_v60, %v2222_v54  ;;  %3875 = vmatprep.mubr.bf16.mxu1 %v11782_v53  ;;  %v2224_v9 = vpop.f32.mrf.mxu0  ;;  %v10439_v45 = vld [vmem:[%s15062_s1 + $0x1c4] ss:$16 sps:$4 sm:$0xff]  }
 0x113   : > { %v2265_v10 = vpop.f32.mrf.mxu1  ;;  %3805 = vmatpush1.bf16.msra.mxu0 %v10389_v51  ;;  %v10442_v46 = vld [vmem:[%s15062_s1 + $0x3c4] ss:$16 sps:$4 sm:$0xff]   ;;  %v10437_v51 = vld [vmem:[%s15062_s1 + $0x1c0] ss:$16 sps:$4 sm:$0xff]  }
 0x114   : > { %3846 = vmatpush1.bf16.msra.mxu1 %v10392_v52  ;;  %v2225_v21 = vpop.f32.mrf.mxu0  ;;  %3806 = vmatprep.subr.bf16.mxu0 %v10397_v16  ;;  %v10440_v52 = vld [vmem:[%s15062_s1 + $0x3c0] ss:$16 sps:$4 sm:$0xff]   ;;  %v10445_v54 = vld [vmem:[%s15062_s1 + $0x1a4] ss:$16 sps:$4 sm:$0xff]  }
 0x115   : > { %v2266_v22 = vpop.f32.mrf.mxu1  ;;  %3847 = vmatprep.subr.bf16.mxu1 %v10400_v18  ;;  %v10448_v60 = vld [vmem:[%s15062_s1 + $0x3a4] ss:$16 sps:$4 sm:$0xff]   ;;  %v10443_v16 = vld [vmem:[%s15062_s1 + $0x1a0] ss:$16 sps:$4 sm:$0xff]  }
 0x116   : > { %v10446_v18 = vld [vmem:[%s15062_s1 + $0x3a0] ss:$16 sps:$4 sm:$0xff]   ;;  %v10451_v9 = vld [vmem:[%s15062_s1 + $0x184] ss:$16 sps:$4 sm:$0xff]  }
 0x117   : > { %3807 = vmatpush1.bf16.msra.mxu0 %v10395_v13  ;;  %v10454_v10 = vld [vmem:[%s15062_s1 + $0x384] ss:$16 sps:$4 sm:$0xff]   ;;  %v10449_v13 = vld [vmem:[%s15062_s1 + $0x180] ss:$16 sps:$4 sm:$0xff]  }
 0x118   : > { %3848 = vmatpush1.bf16.msra.mxu1 %v10398_v14  ;;  %3808 = vmatprep.subr.bf16.mxu0 %v10403_v25  ;;  %v10452_v14 = vld [vmem:[%s15062_s1 + $0x380] ss:$16 sps:$4 sm:$0xff]   ;;  %v10457_v21 = vld [vmem:[%s15062_s1 + $0x164] ss:$16 sps:$4 sm:$0xff]  }
 0x119   : > { %3849 = vmatprep.subr.bf16.mxu1 %v10406_v23  ;;  %v10460_v22 = vld [vmem:[%s15062_s1 + $0x364] ss:$16 sps:$4 sm:$0xff]   ;;  %v10455_v25 = vld [vmem:[%s15062_s1 + $0x160] ss:$16 sps:$4 sm:$0xff]  }
 0x11a   : > { %v10458_v23 = vld [vmem:[%s15062_s1 + $0x360] ss:$16 sps:$4 sm:$0xff]  }
 0x11b   : > { %3809 = vmatpush1.bf16.msra.mxu0 %v10401_v24  ;;  %v10463_v24 = vld [vmem:[%s15062_s1 + $0x144] ss:$16 sps:$4 sm:$0xff]  }
 0x11c   : > { %3850 = vmatpush1.bf16.msra.mxu1 %v10404_v26  ;;  %3810 = vmatprep.subr.bf16.mxu0 %v10409_v27  ;;  %v10466_v26 = vld [vmem:[%s15062_s1 + $0x344] ss:$16 sps:$4 sm:$0xff]   ;;  %v10461_v27 = vld [vmem:[%s15062_s1 + $0x140] ss:$16 sps:$4 sm:$0xff]  }
 0x11d   : > { %3851 = vmatprep.subr.bf16.mxu1 %v10412_v15  ;;  %v10464_v15 = vld [vmem:[%s15062_s1 + $0x340] ss:$16 sps:$4 sm:$0xff]  }
 0x11f   : > { %3811 = vmatpush1.bf16.msra.mxu0 %v10407_v20  ;;  %v10469_v20 = vld [vmem:[%s15062_s1 + $0x124] ss:$16 sps:$4 sm:$0xff]  }
 0x120   : > { %3852 = vmatpush1.bf16.msra.mxu1 %v10410_v28  ;;  %3812 = vmatprep.subr.bf16.mxu0 %v10415_v29  ;;  %v10472_v28 = vld [vmem:[%s15062_s1 + $0x324] ss:$16 sps:$4 sm:$0xff]   ;;  %v10467_v29 = vld [vmem:[%s15062_s1 + $0x120] ss:$16 sps:$4 sm:$0xff]  }
 0x121   : > { %3853 = vmatprep.subr.bf16.mxu1 %v10418_v30  ;;  %v10470_v30 = vld [vmem:[%s15062_s1 + $0x320] ss:$16 sps:$4 sm:$0xff]  }
 0x123   : > { %3813 = vmatpush1.bf16.msra.mxu0 %v10413_v31  ;;  %v10475_v31 = vld [vmem:[%s15062_s1 + $0x104] ss:$16 sps:$4 sm:$0xff]  }
 0x124   : > { %3854 = vmatpush1.bf16.msra.mxu1 %v10416_v32  ;;  %3814 = vmatprep.subr.bf16.mxu0 %v10421_v33  ;;  %v10478_v32 = vld [vmem:[%s15062_s1 + $0x304] ss:$16 sps:$4 sm:$0xff]   ;;  %v10473_v33 = vld [vmem:[%s15062_s1 + $0x100] ss:$16 sps:$4 sm:$0xff]  }
 0x125   : > { %3855 = vmatprep.subr.bf16.mxu1 %v10424_v1  ;;  %v10476_v1 = vld [vmem:[%s15062_s1 + $0x300] ss:$16 sps:$4 sm:$0xff]  }
 0x127   : > { %3815 = vmatpush1.bf16.msra.mxu0 %v10419_v2  ;;  %v10481_v2 = vld [vmem:[%s15062_s1 + $0x4e4] ss:$16 sps:$4 sm:$0xff]  }
 0x128   : > { %3856 = vmatpush1.bf16.msra.mxu1 %v10422_v34  ;;  %3816 = vmatprep.subr.bf16.mxu0 %v10427_v35  ;;  %v10484_v34 = vld [vmem:[%s15062_s1 + $0x6e4] ss:$16 sps:$4 sm:$0xff]   ;;  %v10479_v35 = vld [vmem:[%s15062_s1 + $0x4e0] ss:$16 sps:$4 sm:$0xff]  }
 0x129   : > { %3857 = vmatprep.subr.bf16.mxu1 %v10430_v36  ;;  %v10482_v36 = vld [vmem:[%s15062_s1 + $0x6e0] ss:$16 sps:$4 sm:$0xff]  }
 0x12b   : > { %3817 = vmatpush1.bf16.msra.mxu0 %v10425_v37  ;;  %v10487_v37 = vld [vmem:[%s15062_s1 + $0x4c4] ss:$16 sps:$4 sm:$0xff]  }
 0x12c   : > { %3858 = vmatpush1.bf16.msra.mxu1 %v10428_v38  ;;  %3818 = vmatprep.subr.bf16.mxu0 %v10433_v39  ;;  %v10490_v38 = vld [vmem:[%s15062_s1 + $0x6c4] ss:$16 sps:$4 sm:$0xff]   ;;  %v10485_v39 = vld [vmem:[%s15062_s1 + $0x4c0] ss:$16 sps:$4 sm:$0xff]  }
 0x12d   : > { %3859 = vmatprep.subr.bf16.mxu1 %v10436_v40  ;;  %v10488_v40 = vld [vmem:[%s15062_s1 + $0x6c0] ss:$16 sps:$4 sm:$0xff]  }
 0x12f   : > { %3819 = vmatpush2.bf16.msra.mxu0 %v10431_v43 }
 0x130   : > { %3860 = vmatpush2.bf16.msra.mxu1 %v10434_v44  ;;  %3820 = vmatprep.subr.bf16.mxu0 %v10439_v45 }
 0x131   : > { %3861 = vmatprep.subr.bf16.mxu1 %v10442_v46 }
 0x133   : > { %3821 = vmatpush2.bf16.msra.mxu0 %v10437_v51 }
 0x134   : > { %3862 = vmatpush2.bf16.msra.mxu1 %v10440_v52  ;;  %3822 = vmatprep.subr.bf16.mxu0 %v10445_v54  ;;  %v10493_v52 = vld [vmem:[%s15062_s1 + $0x4a4] ss:$16 sps:$4 sm:$0xff]  }
 0x135   : > { %3863 = vmatprep.subr.bf16.mxu1 %v10448_v60  ;;  %v10496_v54 = vld [vmem:[%s15062_s1 + $0x6a4] ss:$16 sps:$4 sm:$0xff]  }
 0x137   : > { %3823 = vmatpush2.bf16.msra.mxu0 %v10443_v16 }
 0x138   : > { %3864 = vmatpush2.bf16.msra.mxu1 %v10446_v18  ;;  %3824 = vmatprep.subr.bf16.mxu0 %v10451_v9  ;;  %v10494_v18 = vld [vmem:[%s15062_s1 + $0x6a0] ss:$16 sps:$4 sm:$0xff]  }
 0x139   : > { %3865 = vmatprep.subr.bf16.mxu1 %v10454_v10 }
 0x13b   : > { %3825 = vmatpush2.bf16.msra.mxu0 %v10449_v13 }
 0x13c   : > { %3866 = vmatpush2.bf16.msra.mxu1 %v10452_v14  ;;  %3826 = vmatprep.subr.bf16.mxu0 %v10457_v21  ;;  %v10499_v21 = vld [vmem:[%s15062_s1 + $0x484] ss:$16 sps:$4 sm:$0xff]  }
 0x13d   : > { %3867 = vmatprep.subr.bf16.mxu1 %v10460_v22  ;;  %v10502_v22 = vld [vmem:[%s15062_s1 + $0x684] ss:$16 sps:$4 sm:$0xff]  }
 0x13f   : > { %3827 = vmatpush2.bf16.msra.mxu0 %v10455_v25  ;;  %v10497_v25 = vld [vmem:[%s15062_s1 + $0x480] ss:$16 sps:$4 sm:$0xff]  }
 0x140   : > { %3868 = vmatpush2.bf16.msra.mxu1 %v10458_v23  ;;  %3828 = vmatprep.subr.bf16.mxu0 %v10463_v24  ;;  %v10500_v23 = vld [vmem:[%s15062_s1 + $0x680] ss:$16 sps:$4 sm:$0xff]   ;;  %v10505_v24 = vld [vmem:[%s15062_s1 + $0x464] ss:$16 sps:$4 sm:$0xff]  }
 0x141   : > { %3869 = vmatprep.subr.bf16.mxu1 %v10466_v26  ;;  %v10508_v26 = vld [vmem:[%s15062_s1 + $0x664] ss:$16 sps:$4 sm:$0xff]  }
 0x143   : > { %3829 = vmatpush2.bf16.msra.mxu0 %v10461_v27  ;;  %v10503_v27 = vld [vmem:[%s15062_s1 + $0x460] ss:$16 sps:$4 sm:$0xff]  }
 0x144   : > { %3870 = vmatpush2.bf16.msra.mxu1 %v10464_v15  ;;  %3830 = vmatprep.subr.bf16.mxu0 %v10469_v20  ;;  %v10506_v15 = vld [vmem:[%s15062_s1 + $0x660] ss:$16 sps:$4 sm:$0xff]   ;;  %v10511_v20 = vld [vmem:[%s15062_s1 + $0x444] ss:$16 sps:$4 sm:$0xff]  }
 0x145   : > { %3871 = vmatprep.subr.bf16.mxu1 %v10472_v28  ;;  %v10514_v28 = vld [vmem:[%s15062_s1 + $0x644] ss:$16 sps:$4 sm:$0xff]  }
 0x147   : > { %3831 = vmatpush2.bf16.msra.mxu0 %v10467_v29  ;;  %v10509_v29 = vld [vmem:[%s15062_s1 + $0x440] ss:$16 sps:$4 sm:$0xff]  }
 0x148   : > { %3872 = vmatpush2.bf16.msra.mxu1 %v10470_v30  ;;  %3832 = vmatprep.subr.bf16.mxu0 %v10475_v31  ;;  %v10512_v30 = vld [vmem:[%s15062_s1 + $0x640] ss:$16 sps:$4 sm:$0xff]   ;;  %v10517_v31 = vld [vmem:[%s15062_s1 + $0x424] ss:$16 sps:$4 sm:$0xff]  }
 0x149   : > { %3873 = vmatprep.subr.bf16.mxu1 %v10478_v32  ;;  %v10520_v32 = vld [vmem:[%s15062_s1 + $0x624] ss:$16 sps:$4 sm:$0xff]  }
 0x14b   : > { %3833 = vmatpush2.bf16.msra.mxu0 %v10473_v33  ;;  %v10515_v33 = vld [vmem:[%s15062_s1 + $0x420] ss:$16 sps:$4 sm:$0xff]  }
 0x14c   : > { %3874 = vmatpush2.bf16.msra.mxu1 %v10476_v1  ;;  %3884 = vmatprep.subr.bf16.mxu0 %v10481_v2  ;;  %v10518_v1 = vld [vmem:[%s15062_s1 + $0x620] ss:$16 sps:$4 sm:$0xff]   ;;  %v10523_v2 = vld [vmem:[%s15062_s1 + $0x404] ss:$16 sps:$4 sm:$0xff]  }
 0x14d   : > { %3925 = vmatprep.subr.bf16.mxu1 %v10484_v34  ;;  %v10526_v34 = vld [vmem:[%s15062_s1 + $0x604] ss:$16 sps:$4 sm:$0xff]  }
 0x14e   : > { %v2302_v43 = vpop.f32.mrf.mxu0  ;;  %3835 = vmatmul.mubr.bf16.vlgmr.msra.gmra.mxu0 %v11821_v5 }
 0x14f   : > { %v2343_v44 = vpop.f32.mrf.mxu1  ;;  %3876 = vmatmul.mubr.bf16.vlgmr.msra.gmra.mxu1 %v11824_v6  ;;  %v2303_v45 = vadd.f32 %v2302_v43, %v12529_v50  ;;  %3885 = vmatpush1.bf16.msra.mxu0 %v10479_v35  ;;  %v10491_v50 = vld [vmem:[%s15062_s1 + $0x4a0] ss:$16 sps:$4 sm:$0xff]   ;;  %v10535_v43 = vld [vmem:[%s15062_s1 + $0x5c4] ss:$16 sps:$4 sm:$0xff]  }
 0x150   : > { %3926 = vmatpush1.bf16.msra.mxu1 %v10482_v36  ;;  %v2304_v46 = vpop.f32.mrf.mxu0  ;;  %3886 = vmatprep.subr.bf16.mxu0 %v10487_v37  ;;  %v10521_v35 = vld [vmem:[%s15062_s1 + $0x400] ss:$16 sps:$4 sm:$0xff]   ;;  %v10529_v37 = vld [vmem:[%s15062_s1 + $0x5e4] ss:$16 sps:$4 sm:$0xff]  }
 0x151   : > { %v2345_v51 = vpop.f32.mrf.mxu1  ;;  %3927 = vmatprep.subr.bf16.mxu1 %v10490_v38  ;;  %v12742_v60 = vadd.f32 %v2343_v44, %v2303_v45  ;;  %v2305_v16 = vadd.f32 %v2304_v46, %v12543_v4  ;;  %3916 = vmatprep.mubr.bf16.mxu0 %v11967_v61  ;;  %v10524_v36 = vld [vmem:[%s15062_s1 + $0x600] ss:$16 sps:$4 sm:$0xff]   ;;  %v10532_v38 = vld [vmem:[%s15062_s1 + $0x7e4] ss:$16 sps:$4 sm:$0xff]  }
 0x152   : > { %3957 = vmatprep.mubr.bf16.mxu1 %v11971_v62  ;;  %v2306_v9 = vpop.f32.mrf.mxu0  ;;  %v10538_v44 = vld [vmem:[%s15062_s1 + $0x7c4] ss:$16 sps:$4 sm:$0xff]   ;;  %v10533_v45 = vld [vmem:[%s15062_s1 + $0x5c0] ss:$16 sps:$4 sm:$0xff]  }
 0x153   : > { %v2347_v10 = vpop.f32.mrf.mxu1  ;;  %v12753_v13 = vadd.f32 %v2345_v51, %v2305_v16  ;;  %3887 = vmatpush1.bf16.msra.mxu0 %v10485_v39  ;;  %v10527_v39 = vld [vmem:[%s15062_s1 + $0x5e0] ss:$16 sps:$4 sm:$0xff]   ;;  %v10541_v51 = vld [vmem:[%s15062_s1 + $0x5a4] ss:$16 sps:$4 sm:$0xff]  }
 0x154   : > { %3928 = vmatpush1.bf16.msra.mxu1 %v10488_v40  ;;  %v2307_v14 = vpop.f32.mrf.mxu0  ;;  %3888 = vmatprep.subr.bf16.mxu0 %v10493_v52  ;;  %v10530_v40 = vld [vmem:[%s15062_s1 + $0x7e0] ss:$16 sps:$4 sm:$0xff]   ;;  %v10544_v52 = vld [vmem:[%s15062_s1 + $0x7a4] ss:$16 sps:$4 sm:$0xff]  }
 0x155   : > { %v2348_v4 = vpop.f32.mrf.mxu1  ;;  %3929 = vmatprep.subr.bf16.mxu1 %v10496_v54  ;;  %v10536_v46 = vld [vmem:[%s15062_s1 + $0x7c0] ss:$16 sps:$4 sm:$0xff]   ;;  %v10553_v14 = vld [vmem:[%s15062_s1 + $0x564] ss:$16 sps:$4 sm:$0xff]  }
 0x156   : > { %v10539_v54 = vld [vmem:[%s15062_s1 + $0x5a0] ss:$16 sps:$4 sm:$0xff]   ;;  %v10556_v4 = vld [vmem:[%s15062_s1 + $0x764] ss:$16 sps:$4 sm:$0xff]  }
 0x157   : > { %3889 = vmatpush1.bf16.msra.mxu0 %v10491_v50  ;;  %v10542_v16 = vld [vmem:[%s15062_s1 + $0x7a0] ss:$16 sps:$4 sm:$0xff]   ;;  %v10547_v50 = vld [vmem:[%s15062_s1 + $0x584] ss:$16 sps:$4 sm:$0xff]  }
 0x158   : > { %3930 = vmatpush1.bf16.msra.mxu1 %v10494_v18  ;;  %3890 = vmatprep.subr.bf16.mxu0 %v10499_v21  ;;  %v10550_v18 = vld [vmem:[%s15062_s1 + $0x784] ss:$16 sps:$4 sm:$0xff]   ;;  %v10545_v9 = vld [vmem:[%s15062_s1 + $0x580] ss:$16 sps:$4 sm:$0xff]  }
 0x159   : > { %3931 = vmatprep.subr.bf16.mxu1 %v10502_v22  ;;  %v10548_v10 = vld [vmem:[%s15062_s1 + $0x780] ss:$16 sps:$4 sm:$0xff]  }
 0x15a   : > { %v10551_v21 = vld [vmem:[%s15062_s1 + $0x560] ss:$16 sps:$4 sm:$0xff]  }
 0x15b   : > { %3891 = vmatpush1.bf16.msra.mxu0 %v10497_v25  ;;  %v10554_v22 = vld [vmem:[%s15062_s1 + $0x760] ss:$16 sps:$4 sm:$0xff]   ;;  %v10559_v25 = vld [vmem:[%s15062_s1 + $0x544] ss:$16 sps:$4 sm:$0xff]  }
 0x15c   : > { %3932 = vmatpush1.bf16.msra.mxu1 %v10500_v23  ;;  %3892 = vmatprep.subr.bf16.mxu0 %v10505_v24  ;;  %v10562_v23 = vld [vmem:[%s15062_s1 + $0x744] ss:$16 sps:$4 sm:$0xff]   ;;  %v10557_v24 = vld [vmem:[%s15062_s1 + $0x540] ss:$16 sps:$4 sm:$0xff]  }
 0x15d   : > { %3933 = vmatprep.subr.bf16.mxu1 %v10508_v26  ;;  %v10560_v26 = vld [vmem:[%s15062_s1 + $0x740] ss:$16 sps:$4 sm:$0xff]  }
 0x15f   : > { %3893 = vmatpush1.bf16.msra.mxu0 %v10503_v27  ;;  %v10565_v27 = vld [vmem:[%s15062_s1 + $0x524] ss:$16 sps:$4 sm:$0xff]  }
 0x160   : > { %3934 = vmatpush1.bf16.msra.mxu1 %v10506_v15  ;;  %3894 = vmatprep.subr.bf16.mxu0 %v10511_v20  ;;  %v10568_v15 = vld [vmem:[%s15062_s1 + $0x724] ss:$16 sps:$4 sm:$0xff]   ;;  %v10563_v20 = vld [vmem:[%s15062_s1 + $0x520] ss:$16 sps:$4 sm:$0xff]  }
 0x161   : > { %3935 = vmatprep.subr.bf16.mxu1 %v10514_v28  ;;  %v10566_v28 = vld [vmem:[%s15062_s1 + $0x720] ss:$16 sps:$4 sm:$0xff]  }
 0x163   : > { %3895 = vmatpush1.bf16.msra.mxu0 %v10509_v29  ;;  %v10571_v29 = vld [vmem:[%s15062_s1 + $0x504] ss:$16 sps:$4 sm:$0xff]  }
 0x164   : > { %3936 = vmatpush1.bf16.msra.mxu1 %v10512_v30  ;;  %3896 = vmatprep.subr.bf16.mxu0 %v10517_v31  ;;  %v10574_v30 = vld [vmem:[%s15062_s1 + $0x704] ss:$16 sps:$4 sm:$0xff]   ;;  %v10569_v31 = vld [vmem:[%s15062_s1 + $0x500] ss:$16 sps:$4 sm:$0xff]  }
 0x165   : > { %3937 = vmatprep.subr.bf16.mxu1 %v10520_v32  ;;  %v10572_v32 = vld [vmem:[%s15062_s1 + $0x700] ss:$16 sps:$4 sm:$0xff]  }
 0x167   : > { %3897 = vmatpush1.bf16.msra.mxu0 %v10515_v33  ;;  %v10577_v33 = vld [vmem:[%s15062_s1 + $0xec] ss:$16 sps:$4 sm:$0xff]  }
 0x168   : > { %3938 = vmatpush1.bf16.msra.mxu1 %v10518_v1  ;;  %3898 = vmatprep.subr.bf16.mxu0 %v10523_v2  ;;  %v10580_v1 = vld [vmem:[%s15062_s1 + $0x2ec] ss:$16 sps:$4 sm:$0xff]   ;;  %v10575_v2 = vld [vmem:[%s15062_s1 + $0xe8] ss:$16 sps:$4 sm:$0xff]  }
 0x169   : > { %3939 = vmatprep.subr.bf16.mxu1 %v10526_v34  ;;  %v10578_v34 = vld [vmem:[%s15062_s1 + $0x2e8] ss:$16 sps:$4 sm:$0xff]  }
 0x16b   : > { %3899 = vmatpush1.bf16.msra.mxu0 %v10521_v35  ;;  %v10583_v35 = vld [vmem:[%s15062_s1 + $0xcc] ss:$16 sps:$4 sm:$0xff]  }
 0x16c   : > { %3940 = vmatpush1.bf16.msra.mxu1 %v10524_v36  ;;  %3900 = vmatprep.subr.bf16.mxu0 %v10529_v37  ;;  %v10586_v36 = vld [vmem:[%s15062_s1 + $0x2cc] ss:$16 sps:$4 sm:$0xff]   ;;  %v10581_v37 = vld [vmem:[%s15062_s1 + $0xc8] ss:$16 sps:$4 sm:$0xff]  }
 0x16d   : > { %3941 = vmatprep.subr.bf16.mxu1 %v10532_v38  ;;  %v10584_v38 = vld [vmem:[%s15062_s1 + $0x2c8] ss:$16 sps:$4 sm:$0xff]  }
 0x16f   : > { %3901 = vmatpush2.bf16.msra.mxu0 %v10527_v39 }
 0x170   : > { %3942 = vmatpush2.bf16.msra.mxu1 %v10530_v40  ;;  %3902 = vmatprep.subr.bf16.mxu0 %v10535_v43 }
 0x171   : > { %3943 = vmatprep.subr.bf16.mxu1 %v10538_v44 }
 0x173   : > { %3903 = vmatpush2.bf16.msra.mxu0 %v10533_v45 }
 0x174   : > { %3944 = vmatpush2.bf16.msra.mxu1 %v10536_v46  ;;  %3904 = vmatprep.subr.bf16.mxu0 %v10541_v51  ;;  %v10589_v46 = vld [vmem:[%s15062_s1 + $0xac] ss:$16 sps:$4 sm:$0xff]  }
 0x175   : > { %3945 = vmatprep.subr.bf16.mxu1 %v10544_v52  ;;  %v10592_v51 = vld [vmem:[%s15062_s1 + $0x2ac] ss:$16 sps:$4 sm:$0xff]  }
 0x177   : > { %3905 = vmatpush2.bf16.msra.mxu0 %v10539_v54  ;;  %v10587_v54 = vld [vmem:[%s15062_s1 + $0xa8] ss:$16 sps:$4 sm:$0xff]  }
 0x178   : > { %3946 = vmatpush2.bf16.msra.mxu1 %v10542_v16  ;;  %3906 = vmatprep.subr.bf16.mxu0 %v10547_v50  ;;  %v10590_v16 = vld [vmem:[%s15062_s1 + $0x2a8] ss:$16 sps:$4 sm:$0xff]  }
 0x179   : > { %3947 = vmatprep.subr.bf16.mxu1 %v10550_v18 }
 0x17b   : > { %3907 = vmatpush2.bf16.msra.mxu0 %v10545_v9 }
 0x17c   : > { %3948 = vmatpush2.bf16.msra.mxu1 %v10548_v10  ;;  %3908 = vmatprep.subr.bf16.mxu0 %v10553_v14  ;;  %v10595_v14 = vld [vmem:[%s15062_s1 + $0x8c] ss:$16 sps:$4 sm:$0xff]  }
 0x17d   : > { %3949 = vmatprep.subr.bf16.mxu1 %v10556_v4  ;;  %v10598_v4 = vld [vmem:[%s15062_s1 + $0x28c] ss:$16 sps:$4 sm:$0xff]  }
 0x17f   : > { %3909 = vmatpush2.bf16.msra.mxu0 %v10551_v21  ;;  %v10593_v21 = vld [vmem:[%s15062_s1 + $0x88] ss:$16 sps:$4 sm:$0xff]  }
 0x180   : > { %3950 = vmatpush2.bf16.msra.mxu1 %v10554_v22  ;;  %3910 = vmatprep.subr.bf16.mxu0 %v10559_v25  ;;  %v10596_v22 = vld [vmem:[%s15062_s1 + $0x288] ss:$16 sps:$4 sm:$0xff]   ;;  %v10601_v25 = vld [vmem:[%s15062_s1 + $0x6c] ss:$16 sps:$4 sm:$0xff]  }
 0x181   : > { %3951 = vmatprep.subr.bf16.mxu1 %v10562_v23  ;;  %v10604_v23 = vld [vmem:[%s15062_s1 + $0x26c] ss:$16 sps:$4 sm:$0xff]  }
 0x183   : > { %3911 = vmatpush2.bf16.msra.mxu0 %v10557_v24  ;;  %v10599_v24 = vld [vmem:[%s15062_s1 + $0x68] ss:$16 sps:$4 sm:$0xff]  }
 0x184   : > { %3952 = vmatpush2.bf16.msra.mxu1 %v10560_v26  ;;  %3912 = vmatprep.subr.bf16.mxu0 %v10565_v27  ;;  %v10602_v26 = vld [vmem:[%s15062_s1 + $0x268] ss:$16 sps:$4 sm:$0xff]   ;;  %v10607_v27 = vld [vmem:[%s15062_s1 + $0x4c] ss:$16 sps:$4 sm:$0xff]  }
 0x185   : > { %3953 = vmatprep.subr.bf16.mxu1 %v10568_v15  ;;  %v10610_v15 = vld [vmem:[%s15062_s1 + $0x24c] ss:$16 sps:$4 sm:$0xff]  }
 0x187   : > { %3913 = vmatpush2.bf16.msra.mxu0 %v10563_v20  ;;  %v10605_v20 = vld [vmem:[%s15062_s1 + $0x48] ss:$16 sps:$4 sm:$0xff]  }
 0x188   : > { %3954 = vmatpush2.bf16.msra.mxu1 %v10566_v28  ;;  %3914 = vmatprep.subr.bf16.mxu0 %v10571_v29  ;;  %v10608_v28 = vld [vmem:[%s15062_s1 + $0x248] ss:$16 sps:$4 sm:$0xff]   ;;  %v10613_v29 = vld [vmem:[%s15062_s1 + $0x2c] ss:$16 sps:$4 sm:$0xff]  }
 0x189   : > { %3955 = vmatprep.subr.bf16.mxu1 %v10574_v30  ;;  %v10616_v30 = vld [vmem:[%s15062_s1 + $0x22c] ss:$16 sps:$4 sm:$0xff]  }
 0x18b   : > { %3915 = vmatpush2.bf16.msra.mxu0 %v10569_v31  ;;  %v10611_v31 = vld [vmem:[%s15062_s1 + $0x28] ss:$16 sps:$4 sm:$0xff]  }
 0x18c   : > { %3956 = vmatpush2.bf16.msra.mxu1 %v10572_v32  ;;  %3966 = vmatprep.subr.bf16.mxu0 %v10577_v33  ;;  %v10614_v32 = vld [vmem:[%s15062_s1 + $0x228] ss:$16 sps:$4 sm:$0xff]   ;;  %v10619_v33 = vld [vmem:[%s15062_s1 + $0xc] ss:$16 sps:$4 sm:$0xff]  }
 0x18d   : > { %4007 = vmatprep.subr.bf16.mxu1 %v10580_v1  ;;  %v10622_v1 = vld [vmem:[%s15062_s1 + $0x20c] ss:$16 sps:$4 sm:$0xff]  }
 0x18e   : > { %v2384_v39 = vpop.f32.mrf.mxu0  ;;  %3917 = vmatmul.mubr.bf16.vlgmr.msra.gmra.mxu0 %v12065_v41 }
 0x18f   : > { %v2425_v40 = vpop.f32.mrf.mxu1  ;;  %3958 = vmatmul.mubr.bf16.vlgmr.msra.gmra.mxu1 %v12069_v42  ;;  %3967 = vmatpush1.bf16.msra.mxu0 %v10575_v2  ;;  %v10617_v2 = vld [vmem:[%s15062_s1 + $0x8] ss:$16 sps:$4 sm:$0xff]  }
 0x190   : > { %v12937_v43 = vadd.f32 %v2425_v40, %v2384_v39  ;;  %4008 = vmatpush1.bf16.msra.mxu1 %v10578_v34  ;;  %v2386_v44 = vpop.f32.mrf.mxu0  ;;  %3968 = vmatprep.subr.bf16.mxu0 %v10583_v35  ;;  %v10620_v34 = vld [vmem:[%s15062_s1 + $0x208] ss:$16 sps:$4 sm:$0xff]   ;;  %v10625_v35 = vld [vmem:[%s15062_s1 + $0x1ec] ss:$16 sps:$4 sm:$0xff]  }
 0x191   : > { %v2427_v45 = vpop.f32.mrf.mxu1  ;;  %4009 = vmatprep.subr.bf16.mxu1 %v10586_v36  ;;  %3998 = vmatprep.mubr.bf16.mxu0 %v11773_v49  ;;  %v10628_v36 = vld [vmem:[%s15062_s1 + $0x3ec] ss:$16 sps:$4 sm:$0xff]  }
 0x192   : > { %v12945_v52 = vadd.f32 %v2427_v45, %v2386_v44  ;;  %4039 = vmatprep.mubr.bf16.mxu1 %v11782_v53  ;;  %v2388_v50 = vpop.f32.mrf.mxu0  ;;  %v10631_v39 = vld [vmem:[%s15062_s1 + $0x1cc] ss:$16 sps:$4 sm:$0xff]   ;;  %v10629_v44 = vld [vmem:[%s15062_s1 + $0x1c8] ss:$16 sps:$4 sm:$0xff]  }
 0x193   : > { %v2429_v18 = vpop.f32.mrf.mxu1  ;;  %3969 = vmatpush1.bf16.msra.mxu0 %v10581_v37  ;;  %v10623_v37 = vld [vmem:[%s15062_s1 + $0x1e8] ss:$16 sps:$4 sm:$0xff]   ;;  %v10634_v40 = vld [vmem:[%s15062_s1 + $0x3cc] ss:$16 sps:$4 sm:$0xff]  }
 0x194   : > { %4010 = vmatpush1.bf16.msra.mxu1 %v10584_v38  ;;  %v2389_v9 = vpop.f32.mrf.mxu0  ;;  %3970 = vmatprep.subr.bf16.mxu0 %v10589_v46  ;;  %v10626_v38 = vld [vmem:[%s15062_s1 + $0x3e8] ss:$16 sps:$4 sm:$0xff]   ;;  %v10637_v46 = vld [vmem:[%s15062_s1 + $0x1ac] ss:$16 sps:$4 sm:$0xff]  }
 0x195   : > { %v2430_v10 = vpop.f32.mrf.mxu1  ;;  %4011 = vmatprep.subr.bf16.mxu1 %v10592_v51  ;;  %v10632_v45 = vld [vmem:[%s15062_s1 + $0x3c8] ss:$16 sps:$4 sm:$0xff]   ;;  %v10640_v51 = vld [vmem:[%s15062_s1 + $0x3ac] ss:$16 sps:$4 sm:$0xff]  }
 0x196   : > { %v10643_v50 = vld [vmem:[%s15062_s1 + $0x18c] ss:$16 sps:$4 sm:$0xff]   ;;  %v10641_v9 = vld [vmem:[%s15062_s1 + $0x188] ss:$16 sps:$4 sm:$0xff]  }
 0x197   : > { %3971 = vmatpush1.bf16.msra.mxu0 %v10587_v54  ;;  %v10635_v54 = vld [vmem:[%s15062_s1 + $0x1a8] ss:$16 sps:$4 sm:$0xff]   ;;  %v10646_v18 = vld [vmem:[%s15062_s1 + $0x38c] ss:$16 sps:$4 sm:$0xff]  }
 0x198   : > { %4012 = vmatpush1.bf16.msra.mxu1 %v10590_v16  ;;  %3972 = vmatprep.subr.bf16.mxu0 %v10595_v14  ;;  %v10638_v16 = vld [vmem:[%s15062_s1 + $0x3a8] ss:$16 sps:$4 sm:$0xff]   ;;  %v10649_v14 = vld [vmem:[%s15062_s1 + $0x16c] ss:$16 sps:$4 sm:$0xff]  }
 0x199   : > { %4013 = vmatprep.subr.bf16.mxu1 %v10598_v4  ;;  %v10644_v10 = vld [vmem:[%s15062_s1 + $0x388] ss:$16 sps:$4 sm:$0xff]   ;;  %v10652_v4 = vld [vmem:[%s15062_s1 + $0x36c] ss:$16 sps:$4 sm:$0xff]  }
 0x19b   : > { %3973 = vmatpush1.bf16.msra.mxu0 %v10593_v21  ;;  %v10647_v21 = vld [vmem:[%s15062_s1 + $0x168] ss:$16 sps:$4 sm:$0xff]  }
 0x19c   : > { %4014 = vmatpush1.bf16.msra.mxu1 %v10596_v22  ;;  %3974 = vmatprep.subr.bf16.mxu0 %v10601_v25  ;;  %v10650_v22 = vld [vmem:[%s15062_s1 + $0x368] ss:$16 sps:$4 sm:$0xff]   ;;  %v10655_v25 = vld [vmem:[%s15062_s1 + $0x14c] ss:$16 sps:$4 sm:$0xff]  }
 0x19d   : > { %4015 = vmatprep.subr.bf16.mxu1 %v10604_v23  ;;  %v10658_v23 = vld [vmem:[%s15062_s1 + $0x34c] ss:$16 sps:$4 sm:$0xff]  }
 0x19f   : > { %3975 = vmatpush1.bf16.msra.mxu0 %v10599_v24  ;;  %v10653_v24 = vld [vmem:[%s15062_s1 + $0x148] ss:$16 sps:$4 sm:$0xff]  }
 0x1a0   : > { %4016 = vmatpush1.bf16.msra.mxu1 %v10602_v26  ;;  %3976 = vmatprep.subr.bf16.mxu0 %v10607_v27  ;;  %v10656_v26 = vld [vmem:[%s15062_s1 + $0x348] ss:$16 sps:$4 sm:$0xff]   ;;  %v10661_v27 = vld [vmem:[%s15062_s1 + $0x12c] ss:$16 sps:$4 sm:$0xff]  }
 0x1a1   : > { %4017 = vmatprep.subr.bf16.mxu1 %v10610_v15  ;;  %v10664_v15 = vld [vmem:[%s15062_s1 + $0x32c] ss:$16 sps:$4 sm:$0xff]  }
 0x1a3   : > { %3977 = vmatpush1.bf16.msra.mxu0 %v10605_v20  ;;  %v10659_v20 = vld [vmem:[%s15062_s1 + $0x128] ss:$16 sps:$4 sm:$0xff]  }
 0x1a4   : > { %4018 = vmatpush1.bf16.msra.mxu1 %v10608_v28  ;;  %3978 = vmatprep.subr.bf16.mxu0 %v10613_v29  ;;  %v10662_v28 = vld [vmem:[%s15062_s1 + $0x328] ss:$16 sps:$4 sm:$0xff]   ;;  %v10667_v29 = vld [vmem:[%s15062_s1 + $0x10c] ss:$16 sps:$4 sm:$0xff]  }
 0x1a5   : > { %4019 = vmatprep.subr.bf16.mxu1 %v10616_v30  ;;  %v10670_v30 = vld [vmem:[%s15062_s1 + $0x30c] ss:$16 sps:$4 sm:$0xff]  }
 0x1a7   : > { %3979 = vmatpush1.bf16.msra.mxu0 %v10611_v31  ;;  %v10665_v31 = vld [vmem:[%s15062_s1 + $0x108] ss:$16 sps:$4 sm:$0xff]  }
 0x1a8   : > { %4020 = vmatpush1.bf16.msra.mxu1 %v10614_v32  ;;  %3980 = vmatprep.subr.bf16.mxu0 %v10619_v33  ;;  %v10668_v32 = vld [vmem:[%s15062_s1 + $0x308] ss:$16 sps:$4 sm:$0xff]   ;;  %v10673_v33 = vld [vmem:[%s15062_s1 + $0x4ec] ss:$16 sps:$4 sm:$0xff]  }
 0x1a9   : > { %4021 = vmatprep.subr.bf16.mxu1 %v10622_v1  ;;  %v10676_v1 = vld [vmem:[%s15062_s1 + $0x6ec] ss:$16 sps:$4 sm:$0xff]  }
 0x1ab   : > { %3981 = vmatpush1.bf16.msra.mxu0 %v10617_v2  ;;  %v10671_v2 = vld [vmem:[%s15062_s1 + $0x4e8] ss:$16 sps:$4 sm:$0xff]  }
 0x1ac   : > { %4022 = vmatpush1.bf16.msra.mxu1 %v10620_v34  ;;  %3982 = vmatprep.subr.bf16.mxu0 %v10625_v35  ;;  %v10674_v34 = vld [vmem:[%s15062_s1 + $0x6e8] ss:$16 sps:$4 sm:$0xff]   ;;  %v10679_v35 = vld [vmem:[%s15062_s1 + $0x4cc] ss:$16 sps:$4 sm:$0xff]  }
 0x1ad   : > { %4023 = vmatprep.subr.bf16.mxu1 %v10628_v36  ;;  %v10682_v36 = vld [vmem:[%s15062_s1 + $0x6cc] ss:$16 sps:$4 sm:$0xff]  }
 0x1af   : > { %3983 = vmatpush2.bf16.msra.mxu0 %v10623_v37  ;;  %v10677_v37 = vld [vmem:[%s15062_s1 + $0x4c8] ss:$16 sps:$4 sm:$0xff]  }
 0x1b0   : > { %4024 = vmatpush2.bf16.msra.mxu1 %v10626_v38  ;;  %3984 = vmatprep.subr.bf16.mxu0 %v10631_v39  ;;  %v10680_v38 = vld [vmem:[%s15062_s1 + $0x6c8] ss:$16 sps:$4 sm:$0xff]  }
 0x1b1   : > { %4025 = vmatprep.subr.bf16.mxu1 %v10634_v40 }
 0x1b3   : > { %3985 = vmatpush2.bf16.msra.mxu0 %v10629_v44 }
 0x1b4   : > { %4026 = vmatpush2.bf16.msra.mxu1 %v10632_v45  ;;  %3986 = vmatprep.subr.bf16.mxu0 %v10637_v46 }
 0x1b5   : > { %4027 = vmatprep.subr.bf16.mxu1 %v10640_v51  ;;  %v10685_v51 = vld [vmem:[%s15062_s1 + $0x4ac] ss:$16 sps:$4 sm:$0xff]  }
 0x1b7   : > { %3987 = vmatpush2.bf16.msra.mxu0 %v10635_v54  ;;  %v10688_v54 = vld [vmem:[%s15062_s1 + $0x6ac] ss:$16 sps:$4 sm:$0xff]  }
 0x1b8   : > { %4028 = vmatpush2.bf16.msra.mxu1 %v10638_v16  ;;  %3988 = vmatprep.subr.bf16.mxu0 %v10643_v50 }
 0x1b9   : > { %4029 = vmatprep.subr.bf16.mxu1 %v10646_v18  ;;  %v10686_v18 = vld [vmem:[%s15062_s1 + $0x6a8] ss:$16 sps:$4 sm:$0xff]  }
 0x1bb   : > { %3989 = vmatpush2.bf16.msra.mxu0 %v10641_v9 }
 0x1bc   : > { %4030 = vmatpush2.bf16.msra.mxu1 %v10644_v10  ;;  %3990 = vmatprep.subr.bf16.mxu0 %v10649_v14 }
 0x1bd   : > { %4031 = vmatprep.subr.bf16.mxu1 %v10652_v4 }
 0x1bf   : > { %3991 = vmatpush2.bf16.msra.mxu0 %v10647_v21  ;;  %v10691_v21 = vld [vmem:[%s15062_s1 + $0x48c] ss:$16 sps:$4 sm:$0xff]  }
 0x1c0   : > { %4032 = vmatpush2.bf16.msra.mxu1 %v10650_v22  ;;  %3992 = vmatprep.subr.bf16.mxu0 %v10655_v25  ;;  %v10694_v22 = vld [vmem:[%s15062_s1 + $0x68c] ss:$16 sps:$4 sm:$0xff]   ;;  %v10689_v25 = vld [vmem:[%s15062_s1 + $0x488] ss:$16 sps:$4 sm:$0xff]  }
 0x1c1   : > { %4033 = vmatprep.subr.bf16.mxu1 %v10658_v23  ;;  %v10692_v23 = vld [vmem:[%s15062_s1 + $0x688] ss:$16 sps:$4 sm:$0xff]  }
 0x1c3   : > { %3993 = vmatpush2.bf16.msra.mxu0 %v10653_v24  ;;  %v10697_v24 = vld [vmem:[%s15062_s1 + $0x46c] ss:$16 sps:$4 sm:$0xff]  }
 0x1c4   : > { %4034 = vmatpush2.bf16.msra.mxu1 %v10656_v26  ;;  %3994 = vmatprep.subr.bf16.mxu0 %v10661_v27  ;;  %v10700_v26 = vld [vmem:[%s15062_s1 + $0x66c] ss:$16 sps:$4 sm:$0xff]   ;;  %v10695_v27 = vld [vmem:[%s15062_s1 + $0x468] ss:$16 sps:$4 sm:$0xff]  }
 0x1c5   : > { %4035 = vmatprep.subr.bf16.mxu1 %v10664_v15  ;;  %v10698_v15 = vld [vmem:[%s15062_s1 + $0x668] ss:$16 sps:$4 sm:$0xff]  }
 0x1c7   : > { %3995 = vmatpush2.bf16.msra.mxu0 %v10659_v20  ;;  %v10703_v20 = vld [vmem:[%s15062_s1 + $0x44c] ss:$16 sps:$4 sm:$0xff]  }
 0x1c8   : > { %4036 = vmatpush2.bf16.msra.mxu1 %v10662_v28  ;;  %3996 = vmatprep.subr.bf16.mxu0 %v10667_v29  ;;  %v10706_v28 = vld [vmem:[%s15062_s1 + $0x64c] ss:$16 sps:$4 sm:$0xff]   ;;  %v10701_v29 = vld [vmem:[%s15062_s1 + $0x448] ss:$16 sps:$4 sm:$0xff]  }
 0x1c9   : > { %4037 = vmatprep.subr.bf16.mxu1 %v10670_v30  ;;  %v10704_v30 = vld [vmem:[%s15062_s1 + $0x648] ss:$16 sps:$4 sm:$0xff]  }
 0x1cb   : > { %3997 = vmatpush2.bf16.msra.mxu0 %v10665_v31  ;;  %v10709_v31 = vld [vmem:[%s15062_s1 + $0x42c] ss:$16 sps:$4 sm:$0xff]  }
 0x1cc   : > { %4038 = vmatpush2.bf16.msra.mxu1 %v10668_v32  ;;  %4048 = vmatprep.subr.bf16.mxu0 %v10673_v33  ;;  %v10712_v32 = vld [vmem:[%s15062_s1 + $0x62c] ss:$16 sps:$4 sm:$0xff]   ;;  %v10707_v33 = vld [vmem:[%s15062_s1 + $0x428] ss:$16 sps:$4 sm:$0xff]  }
 0x1cd   : > { %4089 = vmatprep.subr.bf16.mxu1 %v10676_v1  ;;  %v10710_v1 = vld [vmem:[%s15062_s1 + $0x628] ss:$16 sps:$4 sm:$0xff]  }
 0x1ce   : > { %v2466_v39 = vpop.f32.mrf.mxu0  ;;  %3999 = vmatmul.mubr.bf16.vlgmr.msra.gmra.mxu0 %v11821_v5 }
 0x1cf   : > { %v2507_v40 = vpop.f32.mrf.mxu1  ;;  %4040 = vmatmul.mubr.bf16.vlgmr.msra.gmra.mxu1 %v11824_v6  ;;  %v2467_v44 = vadd.f32 %v2466_v39, %v12937_v43  ;;  %4049 = vmatpush1.bf16.msra.mxu0 %v10671_v2  ;;  %v10683_v43 = vld [vmem:[%s15062_s1 + $0x4a8] ss:$16 sps:$4 sm:$0xff]   ;;  %v10715_v2 = vld [vmem:[%s15062_s1 + $0x40c] ss:$16 sps:$4 sm:$0xff]  }
 0x1d0   : > { %4090 = vmatpush1.bf16.msra.mxu1 %v10674_v34  ;;  %v2468_v45 = vpop.f32.mrf.mxu0  ;;  %4050 = vmatprep.subr.bf16.mxu0 %v10679_v35  ;;  %v10718_v34 = vld [vmem:[%s15062_s1 + $0x60c] ss:$16 sps:$4 sm:$0xff]   ;;  %v10713_v35 = vld [vmem:[%s15062_s1 + $0x408] ss:$16 sps:$4 sm:$0xff]  }
 0x1d1   : > { %v2509_v46 = vpop.f32.mrf.mxu1  ;;  %4091 = vmatprep.subr.bf16.mxu1 %v10682_v36  ;;  %v13144_v16 = vadd.f32 %v2507_v40, %v2467_v44  ;;  %v2469_v50 = vadd.f32 %v2468_v45, %v12945_v52  ;;  %4080 = vmatprep.mubr.bf16.mxu0 %v11967_v61  ;;  %v10716_v36 = vld [vmem:[%s15062_s1 + $0x608] ss:$16 sps:$4 sm:$0xff]   ;;  %v10727_v44 = vld [vmem:[%s15062_s1 + $0x5cc] ss:$16 sps:$4 sm:$0xff]  }
 0x1d2   : > { %4121 = vmatprep.mubr.bf16.mxu1 %v11971_v62  ;;  %v2470_v9 = vpop.f32.mrf.mxu0  ;;  %v10719_v39 = vld [vmem:[%s15062_s1 + $0x5e8] ss:$16 sps:$4 sm:$0xff]   ;;  %v10730_v45 = vld [vmem:[%s15062_s1 + $0x7cc] ss:$16 sps:$4 sm:$0xff]  }
 0x1d3   : > { %v2511_v10 = vpop.f32.mrf.mxu1  ;;  %v13155_v14 = vadd.f32 %v2509_v46, %v2469_v50  ;;  %4051 = vmatpush1.bf16.msra.mxu0 %v10677_v37  ;;  %v10721_v37 = vld [vmem:[%s15062_s1 + $0x5ec] ss:$16 sps:$4 sm:$0xff]   ;;  %v10722_v40 = vld [vmem:[%s15062_s1 + $0x7e8] ss:$16 sps:$4 sm:$0xff]  }
 0x1d4   : > { %4092 = vmatpush1.bf16.msra.mxu1 %v10680_v38  ;;  %v2471_v4 = vpop.f32.mrf.mxu0  ;;  %4052 = vmatprep.subr.bf16.mxu0 %v10685_v51  ;;  %v10724_v38 = vld [vmem:[%s15062_s1 + $0x7ec] ss:$16 sps:$4 sm:$0xff]   ;;  %v10725_v46 = vld [vmem:[%s15062_s1 + $0x5c8] ss:$16 sps:$4 sm:$0xff]  }
 0x1d5   : > { %v2512_v52 = vpop.f32.mrf.mxu1  ;;  %4093 = vmatprep.subr.bf16.mxu1 %v10688_v54  ;;  %v10728_v51 = vld [vmem:[%s15062_s1 + $0x7c8] ss:$16 sps:$4 sm:$0xff]   ;;  %v10733_v54 = vld [vmem:[%s15062_s1 + $0x5ac] ss:$16 sps:$4 sm:$0xff]  }
 0x1d6   : > { %v10736_v50 = vld [vmem:[%s15062_s1 + $0x7ac] ss:$16 sps:$4 sm:$0xff]   ;;  %v10737_v4 = vld [vmem:[%s15062_s1 + $0x588] ss:$16 sps:$4 sm:$0xff]  }
 0x1d7   : > { %4053 = vmatpush1.bf16.msra.mxu0 %v10683_v43  ;;  %v10731_v43 = vld [vmem:[%s15062_s1 + $0x5a8] ss:$16 sps:$4 sm:$0xff]   ;;  %v10739_v9 = vld [vmem:[%s15062_s1 + $0x58c] ss:$16 sps:$4 sm:$0xff]  }
 0x1d8   : > { %4094 = vmatpush1.bf16.msra.mxu1 %v10686_v18  ;;  %4054 = vmatprep.subr.bf16.mxu0 %v10691_v21  ;;  %v10734_v18 = vld [vmem:[%s15062_s1 + $0x7a8] ss:$16 sps:$4 sm:$0xff]   ;;  %v10742_v10 = vld [vmem:[%s15062_s1 + $0x78c] ss:$16 sps:$4 sm:$0xff]  }
 0x1d9   : > { %4095 = vmatprep.subr.bf16.mxu1 %v10694_v22  ;;  %v10740_v52 = vld [vmem:[%s15062_s1 + $0x788] ss:$16 sps:$4 sm:$0xff]   ;;  %v10745_v21 = vld [vmem:[%s15062_s1 + $0x56c] ss:$16 sps:$4 sm:$0xff]  }
 0x1da   : > { %v10748_v22 = vld [vmem:[%s15062_s1 + $0x76c] ss:$16 sps:$4 sm:$0xff]  }
 0x1db   : > { %4055 = vmatpush1.bf16.msra.mxu0 %v10689_v25  ;;  %v10743_v25 = vld [vmem:[%s15062_s1 + $0x568] ss:$16 sps:$4 sm:$0xff]  }
 0x1dc   : > { %4096 = vmatpush1.bf16.msra.mxu1 %v10692_v23  ;;  %4056 = vmatprep.subr.bf16.mxu0 %v10697_v24  ;;  %v10746_v23 = vld [vmem:[%s15062_s1 + $0x768] ss:$16 sps:$4 sm:$0xff]   ;;  %v10751_v24 = vld [vmem:[%s15062_s1 + $0x54c] ss:$16 sps:$4 sm:$0xff]  }
 0x1dd   : > { %4097 = vmatprep.subr.bf16.mxu1 %v10700_v26  ;;  %v10754_v26 = vld [vmem:[%s15062_s1 + $0x74c] ss:$16 sps:$4 sm:$0xff]  }
 0x1df   : > { %4057 = vmatpush1.bf16.msra.mxu0 %v10695_v27  ;;  %v10749_v27 = vld [vmem:[%s15062_s1 + $0x548] ss:$16 sps:$4 sm:$0xff]  }
 0x1e0   : > { %4098 = vmatpush1.bf16.msra.mxu1 %v10698_v15  ;;  %4058 = vmatprep.subr.bf16.mxu0 %v10703_v20  ;;  %v10752_v15 = vld [vmem:[%s15062_s1 + $0x748] ss:$16 sps:$4 sm:$0xff]   ;;  %v10757_v20 = vld [vmem:[%s15062_s1 + $0x52c] ss:$16 sps:$4 sm:$0xff]  }
 0x1e1   : > { %4099 = vmatprep.subr.bf16.mxu1 %v10706_v28  ;;  %v10760_v28 = vld [vmem:[%s15062_s1 + $0x72c] ss:$16 sps:$4 sm:$0xff]  }
 0x1e3   : > { %4059 = vmatpush1.bf16.msra.mxu0 %v10701_v29  ;;  %v10755_v29 = vld [vmem:[%s15062_s1 + $0x528] ss:$16 sps:$4 sm:$0xff]  }
 0x1e4   : > { %4100 = vmatpush1.bf16.msra.mxu1 %v10704_v30  ;;  %4060 = vmatprep.subr.bf16.mxu0 %v10709_v31  ;;  %v10758_v30 = vld [vmem:[%s15062_s1 + $0x728] ss:$16 sps:$4 sm:$0xff]   ;;  %v10763_v31 = vld [vmem:[%s15062_s1 + $0x50c] ss:$16 sps:$4 sm:$0xff]  }
 0x1e5   : > { %4101 = vmatprep.subr.bf16.mxu1 %v10712_v32  ;;  %v10766_v32 = vld [vmem:[%s15062_s1 + $0x70c] ss:$16 sps:$4 sm:$0xff]  }
 0x1e7   : > { %4061 = vmatpush1.bf16.msra.mxu0 %v10707_v33  ;;  %v10761_v33 = vld [vmem:[%s15062_s1 + $0x508] ss:$16 sps:$4 sm:$0xff]  }
 0x1e8   : > { %4102 = vmatpush1.bf16.msra.mxu1 %v10710_v1  ;;  %4062 = vmatprep.subr.bf16.mxu0 %v10715_v2  ;;  %v10764_v1 = vld [vmem:[%s15062_s1 + $0x708] ss:$16 sps:$4 sm:$0xff]   ;;  %v10769_v2 = vld [vmem:[%s15062_s1 + $0x10e4] ss:$16 sps:$4 sm:$0xff]  }
 0x1e9   : > { %4103 = vmatprep.subr.bf16.mxu1 %v10718_v34  ;;  %v10772_v34 = vld [vmem:[%s15062_s1 + $0x12e4] ss:$16 sps:$4 sm:$0xff]  }
 0x1eb   : > { %4063 = vmatpush1.bf16.msra.mxu0 %v10713_v35  ;;  %v10767_v35 = vld [vmem:[%s15062_s1 + $0x10e0] ss:$16 sps:$4 sm:$0xff]  }
 0x1ec   : > { %4104 = vmatpush1.bf16.msra.mxu1 %v10716_v36  ;;  %4064 = vmatprep.subr.bf16.mxu0 %v10721_v37  ;;  %v10770_v36 = vld [vmem:[%s15062_s1 + $0x12e0] ss:$16 sps:$4 sm:$0xff]   ;;  %v10775_v37 = vld [vmem:[%s15062_s1 + $0x10c4] ss:$16 sps:$4 sm:$0xff]  }
 0x1ed   : > { %4105 = vmatprep.subr.bf16.mxu1 %v10724_v38  ;;  %v10778_v38 = vld [vmem:[%s15062_s1 + $0x12c4] ss:$16 sps:$4 sm:$0xff]  }
 0x1ef   : > { %4065 = vmatpush2.bf16.msra.mxu0 %v10719_v39  ;;  %v10773_v39 = vld [vmem:[%s15062_s1 + $0x10c0] ss:$16 sps:$4 sm:$0xff]  }
 0x1f0   : > { %4106 = vmatpush2.bf16.msra.mxu1 %v10722_v40  ;;  %4066 = vmatprep.subr.bf16.mxu0 %v10727_v44  ;;  %v10776_v40 = vld [vmem:[%s15062_s1 + $0x12c0] ss:$16 sps:$4 sm:$0xff]   ;;  %v4388_v44 = vrot.slane %v11773_v49, 1  ;;  %v11159_v49 = vld [vmem:[%s15062_s1 + $0x18c4] ss:$16 sps:$4 sm:$0xff]  }
 0x1f1   : > { %4107 = vmatprep.subr.bf16.mxu1 %v10730_v45  ;;  %v4390_v45 = vrot.slane %v11782_v53, 1  ;;  %v11162_v53 = vld [vmem:[%s15062_s1 + $0x1ac4] ss:$16 sps:$4 sm:$0xff]  }
 0x1f3   : > { %4067 = vmatpush2.bf16.msra.mxu0 %v10725_v46 }
 0x1f4   : > { %4108 = vmatpush2.bf16.msra.mxu1 %v10728_v51  ;;  %4068 = vmatprep.subr.bf16.mxu0 %v10733_v54 }
 0x1f5   : > { %4109 = vmatprep.subr.bf16.mxu1 %v10736_v50 }
 0x1f7   : > { %4069 = vmatpush2.bf16.msra.mxu0 %v10731_v43 }
 0x1f8   : > { %4110 = vmatpush2.bf16.msra.mxu1 %v10734_v18  ;;  %4070 = vmatprep.subr.bf16.mxu0 %v10739_v9  ;;  %v10781_v18 = vld [vmem:[%s15062_s1 + $0x10a4] ss:$16 sps:$4 sm:$0xff]  }
 0x1f9   : > { %4111 = vmatprep.subr.bf16.mxu1 %v10742_v10  ;;  %v10784_v9 = vld [vmem:[%s15062_s1 + $0x12a4] ss:$16 sps:$4 sm:$0xff]  }
 0x1fb   : > { %4071 = vmatpush2.bf16.msra.mxu0 %v10737_v4 }
 0x1fc   : > { %4112 = vmatpush2.bf16.msra.mxu1 %v10740_v52  ;;  %4072 = vmatprep.subr.bf16.mxu0 %v10745_v21  ;;  %v10782_v52 = vld [vmem:[%s15062_s1 + $0x12a0] ss:$16 sps:$4 sm:$0xff]  }
 0x1fd   : > { %4113 = vmatprep.subr.bf16.mxu1 %v10748_v22 }
 0x1ff   : > { %4073 = vmatpush2.bf16.msra.mxu0 %v10743_v25 }
 0x200   : > { %4114 = vmatpush2.bf16.msra.mxu1 %v10746_v23  ;;  %4074 = vmatprep.subr.bf16.mxu0 %v10751_v24  ;;  %v10787_v24 = vld [vmem:[%s15062_s1 + $0x1084] ss:$16 sps:$4 sm:$0xff]  }
 0x201   : > { %4115 = vmatprep.subr.bf16.mxu1 %v10754_v26  ;;  %v10790_v26 = vld [vmem:[%s15062_s1 + $0x1284] ss:$16 sps:$4 sm:$0xff]  }
 0x203   : > { %4075 = vmatpush2.bf16.msra.mxu0 %v10749_v27  ;;  %v10785_v27 = vld [vmem:[%s15062_s1 + $0x1080] ss:$16 sps:$4 sm:$0xff]  }
 0x204   : > { %4116 = vmatpush2.bf16.msra.mxu1 %v10752_v15  ;;  %4076 = vmatprep.subr.bf16.mxu0 %v10757_v20  ;;  %v10788_v15 = vld [vmem:[%s15062_s1 + $0x1280] ss:$16 sps:$4 sm:$0xff]   ;;  %v10793_v20 = vld [vmem:[%s15062_s1 + $0x1064] ss:$16 sps:$4 sm:$0xff]  }
 0x205   : > { %4117 = vmatprep.subr.bf16.mxu1 %v10760_v28  ;;  %v10796_v28 = vld [vmem:[%s15062_s1 + $0x1264] ss:$16 sps:$4 sm:$0xff]  }
 0x207   : > { %4077 = vmatpush2.bf16.msra.mxu0 %v10755_v29  ;;  %v10791_v29 = vld [vmem:[%s15062_s1 + $0x1060] ss:$16 sps:$4 sm:$0xff]  }
 0x208   : > { %4118 = vmatpush2.bf16.msra.mxu1 %v10758_v30  ;;  %4078 = vmatprep.subr.bf16.mxu0 %v10763_v31  ;;  %v10794_v30 = vld [vmem:[%s15062_s1 + $0x1260] ss:$16 sps:$4 sm:$0xff]   ;;  %v10799_v31 = vld [vmem:[%s15062_s1 + $0x1044] ss:$16 sps:$4 sm:$0xff]  }
 0x209   : > { %4119 = vmatprep.subr.bf16.mxu1 %v10766_v32  ;;  %v10802_v32 = vld [vmem:[%s15062_s1 + $0x1244] ss:$16 sps:$4 sm:$0xff]  }
 0x20b   : > { %4079 = vmatpush2.bf16.msra.mxu0 %v10761_v33  ;;  %v10797_v33 = vld [vmem:[%s15062_s1 + $0x1040] ss:$16 sps:$4 sm:$0xff]  }
 0x20c   : > { %4120 = vmatpush2.bf16.msra.mxu1 %v10764_v1  ;;  %5683 = vmatprep.subr.bf16.mxu0 %v10769_v2  ;;  %v10800_v1 = vld [vmem:[%s15062_s1 + $0x1240] ss:$16 sps:$4 sm:$0xff]   ;;  %v10805_v2 = vld [vmem:[%s15062_s1 + $0x1024] ss:$16 sps:$4 sm:$0xff]  }
 0x20d   : > { %5724 = vmatprep.subr.bf16.mxu1 %v10772_v34  ;;  %v10808_v34 = vld [vmem:[%s15062_s1 + $0x1224] ss:$16 sps:$4 sm:$0xff]  }
 0x20e   : > { %v3836_v46 = vpop.f32.mrf.mxu0  ;;  %4081 = vmatmul.mubr.bf16.vlgmr.msra.gmra.mxu0 %v12065_v41 }
 0x20f   : > { %v3877_v51 = vpop.f32.mrf.mxu1  ;;  %4122 = vmatmul.mubr.bf16.vlgmr.msra.gmra.mxu1 %v12069_v42  ;;  %v3837_v54 = vadd.f32 %v3836_v46, %v12742_v60  ;;  %5684 = vmatpush1.bf16.msra.mxu0 %v10767_v35  ;;  %v10779_v60 = vld [vmem:[%s15062_s1 + $0x10a0] ss:$16 sps:$4 sm:$0xff]   ;;  %v10817_v46 = vld [vmem:[%s15062_s1 + $0x11e4] ss:$16 sps:$4 sm:$0xff]  }
 0x210   : > { %5725 = vmatpush1.bf16.msra.mxu1 %v10770_v36  ;;  %v3838_v50 = vpop.f32.mrf.mxu0  ;;  %5685 = vmatprep.subr.bf16.mxu0 %v10775_v37  ;;  %v10803_v35 = vld [vmem:[%s15062_s1 + $0x1020] ss:$16 sps:$4 sm:$0xff]   ;;  %v10811_v37 = vld [vmem:[%s15062_s1 + $0x1004] ss:$16 sps:$4 sm:$0xff]  }
 0x211   : > { %v3879_v43 = vpop.f32.mrf.mxu1  ;;  %5726 = vmatprep.subr.bf16.mxu1 %v10778_v38  ;;  %v13348_v10 = vadd.f32 %v3877_v51, %v3837_v54  ;;  %v3839_v4 = vadd.f32 %v3838_v50, %v12753_v13  ;;  %5715 = vmatprep.mubr.bf16.mxu0 %v4388_v44  ;;  %v10806_v36 = vld [vmem:[%s15062_s1 + $0x1220] ss:$16 sps:$4 sm:$0xff]   ;;  %v10814_v38 = vld [vmem:[%s15062_s1 + $0x1204] ss:$16 sps:$4 sm:$0xff]  }
 0x212   : > { %5756 = vmatprep.mubr.bf16.mxu1 %v4390_v45  ;;  %v3840_v21 = vpop.f32.mrf.mxu0  ;;  %v10820_v51 = vld [vmem:[%s15062_s1 + $0x13e4] ss:$16 sps:$4 sm:$0xff]   ;;  %v10815_v54 = vld [vmem:[%s15062_s1 + $0x11e0] ss:$16 sps:$4 sm:$0xff]  }
 0x213   : > { %v3881_v22 = vpop.f32.mrf.mxu1  ;;  %v13361_v25 = vadd.f32 %v3879_v43, %v3839_v4  ;;  %5686 = vmatpush1.bf16.msra.mxu0 %v10773_v39  ;;  %v10809_v39 = vld [vmem:[%s15062_s1 + $0x1000] ss:$16 sps:$4 sm:$0xff]   ;;  %v10823_v43 = vld [vmem:[%s15062_s1 + $0x11c4] ss:$16 sps:$4 sm:$0xff]  }
 0x214   : > { %5727 = vmatpush1.bf16.msra.mxu1 %v10776_v40  ;;  %v3841_v13 = vpop.f32.mrf.mxu0  ;;  %5687 = vmatprep.subr.bf16.mxu0 %v10781_v18  ;;  %v10812_v40 = vld [vmem:[%s15062_s1 + $0x1200] ss:$16 sps:$4 sm:$0xff]   ;;  %v10826_v18 = vld [vmem:[%s15062_s1 + $0x13c4] ss:$16 sps:$4 sm:$0xff]  }
 0x215   : > { %v3882_v23 = vpop.f32.mrf.mxu1  ;;  %5728 = vmatprep.subr.bf16.mxu1 %v10784_v9  ;;  %v10818_v50 = vld [vmem:[%s15062_s1 + $0x13e0] ss:$16 sps:$4 sm:$0xff]   ;;  %v10835_v13 = vld [vmem:[%s15062_s1 + $0x1184] ss:$16 sps:$4 sm:$0xff]  }
 0x216   : > { %v10821_v9 = vld [vmem:[%s15062_s1 + $0x11c0] ss:$16 sps:$4 sm:$0xff]   ;;  %v10838_v23 = vld [vmem:[%s15062_s1 + $0x1384] ss:$16 sps:$4 sm:$0xff]  }
 0x217   : > { %5688 = vmatpush1.bf16.msra.mxu0 %v10779_v60  ;;  %v10824_v4 = vld [vmem:[%s15062_s1 + $0x13c0] ss:$16 sps:$4 sm:$0xff]   ;;  %v10829_v60 = vld [vmem:[%s15062_s1 + $0x11a4] ss:$16 sps:$4 sm:$0xff]  }
 0x218   : > { %5729 = vmatpush1.bf16.msra.mxu1 %v10782_v52  ;;  %5689 = vmatprep.subr.bf16.mxu0 %v10787_v24  ;;  %v10832_v52 = vld [vmem:[%s15062_s1 + $0x13a4] ss:$16 sps:$4 sm:$0xff]   ;;  %v10827_v21 = vld [vmem:[%s15062_s1 + $0x11a0] ss:$16 sps:$4 sm:$0xff]  }
 0x219   : > { %5730 = vmatprep.subr.bf16.mxu1 %v10790_v26  ;;  %v10830_v22 = vld [vmem:[%s15062_s1 + $0x13a0] ss:$16 sps:$4 sm:$0xff]  }
 0x21a   : > { %v10833_v24 = vld [vmem:[%s15062_s1 + $0x1180] ss:$16 sps:$4 sm:$0xff]  }
 0x21b   : > { %5690 = vmatpush1.bf16.msra.mxu0 %v10785_v27  ;;  %v10836_v26 = vld [vmem:[%s15062_s1 + $0x1380] ss:$16 sps:$4 sm:$0xff]   ;;  %v10841_v27 = vld [vmem:[%s15062_s1 + $0x1164] ss:$16 sps:$4 sm:$0xff]  }
 0x21c   : > { %5731 = vmatpush1.bf16.msra.mxu1 %v10788_v15  ;;  %5691 = vmatprep.subr.bf16.mxu0 %v10793_v20  ;;  %v10844_v15 = vld [vmem:[%s15062_s1 + $0x1364] ss:$16 sps:$4 sm:$0xff]   ;;  %v10839_v20 = vld [vmem:[%s15062_s1 + $0x1160] ss:$16 sps:$4 sm:$0xff]  }
 0x21d   : > { %5732 = vmatprep.subr.bf16.mxu1 %v10796_v28  ;;  %v10842_v28 = vld [vmem:[%s15062_s1 + $0x1360] ss:$16 sps:$4 sm:$0xff]  }
 0x21f   : > { %5692 = vmatpush1.bf16.msra.mxu0 %v10791_v29  ;;  %v10847_v29 = vld [vmem:[%s15062_s1 + $0x1144] ss:$16 sps:$4 sm:$0xff]  }
 0x220   : > { %5733 = vmatpush1.bf16.msra.mxu1 %v10794_v30  ;;  %5693 = vmatprep.subr.bf16.mxu0 %v10799_v31  ;;  %v10850_v30 = vld [vmem:[%s15062_s1 + $0x1344] ss:$16 sps:$4 sm:$0xff]   ;;  %v10845_v31 = vld [vmem:[%s15062_s1 + $0x1140] ss:$16 sps:$4 sm:$0xff]  }
 0x221   : > { %5734 = vmatprep.subr.bf16.mxu1 %v10802_v32  ;;  %v10848_v32 = vld [vmem:[%s15062_s1 + $0x1340] ss:$16 sps:$4 sm:$0xff]  }
 0x223   : > { %5694 = vmatpush1.bf16.msra.mxu0 %v10797_v33  ;;  %v10853_v33 = vld [vmem:[%s15062_s1 + $0x1124] ss:$16 sps:$4 sm:$0xff]  }
 0x224   : > { %5735 = vmatpush1.bf16.msra.mxu1 %v10800_v1  ;;  %5695 = vmatprep.subr.bf16.mxu0 %v10805_v2  ;;  %v10856_v1 = vld [vmem:[%s15062_s1 + $0x1324] ss:$16 sps:$4 sm:$0xff]   ;;  %v10851_v2 = vld [vmem:[%s15062_s1 + $0x1120] ss:$16 sps:$4 sm:$0xff]  }
 0x225   : > { %5736 = vmatprep.subr.bf16.mxu1 %v10808_v34  ;;  %v10854_v34 = vld [vmem:[%s15062_s1 + $0x1320] ss:$16 sps:$4 sm:$0xff]  }
 0x227   : > { %5696 = vmatpush1.bf16.msra.mxu0 %v10803_v35  ;;  %v10859_v35 = vld [vmem:[%s15062_s1 + $0x1104] ss:$16 sps:$4 sm:$0xff]  }
 0x228   : > { %5737 = vmatpush1.bf16.msra.mxu1 %v10806_v36  ;;  %5697 = vmatprep.subr.bf16.mxu0 %v10811_v37  ;;  %v10862_v36 = vld [vmem:[%s15062_s1 + $0x1304] ss:$16 sps:$4 sm:$0xff]   ;;  %v10857_v37 = vld [vmem:[%s15062_s1 + $0x1100] ss:$16 sps:$4 sm:$0xff]  }
 0x229   : > { %5738 = vmatprep.subr.bf16.mxu1 %v10814_v38  ;;  %v10860_v38 = vld [vmem:[%s15062_s1 + $0x1300] ss:$16 sps:$4 sm:$0xff]  }
 0x22b   : > { %5698 = vmatpush1.bf16.msra.mxu0 %v10809_v39  ;;  %v10865_v39 = vld [vmem:[%s15062_s1 + $0x14e4] ss:$16 sps:$4 sm:$0xff]  }
 0x22c   : > { %5739 = vmatpush1.bf16.msra.mxu1 %v10812_v40  ;;  %5699 = vmatprep.subr.bf16.mxu0 %v10817_v46  ;;  %v10868_v40 = vld [vmem:[%s15062_s1 + $0x16e4] ss:$16 sps:$4 sm:$0xff]   ;;  %v10863_v46 = vld [vmem:[%s15062_s1 + $0x14e0] ss:$16 sps:$4 sm:$0xff]  }
 0x22d   : > { %5740 = vmatprep.subr.bf16.mxu1 %v10820_v51  ;;  %v10866_v51 = vld [vmem:[%s15062_s1 + $0x16e0] ss:$16 sps:$4 sm:$0xff]  }
 0x22f   : > { %5700 = vmatpush2.bf16.msra.mxu0 %v10815_v54  ;;  %v4387_v54 = vrot.slane %v11821_v5, 1  ;;  %v11249_v5 = vld [vmem:[%s15062_s1 + $0x1ce4] ss:$16 sps:$4 sm:$0xff]  }
 0x230   : > { %5741 = vmatpush2.bf16.msra.mxu1 %v10818_v50  ;;  %5701 = vmatprep.subr.bf16.mxu0 %v10823_v43  ;;  %v4389_v50 = vrot.slane %v11824_v6, 1  ;;  %v10871_v43 = vld [vmem:[%s15062_s1 + $0x14c4] ss:$16 sps:$4 sm:$0xff]  }
 0x231   : > { %5742 = vmatprep.subr.bf16.mxu1 %v10826_v18  ;;  %v10874_v18 = vld [vmem:[%s15062_s1 + $0x16c4] ss:$16 sps:$4 sm:$0xff]  }
 0x232   : > { %v11252_v6 = vld [vmem:[%s15062_s1 + $0x1ee4] ss:$16 sps:$4 sm:$0xff]  }
 0x233   : > { %5702 = vmatpush2.bf16.msra.mxu0 %v10821_v9  ;;  %v10869_v9 = vld [vmem:[%s15062_s1 + $0x14c0] ss:$16 sps:$4 sm:$0xff]  }
 0x234   : > { %5743 = vmatpush2.bf16.msra.mxu1 %v10824_v4  ;;  %5703 = vmatprep.subr.bf16.mxu0 %v10829_v60  ;;  %v10872_v4 = vld [vmem:[%s15062_s1 + $0x16c0] ss:$16 sps:$4 sm:$0xff]   ;;  %v4392_v60 = vrot.slane %v11967_v61, 1 }
 0x235   : > { %5744 = vmatprep.subr.bf16.mxu1 %v10832_v52  ;;  %v4394_v52 = vrot.slane %v11971_v62, 1  ;;  %v11250_v61 = vld [vmem:[%s15062_s1 + $0x1ee0] ss:$16 sps:$4 sm:$0xff]   ;;  %v11255_v62 = vld [vmem:[%s15062_s1 + $0x1cc4] ss:$16 sps:$4 sm:$0xff]  }
 0x237   : > { %5704 = vmatpush2.bf16.msra.mxu0 %v10827_v21 }
 0x238   : > { %5745 = vmatpush2.bf16.msra.mxu1 %v10830_v22  ;;  %5705 = vmatprep.subr.bf16.mxu0 %v10835_v13 }
 0x239   : > { %5746 = vmatprep.subr.bf16.mxu1 %v10838_v23 }
 0x23b   : > { %5706 = vmatpush2.bf16.msra.mxu0 %v10833_v24 }
 0x23c   : > { %5747 = vmatpush2.bf16.msra.mxu1 %v10836_v26  ;;  %5707 = vmatprep.subr.bf16.mxu0 %v10841_v27  ;;  %v10877_v26 = vld [vmem:[%s15062_s1 + $0x14a4] ss:$16 sps:$4 sm:$0xff]  }
 0x23d   : > { %5748 = vmatprep.subr.bf16.mxu1 %v10844_v15  ;;  %v10880_v27 = vld [vmem:[%s15062_s1 + $0x16a4] ss:$16 sps:$4 sm:$0xff]  }
 0x23f   : > { %5708 = vmatpush2.bf16.msra.mxu0 %v10839_v20 }
 0x240   : > { %5749 = vmatpush2.bf16.msra.mxu1 %v10842_v28  ;;  %5709 = vmatprep.subr.bf16.mxu0 %v10847_v29 }
 0x241   : > { %5750 = vmatprep.subr.bf16.mxu1 %v10850_v30  ;;  %v10875_v30 = vld [vmem:[%s15062_s1 + $0x14a0] ss:$16 sps:$4 sm:$0xff]  }
 0x243   : > { %5710 = vmatpush2.bf16.msra.mxu0 %v10845_v31 }
 0x244   : > { %5751 = vmatpush2.bf16.msra.mxu1 %v10848_v32  ;;  %5711 = vmatprep.subr.bf16.mxu0 %v10853_v33  ;;  %v10883_v33 = vld [vmem:[%s15062_s1 + $0x1484] ss:$16 sps:$4 sm:$0xff]  }
 0x245   : > { %5752 = vmatprep.subr.bf16.mxu1 %v10856_v1  ;;  %v10886_v1 = vld [vmem:[%s15062_s1 + $0x1684] ss:$16 sps:$4 sm:$0xff]  }
 0x247   : > { %5712 = vmatpush2.bf16.msra.mxu0 %v10851_v2  ;;  %v10881_v2 = vld [vmem:[%s15062_s1 + $0x1480] ss:$16 sps:$4 sm:$0xff]  }
 0x248   : > { %5753 = vmatpush2.bf16.msra.mxu1 %v10854_v34  ;;  %5713 = vmatprep.subr.bf16.mxu0 %v10859_v35  ;;  %v10884_v34 = vld [vmem:[%s15062_s1 + $0x1680] ss:$16 sps:$4 sm:$0xff]   ;;  %v10889_v35 = vld [vmem:[%s15062_s1 + $0x1464] ss:$16 sps:$4 sm:$0xff]  }
 0x249   : > { %5754 = vmatprep.subr.bf16.mxu1 %v10862_v36  ;;  %v10892_v36 = vld [vmem:[%s15062_s1 + $0x1664] ss:$16 sps:$4 sm:$0xff]  }
 0x24b   : > { %5714 = vmatpush2.bf16.msra.mxu0 %v10857_v37  ;;  %v10887_v37 = vld [vmem:[%s15062_s1 + $0x1460] ss:$16 sps:$4 sm:$0xff]  }
 0x24c   : > { %5755 = vmatpush2.bf16.msra.mxu1 %v10860_v38  ;;  %5765 = vmatprep.subr.bf16.mxu0 %v10865_v39  ;;  %v10890_v38 = vld [vmem:[%s15062_s1 + $0x1660] ss:$16 sps:$4 sm:$0xff]   ;;  %v10895_v39 = vld [vmem:[%s15062_s1 + $0x1444] ss:$16 sps:$4 sm:$0xff]  }
 0x24d   : > { %5806 = vmatprep.subr.bf16.mxu1 %v10868_v40  ;;  %v10898_v40 = vld [vmem:[%s15062_s1 + $0x1644] ss:$16 sps:$4 sm:$0xff]  }
 0x24e   : > { %v3918_v21 = vpop.f32.mrf.mxu0  ;;  %5716 = vmatmul.mubr.bf16.vlgmr.msra.gmra.mxu0 %v4387_v54 }
 0x24f   : > { %v3959_v22 = vpop.f32.mrf.mxu1  ;;  %5757 = vmatmul.mubr.bf16.vlgmr.msra.gmra.mxu1 %v4389_v50  ;;  %v3919_v13 = vadd.f32 %v3918_v21, %v13348_v10  ;;  %5766 = vmatpush1.bf16.msra.mxu0 %v10863_v46  ;;  %v10893_v46 = vld [vmem:[%s15062_s1 + $0x1440] ss:$16 sps:$4 sm:$0xff]   ;;  %v10907_v21 = vld [vmem:[%s15062_s1 + $0x1404] ss:$16 sps:$4 sm:$0xff]  }
 0x250   : > { %5807 = vmatpush1.bf16.msra.mxu1 %v10866_v51  ;;  %v3920_v23 = vpop.f32.mrf.mxu0  ;;  %5767 = vmatprep.subr.bf16.mxu0 %v10871_v43  ;;  %v10896_v51 = vld [vmem:[%s15062_s1 + $0x1640] ss:$16 sps:$4 sm:$0xff]   ;;  %v10901_v43 = vld [vmem:[%s15062_s1 + $0x1424] ss:$16 sps:$4 sm:$0xff]  }
 0x251   : > { %v3961_v24 = vpop.f32.mrf.mxu1  ;;  %5808 = vmatprep.subr.bf16.mxu1 %v10874_v18  ;;  %v13558_v15 = vadd.f32 %v3959_v22, %v3919_v13  ;;  %v3921_v20 = vadd.f32 %v3920_v23, %v13361_v25  ;;  %5797 = vmatprep.mubr.bf16.mxu0 %v4392_v60  ;;  %v10878_v25 = vld [vmem:[%s15062_s1 + $0x16a0] ss:$16 sps:$4 sm:$0xff]   ;;  %v10904_v18 = vld [vmem:[%s15062_s1 + $0x1624] ss:$16 sps:$4 sm:$0xff]  }
 0x252   : > { %5838 = vmatprep.mubr.bf16.mxu1 %v4394_v52  ;;  %v3922_v10 = vpop.f32.mrf.mxu0  ;;  %v10910_v22 = vld [vmem:[%s15062_s1 + $0x1604] ss:$16 sps:$4 sm:$0xff]   ;;  %v10905_v13 = vld [vmem:[%s15062_s1 + $0x1400] ss:$16 sps:$4 sm:$0xff]  }
 0x253   : > { %v3963_v28 = vpop.f32.mrf.mxu1  ;;  %v13565_v29 = vadd.f32 %v3961_v24, %v3921_v20  ;;  %5768 = vmatpush1.bf16.msra.mxu0 %v10869_v9  ;;  %v10899_v9 = vld [vmem:[%s15062_s1 + $0x1420] ss:$16 sps:$4 sm:$0xff]   ;;  %v10913_v24 = vld [vmem:[%s15062_s1 + $0x15e4] ss:$16 sps:$4 sm:$0xff]  }
 0x254   : > { %5809 = vmatpush1.bf16.msra.mxu1 %v10872_v4  ;;  %v3923_v31 = vpop.f32.mrf.mxu0  ;;  %5769 = vmatprep.subr.bf16.mxu0 %v10877_v26  ;;  %v10902_v4 = vld [vmem:[%s15062_s1 + $0x1620] ss:$16 sps:$4 sm:$0xff]   ;;  %v10916_v26 = vld [vmem:[%s15062_s1 + $0x17e4] ss:$16 sps:$4 sm:$0xff]  }
 0x255   : > { %v3964_v32 = vpop.f32.mrf.mxu1  ;;  %5810 = vmatprep.subr.bf16.mxu1 %v10880_v27  ;;  %v10908_v23 = vld [vmem:[%s15062_s1 + $0x1600] ss:$16 sps:$4 sm:$0xff]   ;;  %v10919_v10 = vld [vmem:[%s15062_s1 + $0x15c4] ss:$16 sps:$4 sm:$0xff]  }
 0x256   : > { %v10911_v27 = vld [vmem:[%s15062_s1 + $0x15e0] ss:$16 sps:$4 sm:$0xff]   ;;  %v10922_v28 = vld [vmem:[%s15062_s1 + $0x17c4] ss:$16 sps:$4 sm:$0xff]  }
 0x257   : > { %5770 = vmatpush1.bf16.msra.mxu0 %v10875_v30  ;;  %v10914_v20 = vld [vmem:[%s15062_s1 + $0x17e0] ss:$16 sps:$4 sm:$0xff]   ;;  %v10925_v31 = vld [vmem:[%s15062_s1 + $0x15a4] ss:$16 sps:$4 sm:$0xff]  }
 0x258   : > { %5811 = vmatpush1.bf16.msra.mxu1 %v10878_v25  ;;  %5771 = vmatprep.subr.bf16.mxu0 %v10883_v33  ;;  %v10917_v30 = vld [vmem:[%s15062_s1 + $0x15c0] ss:$16 sps:$4 sm:$0xff]   ;;  %v10928_v32 = vld [vmem:[%s15062_s1 + $0x17a4] ss:$16 sps:$4 sm:$0xff]  }
 0x259   : > { %5812 = vmatprep.subr.bf16.mxu1 %v10886_v1  ;;  %v10920_v25 = vld [vmem:[%s15062_s1 + $0x17c0] ss:$16 sps:$4 sm:$0xff]  }
 0x25a   : > { %v10923_v33 = vld [vmem:[%s15062_s1 + $0x15a0] ss:$16 sps:$4 sm:$0xff]  }
 0x25b   : > { %5772 = vmatpush1.bf16.msra.mxu0 %v10881_v2  ;;  %v10926_v1 = vld [vmem:[%s15062_s1 + $0x17a0] ss:$16 sps:$4 sm:$0xff]   ;;  %v10931_v2 = vld [vmem:[%s15062_s1 + $0x1584] ss:$16 sps:$4 sm:$0xff]  }
 0x25c   : > { %5813 = vmatpush1.bf16.msra.mxu1 %v10884_v34  ;;  %5773 = vmatprep.subr.bf16.mxu0 %v10889_v35  ;;  %v10934_v34 = vld [vmem:[%s15062_s1 + $0x1784] ss:$16 sps:$4 sm:$0xff]   ;;  %v10929_v35 = vld [vmem:[%s15062_s1 + $0x1580] ss:$16 sps:$4 sm:$0xff]  }
 0x25d   : > { %5814 = vmatprep.subr.bf16.mxu1 %v10892_v36  ;;  %v10932_v36 = vld [vmem:[%s15062_s1 + $0x1780] ss:$16 sps:$4 sm:$0xff]  }
 0x25f   : > { %5774 = vmatpush1.bf16.msra.mxu0 %v10887_v37  ;;  %v10937_v37 = vld [vmem:[%s15062_s1 + $0x1564] ss:$16 sps:$4 sm:$0xff]  }
 0x260   : > { %5815 = vmatpush1.bf16.msra.mxu1 %v10890_v38  ;;  %5775 = vmatprep.subr.bf16.mxu0 %v10895_v39  ;;  %v10940_v38 = vld [vmem:[%s15062_s1 + $0x1764] ss:$16 sps:$4 sm:$0xff]   ;;  %v10935_v39 = vld [vmem:[%s15062_s1 + $0x1560] ss:$16 sps:$4 sm:$0xff]  }
 0x261   : > { %5816 = vmatprep.subr.bf16.mxu1 %v10898_v40  ;;  %v10938_v40 = vld [vmem:[%s15062_s1 + $0x1760] ss:$16 sps:$4 sm:$0xff]  }
 0x263   : > { %5776 = vmatpush1.bf16.msra.mxu0 %v10893_v46  ;;  %v10943_v46 = vld [vmem:[%s15062_s1 + $0x1544] ss:$16 sps:$4 sm:$0xff]  }
 0x264   : > { %5817 = vmatpush1.bf16.msra.mxu1 %v10896_v51  ;;  %5777 = vmatprep.subr.bf16.mxu0 %v10901_v43  ;;  %v10946_v51 = vld [vmem:[%s15062_s1 + $0x1744] ss:$16 sps:$4 sm:$0xff]   ;;  %v10941_v43 = vld [vmem:[%s15062_s1 + $0x1540] ss:$16 sps:$4 sm:$0xff]  }
 0x265   : > { %5818 = vmatprep.subr.bf16.mxu1 %v10904_v18  ;;  %v10944_v18 = vld [vmem:[%s15062_s1 + $0x1740] ss:$16 sps:$4 sm:$0xff]  }
 0x267   : > { %5778 = vmatpush1.bf16.msra.mxu0 %v10899_v9  ;;  %v10949_v9 = vld [vmem:[%s15062_s1 + $0x1524] ss:$16 sps:$4 sm:$0xff]  }
 0x268   : > { %5819 = vmatpush1.bf16.msra.mxu1 %v10902_v4  ;;  %5779 = vmatprep.subr.bf16.mxu0 %v10907_v21  ;;  %v10952_v4 = vld [vmem:[%s15062_s1 + $0x1724] ss:$16 sps:$4 sm:$0xff]   ;;  %v10947_v21 = vld [vmem:[%s15062_s1 + $0x1520] ss:$16 sps:$4 sm:$0xff]  }
 0x269   : > { %5820 = vmatprep.subr.bf16.mxu1 %v10910_v22  ;;  %v10950_v22 = vld [vmem:[%s15062_s1 + $0x1720] ss:$16 sps:$4 sm:$0xff]  }
 0x26b   : > { %5780 = vmatpush1.bf16.msra.mxu0 %v10905_v13  ;;  %v10955_v13 = vld [vmem:[%s15062_s1 + $0x1504] ss:$16 sps:$4 sm:$0xff]  }
 0x26c   : > { %5821 = vmatpush1.bf16.msra.mxu1 %v10908_v23  ;;  %5781 = vmatprep.subr.bf16.mxu0 %v10913_v24  ;;  %v10958_v23 = vld [vmem:[%s15062_s1 + $0x1704] ss:$16 sps:$4 sm:$0xff]   ;;  %v10953_v24 = vld [vmem:[%s15062_s1 + $0x1500] ss:$16 sps:$4 sm:$0xff]  }
 0x26d   : > { %5822 = vmatprep.subr.bf16.mxu1 %v10916_v26  ;;  %v10956_v26 = vld [vmem:[%s15062_s1 + $0x1700] ss:$16 sps:$4 sm:$0xff]  }
 0x26f   : > { %5782 = vmatpush2.bf16.msra.mxu0 %v10911_v27  ;;  %v10961_v27 = vld [vmem:[%s15062_s1 + $0x10ec] ss:$16 sps:$4 sm:$0xff]  }
 0x270   : > { %5823 = vmatpush2.bf16.msra.mxu1 %v10914_v20  ;;  %5783 = vmatprep.subr.bf16.mxu0 %v10919_v10  ;;  %v10964_v20 = vld [vmem:[%s15062_s1 + $0x12ec] ss:$16 sps:$4 sm:$0xff]   ;;  %v4391_v10 = vrot.slane %v12065_v41, 1 }
 0x271   : > { %5824 = vmatprep.subr.bf16.mxu1 %v10922_v28  ;;  %v4393_v28 = vrot.slane %v12069_v42, 1  ;;  %v11345_v41 = vld [vmem:[%s15062_s1 + $0x18ec] ss:$16 sps:$4 sm:$0xff]  }
 0x272   : > { %v11348_v42 = vld [vmem:[%s15062_s1 + $0x1aec] ss:$16 sps:$4 sm:$0xff]  }
 0x273   : > { %5784 = vmatpush2.bf16.msra.mxu0 %v10917_v30  ;;  %v10959_v30 = vld [vmem:[%s15062_s1 + $0x10e8] ss:$16 sps:$4 sm:$0xff]  }
 0x274   : > { %5825 = vmatpush2.bf16.msra.mxu1 %v10920_v25  ;;  %5785 = vmatprep.subr.bf16.mxu0 %v10925_v31  ;;  %v10962_v25 = vld [vmem:[%s15062_s1 + $0x12e8] ss:$16 sps:$4 sm:$0xff]   ;;  %v10967_v31 = vld [vmem:[%s15062_s1 + $0x10cc] ss:$16 sps:$4 sm:$0xff]  }
 0x275   : > { %5826 = vmatprep.subr.bf16.mxu1 %v10928_v32  ;;  %v10970_v32 = vld [vmem:[%s15062_s1 + $0x12cc] ss:$16 sps:$4 sm:$0xff]  }
 0x277   : > { %5786 = vmatpush2.bf16.msra.mxu0 %v10923_v33 }
 0x278   : > { %5827 = vmatpush2.bf16.msra.mxu1 %v10926_v1  ;;  %5787 = vmatprep.subr.bf16.mxu0 %v10931_v2 }
 0x279   : > { %5828 = vmatprep.subr.bf16.mxu1 %v10934_v34  ;;  %v10965_v34 = vld [vmem:[%s15062_s1 + $0x10c8] ss:$16 sps:$4 sm:$0xff]  }
 0x27b   : > { %5788 = vmatpush2.bf16.msra.mxu0 %v10929_v35  ;;  %v10968_v35 = vld [vmem:[%s15062_s1 + $0x12c8] ss:$16 sps:$4 sm:$0xff]  }
 0x27c   : > { %5829 = vmatpush2.bf16.msra.mxu1 %v10932_v36  ;;  %5789 = vmatprep.subr.bf16.mxu0 %v10937_v37 }
 0x27d   : > { %5830 = vmatprep.subr.bf16.mxu1 %v10940_v38  ;;  %v10973_v38 = vld [vmem:[%s15062_s1 + $0x10ac] ss:$16 sps:$4 sm:$0xff]  }
 0x27f   : > { %5790 = vmatpush2.bf16.msra.mxu0 %v10935_v39 }
 0x280   : > { %5831 = vmatpush2.bf16.msra.mxu1 %v10938_v40  ;;  %5791 = vmatprep.subr.bf16.mxu0 %v10943_v46 }
 0x281   : > { %5832 = vmatprep.subr.bf16.mxu1 %v10946_v51 }
 0x283   : > { %5792 = vmatpush2.bf16.msra.mxu0 %v10941_v43 }
 0x284   : > { %5833 = vmatpush2.bf16.msra.mxu1 %v10944_v18  ;;  %5793 = vmatprep.subr.bf16.mxu0 %v10949_v9  ;;  %v10971_v18 = vld [vmem:[%s15062_s1 + $0x10a8] ss:$16 sps:$4 sm:$0xff]  }
 0x285   : > { %5834 = vmatprep.subr.bf16.mxu1 %v10952_v4 }
 0x287   : > { %5794 = vmatpush2.bf16.msra.mxu0 %v10947_v21  ;;  %v10977_v21 = vld [vmem:[%s15062_s1 + $0x1088] ss:$16 sps:$4 sm:$0xff]  }
 0x288   : > { %5835 = vmatpush2.bf16.msra.mxu1 %v10950_v22  ;;  %5795 = vmatprep.subr.bf16.mxu0 %v10955_v13  ;;  %v10980_v22 = vld [vmem:[%s15062_s1 + $0x1288] ss:$16 sps:$4 sm:$0xff]   ;;  %v10985_v13 = vld [vmem:[%s15062_s1 + $0x106c] ss:$16 sps:$4 sm:$0xff]  }
 0x289   : > { %5836 = vmatprep.subr.bf16.mxu1 %v10958_v23  ;;  %v10988_v23 = vld [vmem:[%s15062_s1 + $0x126c] ss:$16 sps:$4 sm:$0xff]  }
 0x28b   : > { %5796 = vmatpush2.bf16.msra.mxu0 %v10953_v24  ;;  %v10983_v24 = vld [vmem:[%s15062_s1 + $0x1068] ss:$16 sps:$4 sm:$0xff]  }
 0x28c   : > { %5837 = vmatpush2.bf16.msra.mxu1 %v10956_v26  ;;  %5847 = vmatprep.subr.bf16.mxu0 %v10961_v27  ;;  %v10986_v26 = vld [vmem:[%s15062_s1 + $0x1268] ss:$16 sps:$4 sm:$0xff]   ;;  %v10991_v27 = vld [vmem:[%s15062_s1 + $0x104c] ss:$16 sps:$4 sm:$0xff]  }
 0x28d   : > { %5888 = vmatprep.subr.bf16.mxu1 %v10964_v20  ;;  %v10994_v20 = vld [vmem:[%s15062_s1 + $0x124c] ss:$16 sps:$4 sm:$0xff]  }
 0x28e   : > { %v4000_v33 = vpop.f32.mrf.mxu0  ;;  %5798 = vmatmul.mubr.bf16.vlgmr.msra.gmra.mxu0 %v4391_v10 }
 0x28f   : > { %v4041_v1 = vpop.f32.mrf.mxu1  ;;  %5839 = vmatmul.mubr.bf16.vlgmr.msra.gmra.mxu1 %v4393_v28  ;;  %v4001_v2 = vadd.f32 %v4000_v33, %v13144_v16  ;;  %5848 = vmatpush1.bf16.msra.mxu0 %v10959_v30  ;;  %v10976_v16 = vld [vmem:[%s15062_s1 + $0x12ac] ss:$16 sps:$4 sm:$0xff]   ;;  %v10989_v30 = vld [vmem:[%s15062_s1 + $0x1048] ss:$16 sps:$4 sm:$0xff]  }
 0x290   : > { %5889 = vmatpush1.bf16.msra.mxu1 %v10962_v25  ;;  %v4002_v36 = vpop.f32.mrf.mxu0  ;;  %5849 = vmatprep.subr.bf16.mxu0 %v10967_v31  ;;  %v10992_v25 = vld [vmem:[%s15062_s1 + $0x1248] ss:$16 sps:$4 sm:$0xff]   ;;  %v10997_v31 = vld [vmem:[%s15062_s1 + $0x102c] ss:$16 sps:$4 sm:$0xff]  }
 0x291   : > { %v4043_v37 = vpop.f32.mrf.mxu1  ;;  %5890 = vmatprep.subr.bf16.mxu1 %v10970_v32  ;;  %v13766_v39 = vadd.f32 %v4041_v1, %v4001_v2  ;;  %v4003_v40 = vadd.f32 %v4002_v36, %v13155_v14  ;;  %5879 = vmatprep.mubr.bf16.mxu0 %v4388_v44  ;;  %v10974_v14 = vld [vmem:[%s15062_s1 + $0x12a8] ss:$16 sps:$4 sm:$0xff]   ;;  %v10979_v44 = vld [vmem:[%s15062_s1 + $0x108c] ss:$16 sps:$4 sm:$0xff]  }
 0x292   : > { %5920 = vmatprep.mubr.bf16.mxu1 %v4390_v45  ;;  %v4004_v46 = vpop.f32.mrf.mxu0  ;;  %v10982_v45 = vld [vmem:[%s15062_s1 + $0x128c] ss:$16 sps:$4 sm:$0xff]   ;;  %v10995_v33 = vld [vmem:[%s15062_s1 + $0x1028] ss:$16 sps:$4 sm:$0xff]  }
 0x293   : > { %v4045_v51 = vpop.f32.mrf.mxu1  ;;  %v13773_v43 = vadd.f32 %v4043_v37, %v4003_v40  ;;  %5850 = vmatpush1.bf16.msra.mxu0 %v10965_v34  ;;  %v11000_v32 = vld [vmem:[%s15062_s1 + $0x122c] ss:$16 sps:$4 sm:$0xff]   ;;  %v10998_v1 = vld [vmem:[%s15062_s1 + $0x1228] ss:$16 sps:$4 sm:$0xff]  }
 0x294   : > { %5891 = vmatpush1.bf16.msra.mxu1 %v10968_v35  ;;  %v4005_v9 = vpop.f32.mrf.mxu0  ;;  %5851 = vmatprep.subr.bf16.mxu0 %v10973_v38  ;;  %v11003_v2 = vld [vmem:[%s15062_s1 + $0x100c] ss:$16 sps:$4 sm:$0xff]   ;;  %v11001_v35 = vld [vmem:[%s15062_s1 + $0x1008] ss:$16 sps:$4 sm:$0xff]  }
 0x295   : > { %v4046_v4 = vpop.f32.mrf.mxu1  ;;  %5892 = vmatprep.subr.bf16.mxu1 %v10976_v16  ;;  %v11006_v34 = vld [vmem:[%s15062_s1 + $0x120c] ss:$16 sps:$4 sm:$0xff]   ;;  %v11004_v36 = vld [vmem:[%s15062_s1 + $0x1208] ss:$16 sps:$4 sm:$0xff]  }
 0x296   : > { %v11009_v37 = vld [vmem:[%s15062_s1 + $0x11ec] ss:$16 sps:$4 sm:$0xff]   ;;  %v11007_v16 = vld [vmem:[%s15062_s1 + $0x11e8] ss:$16 sps:$4 sm:$0xff]  }
 0x297   : > { %5852 = vmatpush1.bf16.msra.mxu0 %v10971_v18  ;;  %v11012_v38 = vld [vmem:[%s15062_s1 + $0x13ec] ss:$16 sps:$4 sm:$0xff]   ;;  %v11010_v40 = vld [vmem:[%s15062_s1 + $0x13e8] ss:$16 sps:$4 sm:$0xff]  }
 0x298   : > { %5893 = vmatpush1.bf16.msra.mxu1 %v10974_v14  ;;  %5853 = vmatprep.subr.bf16.mxu0 %v10979_v44  ;;  %v11015_v46 = vld [vmem:[%s15062_s1 + $0x11cc] ss:$16 sps:$4 sm:$0xff]   ;;  %v11013_v18 = vld [vmem:[%s15062_s1 + $0x11c8] ss:$16 sps:$4 sm:$0xff]  }
 0x299   : > { %5894 = vmatprep.subr.bf16.mxu1 %v10982_v45  ;;  %v11018_v51 = vld [vmem:[%s15062_s1 + $0x13cc] ss:$16 sps:$4 sm:$0xff]   ;;  %v11016_v14 = vld [vmem:[%s15062_s1 + $0x13c8] ss:$16 sps:$4 sm:$0xff]  }
 0x29a   : > { %v11021_v9 = vld [vmem:[%s15062_s1 + $0x11ac] ss:$16 sps:$4 sm:$0xff]   ;;  %v11019_v44 = vld [vmem:[%s15062_s1 + $0x11a8] ss:$16 sps:$4 sm:$0xff]  }
 0x29b   : > { %5854 = vmatpush1.bf16.msra.mxu0 %v10977_v21  ;;  %v11024_v4 = vld [vmem:[%s15062_s1 + $0x13ac] ss:$16 sps:$4 sm:$0xff]   ;;  %v11022_v45 = vld [vmem:[%s15062_s1 + $0x13a8] ss:$16 sps:$4 sm:$0xff]  }
 0x29c   : > { %5895 = vmatpush1.bf16.msra.mxu1 %v10980_v22  ;;  %5855 = vmatprep.subr.bf16.mxu0 %v10985_v13  ;;  %v11027_v21 = vld [vmem:[%s15062_s1 + $0x118c] ss:$16 sps:$4 sm:$0xff]   ;;  %v11025_v13 = vld [vmem:[%s15062_s1 + $0x1188] ss:$16 sps:$4 sm:$0xff]  }
 0x29d   : > { %5896 = vmatprep.subr.bf16.mxu1 %v10988_v23  ;;  %v11030_v22 = vld [vmem:[%s15062_s1 + $0x138c] ss:$16 sps:$4 sm:$0xff]   ;;  %v11028_v23 = vld [vmem:[%s15062_s1 + $0x1388] ss:$16 sps:$4 sm:$0xff]  }
 0x29f   : > { %5856 = vmatpush1.bf16.msra.mxu0 %v10983_v24  ;;  %v11033_v24 = vld [vmem:[%s15062_s1 + $0x116c] ss:$16 sps:$4 sm:$0xff]  }
 0x2a0   : > { %5897 = vmatpush1.bf16.msra.mxu1 %v10986_v26  ;;  %5857 = vmatprep.subr.bf16.mxu0 %v10991_v27  ;;  %v11036_v26 = vld [vmem:[%s15062_s1 + $0x136c] ss:$16 sps:$4 sm:$0xff]   ;;  %v11031_v27 = vld [vmem:[%s15062_s1 + $0x1168] ss:$16 sps:$4 sm:$0xff]  }
 0x2a1   : > { %5898 = vmatprep.subr.bf16.mxu1 %v10994_v20  ;;  %v11034_v20 = vld [vmem:[%s15062_s1 + $0x1368] ss:$16 sps:$4 sm:$0xff]  }
 0x2a3   : > { %5858 = vmatpush1.bf16.msra.mxu0 %v10989_v30  ;;  %v11039_v30 = vld [vmem:[%s15062_s1 + $0x114c] ss:$16 sps:$4 sm:$0xff]  }
 0x2a4   : > { %5899 = vmatpush1.bf16.msra.mxu1 %v10992_v25  ;;  %5859 = vmatprep.subr.bf16.mxu0 %v10997_v31  ;;  %v11042_v25 = vld [vmem:[%s15062_s1 + $0x134c] ss:$16 sps:$4 sm:$0xff]   ;;  %v11037_v31 = vld [vmem:[%s15062_s1 + $0x1148] ss:$16 sps:$4 sm:$0xff]  }
 0x2a5   : > { %5900 = vmatprep.subr.bf16.mxu1 %v11000_v32  ;;  %v11040_v32 = vld [vmem:[%s15062_s1 + $0x1348] ss:$16 sps:$4 sm:$0xff]  }
 0x2a7   : > { %5860 = vmatpush1.bf16.msra.mxu0 %v10995_v33  ;;  %v11045_v33 = vld [vmem:[%s15062_s1 + $0x112c] ss:$16 sps:$4 sm:$0xff]  }
 0x2a8   : > { %5901 = vmatpush1.bf16.msra.mxu1 %v10998_v1  ;;  %5861 = vmatprep.subr.bf16.mxu0 %v11003_v2  ;;  %v11048_v1 = vld [vmem:[%s15062_s1 + $0x132c] ss:$16 sps:$4 sm:$0xff]   ;;  %v11043_v2 = vld [vmem:[%s15062_s1 + $0x1128] ss:$16 sps:$4 sm:$0xff]  }
 0x2a9   : > { %5902 = vmatprep.subr.bf16.mxu1 %v11006_v34  ;;  %v11046_v34 = vld [vmem:[%s15062_s1 + $0x1328] ss:$16 sps:$4 sm:$0xff]  }
 0x2ab   : > { %5862 = vmatpush1.bf16.msra.mxu0 %v11001_v35  ;;  %v11051_v35 = vld [vmem:[%s15062_s1 + $0x110c] ss:$16 sps:$4 sm:$0xff]  }
 0x2ac   : > { %5903 = vmatpush1.bf16.msra.mxu1 %v11004_v36  ;;  %5863 = vmatprep.subr.bf16.mxu0 %v11009_v37  ;;  %v11054_v36 = vld [vmem:[%s15062_s1 + $0x130c] ss:$16 sps:$4 sm:$0xff]   ;;  %v11049_v37 = vld [vmem:[%s15062_s1 + $0x1108] ss:$16 sps:$4 sm:$0xff]  }
 0x2ad   : > { %5904 = vmatprep.subr.bf16.mxu1 %v11012_v38  ;;  %v11052_v38 = vld [vmem:[%s15062_s1 + $0x1308] ss:$16 sps:$4 sm:$0xff]  }
 0x2af   : > { %5864 = vmatpush2.bf16.msra.mxu0 %v11007_v16  ;;  %v11057_v16 = vld [vmem:[%s15062_s1 + $0x14ec] ss:$16 sps:$4 sm:$0xff]  }
 0x2b0   : > { %5905 = vmatpush2.bf16.msra.mxu1 %v11010_v40  ;;  %5865 = vmatprep.subr.bf16.mxu0 %v11015_v46  ;;  %v11060_v40 = vld [vmem:[%s15062_s1 + $0x16ec] ss:$16 sps:$4 sm:$0xff]   ;;  %v11055_v46 = vld [vmem:[%s15062_s1 + $0x14e8] ss:$16 sps:$4 sm:$0xff]  }
 0x2b1   : > { %5906 = vmatprep.subr.bf16.mxu1 %v11018_v51  ;;  %v11058_v51 = vld [vmem:[%s15062_s1 + $0x16e8] ss:$16 sps:$4 sm:$0xff]  }
 0x2b3   : > { %5866 = vmatpush2.bf16.msra.mxu0 %v11013_v18  ;;  %v11063_v18 = vld [vmem:[%s15062_s1 + $0x14cc] ss:$16 sps:$4 sm:$0xff]  }
 0x2b4   : > { %5907 = vmatpush2.bf16.msra.mxu1 %v11016_v14  ;;  %5867 = vmatprep.subr.bf16.mxu0 %v11021_v9  ;;  %v11066_v14 = vld [vmem:[%s15062_s1 + $0x16cc] ss:$16 sps:$4 sm:$0xff]  }
 0x2b5   : > { %5908 = vmatprep.subr.bf16.mxu1 %v11024_v4 }
 0x2b7   : > { %5868 = vmatpush2.bf16.msra.mxu0 %v11019_v44 }
 0x2b8   : > { %5909 = vmatpush2.bf16.msra.mxu1 %v11022_v45  ;;  %5869 = vmatprep.subr.bf16.mxu0 %v11027_v21  ;;  %v11061_v45 = vld [vmem:[%s15062_s1 + $0x14c8] ss:$16 sps:$4 sm:$0xff]  }
 0x2b9   : > { %5910 = vmatprep.subr.bf16.mxu1 %v11030_v22  ;;  %v11064_v21 = vld [vmem:[%s15062_s1 + $0x16c8] ss:$16 sps:$4 sm:$0xff]  }
 0x2bb   : > { %5870 = vmatpush2.bf16.msra.mxu0 %v11025_v13 }
 0x2bc   : > { %5911 = vmatpush2.bf16.msra.mxu1 %v11028_v23  ;;  %5871 = vmatprep.subr.bf16.mxu0 %v11033_v24 }
 0x2bd   : > { %5912 = vmatprep.subr.bf16.mxu1 %v11036_v26 }
 0x2bf   : > { %5872 = vmatpush2.bf16.msra.mxu0 %v11031_v27 }
 0x2c0   : > { %5913 = vmatpush2.bf16.msra.mxu1 %v11034_v20  ;;  %5873 = vmatprep.subr.bf16.mxu0 %v11039_v30  ;;  %v11067_v20 = vld [vmem:[%s15062_s1 + $0x14a8] ss:$16 sps:$4 sm:$0xff]  }
 0x2c1   : > { %5914 = vmatprep.subr.bf16.mxu1 %v11042_v25 }
 0x2c3   : > { %5874 = vmatpush2.bf16.msra.mxu0 %v11037_v31  ;;  %v11073_v31 = vld [vmem:[%s15062_s1 + $0x1488] ss:$16 sps:$4 sm:$0xff]  }
 0x2c4   : > { %5915 = vmatpush2.bf16.msra.mxu1 %v11040_v32  ;;  %5875 = vmatprep.subr.bf16.mxu0 %v11045_v33  ;;  %v11076_v32 = vld [vmem:[%s15062_s1 + $0x1688] ss:$16 sps:$4 sm:$0xff]   ;;  %v11081_v33 = vld [vmem:[%s15062_s1 + $0x146c] ss:$16 sps:$4 sm:$0xff]  }
 0x2c5   : > { %5916 = vmatprep.subr.bf16.mxu1 %v11048_v1  ;;  %v11084_v1 = vld [vmem:[%s15062_s1 + $0x166c] ss:$16 sps:$4 sm:$0xff]  }
 0x2c7   : > { %5876 = vmatpush2.bf16.msra.mxu0 %v11043_v2  ;;  %v11079_v2 = vld [vmem:[%s15062_s1 + $0x1468] ss:$16 sps:$4 sm:$0xff]  }
 0x2c8   : > { %5917 = vmatpush2.bf16.msra.mxu1 %v11046_v34  ;;  %5877 = vmatprep.subr.bf16.mxu0 %v11051_v35  ;;  %v11082_v34 = vld [vmem:[%s15062_s1 + $0x1668] ss:$16 sps:$4 sm:$0xff]   ;;  %v11087_v35 = vld [vmem:[%s15062_s1 + $0x144c] ss:$16 sps:$4 sm:$0xff]  }
 0x2c9   : > { %5918 = vmatprep.subr.bf16.mxu1 %v11054_v36  ;;  %v11090_v36 = vld [vmem:[%s15062_s1 + $0x164c] ss:$16 sps:$4 sm:$0xff]  }
 0x2cb   : > { %5878 = vmatpush2.bf16.msra.mxu0 %v11049_v37  ;;  %v11085_v37 = vld [vmem:[%s15062_s1 + $0x1448] ss:$16 sps:$4 sm:$0xff]  }
 0x2cc   : > { %5919 = vmatpush2.bf16.msra.mxu1 %v11052_v38  ;;  %5929 = vmatprep.subr.bf16.mxu0 %v11057_v16  ;;  %v11088_v38 = vld [vmem:[%s15062_s1 + $0x1648] ss:$16 sps:$4 sm:$0xff]   ;;  %v11093_v16 = vld [vmem:[%s15062_s1 + $0x142c] ss:$16 sps:$4 sm:$0xff]  }
 0x2cd   : > { %5970 = vmatprep.subr.bf16.mxu1 %v11060_v40  ;;  %v11096_v40 = vld [vmem:[%s15062_s1 + $0x162c] ss:$16 sps:$4 sm:$0xff]  }
 0x2ce   : > { %v4082_v9 = vpop.f32.mrf.mxu0  ;;  %5880 = vmatmul.mubr.bf16.vlgmr.msra.gmra.mxu0 %v4387_v54  ;;  %v11069_v54 = vld [vmem:[%s15062_s1 + $0x14ac] ss:$16 sps:$4 sm:$0xff]  }
 0x2cf   : > { %v4123_v4 = vpop.f32.mrf.mxu1  ;;  %5921 = vmatmul.mubr.bf16.vlgmr.msra.gmra.mxu1 %v4389_v50  ;;  %v4083_v44 = vadd.f32 %v4082_v9, %v13766_v39  ;;  %5930 = vmatpush1.bf16.msra.mxu0 %v11055_v46  ;;  %v11072_v50 = vld [vmem:[%s15062_s1 + $0x16ac] ss:$16 sps:$4 sm:$0xff]   ;;  %v11091_v46 = vld [vmem:[%s15062_s1 + $0x1428] ss:$16 sps:$4 sm:$0xff]  }
 0x2d0   : > { %5971 = vmatpush1.bf16.msra.mxu1 %v11058_v51  ;;  %v4084_v22 = vpop.f32.mrf.mxu0  ;;  %5931 = vmatprep.subr.bf16.mxu0 %v11063_v18  ;;  %v11094_v51 = vld [vmem:[%s15062_s1 + $0x1628] ss:$16 sps:$4 sm:$0xff]   ;;  %v11099_v18 = vld [vmem:[%s15062_s1 + $0x140c] ss:$16 sps:$4 sm:$0xff]  }
 0x2d1   : > { %v4125_v13 = vpop.f32.mrf.mxu1  ;;  %5972 = vmatprep.subr.bf16.mxu1 %v11066_v14  ;;  %v13972_v39 = vadd.f32 %v4123_v4, %v4083_v44  ;;  %v4085_v23 = vadd.f32 %v4084_v22, %v13773_v43  ;;  %5961 = vmatprep.mubr.bf16.mxu0 %v4392_v60  ;;  %v11070_v43 = vld [vmem:[%s15062_s1 + $0x16a8] ss:$16 sps:$4 sm:$0xff]   ;;  %v11075_v60 = vld [vmem:[%s15062_s1 + $0x148c] ss:$16 sps:$4 sm:$0xff]  }
 0x2d2   : > { %6002 = vmatprep.mubr.bf16.mxu1 %v4394_v52  ;;  %v4086_v24 = vpop.f32.mrf.mxu0  ;;  %v11078_v52 = vld [vmem:[%s15062_s1 + $0x168c] ss:$16 sps:$4 sm:$0xff]   ;;  %v11097_v9 = vld [vmem:[%s15062_s1 + $0x1408] ss:$16 sps:$4 sm:$0xff]  }
 0x2d3   : > { %v4127_v26 = vpop.f32.mrf.mxu1  ;;  %v13979_v27 = vadd.f32 %v4125_v13, %v4085_v23  ;;  %5932 = vmatpush1.bf16.msra.mxu0 %v11061_v45  ;;  %v11102_v14 = vld [vmem:[%s15062_s1 + $0x160c] ss:$16 sps:$4 sm:$0xff]   ;;  %v11100_v4 = vld [vmem:[%s15062_s1 + $0x1608] ss:$16 sps:$4 sm:$0xff]  }
 0x2d4   : > { %5973 = vmatpush1.bf16.msra.mxu1 %v11064_v21  ;;  %v4087_v30 = vpop.f32.mrf.mxu0  ;;  %5933 = vmatprep.subr.bf16.mxu0 %v11069_v54  ;;  %v11105_v44 = vld [vmem:[%s15062_s1 + $0x15ec] ss:$16 sps:$4 sm:$0xff]   ;;  %v11103_v21 = vld [vmem:[%s15062_s1 + $0x15e8] ss:$16 sps:$4 sm:$0xff]  }
 0x2d5   : > { %v4128_v25 = vpop.f32.mrf.mxu1  ;;  %5974 = vmatprep.subr.bf16.mxu1 %v11072_v50  ;;  %v11108_v45 = vld [vmem:[%s15062_s1 + $0x17ec] ss:$16 sps:$4 sm:$0xff]   ;;  %v11106_v22 = vld [vmem:[%s15062_s1 + $0x17e8] ss:$16 sps:$4 sm:$0xff]  }
 0x2d6   : > { %v11111_v13 = vld [vmem:[%s15062_s1 + $0x15cc] ss:$16 sps:$4 sm:$0xff]   ;;  %v11109_v50 = vld [vmem:[%s15062_s1 + $0x15c8] ss:$16 sps:$4 sm:$0xff]  }
 0x2d7   : > { %5934 = vmatpush1.bf16.msra.mxu0 %v11067_v20  ;;  %v11114_v54 = vld [vmem:[%s15062_s1 + $0x17cc] ss:$16 sps:$4 sm:$0xff]   ;;  %v11112_v23 = vld [vmem:[%s15062_s1 + $0x17c8] ss:$16 sps:$4 sm:$0xff]  }
 0x2d8   : > { %5975 = vmatpush1.bf16.msra.mxu1 %v11070_v43  ;;  %5935 = vmatprep.subr.bf16.mxu0 %v11075_v60  ;;  %v11117_v24 = vld [vmem:[%s15062_s1 + $0x15ac] ss:$16 sps:$4 sm:$0xff]   ;;  %v11115_v20 = vld [vmem:[%s15062_s1 + $0x15a8] ss:$16 sps:$4 sm:$0xff]  }
 0x2d9   : > { %5976 = vmatprep.subr.bf16.mxu1 %v11078_v52  ;;  %v11120_v26 = vld [vmem:[%s15062_s1 + $0x17ac] ss:$16 sps:$4 sm:$0xff]   ;;  %v11118_v43 = vld [vmem:[%s15062_s1 + $0x17a8] ss:$16 sps:$4 sm:$0xff]  }
 0x2da   : > { %v11123_v30 = vld [vmem:[%s15062_s1 + $0x158c] ss:$16 sps:$4 sm:$0xff]   ;;  %v11121_v60 = vld [vmem:[%s15062_s1 + $0x1588] ss:$16 sps:$4 sm:$0xff]  }
 0x2db   : > { %5936 = vmatpush1.bf16.msra.mxu0 %v11073_v31  ;;  %v11126_v25 = vld [vmem:[%s15062_s1 + $0x178c] ss:$16 sps:$4 sm:$0xff]   ;;  %v11124_v52 = vld [vmem:[%s15062_s1 + $0x1788] ss:$16 sps:$4 sm:$0xff]  }
 0x2dc   : > { %5977 = vmatpush1.bf16.msra.mxu1 %v11076_v32  ;;  %5937 = vmatprep.subr.bf16.mxu0 %v11081_v33  ;;  %v11129_v31 = vld [vmem:[%s15062_s1 + $0x156c] ss:$16 sps:$4 sm:$0xff]   ;;  %v11127_v33 = vld [vmem:[%s15062_s1 + $0x1568] ss:$16 sps:$4 sm:$0xff]  }
 0x2dd   : > { %5978 = vmatprep.subr.bf16.mxu1 %v11084_v1  ;;  %v11132_v32 = vld [vmem:[%s15062_s1 + $0x176c] ss:$16 sps:$4 sm:$0xff]   ;;  %v11130_v1 = vld [vmem:[%s15062_s1 + $0x1768] ss:$16 sps:$4 sm:$0xff]  }
 0x2df   : > { %5938 = vmatpush1.bf16.msra.mxu0 %v11079_v2  ;;  %v11135_v2 = vld [vmem:[%s15062_s1 + $0x154c] ss:$16 sps:$4 sm:$0xff]  }
 0x2e0   : > { %5979 = vmatpush1.bf16.msra.mxu1 %v11082_v34  ;;  %5939 = vmatprep.subr.bf16.mxu0 %v11087_v35  ;;  %v11138_v34 = vld [vmem:[%s15062_s1 + $0x174c] ss:$16 sps:$4 sm:$0xff]   ;;  %v11133_v35 = vld [vmem:[%s15062_s1 + $0x1548] ss:$16 sps:$4 sm:$0xff]  }
 0x2e1   : > { %5980 = vmatprep.subr.bf16.mxu1 %v11090_v36  ;;  %v11136_v36 = vld [vmem:[%s15062_s1 + $0x1748] ss:$16 sps:$4 sm:$0xff]  }
 0x2e3   : > { %5940 = vmatpush1.bf16.msra.mxu0 %v11085_v37  ;;  %v11141_v37 = vld [vmem:[%s15062_s1 + $0x152c] ss:$16 sps:$4 sm:$0xff]  }
 0x2e4   : > { %5981 = vmatpush1.bf16.msra.mxu1 %v11088_v38  ;;  %5941 = vmatprep.subr.bf16.mxu0 %v11093_v16  ;;  %v11144_v38 = vld [vmem:[%s15062_s1 + $0x172c] ss:$16 sps:$4 sm:$0xff]   ;;  %v11139_v16 = vld [vmem:[%s15062_s1 + $0x1528] ss:$16 sps:$4 sm:$0xff]  }
 0x2e5   : > { %5982 = vmatprep.subr.bf16.mxu1 %v11096_v40  ;;  %v11142_v40 = vld [vmem:[%s15062_s1 + $0x1728] ss:$16 sps:$4 sm:$0xff]  }
 0x2e7   : > { %5942 = vmatpush1.bf16.msra.mxu0 %v11091_v46  ;;  %v11147_v46 = vld [vmem:[%s15062_s1 + $0x150c] ss:$16 sps:$4 sm:$0xff]  }
 0x2e8   : > { %5983 = vmatpush1.bf16.msra.mxu1 %v11094_v51  ;;  %5943 = vmatprep.subr.bf16.mxu0 %v11099_v18  ;;  %v11150_v51 = vld [vmem:[%s15062_s1 + $0x170c] ss:$16 sps:$4 sm:$0xff]   ;;  %v11145_v18 = vld [vmem:[%s15062_s1 + $0x1508] ss:$16 sps:$4 sm:$0xff]  }
 0x2e9   : > { %5984 = vmatprep.subr.bf16.mxu1 %v11102_v14  ;;  %v11148_v14 = vld [vmem:[%s15062_s1 + $0x1708] ss:$16 sps:$4 sm:$0xff]  }
 0x2eb   : > { %5944 = vmatpush1.bf16.msra.mxu0 %v11097_v9  ;;  %v11153_v9 = vld [vmem:[%s15062_s1 + $0x18e4] ss:$16 sps:$4 sm:$0xff]  }
 0x2ec   : > { %5985 = vmatpush1.bf16.msra.mxu1 %v11100_v4  ;;  %5945 = vmatprep.subr.bf16.mxu0 %v11105_v44  ;;  %v11156_v4 = vld [vmem:[%s15062_s1 + $0x1ae4] ss:$16 sps:$4 sm:$0xff]   ;;  %v6275_v44 = vrot.slane %v850_v55, 1 }
 0x2ed   : > { %5986 = vmatprep.subr.bf16.mxu1 %v11108_v45  ;;  %v6281_v45 = vrot.slane %v864_v57, 1 }
 0x2ef   : > { %5946 = vmatpush2.bf16.msra.mxu0 %v11103_v21  ;;  %v6276_v21 = vrot.slane %v852_v56, 2 }
 0x2f0   : > { %5987 = vmatpush2.bf16.msra.mxu1 %v11106_v22  ;;  %5947 = vmatprep.subr.bf16.mxu0 %v11111_v13  ;;  %v6282_v22 = vrot.slane %v866_v58, 2  ;;  %v11151_v13 = vld [vmem:[%s15062_s1 + $0x18e0] ss:$16 sps:$4 sm:$0xff]  }
 0x2f1   : > { %5988 = vmatprep.subr.bf16.mxu1 %v11114_v54  ;;  %v11154_v54 = vld [vmem:[%s15062_s1 + $0x1ae0] ss:$16 sps:$4 sm:$0xff]   ;;  %v14169_v55 = vor.u32 %v6276_v21, %v6275_v44  ;;  %v11195_v44 = vld [vmem:[%s15062_s1 + $0x1804] ss:$16 sps:$4 sm:$0xff]  }
 0x2f2   : > { %v14171_v56 = vor.u32 %v6282_v22, %v6281_v45  ;;  %v11198_v45 = vld [vmem:[%s15062_s1 + $0x1a04] ss:$16 sps:$4 sm:$0xff]   ;;  %v11193_v21 = vld [vmem:[%s15062_s1 + $0x1800] ss:$16 sps:$4 sm:$0xff]  }
 0x2f3   : > { %5948 = vmatpush2.bf16.msra.mxu0 %v11109_v50  ;;  %v11196_v22 = vld [vmem:[%s15062_s1 + $0x1a00] ss:$16 sps:$4 sm:$0xff]  }
 0x2f4   : > { %5989 = vmatpush2.bf16.msra.mxu1 %v11112_v23  ;;  %5949 = vmatprep.subr.bf16.mxu0 %v11117_v24  ;;  %v11157_v23 = vld [vmem:[%s15062_s1 + $0x18c0] ss:$16 sps:$4 sm:$0xff]  }
 0x2f5   : > { %5990 = vmatprep.subr.bf16.mxu1 %v11120_v26  ;;  %v11160_v24 = vld [vmem:[%s15062_s1 + $0x1ac0] ss:$16 sps:$4 sm:$0xff]  }
 0x2f7   : > { %5950 = vmatpush2.bf16.msra.mxu0 %v11115_v20 }
 0x2f8   : > { %5991 = vmatpush2.bf16.msra.mxu1 %v11118_v43  ;;  %5951 = vmatprep.subr.bf16.mxu0 %v11123_v30 }
 0x2f9   : > { %5992 = vmatprep.subr.bf16.mxu1 %v11126_v25 }
 0x2fb   : > { %5952 = vmatpush2.bf16.msra.mxu0 %v11121_v60  ;;  %v11163_v60 = vld [vmem:[%s15062_s1 + $0x18a0] ss:$16 sps:$4 sm:$0xff]  }
 0x2fc   : > { %5993 = vmatpush2.bf16.msra.mxu1 %v11124_v52  ;;  %5953 = vmatprep.subr.bf16.mxu0 %v11129_v31  ;;  %v11166_v52 = vld [vmem:[%s15062_s1 + $0x1aa0] ss:$16 sps:$4 sm:$0xff]  }
 0x2fd   : > { %5994 = vmatprep.subr.bf16.mxu1 %v11132_v32 }
 0x2ff   : > { %5954 = vmatpush2.bf16.msra.mxu0 %v11127_v33  ;;  %v11171_v33 = vld [vmem:[%s15062_s1 + $0x1884] ss:$16 sps:$4 sm:$0xff]  }
 0x300   : > { %5995 = vmatpush2.bf16.msra.mxu1 %v11130_v1  ;;  %5955 = vmatprep.subr.bf16.mxu0 %v11135_v2  ;;  %v11174_v1 = vld [vmem:[%s15062_s1 + $0x1a84] ss:$16 sps:$4 sm:$0xff]   ;;  %v11169_v2 = vld [vmem:[%s15062_s1 + $0x1880] ss:$16 sps:$4 sm:$0xff]  }
 0x301   : > { %5996 = vmatprep.subr.bf16.mxu1 %v11138_v34  ;;  %v11172_v34 = vld [vmem:[%s15062_s1 + $0x1a80] ss:$16 sps:$4 sm:$0xff]  }
 0x303   : > { %5956 = vmatpush2.bf16.msra.mxu0 %v11133_v35  ;;  %v11177_v35 = vld [vmem:[%s15062_s1 + $0x1864] ss:$16 sps:$4 sm:$0xff]  }
 0x304   : > { %5997 = vmatpush2.bf16.msra.mxu1 %v11136_v36  ;;  %5957 = vmatprep.subr.bf16.mxu0 %v11141_v37  ;;  %v11180_v36 = vld [vmem:[%s15062_s1 + $0x1a64] ss:$16 sps:$4 sm:$0xff]   ;;  %v11175_v37 = vld [vmem:[%s15062_s1 + $0x1860] ss:$16 sps:$4 sm:$0xff]  }
 0x305   : > { %5998 = vmatprep.subr.bf16.mxu1 %v11144_v38  ;;  %v11178_v38 = vld [vmem:[%s15062_s1 + $0x1a60] ss:$16 sps:$4 sm:$0xff]  }
 0x307   : > { %5958 = vmatpush2.bf16.msra.mxu0 %v11139_v16  ;;  %v11183_v16 = vld [vmem:[%s15062_s1 + $0x1844] ss:$16 sps:$4 sm:$0xff]  }
 0x308   : > { %5999 = vmatpush2.bf16.msra.mxu1 %v11142_v40  ;;  %5959 = vmatprep.subr.bf16.mxu0 %v11147_v46  ;;  %v11186_v40 = vld [vmem:[%s15062_s1 + $0x1a44] ss:$16 sps:$4 sm:$0xff]   ;;  %v11181_v46 = vld [vmem:[%s15062_s1 + $0x1840] ss:$16 sps:$4 sm:$0xff]  }
 0x309   : > { %6000 = vmatprep.subr.bf16.mxu1 %v11150_v51  ;;  %v11184_v51 = vld [vmem:[%s15062_s1 + $0x1a40] ss:$16 sps:$4 sm:$0xff]  }
 0x30b   : > { %5960 = vmatpush2.bf16.msra.mxu0 %v11145_v18  ;;  %v11189_v18 = vld [vmem:[%s15062_s1 + $0x1824] ss:$16 sps:$4 sm:$0xff]  }
 0x30c   : > { %6001 = vmatpush2.bf16.msra.mxu1 %v11148_v14  ;;  %7584 = vmatprep.subr.bf16.mxu0 %v11153_v9  ;;  %v11192_v14 = vld [vmem:[%s15062_s1 + $0x1a24] ss:$16 sps:$4 sm:$0xff]   ;;  %v11187_v9 = vld [vmem:[%s15062_s1 + $0x1820] ss:$16 sps:$4 sm:$0xff]  }
 0x30d   : > { %7625 = vmatprep.subr.bf16.mxu1 %v11156_v4  ;;  %v11190_v4 = vld [vmem:[%s15062_s1 + $0x1a20] ss:$16 sps:$4 sm:$0xff]  }
 0x30e   : > { %v5717_v57 = vpop.f32.mrf.mxu0  ;;  %5962 = vmatmul.mubr.bf16.vlgmr.msra.gmra.mxu0 %v4391_v10  ;;  %v11165_v10 = vld [vmem:[%s15062_s1 + $0x18a4] ss:$16 sps:$4 sm:$0xff]  }
 0x30f   : > { %v5758_v58 = vpop.f32.mrf.mxu1  ;;  %6003 = vmatmul.mubr.bf16.vlgmr.msra.gmra.mxu1 %v4393_v28  ;;  %7585 = vmatpush1.bf16.msra.mxu0 %v11151_v13  ;;  %v11168_v28 = vld [vmem:[%s15062_s1 + $0x1aa4] ss:$16 sps:$4 sm:$0xff]  }
 0x310   : > { %v14177_v50 = vadd.f32 %v5758_v58, %v5717_v57  ;;  %7626 = vmatpush1.bf16.msra.mxu1 %v11154_v54  ;;  %v5719_v26 = vpop.f32.mrf.mxu0  ;;  %7586 = vmatprep.subr.bf16.mxu0 %v11159_v49  ;;  %v11201_v13 = vld [vmem:[%s15062_s1 + $0x19e4] ss:$16 sps:$4 sm:$0xff]   ;;  %v11199_v49 = vld [vmem:[%s15062_s1 + $0x19e0] ss:$16 sps:$4 sm:$0xff]  }
 0x311   : > { %v5760_v20 = vpop.f32.mrf.mxu1  ;;  %7627 = vmatprep.subr.bf16.mxu1 %v11162_v53  ;;  %7616 = vmatprep.mubr.bf16.mxu0 %v14169_v55  ;;  %v11204_v54 = vld [vmem:[%s15062_s1 + $0x1be4] ss:$16 sps:$4 sm:$0xff]   ;;  %v11202_v53 = vld [vmem:[%s15062_s1 + $0x1be0] ss:$16 sps:$4 sm:$0xff]  }
 0x312   : > { %v14191_v43 = vadd.f32 %v5760_v20, %v5719_v26  ;;  %7657 = vmatprep.mubr.bf16.mxu1 %v14171_v56  ;;  %v5721_v30 = vpop.f32.mrf.mxu0  ;;  %v11207_v57 = vld [vmem:[%s15062_s1 + $0x19c4] ss:$16 sps:$4 sm:$0xff]  }
 0x313   : > { %v5762_v25 = vpop.f32.mrf.mxu1  ;;  %7587 = vmatpush1.bf16.msra.mxu0 %v11157_v23  ;;  %v11210_v58 = vld [vmem:[%s15062_s1 + $0x1bc4] ss:$16 sps:$4 sm:$0xff]   ;;  %v11205_v23 = vld [vmem:[%s15062_s1 + $0x19c0] ss:$16 sps:$4 sm:$0xff]  }
 0x314   : > { %7628 = vmatpush1.bf16.msra.mxu1 %v11160_v24  ;;  %v5722_v31 = vpop.f32.mrf.mxu0  ;;  %7588 = vmatprep.subr.bf16.mxu0 %v11165_v10  ;;  %v11208_v24 = vld [vmem:[%s15062_s1 + $0x1bc0] ss:$16 sps:$4 sm:$0xff]   ;;  %v11213_v26 = vld [vmem:[%s15062_s1 + $0x19a4] ss:$16 sps:$4 sm:$0xff]  }
 0x315   : > { %v5763_v32 = vpop.f32.mrf.mxu1  ;;  %7629 = vmatprep.subr.bf16.mxu1 %v11168_v28  ;;  %v11216_v20 = vld [vmem:[%s15062_s1 + $0x1ba4] ss:$16 sps:$4 sm:$0xff]   ;;  %v11211_v10 = vld [vmem:[%s15062_s1 + $0x19a0] ss:$16 sps:$4 sm:$0xff]  }
 0x316   : > { %v11214_v28 = vld [vmem:[%s15062_s1 + $0x1ba0] ss:$16 sps:$4 sm:$0xff]   ;;  %v11219_v30 = vld [vmem:[%s15062_s1 + $0x1984] ss:$16 sps:$4 sm:$0xff]  }
 0x317   : > { %7589 = vmatpush1.bf16.msra.mxu0 %v11163_v60  ;;  %v11222_v25 = vld [vmem:[%s15062_s1 + $0x1b84] ss:$16 sps:$4 sm:$0xff]   ;;  %v11217_v60 = vld [vmem:[%s15062_s1 + $0x1980] ss:$16 sps:$4 sm:$0xff]  }
 0x318   : > { %7630 = vmatpush1.bf16.msra.mxu1 %v11166_v52  ;;  %7590 = vmatprep.subr.bf16.mxu0 %v11171_v33  ;;  %v11220_v52 = vld [vmem:[%s15062_s1 + $0x1b80] ss:$16 sps:$4 sm:$0xff]   ;;  %v11225_v31 = vld [vmem:[%s15062_s1 + $0x1964] ss:$16 sps:$4 sm:$0xff]  }
 0x319   : > { %7631 = vmatprep.subr.bf16.mxu1 %v11174_v1  ;;  %v11228_v32 = vld [vmem:[%s15062_s1 + $0x1b64] ss:$16 sps:$4 sm:$0xff]   ;;  %v11223_v33 = vld [vmem:[%s15062_s1 + $0x1960] ss:$16 sps:$4 sm:$0xff]  }
 0x31a   : > { %v11226_v1 = vld [vmem:[%s15062_s1 + $0x1b60] ss:$16 sps:$4 sm:$0xff]  }
 0x31b   : > { %7591 = vmatpush1.bf16.msra.mxu0 %v11169_v2  ;;  %v11231_v2 = vld [vmem:[%s15062_s1 + $0x1944] ss:$16 sps:$4 sm:$0xff]  }
 0x31c   : > { %7632 = vmatpush1.bf16.msra.mxu1 %v11172_v34  ;;  %7592 = vmatprep.subr.bf16.mxu0 %v11177_v35  ;;  %v11234_v34 = vld [vmem:[%s15062_s1 + $0x1b44] ss:$16 sps:$4 sm:$0xff]   ;;  %v11229_v35 = vld [vmem:[%s15062_s1 + $0x1940] ss:$16 sps:$4 sm:$0xff]  }
 0x31d   : > { %7633 = vmatprep.subr.bf16.mxu1 %v11180_v36  ;;  %v11232_v36 = vld [vmem:[%s15062_s1 + $0x1b40] ss:$16 sps:$4 sm:$0xff]  }
 0x31f   : > { %7593 = vmatpush1.bf16.msra.mxu0 %v11175_v37  ;;  %v11237_v37 = vld [vmem:[%s15062_s1 + $0x1924] ss:$16 sps:$4 sm:$0xff]  }
 0x320   : > { %7634 = vmatpush1.bf16.msra.mxu1 %v11178_v38  ;;  %7594 = vmatprep.subr.bf16.mxu0 %v11183_v16  ;;  %v11240_v38 = vld [vmem:[%s15062_s1 + $0x1b24] ss:$16 sps:$4 sm:$0xff]   ;;  %v11235_v16 = vld [vmem:[%s15062_s1 + $0x1920] ss:$16 sps:$4 sm:$0xff]  }
 0x321   : > { %7635 = vmatprep.subr.bf16.mxu1 %v11186_v40  ;;  %v11238_v40 = vld [vmem:[%s15062_s1 + $0x1b20] ss:$16 sps:$4 sm:$0xff]  }
 0x323   : > { %7595 = vmatpush1.bf16.msra.mxu0 %v11181_v46  ;;  %v11243_v46 = vld [vmem:[%s15062_s1 + $0x1904] ss:$16 sps:$4 sm:$0xff]  }
 0x324   : > { %7636 = vmatpush1.bf16.msra.mxu1 %v11184_v51  ;;  %7596 = vmatprep.subr.bf16.mxu0 %v11189_v18  ;;  %v11246_v51 = vld [vmem:[%s15062_s1 + $0x1b04] ss:$16 sps:$4 sm:$0xff]   ;;  %v6272_v18 = vrot.slane %v843_v17, 1  ;;  %v6293_v17 = vrot.slane %v892_v7, 1 }
 0x325   : > { %7637 = vmatprep.subr.bf16.mxu1 %v11192_v14  ;;  %v6278_v14 = vrot.slane %v857_v19, 1  ;;  %v6294_v19 = vrot.slane %v894_v8, 2 }
 0x327   : > { %7597 = vmatpush1.bf16.msra.mxu0 %v11187_v9  ;;  %v6273_v9 = vrot.slane %v845_v11, 2  ;;  %v6287_v11 = vrot.slane %v878_v0, 1  ;;  %v11258_v0 = vld [vmem:[%s15062_s1 + $0x1ec4] ss:$16 sps:$4 sm:$0xff]   ;;  %v14397_v7 = vor.u32 %v6294_v19, %v6293_v17 }
 0x328   : > { %7638 = vmatpush1.bf16.msra.mxu1 %v11190_v4  ;;  %7598 = vmatprep.subr.bf16.mxu0 %v11195_v44  ;;  %v6279_v4 = vrot.slane %v859_v12, 2  ;;  %v11241_v44 = vld [vmem:[%s15062_s1 + $0x1900] ss:$16 sps:$4 sm:$0xff]   ;;  %v6288_v12 = vrot.slane %v880_v3, 2  ;;  %v11303_v17 = vld [vmem:[%s15062_s1 + $0x1dc4] ss:$16 sps:$4 sm:$0xff]  }
 0x329   : > { %7639 = vmatprep.subr.bf16.mxu1 %v11198_v45  ;;  %v11244_v45 = vld [vmem:[%s15062_s1 + $0x1b00] ss:$16 sps:$4 sm:$0xff]   ;;  %v11306_v19 = vld [vmem:[%s15062_s1 + $0x1fc4] ss:$16 sps:$4 sm:$0xff]  }
 0x32a   : > { %v14395_v3 = vor.u32 %v6288_v12, %v6287_v11  ;;  %v11295_v11 = vld [vmem:[%s15062_s1 + $0x1de0] ss:$16 sps:$4 sm:$0xff]  }
 0x32b   : > { %7599 = vmatpush1.bf16.msra.mxu0 %v11193_v21  ;;  %v14379_v21 = vor.u32 %v6273_v9, %v6272_v18  ;;  %v11283_v18 = vld [vmem:[%s15062_s1 + $0x1c20] ss:$16 sps:$4 sm:$0xff]   ;;  %v11291_v9 = vld [vmem:[%s15062_s1 + $0x1c04] ss:$16 sps:$4 sm:$0xff]  }
 0x32c   : > { %7640 = vmatpush1.bf16.msra.mxu1 %v11196_v22  ;;  %7600 = vmatprep.subr.bf16.mxu0 %v11201_v13  ;;  %v14381_v22 = vor.u32 %v6279_v4, %v6278_v14  ;;  %v11247_v13 = vld [vmem:[%s15062_s1 + $0x1ce0] ss:$16 sps:$4 sm:$0xff]   ;;  %v11294_v4 = vld [vmem:[%s15062_s1 + $0x1e04] ss:$16 sps:$4 sm:$0xff]  }
 0x32d   : > { %7641 = vmatprep.subr.bf16.mxu1 %v11204_v54  ;;  %v11286_v14 = vld [vmem:[%s15062_s1 + $0x1e20] ss:$16 sps:$4 sm:$0xff]  }
 0x32e   : > { %v11298_v12 = vld [vmem:[%s15062_s1 + $0x1fe0] ss:$16 sps:$4 sm:$0xff]  }
 0x32f   : > { %7601 = vmatpush2.bf16.msra.mxu0 %v11199_v49 }
 0x330   : > { %7642 = vmatpush2.bf16.msra.mxu1 %v11202_v53  ;;  %7602 = vmatprep.subr.bf16.mxu0 %v11207_v57  ;;  %v11253_v53 = vld [vmem:[%s15062_s1 + $0x1cc0] ss:$16 sps:$4 sm:$0xff]  }
 0x331   : > { %7643 = vmatprep.subr.bf16.mxu1 %v11210_v58  ;;  %v11256_v57 = vld [vmem:[%s15062_s1 + $0x1ec0] ss:$16 sps:$4 sm:$0xff]  }
 0x333   : > { %7603 = vmatpush2.bf16.msra.mxu0 %v11205_v23 }
 0x334   : > { %7644 = vmatpush2.bf16.msra.mxu1 %v11208_v24  ;;  %7604 = vmatprep.subr.bf16.mxu0 %v11213_v26  ;;  %v11261_v24 = vld [vmem:[%s15062_s1 + $0x1ca4] ss:$16 sps:$4 sm:$0xff]  }
 0x335   : > { %7645 = vmatprep.subr.bf16.mxu1 %v11216_v20 }
 0x337   : > { %7605 = vmatpush2.bf16.msra.mxu0 %v11211_v10 }
 0x338   : > { %7646 = vmatpush2.bf16.msra.mxu1 %v11214_v28  ;;  %7606 = vmatprep.subr.bf16.mxu0 %v11219_v30 }
 0x339   : > { %7647 = vmatprep.subr.bf16.mxu1 %v11222_v25 }
 0x33b   : > { %7607 = vmatpush2.bf16.msra.mxu0 %v11217_v60  ;;  %v11259_v60 = vld [vmem:[%s15062_s1 + $0x1ca0] ss:$16 sps:$4 sm:$0xff]  }
 0x33c   : > { %7648 = vmatpush2.bf16.msra.mxu1 %v11220_v52  ;;  %7608 = vmatprep.subr.bf16.mxu0 %v11225_v31 }
 0x33d   : > { %7649 = vmatprep.subr.bf16.mxu1 %v11228_v32  ;;  %v11270_v32 = vld [vmem:[%s15062_s1 + $0x1e84] ss:$16 sps:$4 sm:$0xff]  }
 0x33f   : > { %7609 = vmatpush2.bf16.msra.mxu0 %v11223_v33 }
 0x340   : > { %7650 = vmatpush2.bf16.msra.mxu1 %v11226_v1  ;;  %7610 = vmatprep.subr.bf16.mxu0 %v11231_v2  ;;  %v11265_v1 = vld [vmem:[%s15062_s1 + $0x1c80] ss:$16 sps:$4 sm:$0xff]  }
 0x341   : > { %7651 = vmatprep.subr.bf16.mxu1 %v11234_v34  ;;  %v11268_v2 = vld [vmem:[%s15062_s1 + $0x1e80] ss:$16 sps:$4 sm:$0xff]   ;;  %v11273_v34 = vld [vmem:[%s15062_s1 + $0x1c64] ss:$16 sps:$4 sm:$0xff]  }
 0x343   : > { %7611 = vmatpush2.bf16.msra.mxu0 %v11229_v35  ;;  %v11271_v35 = vld [vmem:[%s15062_s1 + $0x1c60] ss:$16 sps:$4 sm:$0xff]  }
 0x344   : > { %7652 = vmatpush2.bf16.msra.mxu1 %v11232_v36  ;;  %7612 = vmatprep.subr.bf16.mxu0 %v11237_v37  ;;  %v11274_v36 = vld [vmem:[%s15062_s1 + $0x1e60] ss:$16 sps:$4 sm:$0xff]   ;;  %v11279_v37 = vld [vmem:[%s15062_s1 + $0x1c44] ss:$16 sps:$4 sm:$0xff]  }
 0x345   : > { %7653 = vmatprep.subr.bf16.mxu1 %v11240_v38  ;;  %v11282_v38 = vld [vmem:[%s15062_s1 + $0x1e44] ss:$16 sps:$4 sm:$0xff]  }
 0x347   : > { %7613 = vmatpush2.bf16.msra.mxu0 %v11235_v16  ;;  %v11277_v16 = vld [vmem:[%s15062_s1 + $0x1c40] ss:$16 sps:$4 sm:$0xff]  }
 0x348   : > { %7654 = vmatpush2.bf16.msra.mxu1 %v11238_v40  ;;  %7614 = vmatprep.subr.bf16.mxu0 %v11243_v46  ;;  %v11280_v40 = vld [vmem:[%s15062_s1 + $0x1e40] ss:$16 sps:$4 sm:$0xff]   ;;  %v11285_v46 = vld [vmem:[%s15062_s1 + $0x1c24] ss:$16 sps:$4 sm:$0xff]  }
 0x349   : > { %7655 = vmatprep.subr.bf16.mxu1 %v11246_v51  ;;  %v11288_v51 = vld [vmem:[%s15062_s1 + $0x1e24] ss:$16 sps:$4 sm:$0xff]  }
 0x34b   : > { %7615 = vmatpush2.bf16.msra.mxu0 %v11241_v44  ;;  %v11289_v44 = vld [vmem:[%s15062_s1 + $0x1c00] ss:$16 sps:$4 sm:$0xff]  }
 0x34c   : > { %7656 = vmatpush2.bf16.msra.mxu1 %v11244_v45  ;;  %7666 = vmatprep.subr.bf16.mxu0 %v11249_v5  ;;  %v11292_v45 = vld [vmem:[%s15062_s1 + $0x1e00] ss:$16 sps:$4 sm:$0xff]   ;;  %v11297_v5 = vld [vmem:[%s15062_s1 + $0x1de4] ss:$16 sps:$4 sm:$0xff]  }
 0x34d   : > { %7707 = vmatprep.subr.bf16.mxu1 %v11252_v6  ;;  %v11300_v6 = vld [vmem:[%s15062_s1 + $0x1fe4] ss:$16 sps:$4 sm:$0xff]  }
 0x34e   : > { %v5799_v8 = vpop.f32.mrf.mxu0  ;;  %7617 = vmatmul.mubr.bf16.vlgmr.msra.gmra.mxu0 %v14379_v21 }
 0x34f   : > { %v5840_v54 = vpop.f32.mrf.mxu1  ;;  %7658 = vmatmul.mubr.bf16.vlgmr.msra.gmra.mxu1 %v14381_v22  ;;  %v5800_v49 = vadd.f32 %v5799_v8, %v14177_v50  ;;  %7667 = vmatpush1.bf16.msra.mxu0 %v11247_v13  ;;  %v11264_v50 = vld [vmem:[%s15062_s1 + $0x1ea4] ss:$16 sps:$4 sm:$0xff]   ;;  %v11301_v13 = vld [vmem:[%s15062_s1 + $0x1dc0] ss:$16 sps:$4 sm:$0xff]  }
 0x350   : > { %7708 = vmatpush1.bf16.msra.mxu1 %v11250_v61  ;;  %v5801_v58 = vpop.f32.mrf.mxu0  ;;  %7668 = vmatprep.subr.bf16.mxu0 %v11255_v62  ;;  %v11304_v61 = vld [vmem:[%s15062_s1 + $0x1fc0] ss:$16 sps:$4 sm:$0xff]   ;;  %v11309_v62 = vld [vmem:[%s15062_s1 + $0x1da4] ss:$16 sps:$4 sm:$0xff]  }
 0x351   : > { %v5842_v23 = vpop.f32.mrf.mxu1  ;;  %7709 = vmatprep.subr.bf16.mxu1 %v11258_v0  ;;  %v5841_v26 = vadd.f32 %v5840_v54, %v5800_v49  ;;  %v5802_v20 = vadd.f32 %v5801_v58, %v14191_v43  ;;  %7698 = vmatprep.mubr.bf16.mxu0 %v14395_v3  ;;  %v11262_v43 = vld [vmem:[%s15062_s1 + $0x1ea0] ss:$16 sps:$4 sm:$0xff]   ;;  %v11312_v0 = vld [vmem:[%s15062_s1 + $0x1fa4] ss:$16 sps:$4 sm:$0xff]  }
 0x352   : > { %7739 = vmatprep.mubr.bf16.mxu1 %v14397_v7  ;;  %v5803_v10 = vpop.f32.mrf.mxu0  ;;  %v11307_v8 = vld [vmem:[%s15062_s1 + $0x1da0] ss:$16 sps:$4 sm:$0xff]   ;;  %v11315_v49 = vld [vmem:[%s15062_s1 + $0x1d84] ss:$16 sps:$4 sm:$0xff]  }
 0x353   : > { %v5844_v28 = vpop.f32.mrf.mxu1  ;;  %v14418_v30 = vadd.f32 %v5841_v26, %v13558_v15  ;;  %v5843_v25 = vadd.f32 %v5842_v23, %v5802_v20  ;;  %7669 = vmatpush1.bf16.msra.mxu0 %v11253_v53  ;;  %v11267_v15 = vld [vmem:[%s15062_s1 + $0x1c84] ss:$16 sps:$4 sm:$0xff]   ;;  %v11310_v54 = vld [vmem:[%s15062_s1 + $0x1fa0] ss:$16 sps:$4 sm:$0xff]  }
 0x354   : > { %7710 = vmatpush1.bf16.msra.mxu1 %v11256_v57  ;;  %v5804_v52 = vpop.f32.mrf.mxu0  ;;  %7670 = vmatprep.subr.bf16.mxu0 %v11261_v24  ;;  %v11318_v53 = vld [vmem:[%s15062_s1 + $0x1f84] ss:$16 sps:$4 sm:$0xff]   ;;  %v11313_v57 = vld [vmem:[%s15062_s1 + $0x1d80] ss:$16 sps:$4 sm:$0xff]  }
 0x355   : > { %v5845_v31 = vpop.f32.mrf.mxu1  ;;  %7711 = vmatprep.subr.bf16.mxu1 %v11264_v50  ;;  %v14433_v33 = vadd.f32 %v5843_v25, %v13565_v29  ;;  %v11276_v29 = vld [vmem:[%s15062_s1 + $0x1e64] ss:$16 sps:$4 sm:$0xff]   ;;  %v11316_v58 = vld [vmem:[%s15062_s1 + $0x1f80] ss:$16 sps:$4 sm:$0xff]  }
 0x356   : > { %v11321_v23 = vld [vmem:[%s15062_s1 + $0x1d64] ss:$16 sps:$4 sm:$0xff]   ;;  %v11319_v50 = vld [vmem:[%s15062_s1 + $0x1d60] ss:$16 sps:$4 sm:$0xff]  }
 0x357   : > { %7671 = vmatpush1.bf16.msra.mxu0 %v11259_v60  ;;  %v11324_v24 = vld [vmem:[%s15062_s1 + $0x1f64] ss:$16 sps:$4 sm:$0xff]   ;;  %v11322_v26 = vld [vmem:[%s15062_s1 + $0x1f60] ss:$16 sps:$4 sm:$0xff]  }
 0x358   : > { %7712 = vmatpush1.bf16.msra.mxu1 %v11262_v43  ;;  %7672 = vmatprep.subr.bf16.mxu0 %v11267_v15  ;;  %v11327_v20 = vld [vmem:[%s15062_s1 + $0x1d44] ss:$16 sps:$4 sm:$0xff]   ;;  %v11325_v28 = vld [vmem:[%s15062_s1 + $0x1d40] ss:$16 sps:$4 sm:$0xff]  }
 0x359   : > { %7713 = vmatprep.subr.bf16.mxu1 %v11270_v32  ;;  %v11330_v10 = vld [vmem:[%s15062_s1 + $0x1f44] ss:$16 sps:$4 sm:$0xff]   ;;  %v11328_v25 = vld [vmem:[%s15062_s1 + $0x1f40] ss:$16 sps:$4 sm:$0xff]  }
 0x35a   : > { %v11333_v60 = vld [vmem:[%s15062_s1 + $0x1d24] ss:$16 sps:$4 sm:$0xff]   ;;  %v11331_v52 = vld [vmem:[%s15062_s1 + $0x1d20] ss:$16 sps:$4 sm:$0xff]  }
 0x35b   : > { %7673 = vmatpush1.bf16.msra.mxu0 %v11265_v1  ;;  %v11336_v43 = vld [vmem:[%s15062_s1 + $0x1f24] ss:$16 sps:$4 sm:$0xff]   ;;  %v11334_v31 = vld [vmem:[%s15062_s1 + $0x1f20] ss:$16 sps:$4 sm:$0xff]   ;;  %v6284_v1 = vrot.slane %v871_v59, 1 }
 0x35c   : > { %7714 = vmatpush1.bf16.msra.mxu1 %v11268_v2  ;;  %7674 = vmatprep.subr.bf16.mxu0 %v11273_v34  ;;  %v11339_v15 = vld [vmem:[%s15062_s1 + $0x1d04] ss:$16 sps:$4 sm:$0xff]   ;;  %v6285_v2 = vrot.slane %v873_v47, 2  ;;  %v6290_v34 = vrot.slane %v885_v63, 1  ;;  %v11343_v59 = vld [vmem:[%s15062_s1 + $0x18e8] ss:$16 sps:$4 sm:$0xff]  }
 0x35d   : > { %7715 = vmatprep.subr.bf16.mxu1 %v11276_v29  ;;  %v11342_v32 = vld [vmem:[%s15062_s1 + $0x1f04] ss:$16 sps:$4 sm:$0xff]   ;;  %v6291_v29 = vrot.slane %v887_v48, 2  ;;  %v11346_v63 = vld [vmem:[%s15062_s1 + $0x1ae8] ss:$16 sps:$4 sm:$0xff]  }
 0x35e   : > { %v14599_v47 = vor.u32 %v6285_v2, %v6284_v1  ;;  %v11397_v1 = vld [vmem:[%s15062_s1 + $0x19c8] ss:$16 sps:$4 sm:$0xff]  }
 0x35f   : > { %7675 = vmatpush1.bf16.msra.mxu0 %v11271_v35  ;;  %v11337_v35 = vld [vmem:[%s15062_s1 + $0x1d00] ss:$16 sps:$4 sm:$0xff]   ;;  %v14601_v48 = vor.u32 %v6291_v29, %v6290_v34  ;;  %v11400_v2 = vld [vmem:[%s15062_s1 + $0x1bc8] ss:$16 sps:$4 sm:$0xff]   ;;  %v11405_v34 = vld [vmem:[%s15062_s1 + $0x19ac] ss:$16 sps:$4 sm:$0xff]  }
 0x360   : > { %7716 = vmatpush1.bf16.msra.mxu1 %v11274_v36  ;;  %7676 = vmatprep.subr.bf16.mxu0 %v11279_v37  ;;  %v11340_v36 = vld [vmem:[%s15062_s1 + $0x1f00] ss:$16 sps:$4 sm:$0xff]   ;;  %v11351_v37 = vld [vmem:[%s15062_s1 + $0x18cc] ss:$16 sps:$4 sm:$0xff]  }
 0x361   : > { %7717 = vmatprep.subr.bf16.mxu1 %v11282_v38  ;;  %v11354_v38 = vld [vmem:[%s15062_s1 + $0x1acc] ss:$16 sps:$4 sm:$0xff]  }
 0x362   : > { %v11408_v29 = vld [vmem:[%s15062_s1 + $0x1bac] ss:$16 sps:$4 sm:$0xff]  }
 0x363   : > { %7677 = vmatpush1.bf16.msra.mxu0 %v11277_v16 }
 0x364   : > { %7718 = vmatpush1.bf16.msra.mxu1 %v11280_v40  ;;  %7678 = vmatprep.subr.bf16.mxu0 %v11285_v46 }
 0x365   : > { %7719 = vmatprep.subr.bf16.mxu1 %v11288_v51  ;;  %v11349_v51 = vld [vmem:[%s15062_s1 + $0x18c8] ss:$16 sps:$4 sm:$0xff]  }
 0x367   : > { %7679 = vmatpush1.bf16.msra.mxu0 %v11283_v18  ;;  %v11352_v18 = vld [vmem:[%s15062_s1 + $0x1ac8] ss:$16 sps:$4 sm:$0xff]  }
 0x368   : > { %7720 = vmatpush1.bf16.msra.mxu1 %v11286_v14  ;;  %7680 = vmatprep.subr.bf16.mxu0 %v11291_v9 }
 0x369   : > { %7721 = vmatprep.subr.bf16.mxu1 %v11294_v4  ;;  %v11357_v4 = vld [vmem:[%s15062_s1 + $0x18ac] ss:$16 sps:$4 sm:$0xff]  }
 0x36b   : > { %7681 = vmatpush1.bf16.msra.mxu0 %v11289_v44  ;;  %v11360_v44 = vld [vmem:[%s15062_s1 + $0x1aac] ss:$16 sps:$4 sm:$0xff]  }
 0x36c   : > { %7722 = vmatpush1.bf16.msra.mxu1 %v11292_v45  ;;  %7682 = vmatprep.subr.bf16.mxu0 %v11297_v5 }
 0x36d   : > { %7723 = vmatprep.subr.bf16.mxu1 %v11300_v6 }
 0x36f   : > { %7683 = vmatpush2.bf16.msra.mxu0 %v11295_v11  ;;  %v11355_v11 = vld [vmem:[%s15062_s1 + $0x18a8] ss:$16 sps:$4 sm:$0xff]  }
 0x370   : > { %7724 = vmatpush2.bf16.msra.mxu1 %v11298_v12  ;;  %7684 = vmatprep.subr.bf16.mxu0 %v11303_v17  ;;  %v11358_v12 = vld [vmem:[%s15062_s1 + $0x1aa8] ss:$16 sps:$4 sm:$0xff]  }
 0x371   : > { %7725 = vmatprep.subr.bf16.mxu1 %v11306_v19 }
 0x373   : > { %7685 = vmatpush2.bf16.msra.mxu0 %v11301_v13  ;;  %v11361_v13 = vld [vmem:[%s15062_s1 + $0x1888] ss:$16 sps:$4 sm:$0xff]  }
 0x374   : > { %7726 = vmatpush2.bf16.msra.mxu1 %v11304_v61  ;;  %7686 = vmatprep.subr.bf16.mxu0 %v11309_v62  ;;  %v11364_v61 = vld [vmem:[%s15062_s1 + $0x1a88] ss:$16 sps:$4 sm:$0xff]   ;;  %v11369_v62 = vld [vmem:[%s15062_s1 + $0x186c] ss:$16 sps:$4 sm:$0xff]  }
 0x375   : > { %7727 = vmatprep.subr.bf16.mxu1 %v11312_v0  ;;  %v11372_v0 = vld [vmem:[%s15062_s1 + $0x1a6c] ss:$16 sps:$4 sm:$0xff]  }
 0x377   : > { %7687 = vmatpush2.bf16.msra.mxu0 %v11307_v8  ;;  %v11367_v8 = vld [vmem:[%s15062_s1 + $0x1868] ss:$16 sps:$4 sm:$0xff]  }
 0x378   : > { %7728 = vmatpush2.bf16.msra.mxu1 %v11310_v54  ;;  %7688 = vmatprep.subr.bf16.mxu0 %v11315_v49  ;;  %v11370_v54 = vld [vmem:[%s15062_s1 + $0x1a68] ss:$16 sps:$4 sm:$0xff]   ;;  %v11375_v49 = vld [vmem:[%s15062_s1 + $0x184c] ss:$16 sps:$4 sm:$0xff]  }
 0x379   : > { %7729 = vmatprep.subr.bf16.mxu1 %v11318_v53  ;;  %v11378_v53 = vld [vmem:[%s15062_s1 + $0x1a4c] ss:$16 sps:$4 sm:$0xff]  }
 0x37b   : > { %7689 = vmatpush2.bf16.msra.mxu0 %v11313_v57  ;;  %v11373_v57 = vld [vmem:[%s15062_s1 + $0x1848] ss:$16 sps:$4 sm:$0xff]  }
 0x37c   : > { %7730 = vmatpush2.bf16.msra.mxu1 %v11316_v58  ;;  %7690 = vmatprep.subr.bf16.mxu0 %v11321_v23  ;;  %v11376_v58 = vld [vmem:[%s15062_s1 + $0x1a48] ss:$16 sps:$4 sm:$0xff]   ;;  %v11381_v23 = vld [vmem:[%s15062_s1 + $0x182c] ss:$16 sps:$4 sm:$0xff]  }
 0x37d   : > { %7731 = vmatprep.subr.bf16.mxu1 %v11324_v24  ;;  %v11384_v24 = vld [vmem:[%s15062_s1 + $0x1a2c] ss:$16 sps:$4 sm:$0xff]  }
 0x37f   : > { %7691 = vmatpush2.bf16.msra.mxu0 %v11319_v50  ;;  %v11379_v50 = vld [vmem:[%s15062_s1 + $0x1828] ss:$16 sps:$4 sm:$0xff]  }
 0x380   : > { %7732 = vmatpush2.bf16.msra.mxu1 %v11322_v26  ;;  %7692 = vmatprep.subr.bf16.mxu0 %v11327_v20  ;;  %v11382_v26 = vld [vmem:[%s15062_s1 + $0x1a28] ss:$16 sps:$4 sm:$0xff]   ;;  %v11387_v20 = vld [vmem:[%s15062_s1 + $0x180c] ss:$16 sps:$4 sm:$0xff]  }
 0x381   : > { %7733 = vmatprep.subr.bf16.mxu1 %v11330_v10  ;;  %v11390_v10 = vld [vmem:[%s15062_s1 + $0x1a0c] ss:$16 sps:$4 sm:$0xff]  }
 0x383   : > { %7693 = vmatpush2.bf16.msra.mxu0 %v11325_v28  ;;  %v11385_v28 = vld [vmem:[%s15062_s1 + $0x1808] ss:$16 sps:$4 sm:$0xff]  }
 0x384   : > { %7734 = vmatpush2.bf16.msra.mxu1 %v11328_v25  ;;  %7694 = vmatprep.subr.bf16.mxu0 %v11333_v60  ;;  %v11388_v25 = vld [vmem:[%s15062_s1 + $0x1a08] ss:$16 sps:$4 sm:$0xff]   ;;  %v11393_v60 = vld [vmem:[%s15062_s1 + $0x19ec] ss:$16 sps:$4 sm:$0xff]  }
 0x385   : > { %7735 = vmatprep.subr.bf16.mxu1 %v11336_v43  ;;  %v11396_v43 = vld [vmem:[%s15062_s1 + $0x1bec] ss:$16 sps:$4 sm:$0xff]  }
 0x387   : > { %7695 = vmatpush2.bf16.msra.mxu0 %v11331_v52  ;;  %v11391_v52 = vld [vmem:[%s15062_s1 + $0x19e8] ss:$16 sps:$4 sm:$0xff]  }
 0x388   : > { %7736 = vmatpush2.bf16.msra.mxu1 %v11334_v31  ;;  %7696 = vmatprep.subr.bf16.mxu0 %v11339_v15  ;;  %v11394_v31 = vld [vmem:[%s15062_s1 + $0x1be8] ss:$16 sps:$4 sm:$0xff]   ;;  %v11399_v15 = vld [vmem:[%s15062_s1 + $0x19cc] ss:$16 sps:$4 sm:$0xff]  }
 0x389   : > { %7737 = vmatprep.subr.bf16.mxu1 %v11342_v32  ;;  %v11402_v32 = vld [vmem:[%s15062_s1 + $0x1bcc] ss:$16 sps:$4 sm:$0xff]  }
 0x38b   : > { %7697 = vmatpush2.bf16.msra.mxu0 %v11337_v35  ;;  %v11403_v35 = vld [vmem:[%s15062_s1 + $0x19a8] ss:$16 sps:$4 sm:$0xff]  }
 0x38c   : > { %7738 = vmatpush2.bf16.msra.mxu1 %v11340_v36  ;;  %7748 = vmatprep.subr.bf16.mxu0 %v11345_v41  ;;  %v11406_v36 = vld [vmem:[%s15062_s1 + $0x1ba8] ss:$16 sps:$4 sm:$0xff]   ;;  %v11411_v41 = vld [vmem:[%s15062_s1 + $0x198c] ss:$16 sps:$4 sm:$0xff]  }
 0x38d   : > { %7789 = vmatprep.subr.bf16.mxu1 %v11348_v42  ;;  %v11414_v42 = vld [vmem:[%s15062_s1 + $0x1b8c] ss:$16 sps:$4 sm:$0xff]  }
 0x38e   : > { %v5881_v16 = vpop.f32.mrf.mxu0  ;;  %7699 = vmatmul.mubr.bf16.vlgmr.msra.gmra.mxu0 %v14599_v47 }
 0x38f   : > { %v5922_v40 = vpop.f32.mrf.mxu1  ;;  %7740 = vmatmul.mubr.bf16.vlgmr.msra.gmra.mxu1 %v14601_v48  ;;  %7749 = vmatpush1.bf16.msra.mxu0 %v11343_v59  ;;  %v11409_v59 = vld [vmem:[%s15062_s1 + $0x1988] ss:$16 sps:$4 sm:$0xff]  }
 0x390   : > { %v14617_v46 = vadd.f32 %v5922_v40, %v5881_v16  ;;  %7790 = vmatpush1.bf16.msra.mxu1 %v11346_v63  ;;  %v5883_v14 = vpop.f32.mrf.mxu0  ;;  %7750 = vmatprep.subr.bf16.mxu0 %v11351_v37  ;;  %v11412_v63 = vld [vmem:[%s15062_s1 + $0x1b88] ss:$16 sps:$4 sm:$0xff]   ;;  %v11417_v37 = vld [vmem:[%s15062_s1 + $0x196c] ss:$16 sps:$4 sm:$0xff]  }
 0x391   : > { %v5924_v9 = vpop.f32.mrf.mxu1  ;;  %7791 = vmatprep.subr.bf16.mxu1 %v11354_v38  ;;  %7780 = vmatprep.mubr.bf16.mxu0 %v14169_v55  ;;  %v11363_v55 = vld [vmem:[%s15062_s1 + $0x188c] ss:$16 sps:$4 sm:$0xff]   ;;  %v11415_v16 = vld [vmem:[%s15062_s1 + $0x1968] ss:$16 sps:$4 sm:$0xff]  }
 0x392   : > { %v14631_v45 = vadd.f32 %v5924_v9, %v5883_v14  ;;  %7821 = vmatprep.mubr.bf16.mxu1 %v14171_v56  ;;  %v5885_v5 = vpop.f32.mrf.mxu0  ;;  %v11366_v56 = vld [vmem:[%s15062_s1 + $0x1a8c] ss:$16 sps:$4 sm:$0xff]   ;;  %v11418_v40 = vld [vmem:[%s15062_s1 + $0x1b68] ss:$16 sps:$4 sm:$0xff]  }
 0x393   : > { %v5926_v6 = vpop.f32.mrf.mxu1  ;;  %7751 = vmatpush1.bf16.msra.mxu0 %v11349_v51  ;;  %v11420_v38 = vld [vmem:[%s15062_s1 + $0x1b6c] ss:$16 sps:$4 sm:$0xff]   ;;  %v11421_v14 = vld [vmem:[%s15062_s1 + $0x1948] ss:$16 sps:$4 sm:$0xff]  }
 0x394   : > { %7792 = vmatpush1.bf16.msra.mxu1 %v11352_v18  ;;  %v5886_v17 = vpop.f32.mrf.mxu0  ;;  %7752 = vmatprep.subr.bf16.mxu0 %v11357_v4  ;;  %v11423_v51 = vld [vmem:[%s15062_s1 + $0x194c] ss:$16 sps:$4 sm:$0xff]   ;;  %v11424_v9 = vld [vmem:[%s15062_s1 + $0x1b48] ss:$16 sps:$4 sm:$0xff]  }
 0x395   : > { %v5927_v19 = vpop.f32.mrf.mxu1  ;;  %7793 = vmatprep.subr.bf16.mxu1 %v11360_v44  ;;  %v11426_v18 = vld [vmem:[%s15062_s1 + $0x1b4c] ss:$16 sps:$4 sm:$0xff]   ;;  %v11427_v5 = vld [vmem:[%s15062_s1 + $0x1928] ss:$16 sps:$4 sm:$0xff]  }
 0x396   : > { %v11429_v4 = vld [vmem:[%s15062_s1 + $0x192c] ss:$16 sps:$4 sm:$0xff]   ;;  %v11430_v6 = vld [vmem:[%s15062_s1 + $0x1b28] ss:$16 sps:$4 sm:$0xff]  }
 0x397   : > { %7753 = vmatpush1.bf16.msra.mxu0 %v11355_v11  ;;  %v11432_v44 = vld [vmem:[%s15062_s1 + $0x1b2c] ss:$16 sps:$4 sm:$0xff]   ;;  %v11433_v17 = vld [vmem:[%s15062_s1 + $0x1908] ss:$16 sps:$4 sm:$0xff]  }
 0x398   : > { %7794 = vmatpush1.bf16.msra.mxu1 %v11358_v12  ;;  %7754 = vmatprep.subr.bf16.mxu0 %v11363_v55  ;;  %v11435_v11 = vld [vmem:[%s15062_s1 + $0x190c] ss:$16 sps:$4 sm:$0xff]   ;;  %v11436_v19 = vld [vmem:[%s15062_s1 + $0x1b08] ss:$16 sps:$4 sm:$0xff]  }
 0x399   : > { %7795 = vmatprep.subr.bf16.mxu1 %v11366_v56  ;;  %v11438_v12 = vld [vmem:[%s15062_s1 + $0x1b0c] ss:$16 sps:$4 sm:$0xff]  }
 0x39a   : > { %v11441_v55 = vld [vmem:[%s15062_s1 + $0x1cec] ss:$16 sps:$4 sm:$0xff]  }
 0x39b   : > { %7755 = vmatpush1.bf16.msra.mxu0 %v11361_v13  ;;  %v11444_v56 = vld [vmem:[%s15062_s1 + $0x1eec] ss:$16 sps:$4 sm:$0xff]   ;;  %v11439_v13 = vld [vmem:[%s15062_s1 + $0x1ce8] ss:$16 sps:$4 sm:$0xff]  }
 0x39c   : > { %7796 = vmatpush1.bf16.msra.mxu1 %v11364_v61  ;;  %7756 = vmatprep.subr.bf16.mxu0 %v11369_v62  ;;  %v11442_v61 = vld [vmem:[%s15062_s1 + $0x1ee8] ss:$16 sps:$4 sm:$0xff]   ;;  %v11447_v62 = vld [vmem:[%s15062_s1 + $0x1ccc] ss:$16 sps:$4 sm:$0xff]  }
 0x39d   : > { %7797 = vmatprep.subr.bf16.mxu1 %v11372_v0  ;;  %v11450_v0 = vld [vmem:[%s15062_s1 + $0x1ecc] ss:$16 sps:$4 sm:$0xff]  }
 0x39f   : > { %7757 = vmatpush1.bf16.msra.mxu0 %v11367_v8 }
 0x3a0   : > { %7798 = vmatpush1.bf16.msra.mxu1 %v11370_v54  ;;  %7758 = vmatprep.subr.bf16.mxu0 %v11375_v49 }
 0x3a1   : > { %7799 = vmatprep.subr.bf16.mxu1 %v11378_v53  ;;  %v11445_v53 = vld [vmem:[%s15062_s1 + $0x1cc8] ss:$16 sps:$4 sm:$0xff]  }
 0x3a3   : > { %7759 = vmatpush1.bf16.msra.mxu0 %v11373_v57  ;;  %v11448_v57 = vld [vmem:[%s15062_s1 + $0x1ec8] ss:$16 sps:$4 sm:$0xff]  }
 0x3a4   : > { %7800 = vmatpush1.bf16.msra.mxu1 %v11376_v58  ;;  %7760 = vmatprep.subr.bf16.mxu0 %v11381_v23 }
 0x3a5   : > { %7801 = vmatprep.subr.bf16.mxu1 %v11384_v24 }
 0x3a7   : > { %7761 = vmatpush1.bf16.msra.mxu0 %v11379_v50 }
 0x3a8   : > { %7802 = vmatpush1.bf16.msra.mxu1 %v11382_v26  ;;  %7762 = vmatprep.subr.bf16.mxu0 %v11387_v20 }
 0x3a9   : > { %7803 = vmatprep.subr.bf16.mxu1 %v11390_v10 }
 0x3ab   : > { %7763 = vmatpush1.bf16.msra.mxu0 %v11385_v28  ;;  %v11451_v28 = vld [vmem:[%s15062_s1 + $0x1ca8] ss:$16 sps:$4 sm:$0xff]  }
 0x3ac   : > { %7804 = vmatpush1.bf16.msra.mxu1 %v11388_v25  ;;  %7764 = vmatprep.subr.bf16.mxu0 %v11393_v60 }
 0x3ad   : > { %7805 = vmatprep.subr.bf16.mxu1 %v11396_v43  ;;  %v11457_v43 = vld [vmem:[%s15062_s1 + $0x1c88] ss:$16 sps:$4 sm:$0xff]  }
 0x3af   : > { %7765 = vmatpush2.bf16.msra.mxu0 %v11391_v52  ;;  %v11460_v52 = vld [vmem:[%s15062_s1 + $0x1e88] ss:$16 sps:$4 sm:$0xff]  }
 0x3b0   : > { %7806 = vmatpush2.bf16.msra.mxu1 %v11394_v31  ;;  %7766 = vmatprep.subr.bf16.mxu0 %v11399_v15  ;;  %v11465_v31 = vld [vmem:[%s15062_s1 + $0x1c6c] ss:$16 sps:$4 sm:$0xff]   ;;  %v11463_v15 = vld [vmem:[%s15062_s1 + $0x1c68] ss:$16 sps:$4 sm:$0xff]  }
 0x3b1   : > { %7807 = vmatprep.subr.bf16.mxu1 %v11402_v32  ;;  %v11466_v32 = vld [vmem:[%s15062_s1 + $0x1e68] ss:$16 sps:$4 sm:$0xff]  }
 0x3b3   : > { %7767 = vmatpush2.bf16.msra.mxu0 %v11397_v1  ;;  %v11471_v1 = vld [vmem:[%s15062_s1 + $0x1c4c] ss:$16 sps:$4 sm:$0xff]  }
 0x3b4   : > { %7808 = vmatpush2.bf16.msra.mxu1 %v11400_v2  ;;  %7768 = vmatprep.subr.bf16.mxu0 %v11405_v34  ;;  %v11474_v2 = vld [vmem:[%s15062_s1 + $0x1e4c] ss:$16 sps:$4 sm:$0xff]   ;;  %v11469_v34 = vld [vmem:[%s15062_s1 + $0x1c48] ss:$16 sps:$4 sm:$0xff]  }
 0x3b5   : > { %7809 = vmatprep.subr.bf16.mxu1 %v11408_v29  ;;  %v11472_v29 = vld [vmem:[%s15062_s1 + $0x1e48] ss:$16 sps:$4 sm:$0xff]  }
 0x3b7   : > { %7769 = vmatpush2.bf16.msra.mxu0 %v11403_v35  ;;  %v11477_v35 = vld [vmem:[%s15062_s1 + $0x1c2c] ss:$16 sps:$4 sm:$0xff]  }
 0x3b8   : > { %7810 = vmatpush2.bf16.msra.mxu1 %v11406_v36  ;;  %7770 = vmatprep.subr.bf16.mxu0 %v11411_v41  ;;  %v11480_v36 = vld [vmem:[%s15062_s1 + $0x1e2c] ss:$16 sps:$4 sm:$0xff]   ;;  %v11475_v41 = vld [vmem:[%s15062_s1 + $0x1c28] ss:$16 sps:$4 sm:$0xff]  }
 0x3b9   : > { %7811 = vmatprep.subr.bf16.mxu1 %v11414_v42  ;;  %v11478_v42 = vld [vmem:[%s15062_s1 + $0x1e28] ss:$16 sps:$4 sm:$0xff]  }
 0x3bb   : > { %7771 = vmatpush2.bf16.msra.mxu0 %v11409_v59  ;;  %v11483_v59 = vld [vmem:[%s15062_s1 + $0x1c0c] ss:$16 sps:$4 sm:$0xff]  }
 0x3bc   : > { %7812 = vmatpush2.bf16.msra.mxu1 %v11412_v63  ;;  %7772 = vmatprep.subr.bf16.mxu0 %v11417_v37  ;;  %v11486_v63 = vld [vmem:[%s15062_s1 + $0x1e0c] ss:$16 sps:$4 sm:$0xff]   ;;  %v11481_v37 = vld [vmem:[%s15062_s1 + $0x1c08] ss:$16 sps:$4 sm:$0xff]  }
 0x3bd   : > { %7813 = vmatprep.subr.bf16.mxu1 %v11420_v38  ;;  %v11484_v38 = vld [vmem:[%s15062_s1 + $0x1e08] ss:$16 sps:$4 sm:$0xff]  }
 0x3bf   : > { %7773 = vmatpush2.bf16.msra.mxu0 %v11415_v16  ;;  %v11489_v16 = vld [vmem:[%s15062_s1 + $0x1dec] ss:$16 sps:$4 sm:$0xff]  }
 0x3c0   : > { %7814 = vmatpush2.bf16.msra.mxu1 %v11418_v40  ;;  %7774 = vmatprep.subr.bf16.mxu0 %v11423_v51  ;;  %v11492_v40 = vld [vmem:[%s15062_s1 + $0x1fec] ss:$16 sps:$4 sm:$0xff]   ;;  %v11487_v51 = vld [vmem:[%s15062_s1 + $0x1de8] ss:$16 sps:$4 sm:$0xff]  }
 0x3c1   : > { %7815 = vmatprep.subr.bf16.mxu1 %v11426_v18  ;;  %v11490_v18 = vld [vmem:[%s15062_s1 + $0x1fe8] ss:$16 sps:$4 sm:$0xff]  }
 0x3c3   : > { %7775 = vmatpush2.bf16.msra.mxu0 %v11421_v14  ;;  %v11495_v14 = vld [vmem:[%s15062_s1 + $0x1dcc] ss:$16 sps:$4 sm:$0xff]  }
 0x3c4   : > { %7816 = vmatpush2.bf16.msra.mxu1 %v11424_v9  ;;  %7776 = vmatprep.subr.bf16.mxu0 %v11429_v4  ;;  %v11498_v9 = vld [vmem:[%s15062_s1 + $0x1fcc] ss:$16 sps:$4 sm:$0xff]   ;;  %v11493_v4 = vld [vmem:[%s15062_s1 + $0x1dc8] ss:$16 sps:$4 sm:$0xff]  }
 0x3c5   : > { %7817 = vmatprep.subr.bf16.mxu1 %v11432_v44  ;;  %v11496_v44 = vld [vmem:[%s15062_s1 + $0x1fc8] ss:$16 sps:$4 sm:$0xff]  }
 0x3c7   : > { %7777 = vmatpush2.bf16.msra.mxu0 %v11427_v5  ;;  %v11501_v5 = vld [vmem:[%s15062_s1 + $0x1dac] ss:$16 sps:$4 sm:$0xff]  }
 0x3c8   : > { %7818 = vmatpush2.bf16.msra.mxu1 %v11430_v6  ;;  %7778 = vmatprep.subr.bf16.mxu0 %v11435_v11  ;;  %v11504_v6 = vld [vmem:[%s15062_s1 + $0x1fac] ss:$16 sps:$4 sm:$0xff]   ;;  %v11499_v11 = vld [vmem:[%s15062_s1 + $0x1da8] ss:$16 sps:$4 sm:$0xff]  }
 0x3c9   : > { %7819 = vmatprep.subr.bf16.mxu1 %v11438_v12  ;;  %v11502_v12 = vld [vmem:[%s15062_s1 + $0x1fa8] ss:$16 sps:$4 sm:$0xff]  }
 0x3cb   : > { %7779 = vmatpush2.bf16.msra.mxu0 %v11433_v17  ;;  %v11507_v17 = vld [vmem:[%s15062_s1 + $0x1d8c] ss:$16 sps:$4 sm:$0xff]  }
 0x3cc   : > { %7820 = vmatpush2.bf16.msra.mxu1 %v11436_v19  ;;  %7830 = vmatprep.subr.bf16.mxu0 %v11441_v55  ;;  %v11510_v19 = vld [vmem:[%s15062_s1 + $0x1f8c] ss:$16 sps:$4 sm:$0xff]   ;;  %v11505_v55 = vld [vmem:[%s15062_s1 + $0x1d88] ss:$16 sps:$4 sm:$0xff]  }
 0x3cd   : > { %7871 = vmatprep.subr.bf16.mxu1 %v11444_v56  ;;  %v11508_v56 = vld [vmem:[%s15062_s1 + $0x1f88] ss:$16 sps:$4 sm:$0xff]  }
 0x3ce   : > { %v5963_v8 = vpop.f32.mrf.mxu0  ;;  %7781 = vmatmul.mubr.bf16.vlgmr.msra.gmra.mxu0 %v14379_v21  ;;  %v11453_v21 = vld [vmem:[%s15062_s1 + $0x1cac] ss:$16 sps:$4 sm:$0xff]  }
 0x3cf   : > { %v6004_v54 = vpop.f32.mrf.mxu1  ;;  %7822 = vmatmul.mubr.bf16.vlgmr.msra.gmra.mxu1 %v14381_v22  ;;  %v5964_v49 = vadd.f32 %v5963_v8, %v14617_v46  ;;  %7831 = vmatpush1.bf16.msra.mxu0 %v11439_v13  ;;  %v11456_v22 = vld [vmem:[%s15062_s1 + $0x1eac] ss:$16 sps:$4 sm:$0xff]  }
 0x3d0   : > { %7872 = vmatpush1.bf16.msra.mxu1 %v11442_v61  ;;  %v5965_v58 = vpop.f32.mrf.mxu0  ;;  %7832 = vmatprep.subr.bf16.mxu0 %v11447_v62  ;;  %v11513_v13 = vld [vmem:[%s15062_s1 + $0x1d6c] ss:$16 sps:$4 sm:$0xff]   ;;  %v11511_v62 = vld [vmem:[%s15062_s1 + $0x1d68] ss:$16 sps:$4 sm:$0xff]  }
 0x3d1   : > { %v6006_v23 = vpop.f32.mrf.mxu1  ;;  %7873 = vmatprep.subr.bf16.mxu1 %v11450_v0  ;;  %v6005_v46 = vadd.f32 %v6004_v54, %v5964_v49  ;;  %v5966_v24 = vadd.f32 %v5965_v58, %v14631_v45  ;;  %7862 = vmatprep.mubr.bf16.mxu0 %v14395_v3  ;;  %v11454_v45 = vld [vmem:[%s15062_s1 + $0x1ea8] ss:$16 sps:$4 sm:$0xff]   ;;  %v11516_v61 = vld [vmem:[%s15062_s1 + $0x1f6c] ss:$16 sps:$4 sm:$0xff]  }
 0x3d2   : > { %7903 = vmatprep.mubr.bf16.mxu1 %v14397_v7  ;;  %v5967_v50 = vpop.f32.mrf.mxu0  ;;  %v11462_v7 = vld [vmem:[%s15062_s1 + $0x1e8c] ss:$16 sps:$4 sm:$0xff]   ;;  %v11514_v0 = vld [vmem:[%s15062_s1 + $0x1f68] ss:$16 sps:$4 sm:$0xff]  }
 0x3d3   : > { %v6008_v26 = vpop.f32.mrf.mxu1  ;;  %v14834_v20 = vadd.f32 %v6005_v46, %v13972_v39  ;;  %v6007_v10 = vadd.f32 %v6006_v23, %v5966_v24  ;;  %7833 = vmatpush1.bf16.msra.mxu0 %v11445_v53  ;;  %v11459_v39 = vld [vmem:[%s15062_s1 + $0x1c8c] ss:$16 sps:$4 sm:$0xff]   ;;  %v11517_v49 = vld [vmem:[%s15062_s1 + $0x1d48] ss:$16 sps:$4 sm:$0xff]  }
 0x3d4   : > { %7874 = vmatpush1.bf16.msra.mxu1 %v11448_v57  ;;  %v5968_v25 = vpop.f32.mrf.mxu0  ;;  %7834 = vmatprep.subr.bf16.mxu0 %v11453_v21  ;;  %v11519_v8 = vld [vmem:[%s15062_s1 + $0x1d4c] ss:$16 sps:$4 sm:$0xff]   ;;  %v11520_v53 = vld [vmem:[%s15062_s1 + $0x1f48] ss:$16 sps:$4 sm:$0xff]  }
 0x3d5   : > { %v6009_v3 = vpop.f32.mrf.mxu1  ;;  %7875 = vmatprep.subr.bf16.mxu1 %v11456_v22  ;;  %v14849_v60 = vadd.f32 %v6007_v10, %v13979_v27  ;;  %v11468_v27 = vld [vmem:[%s15062_s1 + $0x1e6c] ss:$16 sps:$4 sm:$0xff]   ;;  %v11523_v23 = vld [vmem:[%s15062_s1 + $0x1d28] ss:$16 sps:$4 sm:$0xff]  }
 0x3d6   : > { %v11522_v54 = vld [vmem:[%s15062_s1 + $0x1f4c] ss:$16 sps:$4 sm:$0xff]   ;;  %v11526_v21 = vld [vmem:[%s15062_s1 + $0x1f28] ss:$16 sps:$4 sm:$0xff]  }
 0x3d7   : > { %7835 = vmatpush1.bf16.msra.mxu0 %v11451_v28  ;;  %v11525_v57 = vld [vmem:[%s15062_s1 + $0x1d2c] ss:$16 sps:$4 sm:$0xff]   ;;  %v11529_v24 = vld [vmem:[%s15062_s1 + $0x1d08] ss:$16 sps:$4 sm:$0xff]  }
 0x3d8   : > { %7876 = vmatpush1.bf16.msra.mxu1 %v11454_v45  ;;  %7836 = vmatprep.subr.bf16.mxu0 %v11459_v39  ;;  %v11528_v58 = vld [vmem:[%s15062_s1 + $0x1f2c] ss:$16 sps:$4 sm:$0xff]   ;;  %v11532_v50 = vld [vmem:[%s15062_s1 + $0x1f08] ss:$16 sps:$4 sm:$0xff]  }
 0x3d9   : > { %7877 = vmatprep.subr.bf16.mxu1 %v11462_v7  ;;  %v11531_v22 = vld [vmem:[%s15062_s1 + $0x1d0c] ss:$16 sps:$4 sm:$0xff]  }
 0x3da   : > { %v11534_v46 = vld [vmem:[%s15062_s1 + $0x1f0c] ss:$16 sps:$4 sm:$0xff]  }
 0x3db   : > { %7837 = vmatpush1.bf16.msra.mxu0 %v11457_v43 }
 0x3dc   : > { %7878 = vmatpush1.bf16.msra.mxu1 %v11460_v52  ;;  %7838 = vmatprep.subr.bf16.mxu0 %v11465_v31  ;;  %v7918_v31 = vlaneseq }
 0x3dd   : > { %7879 = vmatprep.subr.bf16.mxu1 %v11468_v27 }
 0x3de   : > { %v15003_v27 = vshrl.u32 %v7918_v31, 7 }
 0x3df   : > { %7839 = vmatpush1.bf16.msra.mxu0 %v11463_v15 }
 0x3e0   : > { %7880 = vmatpush1.bf16.msra.mxu1 %v11466_v32  ;;  %7840 = vmatprep.subr.bf16.mxu0 %v11471_v1  ;;  %v15006_v15 = vsub.s32 0, %v15003_v27 }
 0x3e1   : > { %7881 = vmatprep.subr.bf16.mxu1 %v11474_v2  ;;  %v7924_v2 = vsub.s32 1, %v15003_v27 }
 0x3e3   : > { %7841 = vmatpush1.bf16.msra.mxu0 %v11469_v34  ;;  %v7962_v34 = vld [vmem:[%s15064_s3] sm:$0xf] }
 0x3e4   : > { %7882 = vmatpush1.bf16.msra.mxu1 %v11472_v29  ;;  %7842 = vmatprep.subr.bf16.mxu0 %v11477_v35 }
 0x3e5   : > { %7883 = vmatprep.subr.bf16.mxu1 %v11480_v36 }
 0x3e7   : > { %7843 = vmatpush1.bf16.msra.mxu0 %v11475_v41 }
 0x3e8   : > { %7884 = vmatpush1.bf16.msra.mxu1 %v11478_v42  ;;  %7844 = vmatprep.subr.bf16.mxu0 %v11483_v59 }
 0x3e9   : > { %7885 = vmatprep.subr.bf16.mxu1 %v11486_v63 }
 0x3eb   : > { %7845 = vmatpush1.bf16.msra.mxu0 %v11481_v37  ;;  %v15019_v37 = vunpack.c.l.bf16 %v7962_v34 }
 0x3ec   : > { %7886 = vmatpush1.bf16.msra.mxu1 %v11484_v38  ;;  %7846 = vmatprep.subr.bf16.mxu0 %v11489_v16 }
 0x3ed   : > { %7887 = vmatprep.subr.bf16.mxu1 %v11492_v40 }
 0x3ef   : > { %7847 = vmatpush2.bf16.msra.mxu0 %v11487_v51 }
 0x3f0   : > { %7888 = vmatpush2.bf16.msra.mxu1 %v11490_v18  ;;  %7848 = vmatprep.subr.bf16.mxu0 %v11495_v14  ;;  %v7928_v14 = vsub.s32 2, %v15003_v27 }
 0x3f1   : > { %7889 = vmatprep.subr.bf16.mxu1 %v11498_v9 }
 0x3f3   : > { %7849 = vmatpush2.bf16.msra.mxu0 %v11493_v4 }
 0x3f4   : > { %7890 = vmatpush2.bf16.msra.mxu1 %v11496_v44  ;;  %7850 = vmatprep.subr.bf16.mxu0 %v11501_v5  ;;  %v7968_v44 = vrot.slane %v15019_v37, %v15006_v15 }
 0x3f5   : > { %7891 = vmatprep.subr.bf16.mxu1 %v11504_v6 }
 0x3f7   : > { %7851 = vmatpush2.bf16.msra.mxu0 %v11499_v11  ;;  %v7972_v11 = vrot.slane %v15019_v37, %v7928_v14 }
 0x3f8   : > { %7892 = vmatpush2.bf16.msra.mxu1 %v11502_v12  ;;  %7852 = vmatprep.subr.bf16.mxu0 %v11507_v17 }
 0x3f9   : > { %7893 = vmatprep.subr.bf16.mxu1 %v11510_v19  ;;  %v7988_v19 = vrot.slane %v7968_v44, %v15006_v15 }
 0x3fb   : > { %7853 = vmatpush2.bf16.msra.mxu0 %v11505_v55 }
 0x3fc   : > { %7894 = vmatpush2.bf16.msra.mxu1 %v11508_v56  ;;  %7854 = vmatprep.subr.bf16.mxu0 %v11513_v13 }
 0x3fd   : > { %7895 = vmatprep.subr.bf16.mxu1 %v11516_v61  ;;  %v7992_v61 = vrot.slane %v7972_v11, %v15006_v15 }
 0x3ff   : > { %7855 = vmatpush2.bf16.msra.mxu0 %v11511_v62 }
 0x400   : > { %7896 = vmatpush2.bf16.msra.mxu1 %v11514_v0  ;;  %7856 = vmatprep.subr.bf16.mxu0 %v11519_v8 }
 0x401   : > { %7897 = vmatprep.subr.bf16.mxu1 %v11522_v54 }
 0x403   : > { %7857 = vmatpush2.bf16.msra.mxu0 %v11517_v49 }
 0x404   : > { %7898 = vmatpush2.bf16.msra.mxu1 %v11520_v53  ;;  %7858 = vmatprep.subr.bf16.mxu0 %v11525_v57 }
 0x405   : > { %7899 = vmatprep.subr.bf16.mxu1 %v11528_v58 }
 0x407   : > { %7859 = vmatpush2.bf16.msra.mxu0 %v11523_v23 }
 0x408   : > { %7900 = vmatpush2.bf16.msra.mxu1 %v11526_v21  ;;  %7860 = vmatprep.subr.bf16.mxu0 %v11531_v22 }
 0x409   : > { %7901 = vmatprep.subr.bf16.mxu1 %v11534_v46 }
 0x40b   : > { %7861 = vmatpush2.bf16.msra.mxu0 %v11529_v24 }
 0x40c   : > { %7902 = vmatpush2.bf16.msra.mxu1 %v11532_v50 }
 0x40e   : > { %v7618_v26 = vpop.f32.mrf.mxu0  ;;  %7863 = vmatmul.mubr.bf16.vlgmr.msra.gmra.mxu0 %v14599_v47  ;;  %v15011_v47 = vld [vmem:[%s15063_s2] sm:$0xf] }
 0x40f   : > { %v7659_v10 = vpop.f32.mrf.mxu1  ;;  %7904 = vmatmul.mubr.bf16.vlgmr.msra.gmra.mxu1 %v14601_v48  ;;  %v7921_v41 = vrot.slane %v15011_v47, %v15006_v15  ;;  %v7925_v40 = vrot.slane %v15011_v47, %v7924_v2 }
 0x410   : > { %v7660_v28 = vadd.f32 %v7659_v10, %v7618_v26  ;;  %v7620_v45 = vpop.f32.mrf.mxu0 }
 0x411   : > { %v7661_v25 = vpop.f32.mrf.mxu1 }
 0x412   : > { %v7662_v3 = vadd.f32 %v7661_v25, %v7620_v45  ;;  %v7622_v39 = vpop.f32.mrf.mxu0  ;;  %v7932_v25 = vsub.s32 3, %v15003_v27 }
 0x413   : > { %v7663_v7 = vpop.f32.mrf.mxu1 }
 0x414   : > { %v7623_v43 = vpop.f32.mrf.mxu0  ;;  %v7933_v34 = vrot.slane %v15011_v47, %v7932_v25 }
 0x415   : > { %v7664_v52 = vpop.f32.mrf.mxu1  ;;  %v7929_v43 = vrot.slane %v15011_v47, %v7928_v14 }
 0x44e   : > { %v7700_v32 = vpop.f32.mrf.mxu0 }
 0x44f   : > { %v7741_v1 = vpop.f32.mrf.mxu1  ;;  %v7701_v48 = vadd.f32 %v7700_v32, %v7660_v28 }
 0x450   : > { %v7702_v29 = vpop.f32.mrf.mxu0 }
 0x451   : > { %v7743_v35 = vpop.f32.mrf.mxu1  ;;  %v7742_v36 = vadd.f32 %v7741_v1, %v7701_v48  ;;  %v7703_v42 = vadd.f32 %v7702_v29, %v7662_v3  ;;  %v7975_v1 = vsub.s32 4, %v15003_v27 }
 0x452   : > { %v7704_v59 = vpop.f32.mrf.mxu0 }
 0x453   : > { %v7745_v63 = vpop.f32.mrf.mxu1  ;;  %v7912_v38 = vadd.f32 %v7742_v36, %v14418_v30  ;;  %v7744_v16 = vadd.f32 %v7743_v35, %v7703_v42  ;;  %v7979_v36 = vsub.s32 6, %v15003_v27  ;;  %v7976_v59 = vrot.slane %v15019_v37, %v7975_v1 }
 0x454   : > { %v7705_v51 = vpop.f32.mrf.mxu0 }
 0x455   : > { %v7746_v18 = vpop.f32.mrf.mxu1  ;;  %v7938_v9 = vadd.f32 %v7921_v41, %v7912_v38  ;;  %v7913_v4 = vadd.f32 %v7744_v16, %v14433_v33  ;;  %v7980_v16 = vrot.slane %v15019_v37, %v7979_v36  ;;  %v7996_v47 = vrot.slane %v7976_v59, %v15006_v15 }
 0x457   : > { %vm7942_vm0 = vcmp.ge.f32.partialorder %v7938_v9, 0.0  ;;  %v7946_v5 = vmul.f32 0.2, %v7938_v9  ;;  %v7939_v6 = vadd.f32 %v7925_v40, %v7913_v4 }
 0x459   : > { %v7950_v12 = vsel %vm7942_vm0, %v7938_v9, %v7946_v5  ;;  %vm7943_vm1 = vcmp.ge.f32.partialorder %v7939_v6, 0.0  ;;  %v7947_v30 = vmul.f32 0.2, %v7939_v6  ;;  %v8000_v9 = vrot.slane %v7980_v16, %v15006_v15 }
 0x45a   : > { %v7954_v17 = vpack.c.bf16 %v7950_v12, %v7950_v12  ;;  %v9962_v12 = vld [vmem:[#allocation2] ss:$0 sm:$0xff] }
 0x45b   : > { %v7951_v55 = vsel %vm7943_vm1, %v7939_v6, %v7947_v30 }
 0x45c   : > { %v7955_v56 = vpack.c.bf16 %v7951_v55, %v7951_v55  ;;  %v7958_v13 = vunpack.c.l.bf16 %v7954_v17 }
 0x45e   : > { %v7959_v33 = vunpack.c.l.bf16 %v7955_v56  ;;  %v8001_v62 = vmul.f32 %v7988_v19, %v7958_v13 }
 0x460   : > { %v8002_v0 = vmul.f32 %v7992_v61, %v7959_v33  ;;  %v8006_v8 = vsel %vm8005_vm2, %v8001_v62, 0.0 }
 0x462   : > { %v8007_v54 = vsel %vm8005_vm2, %v8002_v0, 0.0 }
 0x463   : > { %v8008_v49 = vadd.f32 %v8007_v54, %v8006_v8 }
 0x48e   : > { %v7782_v53 = vpop.f32.mrf.mxu0 }
 0x48f   : > { %v7823_v57 = vpop.f32.mrf.mxu1 }
 0x490   : > { %v7784_v58 = vpop.f32.mrf.mxu0  ;;  %v7824_v50 = vadd.f32 %v7823_v57, %v7782_v53 }
 0x491   : > { %v7825_v23 = vpop.f32.mrf.mxu1 }
 0x492   : > { %v7786_v21 = vpop.f32.mrf.mxu0  ;;  %v7826_v28 = vadd.f32 %v7825_v23, %v7784_v58 }
 0x493   : > { %v7827_v22 = vpop.f32.mrf.mxu1 }
 0x494   : > { %v7787_v46 = vpop.f32.mrf.mxu0 }
 0x495   : > { %v7828_v24 = vpop.f32.mrf.mxu1 }
 0x4ce   : > { %v7864_v26 = vpop.f32.mrf.mxu0 }
 0x4cf   : > { %v7905_v10 = vpop.f32.mrf.mxu1  ;;  %v7865_v45 = vadd.f32 %v7864_v26, %v7824_v50 }
 0x4d0   : > { %v7866_v3 = vpop.f32.mrf.mxu0 }
 0x4d1   : > { %v7907_v39 = vpop.f32.mrf.mxu1  ;;  %v7906_v7 = vadd.f32 %v7905_v10, %v7865_v45  ;;  %v7867_v52 = vadd.f32 %v7866_v3, %v7826_v28 }
 0x4d2   : > { %v7868_v31 = vpop.f32.mrf.mxu0 }
 0x4d3   : > { %v7909_v32 = vpop.f32.mrf.mxu1  ;;  %v7914_v48 = vadd.f32 %v7906_v7, %v14834_v20  ;;  %v7908_v2 = vadd.f32 %v7907_v39, %v7867_v52 }
 0x4d4   : > { %v7869_v29 = vpop.f32.mrf.mxu0 }
 0x4d5   : > { %v7910_v35 = vpop.f32.mrf.mxu1  ;;  %v7940_v41 = vadd.f32 %v7929_v43, %v7914_v48  ;;  %v7915_v42 = vadd.f32 %v7908_v2, %v14849_v60 }
 0x4d7   : > { %vm7944_vm3 = vcmp.ge.f32.partialorder %v7940_v41, 0.0  ;;  %v7948_v63 = vmul.f32 0.2, %v7940_v41  ;;  %v7941_v38 = vadd.f32 %v7933_v34, %v7915_v42 }
 0x4d9   : > { %v7949_v40 = vmul.f32 0.2, %v7941_v38  ;;  %vm7945_vm4 = vcmp.ge.f32.partialorder %v7941_v38, 0.0  ;;  %v7952_v20 = vsel %vm7944_vm3, %v7940_v41, %v7948_v63 }
 0x4da   : > { %v7956_v51 = vpack.c.bf16 %v7952_v20, %v7952_v20 }
 0x4db   : > { %v7953_v18 = vsel %vm7945_vm4, %v7941_v38, %v7949_v40 }
 0x4dc   : > { %v7957_v14 = vpack.c.bf16 %v7953_v18, %v7953_v18  ;;  %v7960_v27 = vunpack.c.l.bf16 %v7956_v51 }
 0x4de   : > { %v7961_v60 = vunpack.c.l.bf16 %v7957_v14  ;;  %v8003_v4 = vmul.f32 %v7996_v47, %v7960_v27 }
 0x4e0   : > { %v8004_v44 = vmul.f32 %v8000_v9, %v7961_v60  ;;  %v8009_v5 = vsel %vm8005_vm2, %v8003_v4, 0.0 }
 0x4e1   : > { %v8010_v6 = vadd.f32 %v8009_v5, %v8008_v49 }
 0x4e2   : > { %v8011_v37 = vsel %vm8005_vm2, %v8004_v44, 0.0 }
 0x4e3   : > { %v8012_v11 = vadd.f32 %v8011_v37, %v8010_v6 }
 0x4e5   : > { %8013 = vadd.xlane.f32.xlu0 %v8012_v11 }
 0x56e   : > { %v8014_v30 = vpop.xlane.xlu0 %8013 }
 0x56f   : > { %v8022_v17 = vadd.f32 %v9962_v12, %v8014_v30 }
 0x571   : > { %8024 = vst.msk [vmem:[%s304_s7] sm:$0x3] %vm8023_vm5, %v8022_v17  ;;  %v9963_v15 = vmul.f32 -1.442695, %v8022_v17 }
 0x573   : > { %11535 = vpow2.f32 %v9963_v15 }
 0x580   : > { %v11536_v19 = vpop.eup %11535 }
 0x581   : > { %v8028_v55 = vadd.f32 1.0, %v11536_v19 }
 0x583   : > { %11537 = vrcp.f32 %v8028_v55 }
 0x590   : > { %v11538_v56 = vpop.eup %11537 }
 0x591   : > { %8031 = vst.msk [vmem:[%s297_s10] sm:$0x3] %vm8023_vm5, %v11538_v56 }
 0x592 PF: > { %s19_s25 = sadd.s32 1, %s11561_s25   ;;  %s15068_s23 = smov %s11557_s24 }
 0x593   : > { %p16_p5 = scmp.ge.s32.totalorder %s19_s25, 4   ;;  %s15069_s24 = smov %s15071_s4 }
 0x595   :  { %18 = sbr.rel (!%p16_p5) target bundleno = 3 (0x3), region = 85 }

</bundles_post_ra>
